<compile_context>
chip_gen: v7x
topology: tpu7x:2x2x1
jax: 0.10.0
libtpu: 0.0.40
codegen_flags: <defaults>
</compile_context>

<pallas_src>
import functools

import jax
import jax.numpy as jnp
from jax import lax
from jax.experimental import pallas as pl
from jax.experimental.pallas import tpu as pltpu

LANE = 128
_TM_TARGET = 512                 # row tile for spmm / transform / decoder
_TK_MULTS = (16, 8, 4, 2, 1)     # tk candidates as multiples of tm, largest first


def _round_up(n, m):
    return ((n + m - 1) // m) * m


def _vmem_budget_bytes():
    """~75% of physical VMEM: ~48 MiB on v7x, ~96 MiB on v5e/v6e."""
    cap = 64 * 1024 * 1024  # conservative fallback (v7x per-TC VMEM)
    try:
        info = pltpu.get_tpu_info()
        cap = int(getattr(info, "vmem_capacity_bytes", cap))
    except Exception:
        pass
    return min((cap * 3) // 4, 112 * 1024 * 1024)


def _plan_rows(n):
    """Pick the row tile and padded node count (exact zero-padding)."""
    n128 = _round_up(n, LANE)
    tm = min(_TM_TARGET, n128)
    n_pad = _round_up(n, tm)
    return n_pad, tm


def _pick_tk(n_pad, tm, d_out, budget):
    """Largest reduction tile (multiple of tm, divides n_pad) under the budget."""
    for mult in _TK_MULTS:
        tk = tm * mult
        if tk > n_pad or n_pad % tk != 0:
            continue
        # double-buffered working set: adj tile + t slab (bf16) + resident f32 out
        ws = 2 * (tm * tk * 2) + 2 * (tk * d_out * 2) + 2 * (tm * d_out * 4)
        if ws <= budget:
            return tk
    return tm


# ---------------------------------------------------------------------------
# Feature transform (hoisted out of the spmm):  t = act(h @ W)  -> bf16
# ---------------------------------------------------------------------------
def _transform_kernel(h_ref, w_ref, t_ref, *, activate):
    t = jnp.dot(h_ref[...].astype(jnp.bfloat16), w_ref[...],
                preferred_element_type=jnp.float32)
    if activate:
        t = jnp.tanh(t)
    t_ref[...] = t.astype(t_ref.dtype)


def _feature_transform(h, w_bf16, *, activate, tm, vmem_limit):
    n_pad, d_in = h.shape
    d_out = w_bf16.shape[1]
    grid = (n_pad // tm,)
    kernel = functools.partial(_transform_kernel, activate=activate)
    return pl.pallas_call(
        kernel,
        out_shape=jax.ShapeDtypeStruct((n_pad, d_out), jnp.bfloat16),
        grid_spec=pltpu.PrefetchScalarGridSpec(
            num_scalar_prefetch=0,
            grid=grid,
            in_specs=[
                pl.BlockSpec((tm, d_in), lambda i: (i, 0)),       # h row tile
                pl.BlockSpec((d_in, d_out), lambda i: (0, 0)),    # W resident
            ],
            out_specs=pl.BlockSpec((tm, d_out), lambda i: (i, 0)),
        ),
        compiler_params=pltpu.CompilerParams(
            dimension_semantics=("parallel",),
            vmem_limit_bytes=vmem_limit,
        ),
        cost_estimate=pl.CostEstimate(
            flops=2 * n_pad * d_in * d_out,
            transcendentals=(n_pad * d_out) if activate else 0,
            bytes_accessed=n_pad * d_in * h.dtype.itemsize
                           + d_in * d_out * 2
                           + n_pad * d_out * 2),
    )(h, w_bf16)


# ---------------------------------------------------------------------------
# spmm stand-in:  out = adj @ t     (adj streamed in (tm, tk) bf16 tiles,
#                                    f32 accumulation directly in out block)
# ---------------------------------------------------------------------------
def _spmm_kernel(adj_ref, t_ref, out_ref):
    @pl.when(pl.program_id(1) == 0)
    def _():
        out_ref[...] = jnp.zeros_like(out_ref)

    out_ref[...] += jnp.dot(adj_ref[...], t_ref[...],
                            preferred_element_type=jnp.float32)


def _spmm(adj_bf16, t_bf16, *, tm, tk, vmem_limit):
    n_pad = adj_bf16.shape[0]
    d_out = t_bf16.shape[1]
    grid = (n_pad // tm, n_pad // tk)
    m_tiles = grid[0]
    return pl.pallas_call(
        _spmm_kernel,
        out_shape=jax.ShapeDtypeStruct((n_pad, d_out), jnp.float32),
        grid_spec=pltpu.PrefetchScalarGridSpec(
            num_scalar_prefetch=0,
            grid=grid,
            in_specs=[
                pl.BlockSpec((tm, tk), lambda i, k: (i, k)),       # adj stream
                pl.BlockSpec((tk, d_out), lambda i, k: (k, 0)),    # bf16 t slab
            ],
            out_specs=pl.BlockSpec((tm, d_out), lambda i, k: (i, 0)),
        ),
        compiler_params=pltpu.CompilerParams(
            dimension_semantics=("parallel", "arbitrary"),
            vmem_limit_bytes=vmem_limit,
        ),
        cost_estimate=pl.CostEstimate(
            flops=2 * n_pad * n_pad * d_out,
            transcendentals=0,
            bytes_accessed=n_pad * n_pad * 2            # adj (bf16), read once
                           + m_tiles * n_pad * d_out * 2  # t re-read per row tile
                           + n_pad * d_out * 4),          # f32 output
    )(adj_bf16, t_bf16)


# ---------------------------------------------------------------------------
# Inner-product decoder:  adj_hat = sigmoid(z @ z.T), tiled (tm, tm)
# ---------------------------------------------------------------------------
def _decoder_kernel(zi_ref, zj_ref, out_ref):
    # NT-form gram tile: contract last axes, z.T never materialized.
    logits = lax.dot_general(
        zi_ref[...], zj_ref[...],
        dimension_numbers=(((1,), (1,)), ((), ())),
        preferred_element_type=jnp.float32)
    out_ref[...] = jax.nn.sigmoid(logits)


def _inner_product_decoder(z_bf16, *, tm, vmem_limit):
    n_pad, d = z_bf16.shape
    grid = (n_pad // tm, n_pad // tm)
    return pl.pallas_call(
        _decoder_kernel,
        out_shape=jax.ShapeDtypeStruct((n_pad, n_pad), jnp.float32),
        grid_spec=pltpu.PrefetchScalarGridSpec(
            num_scalar_prefetch=0,
            grid=grid,
            in_specs=[
                pl.BlockSpec((tm, d), lambda i, j: (i, 0)),   # z row tile
                pl.BlockSpec((tm, d), lambda i, j: (j, 0)),   # z "col" tile
            ],
            out_specs=pl.BlockSpec((tm, tm), lambda i, j: (i, j)),
        ),
        compiler_params=pltpu.CompilerParams(
            dimension_semantics=("parallel", "parallel"),
            vmem_limit_bytes=vmem_limit,
        ),
        cost_estimate=pl.CostEstimate(
            flops=2 * n_pad * n_pad * d,
            transcendentals=n_pad * n_pad,
            bytes_accessed=2 * grid[0] * n_pad * d * 2 + n_pad * n_pad * 4),
    )(z_bf16, z_bf16)


# ---------------------------------------------------------------------------
# Full IGAE_encoder forward
# ---------------------------------------------------------------------------
def igae_encoder(x, adj, w1, w2, w3):
    n, n_in = x.shape
    d1, d2, d3 = w1.shape[1], w2.shape[1], w3.shape[1]

    n_pad, tm = _plan_rows(n)
    f_in = _round_up(n_in, LANE)
    f1, f2, f3 = (_round_up(d, LANE) for d in (d1, d2, d3))

    budget = _vmem_budget_bytes()
    tk = _pick_tk(n_pad, tm, max(f1, f2, f3), budget)
    vmem_limit = budget

    # Exact zero-padding to lane-dense shapes; adj cast to bf16 BEFORE padding
    # so no f32 N_pad^2 intermediate is ever materialized.
    adj_bf = jnp.pad(adj.astype(jnp.bfloat16),
                     ((0, n_pad - n), (0, n_pad - n)))
    x_p = jnp.pad(x.astype(jnp.float32),
                  ((0, n_pad - n), (0, f_in - n_in)))
    w1_b = jnp.pad(w1, ((0, f_in - n_in), (0, f1 - d1))).astype(jnp.bfloat16)
    w2_b = jnp.pad(w2, ((0, f1 - d1), (0, f2 - d2))).astype(jnp.bfloat16)
    w3_b = jnp.pad(w3, ((0, f2 - d2), (0, f3 - d3))).astype(jnp.bfloat16)

    # gnn_1:  h1 = adj @ tanh(x @ W1)
    t1 = _feature_transform(x_p, w1_b, activate=True, tm=tm, vmem_limit=vmem_limit)
    h1 = _spmm(adj_bf, t1, tm=tm, tk=tk, vmem_limit=vmem_limit)
    # gnn_2:  h2 = adj @ tanh(h1 @ W2)
    t2 = _feature_transform(h1, w2_b, activate=True, tm=tm, vmem_limit=vmem_limit)
    h2 = _spmm(adj_bf, t2, tm=tm, tk=tk, vmem_limit=vmem_limit)
    # gnn_3:  z = adj @ (h2 @ W3)
    t3 = _feature_transform(h2, w3_b, activate=False, tm=tm, vmem_limit=vmem_limit)
    z_p = _spmm(adj_bf, t3, tm=tm, tk=tk, vmem_limit=vmem_limit)

    # Decoder: bf16 z halves both gram reads; sigmoid output kept f32.
    adj_hat_p = _inner_product_decoder(z_p.astype(jnp.bfloat16),
                                       tm=tm, vmem_limit=vmem_limit)

    return z_p[:n, :d3], adj_hat_p[:n, :n]


# ---------------------------------------------------------------------------
# Reference + test harness
# ---------------------------------------------------------------------------
def xavier_uniform(key, shape, dtype=jnp.float32):
    fan_in, fan_out = shape
    limit = (6.0 / (fan_in + fan_out)) ** 0.5
    return jax.random.uniform(key, shape, dtype, minval=-limit, maxval=limit)


def reference(x, adj, w1, w2, w3):
    h = adj @ jnp.tanh(x @ w1)
    h = adj @ jnp.tanh(h @ w2)
    z = adj @ (h @ w3)
    return z, jax.nn.sigmoid(z @ z.T)


if __name__ == "__main__":
    # Synthetic graph: N nodes, n_inputs features, encoder widths
    # (gae_n_enc_1, gae_n_enc_2, gae_n_enc_3).  N=1200 -> N_pad=1536 with
    # tm=tk=512 exercises a genuine 3x3 grid (parallel rows + k-reduction with
    # pl.when init) in the spmm and a 3x3 decoder grid.
    N, n_inputs = 1200, 50
    gae_n_enc_1, gae_n_enc_2, gae_n_enc_3 = 32, 16, 16

    key = jax.random.PRNGKey(0)
    k_x, k_adj, k_w1, k_w2, k_w3 = jax.random.split(key, 5)

    x = jax.random.normal(k_x, (N, n_inputs), dtype=jnp.float32)

    # Symmetric, row-normalized dense adjacency (stand-in for the sparse adj).
    a = jax.random.uniform(k_adj, (N, N), dtype=jnp.float32)
    a = (a + a.T) * 0.5 + jnp.eye(N, dtype=jnp.float32)
    adj = a / jnp.sum(a, axis=1, keepdims=True)

    w1 = xavier_uniform(k_w1, (n_inputs, gae_n_enc_1))
    w2 = xavier_uniform(k_w2, (gae_n_enc_1, gae_n_enc_2))
    w3 = xavier_uniform(k_w3, (gae_n_enc_2, gae_n_enc_3))

    z, adj_hat = jax.jit(igae_encoder)(x, adj, w1, w2, w3)
    jax.block_until_ready((z, adj_hat))

    z_ref, adj_hat_ref = reference(x, adj, w1, w2, w3)

    # bf16 MXU inputs (adj, activations, weights, z) -> compare at a
    # scale-relative tolerance against the pure-f32 reference.
    def _check(name, got, want, tol):
        err = float(jnp.max(jnp.abs(got - want)))
        scale = float(jnp.max(jnp.abs(want))) + 1e-12
        assert err <= tol * scale, f"{name}: max err {err} vs scale {scale}"

    assert z.shape == (N, gae_n_enc_3)
    assert adj_hat.shape == (N, N)
    _check("z", z, z_ref, 5e-2)
    _check("adj_hat", adj_hat, adj_hat_ref, 2e-2)

    print("KERNEL_OK")
</pallas_src>

<mosaic_0001>
module attributes {stable_mosaic.version = 11 : i64} {
  func.func @_transform_kernel(%arg0: i32, %arg1: memref<512x128xf32, #tpu.memory_space<vmem>>, %arg2: memref<128x128xbf16, #tpu.memory_space<vmem>>, %arg3: memref<512x128xbf16, #tpu.memory_space<vmem>>) attributes {dimension_semantics = [#tpu.dimension_semantics<parallel>], iteration_bounds = array<i64: 3>, scalar_prefetch = 0 : i64, scratch_operands = 0 : i64, tpu.core_type = #tpu.core_type<tc>, window_params = [{transform_indices = @transform_0, window_bounds = array<i64: 512, 128>}, {pipeline_mode = #tpu.pipeline_mode<synchronous>, transform_indices = @transform_1, window_bounds = array<i64: 128, 128>}, {transform_indices = @transform_2, window_bounds = array<i64: 512, 128>}]} {
    %c0 = arith.constant 0 : index
    %c0_0 = arith.constant 0 : index
    %0 = vector.load %arg1[%c0, %c0_0] : memref<512x128xf32, #tpu.memory_space<vmem>>, vector<512x128xf32>
    %1 = arith.truncf %0 : vector<512x128xf32> to vector<512x128xbf16>
    %c0_1 = arith.constant 0 : index
    %c0_2 = arith.constant 0 : index
    %2 = vector.load %arg2[%c0_1, %c0_2] : memref<128x128xbf16, #tpu.memory_space<vmem>>, vector<128x128xbf16>
    %cst = arith.constant dense<0.000000e+00> : vector<512x128xf32>
    %3 = tpu.matmul %1, %2, %cst {dimension_numbers = #tpu.dot_dimension_numbers<[1], [0], [0], [1], [0, 0, 1, 1], [], []>} : vector<512x128xbf16>, vector<128x128xbf16>, vector<512x128xf32> -> vector<512x128xf32>
    %4 = math.tanh %3 : vector<512x128xf32>
    %5 = arith.truncf %4 : vector<512x128xf32> to vector<512x128xbf16>
    %c0_3 = arith.constant 0 : index
    %c0_4 = arith.constant 0 : index
    %6 = vector.load %arg3[%c0_3, %c0_4] : memref<512x128xbf16, #tpu.memory_space<vmem>>, vector<512x128xbf16>
    tpu.vector_store %arg3[%c0_3, %c0_4], %5 {strides = array<i32>} : memref<512x128xbf16, #tpu.memory_space<vmem>>, vector<512x128xbf16>,
    return
  }
  func.func @transform_0(%arg0: i32) -> (i32, i32) {
    %c0_i32 = arith.constant 0 : i32
    %c0_i32_0 = arith.constant 0 : i32
    return %arg0, %c0_i32 : i32, i32
  }
  func.func @transform_1(%arg0: i32) -> (i32, i32) {
    %c0_i32 = arith.constant 0 : i32
    %c0_i32_0 = arith.constant 0 : i32
    %c0_i32_1 = arith.constant 0 : i32
    return %c0_i32, %c0_i32_0 : i32, i32
  }
  func.func @transform_2(%arg0: i32) -> (i32, i32) {
    %c0_i32 = arith.constant 0 : i32
    %c0_i32_0 = arith.constant 0 : i32
    return %arg0, %c0_i32 : i32, i32
  }
}

module attributes {stable_mosaic.version = 11 : i64} {
  func.func @_spmm_kernel(%arg0: i32, %arg1: i32, %arg2: memref<512x512xbf16, #tpu.memory_space<vmem>>, %arg3: memref<512x128xbf16, #tpu.memory_space<vmem>>, %arg4: memref<512x128xf32, #tpu.memory_space<vmem>>) attributes {dimension_semantics = [#tpu.dimension_semantics<parallel>, #tpu.dimension_semantics<arbitrary>], iteration_bounds = array<i64: 3, 3>, scalar_prefetch = 0 : i64, scratch_operands = 0 : i64, tpu.core_type = #tpu.core_type<tc>, window_params = [{transform_indices = @transform_0, window_bounds = array<i64: 512, 512>}, {transform_indices = @transform_1, window_bounds = array<i64: 512, 128>}, {transform_indices = @transform_2, window_bounds = array<i64: 512, 128>}]} {
    %c0_i32 = arith.constant 0 : i32
    %0 = arith.cmpi eq, %arg1, %c0_i32 : i32
    %1 = arith.extui %0 : i1 to i32
    %c0_i32_0 = arith.constant 0 : i32
    %2 = arith.cmpi ne, %1, %c0_i32_0 : i32
    scf.if %2 {
      %cst_8 = arith.constant 0.000000e+00 : f32
      %9 = vector.broadcast %cst_8 : f32 to vector<512x128xf32>
      %c0_9 = arith.constant 0 : index
      %c0_10 = arith.constant 0 : index
      %10 = vector.load %arg4[%c0_9, %c0_10] : memref<512x128xf32, #tpu.memory_space<vmem>>, vector<512x128xf32>
      tpu.vector_store %arg4[%c0_9, %c0_10], %9 {strides = array<i32>} : memref<512x128xf32, #tpu.memory_space<vmem>>, vector<512x128xf32>,
    } else {
    }
    %c0 = arith.constant 0 : index
    %c0_1 = arith.constant 0 : index
    %3 = vector.load %arg4[%c0, %c0_1] : memref<512x128xf32, #tpu.memory_space<vmem>>, vector<512x128xf32>
    %c0_2 = arith.constant 0 : index
    %c0_3 = arith.constant 0 : index
    %4 = vector.load %arg2[%c0_2, %c0_3] : memref<512x512xbf16, #tpu.memory_space<vmem>>, vector<512x512xbf16>
    %c0_4 = arith.constant 0 : index
    %c0_5 = arith.constant 0 : index
    %5 = vector.load %arg3[%c0_4, %c0_5] : memref<512x128xbf16, #tpu.memory_space<vmem>>, vector<512x128xbf16>
    %cst = arith.constant dense<0.000000e+00> : vector<512x128xf32>
    %6 = tpu.matmul %4, %5, %cst {dimension_numbers = #tpu.dot_dimension_numbers<[1], [0], [0], [1], [0, 0, 1, 1], [], []>} : vector<512x512xbf16>, vector<512x128xbf16>, vector<512x128xf32> -> vector<512x128xf32>
    %7 = arith.addf %3, %6 : vector<512x128xf32>
    %c0_6 = arith.constant 0 : index
    %c0_7 = arith.constant 0 : index
    %8 = vector.load %arg4[%c0_6, %c0_7] : memref<512x128xf32, #tpu.memory_space<vmem>>, vector<512x128xf32>
    tpu.vector_store %arg4[%c0_6, %c0_7], %7 {strides = array<i32>} : memref<512x128xf32, #tpu.memory_space<vmem>>, vector<512x128xf32>,
    return
  }
  func.func @transform_0(%arg0: i32, %arg1: i32) -> (i32, i32) {
    %c0_i32 = arith.constant 0 : i32
    return %arg0, %arg1 : i32, i32
  }
  func.func @transform_1(%arg0: i32, %arg1: i32) -> (i32, i32) {
    %c0_i32 = arith.constant 0 : i32
    %c0_i32_0 = arith.constant 0 : i32
    return %arg1, %c0_i32 : i32, i32
  }
  func.func @transform_2(%arg0: i32, %arg1: i32) -> (i32, i32) {
    %c0_i32 = arith.constant 0 : i32
    %c0_i32_0 = arith.constant 0 : i32
    return %arg0, %c0_i32 : i32, i32
  }
}

module attributes {stable_mosaic.version = 11 : i64} {
  func.func @_transform_kernel(%arg0: i32, %arg1: memref<512x128xf32, #tpu.memory_space<vmem>>, %arg2: memref<128x128xbf16, #tpu.memory_space<vmem>>, %arg3: memref<512x128xbf16, #tpu.memory_space<vmem>>) attributes {dimension_semantics = [#tpu.dimension_semantics<parallel>], iteration_bounds = array<i64: 3>, scalar_prefetch = 0 : i64, scratch_operands = 0 : i64, tpu.core_type = #tpu.core_type<tc>, window_params = [{transform_indices = @transform_0, window_bounds = array<i64: 512, 128>}, {pipeline_mode = #tpu.pipeline_mode<synchronous>, transform_indices = @transform_1, window_bounds = array<i64: 128, 128>}, {transform_indices = @transform_2, window_bounds = array<i64: 512, 128>}]} {
    %c0 = arith.constant 0 : index
    %c0_0 = arith.constant 0 : index
    %0 = vector.load %arg1[%c0, %c0_0] : memref<512x128xf32, #tpu.memory_space<vmem>>, vector<512x128xf32>
    %1 = arith.truncf %0 : vector<512x128xf32> to vector<512x128xbf16>
    %c0_1 = arith.constant 0 : index
    %c0_2 = arith.constant 0 : index
    %2 = vector.load %arg2[%c0_1, %c0_2] : memref<128x128xbf16, #tpu.memory_space<vmem>>, vector<128x128xbf16>
    %cst = arith.constant dense<0.000000e+00> : vector<512x128xf32>
    %3 = tpu.matmul %1, %2, %cst {dimension_numbers = #tpu.dot_dimension_numbers<[1], [0], [0], [1], [0, 0, 1, 1], [], []>} : vector<512x128xbf16>, vector<128x128xbf16>, vector<512x128xf32> -> vector<512x128xf32>
    %4 = arith.truncf %3 : vector<512x128xf32> to vector<512x128xbf16>
    %c0_3 = arith.constant 0 : index
    %c0_4 = arith.constant 0 : index
    %5 = vector.load %arg3[%c0_3, %c0_4] : memref<512x128xbf16, #tpu.memory_space<vmem>>, vector<512x128xbf16>
    tpu.vector_store %arg3[%c0_3, %c0_4], %4 {strides = array<i32>} : memref<512x128xbf16, #tpu.memory_space<vmem>>, vector<512x128xbf16>,
    return
  }
  func.func @transform_0(%arg0: i32) -> (i32, i32) {
    %c0_i32 = arith.constant 0 : i32
    %c0_i32_0 = arith.constant 0 : i32
    return %arg0, %c0_i32 : i32, i32
  }
  func.func @transform_1(%arg0: i32) -> (i32, i32) {
    %c0_i32 = arith.constant 0 : i32
    %c0_i32_0 = arith.constant 0 : i32
    %c0_i32_1 = arith.constant 0 : i32
    return %c0_i32, %c0_i32_0 : i32, i32
  }
  func.func @transform_2(%arg0: i32) -> (i32, i32) {
    %c0_i32 = arith.constant 0 : i32
    %c0_i32_0 = arith.constant 0 : i32
    return %arg0, %c0_i32 : i32, i32
  }
}

module attributes {stable_mosaic.version = 11 : i64} {
  func.func @_decoder_kernel(%arg0: i32, %arg1: i32, %arg2: memref<512x128xbf16, #tpu.memory_space<vmem>>, %arg3: memref<512x128xbf16, #tpu.memory_space<vmem>>, %arg4: memref<512x512xf32, #tpu.memory_space<vmem>>) attributes {dimension_semantics = [#tpu.dimension_semantics<parallel>, #tpu.dimension_semantics<parallel>], iteration_bounds = array<i64: 3, 3>, scalar_prefetch = 0 : i64, scratch_operands = 0 : i64, tpu.core_type = #tpu.core_type<tc>, window_params = [{transform_indices = @transform_0, window_bounds = array<i64: 512, 128>}, {transform_indices = @transform_1, window_bounds = array<i64: 512, 128>}, {transform_indices = @transform_2, window_bounds = array<i64: 512, 512>}]} {
    %c0 = arith.constant 0 : index
    %c0_0 = arith.constant 0 : index
    %0 = vector.load %arg2[%c0, %c0_0] : memref<512x128xbf16, #tpu.memory_space<vmem>>, vector<512x128xbf16>
    %c0_1 = arith.constant 0 : index
    %c0_2 = arith.constant 0 : index
    %1 = vector.load %arg3[%c0_1, %c0_2] : memref<512x128xbf16, #tpu.memory_space<vmem>>, vector<512x128xbf16>
    %cst = arith.constant dense<0.000000e+00> : vector<512x512xf32>
    %2 = tpu.matmul %0, %1, %cst {dimension_numbers = #tpu.dot_dimension_numbers<[1], [1], [0], [0], [0, 0, 1, 0], [], []>} : vector<512x128xbf16>, vector<512x128xbf16>, vector<512x512xf32> -> vector<512x512xf32>
    %3 = arith.negf %2 : vector<512x512xf32>
    %4 = math.exp %3 : vector<512x512xf32>
    %cst_3 = arith.constant 1.000000e+00 : f32
    %5 = vector.broadcast %cst_3 : f32 to vector<512x512xf32>
    %6 = arith.addf %5, %4 : vector<512x512xf32>
    %7 = arith.divf %5, %6 : vector<512x512xf32>
    %c0_4 = arith.constant 0 : index
    %c0_5 = arith.constant 0 : index
    %8 = vector.load %arg4[%c0_4, %c0_5] : memref<512x512xf32, #tpu.memory_space<vmem>>, vector<512x512xf32>
    tpu.vector_store %arg4[%c0_4, %c0_5], %7 {strides = array<i32>} : memref<512x512xf32, #tpu.memory_space<vmem>>, vector<512x512xf32>,
    return
  }
  func.func @transform_0(%arg0: i32, %arg1: i32) -> (i32, i32) {
    %c0_i32 = arith.constant 0 : i32
    %c0_i32_0 = arith.constant 0 : i32
    return %arg0, %c0_i32 : i32, i32
  }
  func.func @transform_1(%arg0: i32, %arg1: i32) -> (i32, i32) {
    %c0_i32 = arith.constant 0 : i32
    %c0_i32_0 = arith.constant 0 : i32
    return %arg1, %c0_i32 : i32, i32
  }
  func.func @transform_2(%arg0: i32, %arg1: i32) -> (i32, i32) {
    %c0_i32 = arith.constant 0 : i32
    return %arg0, %arg1 : i32, i32
  }
}

</mosaic_0001>

<bundles_post_ra>
// kernel: igae_encoder.7
= control target key start
LH: loop header
LB: loop body
LE: loop exit
PB: predicated region body
PF: predicated region fallthrough
CT: control target
= control target key end

     0   :  { %s1678_s9 = smov 0   ;;  %s1823_s0 = inlined_call_operand.vmem [shape: f32[1536,128], index: 0, kind: input, shape index: {}]   ;;  %s1824_s1 = inlined_call_operand.vmem [shape: bf16[128,128], index: 1, kind: input, shape index: {}]   ;;  %s1825_s2 = inlined_call_operand.vmem [shape: bf16[1536,128], index: 2, kind: output, shape index: {}]  }
   0x1 LB: > { %s1037_s10 = sadd.s32 4294967295, %s1661_s9   ;;  %p1041_p0 = scmp.ge.s32.totalorder %s1661_s9, 1  ;;  %s1661_s9 = sphi %s1678_s9, %s12_s9  }
   0x2   : > { %p113_p1 = scmp.lt.s32.totalorder %s1661_s9, 4 }
   0x4   : > { %p114_p2 = pnand %p1041_p0, %p113_p1 }
   0x5   : > { %v1519_v0 = vld [vmem:[%s1824_s1] sm:$0xff] (!%p114_p2)   ;;  %s1042_s13 = sshll.u32 (!%p114_p2), %s1037_s10, 6  ;;  %v1520_v1 = vld [vmem:[%s1824_s1 + $0x8] sm:$0xff] (!%p114_p2)   ;;  %v1521_v2 = vld [vmem:[%s1824_s1 + $0x10] sm:$0xff] (!%p114_p2)  }
   0x6   : > { %117 = sbr.rel (%p114_p2) target bundleno = 330 (0x14a), region = 28  ;;  %p136_p3 = scmp.lt.s32.totalorder (!%p114_p2), %s1042_s13, 191  ;;  %1415 = vmatprep.subr.bf16.mxu0 (!%p114_p2), %v1519_v0  ;;  %1495 = vmatprep.subr.bf16.mxu1 (!%p114_p2), %v1519_v0  ;;  %v1522_v3 = vld [vmem:[%s1824_s1 + $0x18] sm:$0xff] (!%p114_p2)   ;;  %v1523_v10 = vld [vmem:[%s1824_s1 + $0x20] sm:$0xff] (!%p114_p2)   ;;  %v1524_v11 = vld [vmem:[%s1824_s1 + $0x28] sm:$0xff] (!%p114_p2)  }
   0x7   : > { %1416 = vmatpush3.bf16.msra.mxu0 (!%p114_p2), %v1519_v0  ;;  %1503 = vmatpush3.bf16.msra.mxu1 (!%p114_p2), %v1519_v0  ;;  %v1525_v12 = vld [vmem:[%s1824_s1 + $0x30] sm:$0xff] (!%p114_p2)   ;;  %v1526_v13 = vld [vmem:[%s1824_s1 + $0x38] sm:$0xff] (!%p114_p2)  }
   0x8   : > { %1417 = vmatprep.subr.bf16.mxu0 (!%p114_p2), %v1520_v1  ;;  %1496 = vmatprep.subr.bf16.mxu1 (!%p114_p2), %v1520_v1 }
   0xb   : > { %1418 = vmatpush3.bf16.msra.mxu0 (!%p114_p2), %v1520_v1  ;;  %1504 = vmatpush3.bf16.msra.mxu1 (!%p114_p2), %v1520_v1 }
   0xc   : > { %1419 = vmatprep.subr.bf16.mxu0 (!%p114_p2), %v1521_v2  ;;  %1497 = vmatprep.subr.bf16.mxu1 (!%p114_p2), %v1521_v2 }
   0xd   : > { %s1827_s13 = smov (!%p136_p3, %s1042_s13), 191 }
   0xe   : > { %s1043_s18 = sshll.u32 %s1827_s13, 3  ;;  %s1045_s4 = sshll.u32 %s1827_s13, 2 }
   0xf   : > { %s1701_s21 = scalar_lea.vmem %s1823_s0, %s1043_s18  ;;  %1420 = vmatpush3.bf16.msra.mxu0 %v1521_v2  ;;  %1505 = vmatpush3.bf16.msra.mxu1 %v1521_v2  ;;  %s1786_s7 = scalar_lea.vmem %s1825_s2, %s1045_s4 }
  0x10   : > { %v148_v4 = vld [vmem:[%s1701_s21] sm:$0xff]  ;;  %v149_v5 = vld [vmem:[%s1701_s21 + $0x8] sm:$0xff]  ;;  %1421 = vmatprep.subr.bf16.mxu0 %v1522_v3  ;;  %1498 = vmatprep.subr.bf16.mxu1 %v1522_v3  ;;  %v150_v14 = vld [vmem:[%s1701_s21 + $0x10] sm:$0xff] }
  0x11   : > { %v180_v6 = vld [vmem:[%s1701_s21 + $0x100] sm:$0xff]  ;;  %v212_v7 = vpack.c.bf16 %v149_v5, %v148_v4  ;;  %v181_v8 = vld [vmem:[%s1701_s21 + $0x108] sm:$0xff]  ;;  %v151_v15 = vld [vmem:[%s1701_s21 + $0x18] sm:$0xff] }
  0x12   : > { %v228_v9 = vpack.c.bf16 %v181_v8, %v180_v6  ;;  %v182_v16 = vld [vmem:[%s1701_s21 + $0x110] sm:$0xff]  ;;  %v183_v17 = vld [vmem:[%s1701_s21 + $0x118] sm:$0xff]  ;;  %v152_v18 = vld [vmem:[%s1701_s21 + $0x20] sm:$0xff]  ;;  %v213_v22 = vpack.c.bf16 %v151_v15, %v150_v14 }
  0x13   : > { %1431 = vmatprep.mubr.bf16.mxu0 %v212_v7  ;;  %1422 = vmatpush3.bf16.msra.mxu0 %v1522_v3  ;;  %v153_v19 = vld [vmem:[%s1701_s21 + $0x28] sm:$0xff]  ;;  %v184_v20 = vld [vmem:[%s1701_s21 + $0x120] sm:$0xff]  ;;  %v229_v23 = vpack.c.bf16 %v183_v17, %v182_v16  ;;  %v154_v26 = vld [vmem:[%s1701_s21 + $0x30] sm:$0xff] }
  0x14   : > { %1463 = vmatprep.mubr.bf16.mxu1 %v228_v9  ;;  %1506 = vmatpush3.bf16.msra.mxu1 %v1522_v3  ;;  %v185_v21 = vld [vmem:[%s1701_s21 + $0x128] sm:$0xff]  ;;  %v214_v24 = vpack.c.bf16 %v153_v19, %v152_v18  ;;  %v155_v27 = vld [vmem:[%s1701_s21 + $0x38] sm:$0xff]  ;;  %v186_v28 = vld [vmem:[%s1701_s21 + $0x130] sm:$0xff] }
  0x15   : > { %1423 = vmatprep.subr.bf16.mxu0 %v1523_v10  ;;  %1499 = vmatprep.subr.bf16.mxu1 %v1523_v10  ;;  %v230_v25 = vpack.c.bf16 %v185_v21, %v184_v20  ;;  %v187_v29 = vld [vmem:[%s1701_s21 + $0x138] sm:$0xff]  ;;  %v156_v30 = vld [vmem:[%s1701_s21 + $0x40] sm:$0xff]  ;;  %v157_v31 = vld [vmem:[%s1701_s21 + $0x48] sm:$0xff]  ;;  %v215_v34 = vpack.c.bf16 %v155_v27, %v154_v26 }
  0x16   : > { %v188_v32 = vld [vmem:[%s1701_s21 + $0x140] sm:$0xff]  ;;  %v189_v33 = vld [vmem:[%s1701_s21 + $0x148] sm:$0xff]  ;;  %v231_v35 = vpack.c.bf16 %v187_v29, %v186_v28  ;;  %v216_v36 = vpack.c.bf16 %v157_v31, %v156_v30  ;;  %v158_v38 = vld [vmem:[%s1701_s21 + $0x50] sm:$0xff] }
  0x17   : > { %1424 = vmatpush3.bf16.msra.mxu0 %v1523_v10  ;;  %v232_v37 = vpack.c.bf16 %v189_v33, %v188_v32  ;;  %v159_v39 = vld [vmem:[%s1701_s21 + $0x58] sm:$0xff]  ;;  %v190_v40 = vld [vmem:[%s1701_s21 + $0x150] sm:$0xff]  ;;  %v160_v42 = vld [vmem:[%s1701_s21 + $0x60] sm:$0xff] }
  0x18   : > { %1507 = vmatpush3.bf16.msra.mxu1 %v1523_v10  ;;  %1425 = vmatprep.subr.bf16.mxu0 %v1524_v11  ;;  %v191_v41 = vld [vmem:[%s1701_s21 + $0x158] sm:$0xff]  ;;  %v161_v43 = vld [vmem:[%s1701_s21 + $0x68] sm:$0xff]  ;;  %v192_v44 = vld [vmem:[%s1701_s21 + $0x160] sm:$0xff]  ;;  %v217_v46 = vpack.c.bf16 %v159_v39, %v158_v38 }
  0x19   : > { %1500 = vmatprep.subr.bf16.mxu1 %v1524_v11  ;;  %v193_v45 = vld [vmem:[%s1701_s21 + $0x168] sm:$0xff]  ;;  %v233_v47 = vpack.c.bf16 %v191_v41, %v190_v40  ;;  %v218_v48 = vpack.c.bf16 %v161_v43, %v160_v42  ;;  %v162_v50 = vld [vmem:[%s1701_s21 + $0x70] sm:$0xff]  ;;  %v163_v51 = vld [vmem:[%s1701_s21 + $0x78] sm:$0xff] }
  0x1a   : > { %v234_v49 = vpack.c.bf16 %v193_v45, %v192_v44  ;;  %v194_v52 = vld [vmem:[%s1701_s21 + $0x170] sm:$0xff]  ;;  %v195_v53 = vld [vmem:[%s1701_s21 + $0x178] sm:$0xff]  ;;  %v164_v54 = vld [vmem:[%s1701_s21 + $0x80] sm:$0xff]  ;;  %v219_v58 = vpack.c.bf16 %v163_v51, %v162_v50 }
  0x1b   : > { %1426 = vmatpush3.bf16.msra.mxu0 %v1524_v11  ;;  %v165_v55 = vld [vmem:[%s1701_s21 + $0x88] sm:$0xff]  ;;  %v196_v56 = vld [vmem:[%s1701_s21 + $0x180] sm:$0xff]  ;;  %v235_v59 = vpack.c.bf16 %v195_v53, %v194_v52  ;;  %v166_v62 = vld [vmem:[%s1701_s21 + $0x90] sm:$0xff] }
  0x1c   : > { %1508 = vmatpush3.bf16.msra.mxu1 %v1524_v11  ;;  %1427 = vmatprep.subr.bf16.mxu0 %v1525_v12  ;;  %v197_v57 = vld [vmem:[%s1701_s21 + $0x188] sm:$0xff]  ;;  %v220_v60 = vpack.c.bf16 %v165_v55, %v164_v54  ;;  %v167_v63 = vld [vmem:[%s1701_s21 + $0x98] sm:$0xff]  ;;  %v198_v0 = vld [vmem:[%s1701_s21 + $0x190] sm:$0xff] }
  0x1d   : > { %1501 = vmatprep.subr.bf16.mxu1 %v1525_v12  ;;  %v236_v61 = vpack.c.bf16 %v197_v57, %v196_v56  ;;  %v199_v1 = vld [vmem:[%s1701_s21 + $0x198] sm:$0xff]  ;;  %v168_v2 = vld [vmem:[%s1701_s21 + $0xa0] sm:$0xff]  ;;  %v169_v3 = vld [vmem:[%s1701_s21 + $0xa8] sm:$0xff]  ;;  %v221_v6 = vpack.c.bf16 %v167_v63, %v166_v62 }
  0x1e   : > { %v200_v4 = vld [vmem:[%s1701_s21 + $0x1a0] sm:$0xff]  ;;  %v201_v5 = vld [vmem:[%s1701_s21 + $0x1a8] sm:$0xff]  ;;  %v237_v7 = vpack.c.bf16 %v199_v1, %v198_v0  ;;  %v222_v8 = vpack.c.bf16 %v169_v3, %v168_v2  ;;  %v170_v10 = vld [vmem:[%s1701_s21 + $0xb0] sm:$0xff] }
  0x1f   : > { %1428 = vmatpush3.bf16.msra.mxu0 %v1525_v12  ;;  %v238_v9 = vpack.c.bf16 %v201_v5, %v200_v4  ;;  %v171_v11 = vld [vmem:[%s1701_s21 + $0xb8] sm:$0xff]  ;;  %v172_v14 = vld [vmem:[%s1701_s21 + $0xc0] sm:$0xff]  ;;  %v173_v15 = vld [vmem:[%s1701_s21 + $0xc8] sm:$0xff] }
  0x20   : > { %1509 = vmatpush3.bf16.msra.mxu1 %v1525_v12  ;;  %1429 = vmatprep.subr.bf16.mxu0 %v1526_v13  ;;  %v202_v12 = vld [vmem:[%s1701_s21 + $0x1b0] sm:$0xff]  ;;  %v204_v16 = vld [vmem:[%s1701_s21 + $0x1c0] sm:$0xff]  ;;  %v205_v17 = vld [vmem:[%s1701_s21 + $0x1c8] sm:$0xff]  ;;  %v223_v18 = vpack.c.bf16 %v171_v11, %v170_v10  ;;  %v224_v20 = vpack.c.bf16 %v173_v15, %v172_v14 }
  0x21   : > { %1502 = vmatprep.subr.bf16.mxu1 %v1526_v13  ;;  %v240_v21 = vpack.c.bf16 %v205_v17, %v204_v16  ;;  %v176_v26 = vld [vmem:[%s1701_s21 + $0xe0] sm:$0xff]  ;;  %v177_v27 = vld [vmem:[%s1701_s21 + $0xe8] sm:$0xff] }
  0x22   : > { %v208_v28 = vld [vmem:[%s1701_s21 + $0x1e0] sm:$0xff]  ;;  %v209_v29 = vld [vmem:[%s1701_s21 + $0x1e8] sm:$0xff]  ;;  %v226_v32 = vpack.c.bf16 %v177_v27, %v176_v26 }
  0x23   : > { %1430 = vmatpush3.bf16.msra.mxu0 %v1526_v13  ;;  %v242_v33 = vpack.c.bf16 %v209_v29, %v208_v28 }
  0x24   : > { %1510 = vmatpush3.bf16.msra.mxu1 %v1526_v13  ;;  %v203_v13 = vld [vmem:[%s1701_s21 + $0x1b8] sm:$0xff] }
  0x25   : > { %v239_v19 = vpack.c.bf16 %v203_v13, %v202_v12 }
  0x26   : > { %1432 = vmatmul.mubr.bf16.vlgmr.msra.gmra.mrb[0].mxu0 %v213_v22  ;;  %v174_v22 = vld [vmem:[%s1701_s21 + $0xd0] sm:$0xff] }
  0x27   : > { %1464 = vmatmul.mubr.bf16.vlgmr.msra.gmra.mrb[0].mxu1 %v229_v23  ;;  %1435 = vmatprep.mubr.bf16.mxu0 %v214_v24  ;;  %v175_v23 = vld [vmem:[%s1701_s21 + $0xd8] sm:$0xff]  ;;  %v206_v24 = vld [vmem:[%s1701_s21 + $0x1d0] sm:$0xff] }
  0x28   : > { %1467 = vmatprep.mubr.bf16.mxu1 %v230_v25  ;;  %v207_v25 = vld [vmem:[%s1701_s21 + $0x1d8] sm:$0xff]  ;;  %v225_v30 = vpack.c.bf16 %v175_v23, %v174_v22 }
  0x29   : > { %v241_v31 = vpack.c.bf16 %v207_v25, %v206_v24 }
  0x2e   : > { %1436 = vmatmul.mubr.bf16.gmra.mrb[4].mxu0 %v215_v34  ;;  %v178_v34 = vld [vmem:[%s1701_s21 + $0xf0] sm:$0xff] }
  0x2f   : > { %1468 = vmatmul.mubr.bf16.gmra.mrb[4].mxu1 %v231_v35  ;;  %1439 = vmatprep.mubr.bf16.mxu0 %v216_v36  ;;  %v179_v35 = vld [vmem:[%s1701_s21 + $0xf8] sm:$0xff]  ;;  %v210_v36 = vld [vmem:[%s1701_s21 + $0x1f0] sm:$0xff] }
  0x30   : > { %1471 = vmatprep.mubr.bf16.mxu1 %v232_v37  ;;  %v211_v37 = vld [vmem:[%s1701_s21 + $0x1f8] sm:$0xff]  ;;  %v227_v38 = vpack.c.bf16 %v179_v35, %v178_v34 }
  0x31   : > { %v243_v39 = vpack.c.bf16 %v211_v37, %v210_v36 }
  0x36   : > { %1440 = vmatmul.mubr.bf16.gmra.mrb[8].mxu0 %v217_v46 }
  0x37   : > { %1472 = vmatmul.mubr.bf16.gmra.mrb[8].mxu1 %v233_v47  ;;  %1443 = vmatprep.mubr.bf16.mxu0 %v218_v48 }
  0x38   : > { %1475 = vmatprep.mubr.bf16.mxu1 %v234_v49 }
  0x3e   : > { %1444 = vmatmul.mubr.bf16.gmra.mrb[12].mxu0 %v219_v58 }
  0x3f   : > { %1476 = vmatmul.mubr.bf16.gmra.mrb[12].mxu1 %v235_v59  ;;  %1447 = vmatprep.mubr.bf16.mxu0 %v220_v60 }
  0x40   : > { %1479 = vmatprep.mubr.bf16.mxu1 %v236_v61 }
  0x46   : > { %1448 = vmatmul.mubr.bf16.gmra.mrb[16].mxu0 %v221_v6 }
  0x47   : > { %1480 = vmatmul.mubr.bf16.gmra.mrb[16].mxu1 %v237_v7  ;;  %1451 = vmatprep.mubr.bf16.mxu0 %v222_v8 }
  0x48   : > { %1483 = vmatprep.mubr.bf16.mxu1 %v238_v9 }
  0x4e   : > { %1452 = vmatmul.mubr.bf16.gmra.mrb[20].mxu0 %v223_v18 }
  0x4f   : > { %1484 = vmatmul.mubr.bf16.gmra.mrb[20].mxu1 %v239_v19  ;;  %1455 = vmatprep.mubr.bf16.mxu0 %v224_v20 }
  0x50   : > { %1487 = vmatprep.mubr.bf16.mxu1 %v240_v21 }
  0x56   : > { %1456 = vmatmul.mubr.bf16.gmra.mrb[24].mxu0 %v225_v30 }
  0x57   : > { %1488 = vmatmul.mubr.bf16.gmra.mrb[24].mxu1 %v241_v31  ;;  %1459 = vmatprep.mubr.bf16.mxu0 %v226_v32 }
  0x58   : > { %1491 = vmatprep.mubr.bf16.mxu1 %v242_v33 }
  0x5e   : > { %1460 = vmatmul.mubr.bf16.gmra.mrb[28].mxu0 %v227_v38 }
  0x5f   : > { %1492 = vmatmul.mubr.bf16.gmra.mrb[28].mxu1 %v243_v39 }
  0xf9   : > { %v1433_v40 = vpop.f32.mrb[0].mxu0 }
  0xfa   : > { %v1465_v41 = vpop.f32.mrb[0].mxu1  ;;  %1527 = vtanh.f32 %v1433_v40  ;;  %v342_v42 = vpop.f32.mrb[1].mxu0 }
  0xfb   : > { %v470_v43 = vpop.f32.mrb[1].mxu1  ;;  %1529 = vtanh.f32 %v1465_v41  ;;  %v1434_v44 = vpop.f32.mrb[2].mxu0 }
  0xfc   : > { %v1466_v45 = vpop.f32.mrb[2].mxu1  ;;  %1531 = vtanh.f32 %v342_v42  ;;  %v345_v46 = vpop.f32.mrb[3].mxu0 }
  0xfd   : > { %v473_v47 = vpop.f32.mrb[3].mxu1  ;;  %1533 = vtanh.f32 %v470_v43 }
  0xfe   : > { %1535 = vtanh.f32 %v1434_v44 }
  0xff   : > { %1537 = vtanh.f32 %v1466_v45 }
 0x100   : > { %1539 = vtanh.f32 %v345_v46 }
 0x101   : > { %1541 = vtanh.f32 %v473_v47  ;;  %v1437_v48 = vpop.f32.mrb[4].mxu0 }
 0x102   : > { %v1469_v49 = vpop.f32.mrb[4].mxu1  ;;  %1543 = vtanh.f32 %v1437_v48  ;;  %v358_v50 = vpop.f32.mrb[5].mxu0 }
 0x103   : > { %v486_v51 = vpop.f32.mrb[5].mxu1  ;;  %1545 = vtanh.f32 %v1469_v49  ;;  %v1438_v52 = vpop.f32.mrb[6].mxu0 }
 0x104   : > { %v1470_v53 = vpop.f32.mrb[6].mxu1  ;;  %v1528_v54 = vpop.eup %1527  ;;  %1547 = vtanh.f32 %v358_v50 }
 0x105   : > { %v361_v55 = vpop.f32.mrb[7].mxu0  ;;  %v489_v56 = vpop.f32.mrb[7].mxu1  ;;  %1549 = vtanh.f32 %v486_v51 }
 0x106   : > { %v1530_v57 = vpop.eup %1529  ;;  %1551 = vtanh.f32 %v1438_v52 }
 0x107   : > { %v1532_v58 = vpop.eup %1531  ;;  %1553 = vtanh.f32 %v1470_v53 }
 0x108   : > { %v1534_v59 = vpop.eup %1533  ;;  %1555 = vtanh.f32 %v361_v55 }
 0x109   : > { %v1536_v60 = vpop.eup %1535  ;;  %1557 = vtanh.f32 %v489_v56  ;;  %v1441_v63 = vpop.f32.mrb[8].mxu0 }
 0x10a   : > { %v1538_v61 = vpop.eup %1537  ;;  %v1192_v62 = vpack.c.bf16 %v1536_v60, %v1528_v54  ;;  %v1473_v0 = vpop.f32.mrb[8].mxu1  ;;  %1559 = vtanh.f32 %v1441_v63 }
 0x10b   : > { %v1540_v1 = vpop.eup %1539  ;;  %v1272_v2 = vpack.c.bf16 %v1538_v61, %v1530_v57  ;;  %v374_v3 = vpop.f32.mrb[9].mxu0  ;;  %1561 = vtanh.f32 %v1473_v0 }
 0x10c   : > { %v502_v4 = vpop.f32.mrb[9].mxu1  ;;  %v1542_v5 = vpop.eup %1541  ;;  %1344 = vst [vmem:[%s1786_s7 + $0x8] sm:$0xff] %v1192_v62   ;;  %v1187_v6 = vpack.c.bf16 %v1540_v1, %v1532_v58  ;;  %1563 = vtanh.f32 %v374_v3 }
 0x10d   : > { %v1442_v7 = vpop.f32.mrb[10].mxu0  ;;  %v1474_v8 = vpop.f32.mrb[10].mxu1  ;;  %1360 = vst [vmem:[%s1786_s7 + $0x88] sm:$0xff] %v1272_v2   ;;  %v1267_v10 = vpack.c.bf16 %v1542_v5, %v1534_v59  ;;  %1565 = vtanh.f32 %v502_v4 }
 0x10e   : > { %v1544_v9 = vpop.eup %1543  ;;  %v377_v11 = vpop.f32.mrb[11].mxu0  ;;  %1188 = vst [vmem:[%s1786_s7] sm:$0xff] %v1187_v6   ;;  %1567 = vtanh.f32 %v1442_v7 }
 0x10f   : > { %v505_v12 = vpop.f32.mrb[11].mxu1  ;;  %v1546_v13 = vpop.eup %1545  ;;  %1359 = vst [vmem:[%s1786_s7 + $0x80] sm:$0xff] %v1267_v10   ;;  %1569 = vtanh.f32 %v1474_v8 }
 0x110   : > { %v1548_v14 = vpop.eup %1547  ;;  %1571 = vtanh.f32 %v377_v11 }
 0x111   : > { %v1550_v15 = vpop.eup %1549  ;;  %1573 = vtanh.f32 %v505_v12  ;;  %v1445_v19 = vpop.f32.mrb[12].mxu0 }
 0x112   : > { %v1552_v16 = vpop.eup %1551  ;;  %v1477_v20 = vpop.f32.mrb[12].mxu1  ;;  %1575 = vtanh.f32 %v1445_v19 }
 0x113   : > { %v1554_v17 = vpop.eup %1553  ;;  %v1202_v18 = vpack.c.bf16 %v1552_v16, %v1544_v9  ;;  %v390_v23 = vpop.f32.mrb[13].mxu0  ;;  %1577 = vtanh.f32 %v1477_v20 }
 0x114   : > { %v1556_v21 = vpop.eup %1555  ;;  %v1282_v22 = vpack.c.bf16 %v1554_v17, %v1546_v13  ;;  %v518_v24 = vpop.f32.mrb[13].mxu1  ;;  %1579 = vtanh.f32 %v390_v23 }
 0x115   : > { %v1558_v25 = vpop.eup %1557  ;;  %1346 = vst [vmem:[%s1786_s7 + $0x18] sm:$0xff] %v1202_v18   ;;  %v1197_v26 = vpack.c.bf16 %v1556_v21, %v1548_v14  ;;  %v1446_v27 = vpop.f32.mrb[14].mxu0  ;;  %1581 = vtanh.f32 %v518_v24 }
 0x116   : > { %v1478_v28 = vpop.f32.mrb[14].mxu1  ;;  %v1560_v29 = vpop.eup %1559  ;;  %1362 = vst [vmem:[%s1786_s7 + $0x98] sm:$0xff] %v1282_v22   ;;  %v1277_v30 = vpack.c.bf16 %v1558_v25, %v1550_v15  ;;  %1583 = vtanh.f32 %v1446_v27 }
 0x117   : > { %v393_v31 = vpop.f32.mrb[15].mxu0  ;;  %v521_v32 = vpop.f32.mrb[15].mxu1  ;;  %1345 = vst [vmem:[%s1786_s7 + $0x10] sm:$0xff] %v1197_v26   ;;  %1585 = vtanh.f32 %v1478_v28 }
 0x118   : > { %v1562_v33 = vpop.eup %1561  ;;  %1361 = vst [vmem:[%s1786_s7 + $0x90] sm:$0xff] %v1277_v30   ;;  %1587 = vtanh.f32 %v393_v31 }
 0x119   : > { %v1564_v34 = vpop.eup %1563  ;;  %1589 = vtanh.f32 %v521_v32  ;;  %v1449_v39 = vpop.f32.mrb[16].mxu0 }
 0x11a   : > { %v1566_v35 = vpop.eup %1565  ;;  %v1481_v40 = vpop.f32.mrb[16].mxu1  ;;  %1591 = vtanh.f32 %v1449_v39 }
 0x11b   : > { %v1568_v36 = vpop.eup %1567  ;;  %v406_v43 = vpop.f32.mrb[17].mxu0  ;;  %1593 = vtanh.f32 %v1481_v40 }
 0x11c   : > { %v1570_v37 = vpop.eup %1569  ;;  %v1212_v38 = vpack.c.bf16 %v1568_v36, %v1560_v29  ;;  %v534_v44 = vpop.f32.mrb[17].mxu1  ;;  %1595 = vtanh.f32 %v406_v43 }
 0x11d   : > { %v1572_v41 = vpop.eup %1571  ;;  %v1292_v42 = vpack.c.bf16 %v1570_v37, %v1562_v33  ;;  %v1450_v47 = vpop.f32.mrb[18].mxu0  ;;  %1597 = vtanh.f32 %v534_v44 }
 0x11e   : > { %v1574_v45 = vpop.eup %1573  ;;  %1348 = vst [vmem:[%s1786_s7 + $0x28] sm:$0xff] %v1212_v38   ;;  %v1207_v46 = vpack.c.bf16 %v1572_v41, %v1564_v34  ;;  %v1482_v48 = vpop.f32.mrb[18].mxu1  ;;  %1599 = vtanh.f32 %v1450_v47 }
 0x11f   : > { %v1576_v49 = vpop.eup %1575  ;;  %1364 = vst [vmem:[%s1786_s7 + $0xa8] sm:$0xff] %v1292_v42   ;;  %v1287_v50 = vpack.c.bf16 %v1574_v45, %v1566_v35  ;;  %v409_v51 = vpop.f32.mrb[19].mxu0  ;;  %1601 = vtanh.f32 %v1482_v48 }
 0x120   : > { %v537_v52 = vpop.f32.mrb[19].mxu1  ;;  %v1578_v53 = vpop.eup %1577  ;;  %1347 = vst [vmem:[%s1786_s7 + $0x20] sm:$0xff] %v1207_v46   ;;  %1603 = vtanh.f32 %v409_v51 }
 0x121   : > { %v1580_v54 = vpop.eup %1579  ;;  %1363 = vst [vmem:[%s1786_s7 + $0xa0] sm:$0xff] %v1287_v50   ;;  %1605 = vtanh.f32 %v537_v52  ;;  %v1453_v59 = vpop.f32.mrb[20].mxu0 }
 0x122   : > { %v1582_v55 = vpop.eup %1581  ;;  %v1485_v60 = vpop.f32.mrb[20].mxu1  ;;  %1607 = vtanh.f32 %v1453_v59 }
 0x123   : > { %v1584_v56 = vpop.eup %1583  ;;  %v422_v63 = vpop.f32.mrb[21].mxu0  ;;  %1609 = vtanh.f32 %v1485_v60 }
 0x124   : > { %v1586_v57 = vpop.eup %1585  ;;  %v1222_v58 = vpack.c.bf16 %v1584_v56, %v1576_v49  ;;  %v550_v0 = vpop.f32.mrb[21].mxu1  ;;  %1611 = vtanh.f32 %v422_v63 }
 0x125   : > { %v1588_v61 = vpop.eup %1587  ;;  %v1302_v62 = vpack.c.bf16 %v1586_v57, %v1578_v53  ;;  %v1454_v3 = vpop.f32.mrb[22].mxu0  ;;  %1613 = vtanh.f32 %v550_v0 }
 0x126   : > { %v1590_v1 = vpop.eup %1589  ;;  %1350 = vst [vmem:[%s1786_s7 + $0x38] sm:$0xff] %v1222_v58   ;;  %v1217_v2 = vpack.c.bf16 %v1588_v61, %v1580_v54  ;;  %v1486_v4 = vpop.f32.mrb[22].mxu1  ;;  %1615 = vtanh.f32 %v1454_v3 }
 0x127   : > { %v1592_v5 = vpop.eup %1591  ;;  %1366 = vst [vmem:[%s1786_s7 + $0xb8] sm:$0xff] %v1302_v62   ;;  %v1297_v6 = vpack.c.bf16 %v1590_v1, %v1582_v55  ;;  %v425_v7 = vpop.f32.mrb[23].mxu0  ;;  %1617 = vtanh.f32 %v1486_v4 }
 0x128   : > { %v553_v8 = vpop.f32.mrb[23].mxu1  ;;  %v1594_v9 = vpop.eup %1593  ;;  %1349 = vst [vmem:[%s1786_s7 + $0x30] sm:$0xff] %v1217_v2   ;;  %1619 = vtanh.f32 %v425_v7 }
 0x129   : > { %v1596_v10 = vpop.eup %1595  ;;  %1365 = vst [vmem:[%s1786_s7 + $0xb0] sm:$0xff] %v1297_v6   ;;  %1621 = vtanh.f32 %v553_v8  ;;  %v1457_v15 = vpop.f32.mrb[24].mxu0 }
 0x12a   : > { %v1598_v11 = vpop.eup %1597  ;;  %v1489_v16 = vpop.f32.mrb[24].mxu1  ;;  %1623 = vtanh.f32 %v1457_v15 }
 0x12b   : > { %v1600_v12 = vpop.eup %1599  ;;  %v438_v19 = vpop.f32.mrb[25].mxu0  ;;  %1625 = vtanh.f32 %v1489_v16 }
 0x12c   : > { %v1602_v13 = vpop.eup %1601  ;;  %v1232_v14 = vpack.c.bf16 %v1600_v12, %v1592_v5  ;;  %v566_v20 = vpop.f32.mrb[25].mxu1  ;;  %1627 = vtanh.f32 %v438_v19 }
 0x12d   : > { %v1604_v17 = vpop.eup %1603  ;;  %v1312_v18 = vpack.c.bf16 %v1602_v13, %v1594_v9  ;;  %v1458_v23 = vpop.f32.mrb[26].mxu0  ;;  %1629 = vtanh.f32 %v566_v20 }
 0x12e   : > { %v1606_v21 = vpop.eup %1605  ;;  %1352 = vst [vmem:[%s1786_s7 + $0x48] sm:$0xff] %v1232_v14   ;;  %v1227_v22 = vpack.c.bf16 %v1604_v17, %v1596_v10  ;;  %v1490_v24 = vpop.f32.mrb[26].mxu1  ;;  %1631 = vtanh.f32 %v1458_v23 }
 0x12f   : > { %v1608_v25 = vpop.eup %1607  ;;  %1368 = vst [vmem:[%s1786_s7 + $0xc8] sm:$0xff] %v1312_v18   ;;  %v1307_v26 = vpack.c.bf16 %v1606_v21, %v1598_v11  ;;  %v441_v27 = vpop.f32.mrb[27].mxu0  ;;  %1633 = vtanh.f32 %v1490_v24 }
 0x130   : > { %v569_v28 = vpop.f32.mrb[27].mxu1  ;;  %v1610_v29 = vpop.eup %1609  ;;  %1351 = vst [vmem:[%s1786_s7 + $0x40] sm:$0xff] %v1227_v22   ;;  %1635 = vtanh.f32 %v441_v27 }
 0x131   : > { %v1612_v30 = vpop.eup %1611  ;;  %1367 = vst [vmem:[%s1786_s7 + $0xc0] sm:$0xff] %v1307_v26   ;;  %1637 = vtanh.f32 %v569_v28  ;;  %v1461_v35 = vpop.f32.mrb[28].mxu0 }
 0x132   : > { %v1614_v31 = vpop.eup %1613  ;;  %v1493_v36 = vpop.f32.mrb[28].mxu1  ;;  %1639 = vtanh.f32 %v1461_v35 }
 0x133   : > { %v1616_v32 = vpop.eup %1615  ;;  %v454_v39 = vpop.f32.mrb[29].mxu0  ;;  %1641 = vtanh.f32 %v1493_v36 }
 0x134   : > { %v1618_v33 = vpop.eup %1617  ;;  %v1242_v34 = vpack.c.bf16 %v1616_v32, %v1608_v25  ;;  %v582_v40 = vpop.f32.mrb[29].mxu1  ;;  %1643 = vtanh.f32 %v454_v39 }
 0x135   : > { %v1620_v37 = vpop.eup %1619  ;;  %v1322_v38 = vpack.c.bf16 %v1618_v33, %v1610_v29  ;;  %v1462_v43 = vpop.f32.mrb[30].mxu0  ;;  %1645 = vtanh.f32 %v582_v40 }
 0x136   : > { %v1622_v41 = vpop.eup %1621  ;;  %1354 = vst [vmem:[%s1786_s7 + $0x58] sm:$0xff] %v1242_v34   ;;  %v1237_v42 = vpack.c.bf16 %v1620_v37, %v1612_v30  ;;  %v1494_v44 = vpop.f32.mrb[30].mxu1  ;;  %1647 = vtanh.f32 %v1462_v43 }
 0x137   : > { %v1624_v45 = vpop.eup %1623  ;;  %1370 = vst [vmem:[%s1786_s7 + $0xd8] sm:$0xff] %v1322_v38   ;;  %v1317_v46 = vpack.c.bf16 %v1622_v41, %v1614_v31  ;;  %v457_v47 = vpop.f32.mrb[31].mxu0  ;;  %1649 = vtanh.f32 %v1494_v44 }
 0x138   : > { %v585_v48 = vpop.f32.mrb[31].mxu1  ;;  %v1626_v49 = vpop.eup %1625  ;;  %1353 = vst [vmem:[%s1786_s7 + $0x50] sm:$0xff] %v1237_v42   ;;  %1651 = vtanh.f32 %v457_v47 }
 0x139   : > { %v1628_v50 = vpop.eup %1627  ;;  %1369 = vst [vmem:[%s1786_s7 + $0xd0] sm:$0xff] %v1317_v46   ;;  %1653 = vtanh.f32 %v585_v48 }
 0x13a   : > { %v1630_v51 = vpop.eup %1629 }
 0x13b   : > { %v1632_v52 = vpop.eup %1631 }
 0x13c   : > { %v1634_v53 = vpop.eup %1633  ;;  %v1252_v54 = vpack.c.bf16 %v1632_v52, %v1624_v45 }
 0x13d   : > { %v1636_v55 = vpop.eup %1635  ;;  %v1332_v56 = vpack.c.bf16 %v1634_v53, %v1626_v49 }
 0x13e   : > { %v1638_v57 = vpop.eup %1637  ;;  %1356 = vst [vmem:[%s1786_s7 + $0x68] sm:$0xff] %v1252_v54   ;;  %v1247_v58 = vpack.c.bf16 %v1636_v55, %v1628_v50 }
 0x13f   : > { %v1640_v59 = vpop.eup %1639  ;;  %1372 = vst [vmem:[%s1786_s7 + $0xe8] sm:$0xff] %v1332_v56   ;;  %v1327_v60 = vpack.c.bf16 %v1638_v57, %v1630_v51 }
 0x140   : > { %v1642_v61 = vpop.eup %1641  ;;  %1355 = vst [vmem:[%s1786_s7 + $0x60] sm:$0xff] %v1247_v58  }
 0x141   : > { %v1644_v62 = vpop.eup %1643  ;;  %1371 = vst [vmem:[%s1786_s7 + $0xe0] sm:$0xff] %v1327_v60  }
 0x142   : > { %v1646_v63 = vpop.eup %1645 }
 0x143   : > { %v1648_v0 = vpop.eup %1647 }
 0x144   : > { %v1650_v1 = vpop.eup %1649  ;;  %v1262_v2 = vpack.c.bf16 %v1648_v0, %v1640_v59 }
 0x145   : > { %v1652_v3 = vpop.eup %1651  ;;  %v1342_v4 = vpack.c.bf16 %v1650_v1, %v1642_v61 }
 0x146   : > { %v1654_v5 = vpop.eup %1653  ;;  %1358 = vst [vmem:[%s1786_s7 + $0x78] sm:$0xff] %v1262_v2   ;;  %v1257_v6 = vpack.c.bf16 %v1652_v3, %v1644_v62 }
 0x147   : > { %1374 = vst [vmem:[%s1786_s7 + $0xf8] sm:$0xff] %v1342_v4   ;;  %v1337_v7 = vpack.c.bf16 %v1654_v5, %v1646_v63 }
 0x148   : > { %1357 = vst [vmem:[%s1786_s7 + $0x70] sm:$0xff] %v1257_v6  }
 0x149   : > { %1373 = vst [vmem:[%s1786_s7 + $0xf0] sm:$0xff] %v1337_v7  }
 0x14a PF: > { %s12_s9 = sadd.s32 1, %s1661_s9  }
 0x14b   : > { %p9_p4 = scmp.ge.s32.totalorder %s12_s9, 5  }
 0x14d   :  { %11 = sbr.rel (!%p9_p4) target bundleno = 1 (0x1), region = 58 }

// kernel: igae_encoder.8
= control target key start
LH: loop header
LB: loop body
LE: loop exit
PB: predicated region body
PF: predicated region fallthrough
CT: control target
= control target key end

     0   :  { %s2946_s9 = smov 0   ;;  %s2948_s10 = smov 0   ;;  %s3753_s0 = inlined_call_operand.vmem [shape: bf16[1536,1536], index: 0, kind: input, shape index: {}]   ;;  %s3754_s1 = inlined_call_operand.vmem [shape: bf16[1536,128], index: 1, kind: input, shape index: {}]   ;;  %s3755_s2 = inlined_call_operand.vmem [shape: f32[1536,128], index: 2, kind: output, shape index: {}]  }
   0x1   :  { %s2950_s11 = smov 0   ;;  %s2952_s12 = smov 0  }
   0x2   :  { %s2954_s13 = smov 0   ;;  %s2956_s14 = smov 0  }
   0x3   :  { %s2958_s15 = smov 0  }
   0x4 LB: > { %s21_s16 = sadd.s32 1, %s2919_s13  ;;  %s24_s17 = sadd.s32 1, %s2923_s14  ;;  %s2927_s15 = sphi %s2958_s15, %s12_s15   ;;  %s2923_s14 = sphi %s2956_s14, %s3761_s14   ;;  %s2919_s13 = sphi %s2954_s13, %s3760_s13   ;;  %s2915_s12 = sphi %s2952_s12, %s3759_s12   ;;  %s2911_s11 = sphi %s2950_s11, %s3758_s11   ;;  %s2907_s10 = sphi %s2948_s10, %s3757_s10   ;;  %s2903_s9 = sphi %s2946_s9, %s3756_s9  }
   0x5   : > { %p22_p0 = scmp.ge.s32.totalorder %s21_s16, 3  ;;  %p40_p1 = scmp.ne.s32.totalorder %s2907_s10, %s2903_s9 }
   0x6   : > { %p41_p2 = scmp.eq.s32.totalorder %s2927_s15, 0  ;;  %s33_s21 = sadd.s32 1, %s2907_s10 }
   0x7   : > { %s3763_s16 = smov (%p22_p0, %s21_s16), 0  ;;  %s3765_s17 = smov (!%p22_p0, %s24_s17), %s2923_s14 }
   0x8   : > { %p42_p3 = por %p41_p2, %p40_p1  ;;  %p26_p4 = scmp.ge.s32.totalorder %s3765_s17, 3 }
   0x9   : > { %s29_s18 = ssub.s32 %s2919_s13, %s3763_s16  ;;  %p2415_p6 = scmp.ge.s32.totalorder %s2927_s15, 9 }
   0xa   : > { %s3767_s17 = smov (%p26_p4, %s3765_s17), 0 }
   0xb   : > { %s28_s19 = ssub.s32 %s2923_s14, %s3767_s17  ;;  %118 = sbr.rel (%p2415_p6) target bundleno = 90 (0x5a), region = 16 }
   0xc   : > { %s30_s20 = sor.u32 %s29_s18, %s28_s19 }
   0xd   : > { %p31_p5 = scmp.eq.s32.totalorder %s30_s20, 0 }
   0xf   : > { %s2997_s22 = scalar_select %p31_p5, %s2907_s10, %s33_s21  }
  0x12   : > { %121 = sbr.rel (!%p42_p3) target bundleno = 90 (0x5a), region = 20  ;;  %s123_s23 = sand.u32 (%p42_p3), 1, %s2907_s10  }
  0x13   : > { %s2418_s24 = sshll.u32 (%p42_p3), %s2919_s13, 2  ;;  %s2416_s25 = sshll.u32 (%p42_p3), %s123_s23, 10 }
  0x14   : > { %s2590_s26 = smul.u32 (%p42_p3), 768, %s2923_s14  ;;  %s3011_s4 = scalar_lea.vmem (%p42_p3), [#allocation2], %s2416_s25 }
  0x16   : > { %s129_s27 = sadd.s32 (%p42_p3), %s2590_s26, %s2418_s24 }
  0x17   : > { %s2420_s28 = sshll.u32 (%p42_p3), %s129_s27, 2 }
  0x18   : > { %s3006_s3 = scalar_lea.vmem (%p42_p3), %s3753_s0, %s2420_s28 }
  0x19   : > { %v144_v0 = vld [vmem:[%s3006_s3] sm:$0xff]  ;;  %v146_v1 = vld [vmem:[%s3006_s3 + $0x8] sm:$0xff]  ;;  %v148_v2 = vld [vmem:[%s3006_s3 + $0x30] sm:$0xff] }
  0x1a   : > { %145 = vst [vmem:[%s3011_s4] sm:$0xff] %v144_v0  ;;  %147 = vst [vmem:[%s3011_s4 + $0x8] sm:$0xff] %v146_v1  ;;  %v150_v3 = vld [vmem:[%s3006_s3 + $0x38] sm:$0xff]  ;;  %v152_v4 = vld [vmem:[%s3006_s3 + $0x60] sm:$0xff] }
  0x1b   : > { %149 = vst [vmem:[%s3011_s4 + $0x10] sm:$0xff] %v148_v2  ;;  %v154_v5 = vld [vmem:[%s3006_s3 + $0x68] sm:$0xff]  ;;  %151 = vst [vmem:[%s3011_s4 + $0x18] sm:$0xff] %v150_v3  ;;  %v156_v6 = vld [vmem:[%s3006_s3 + $0x90] sm:$0xff] }
  0x1c   : > { %153 = vst [vmem:[%s3011_s4 + $0x20] sm:$0xff] %v152_v4  ;;  %155 = vst [vmem:[%s3011_s4 + $0x28] sm:$0xff] %v154_v5  ;;  %v158_v7 = vld [vmem:[%s3006_s3 + $0x98] sm:$0xff]  ;;  %v160_v8 = vld [vmem:[%s3006_s3 + $0xc0] sm:$0xff] }
  0x1d   : > { %157 = vst [vmem:[%s3011_s4 + $0x30] sm:$0xff] %v156_v6  ;;  %159 = vst [vmem:[%s3011_s4 + $0x38] sm:$0xff] %v158_v7  ;;  %v162_v9 = vld [vmem:[%s3006_s3 + $0xc8] sm:$0xff]  ;;  %v164_v10 = vld [vmem:[%s3006_s3 + $0xf0] sm:$0xff] }
  0x1e   : > { %161 = vst [vmem:[%s3011_s4 + $0x40] sm:$0xff] %v160_v8  ;;  %v166_v11 = vld [vmem:[%s3006_s3 + $0xf8] sm:$0xff]  ;;  %163 = vst [vmem:[%s3011_s4 + $0x48] sm:$0xff] %v162_v9  ;;  %v168_v12 = vld [vmem:[%s3006_s3 + $0x120] sm:$0xff] }
  0x1f   : > { %165 = vst [vmem:[%s3011_s4 + $0x50] sm:$0xff] %v164_v10  ;;  %167 = vst [vmem:[%s3011_s4 + $0x58] sm:$0xff] %v166_v11  ;;  %v170_v13 = vld [vmem:[%s3006_s3 + $0x128] sm:$0xff]  ;;  %v172_v14 = vld [vmem:[%s3006_s3 + $0x150] sm:$0xff] }
  0x20   : > { %169 = vst [vmem:[%s3011_s4 + $0x60] sm:$0xff] %v168_v12  ;;  %171 = vst [vmem:[%s3011_s4 + $0x68] sm:$0xff] %v170_v13  ;;  %v174_v15 = vld [vmem:[%s3006_s3 + $0x158] sm:$0xff]  ;;  %v176_v16 = vld [vmem:[%s3006_s3 + $0x180] sm:$0xff] }
  0x21   : > { %173 = vst [vmem:[%s3011_s4 + $0x70] sm:$0xff] %v172_v14  ;;  %v178_v17 = vld [vmem:[%s3006_s3 + $0x188] sm:$0xff]  ;;  %175 = vst [vmem:[%s3011_s4 + $0x78] sm:$0xff] %v174_v15  ;;  %v180_v18 = vld [vmem:[%s3006_s3 + $0x1b0] sm:$0xff] }
  0x22   : > { %177 = vst [vmem:[%s3011_s4 + $0x80] sm:$0xff] %v176_v16  ;;  %179 = vst [vmem:[%s3011_s4 + $0x88] sm:$0xff] %v178_v17  ;;  %v182_v19 = vld [vmem:[%s3006_s3 + $0x1b8] sm:$0xff]  ;;  %v184_v20 = vld [vmem:[%s3006_s3 + $0x1e0] sm:$0xff] }
  0x23   : > { %181 = vst [vmem:[%s3011_s4 + $0x90] sm:$0xff] %v180_v18  ;;  %183 = vst [vmem:[%s3011_s4 + $0x98] sm:$0xff] %v182_v19  ;;  %v186_v21 = vld [vmem:[%s3006_s3 + $0x1e8] sm:$0xff]  ;;  %v188_v22 = vld [vmem:[%s3006_s3 + $0x210] sm:$0xff] }
  0x24   : > { %185 = vst [vmem:[%s3011_s4 + $0xa0] sm:$0xff] %v184_v20  ;;  %v190_v23 = vld [vmem:[%s3006_s3 + $0x218] sm:$0xff]  ;;  %187 = vst [vmem:[%s3011_s4 + $0xa8] sm:$0xff] %v186_v21  ;;  %v192_v24 = vld [vmem:[%s3006_s3 + $0x240] sm:$0xff] }
  0x25   : > { %189 = vst [vmem:[%s3011_s4 + $0xb0] sm:$0xff] %v188_v22  ;;  %191 = vst [vmem:[%s3011_s4 + $0xb8] sm:$0xff] %v190_v23  ;;  %v194_v25 = vld [vmem:[%s3006_s3 + $0x248] sm:$0xff]  ;;  %v196_v26 = vld [vmem:[%s3006_s3 + $0x270] sm:$0xff] }
  0x26   : > { %193 = vst [vmem:[%s3011_s4 + $0xc0] sm:$0xff] %v192_v24  ;;  %195 = vst [vmem:[%s3011_s4 + $0xc8] sm:$0xff] %v194_v25  ;;  %v198_v27 = vld [vmem:[%s3006_s3 + $0x278] sm:$0xff]  ;;  %v200_v28 = vld [vmem:[%s3006_s3 + $0x2a0] sm:$0xff] }
  0x27   : > { %197 = vst [vmem:[%s3011_s4 + $0xd0] sm:$0xff] %v196_v26  ;;  %v202_v29 = vld [vmem:[%s3006_s3 + $0x2a8] sm:$0xff]  ;;  %199 = vst [vmem:[%s3011_s4 + $0xd8] sm:$0xff] %v198_v27  ;;  %v204_v30 = vld [vmem:[%s3006_s3 + $0x2d0] sm:$0xff] }
  0x28   : > { %201 = vst [vmem:[%s3011_s4 + $0xe0] sm:$0xff] %v200_v28  ;;  %203 = vst [vmem:[%s3011_s4 + $0xe8] sm:$0xff] %v202_v29  ;;  %v206_v31 = vld [vmem:[%s3006_s3 + $0x2d8] sm:$0xff]  ;;  %v208_v32 = vld [vmem:[%s3006_s3 + $0x300] sm:$0xff] }
  0x29   : > { %205 = vst [vmem:[%s3011_s4 + $0xf0] sm:$0xff] %v204_v30  ;;  %207 = vst [vmem:[%s3011_s4 + $0xf8] sm:$0xff] %v206_v31  ;;  %v210_v33 = vld [vmem:[%s3006_s3 + $0x308] sm:$0xff]  ;;  %v212_v34 = vld [vmem:[%s3006_s3 + $0x330] sm:$0xff] }
  0x2a   : > { %209 = vst [vmem:[%s3011_s4 + $0x100] sm:$0xff] %v208_v32  ;;  %v214_v35 = vld [vmem:[%s3006_s3 + $0x338] sm:$0xff]  ;;  %211 = vst [vmem:[%s3011_s4 + $0x108] sm:$0xff] %v210_v33  ;;  %v216_v36 = vld [vmem:[%s3006_s3 + $0x360] sm:$0xff] }
  0x2b   : > { %213 = vst [vmem:[%s3011_s4 + $0x110] sm:$0xff] %v212_v34  ;;  %215 = vst [vmem:[%s3011_s4 + $0x118] sm:$0xff] %v214_v35  ;;  %v218_v37 = vld [vmem:[%s3006_s3 + $0x368] sm:$0xff]  ;;  %v220_v38 = vld [vmem:[%s3006_s3 + $0x390] sm:$0xff] }
  0x2c   : > { %217 = vst [vmem:[%s3011_s4 + $0x120] sm:$0xff] %v216_v36  ;;  %219 = vst [vmem:[%s3011_s4 + $0x128] sm:$0xff] %v218_v37  ;;  %v222_v39 = vld [vmem:[%s3006_s3 + $0x398] sm:$0xff]  ;;  %v224_v40 = vld [vmem:[%s3006_s3 + $0x3c0] sm:$0xff] }
  0x2d   : > { %221 = vst [vmem:[%s3011_s4 + $0x130] sm:$0xff] %v220_v38  ;;  %v226_v41 = vld [vmem:[%s3006_s3 + $0x3c8] sm:$0xff]  ;;  %223 = vst [vmem:[%s3011_s4 + $0x138] sm:$0xff] %v222_v39  ;;  %v228_v42 = vld [vmem:[%s3006_s3 + $0x3f0] sm:$0xff] }
  0x2e   : > { %225 = vst [vmem:[%s3011_s4 + $0x140] sm:$0xff] %v224_v40  ;;  %227 = vst [vmem:[%s3011_s4 + $0x148] sm:$0xff] %v226_v41  ;;  %v230_v43 = vld [vmem:[%s3006_s3 + $0x3f8] sm:$0xff]  ;;  %v232_v44 = vld [vmem:[%s3006_s3 + $0x420] sm:$0xff] }
  0x2f   : > { %229 = vst [vmem:[%s3011_s4 + $0x150] sm:$0xff] %v228_v42  ;;  %231 = vst [vmem:[%s3011_s4 + $0x158] sm:$0xff] %v230_v43  ;;  %v234_v45 = vld [vmem:[%s3006_s3 + $0x428] sm:$0xff]  ;;  %v236_v46 = vld [vmem:[%s3006_s3 + $0x450] sm:$0xff] }
  0x30   : > { %233 = vst [vmem:[%s3011_s4 + $0x160] sm:$0xff] %v232_v44  ;;  %v238_v47 = vld [vmem:[%s3006_s3 + $0x458] sm:$0xff]  ;;  %235 = vst [vmem:[%s3011_s4 + $0x168] sm:$0xff] %v234_v45  ;;  %v240_v48 = vld [vmem:[%s3006_s3 + $0x480] sm:$0xff] }
  0x31   : > { %237 = vst [vmem:[%s3011_s4 + $0x170] sm:$0xff] %v236_v46  ;;  %239 = vst [vmem:[%s3011_s4 + $0x178] sm:$0xff] %v238_v47  ;;  %v242_v49 = vld [vmem:[%s3006_s3 + $0x488] sm:$0xff]  ;;  %v244_v50 = vld [vmem:[%s3006_s3 + $0x4b0] sm:$0xff] }
  0x32   : > { %241 = vst [vmem:[%s3011_s4 + $0x180] sm:$0xff] %v240_v48  ;;  %243 = vst [vmem:[%s3011_s4 + $0x188] sm:$0xff] %v242_v49  ;;  %v246_v51 = vld [vmem:[%s3006_s3 + $0x4b8] sm:$0xff]  ;;  %v248_v52 = vld [vmem:[%s3006_s3 + $0x4e0] sm:$0xff] }
  0x33   : > { %245 = vst [vmem:[%s3011_s4 + $0x190] sm:$0xff] %v244_v50  ;;  %v250_v53 = vld [vmem:[%s3006_s3 + $0x4e8] sm:$0xff]  ;;  %247 = vst [vmem:[%s3011_s4 + $0x198] sm:$0xff] %v246_v51  ;;  %v252_v54 = vld [vmem:[%s3006_s3 + $0x510] sm:$0xff] }
  0x34   : > { %249 = vst [vmem:[%s3011_s4 + $0x1a0] sm:$0xff] %v248_v52  ;;  %251 = vst [vmem:[%s3011_s4 + $0x1a8] sm:$0xff] %v250_v53  ;;  %v254_v55 = vld [vmem:[%s3006_s3 + $0x518] sm:$0xff]  ;;  %v256_v56 = vld [vmem:[%s3006_s3 + $0x540] sm:$0xff] }
  0x35   : > { %253 = vst [vmem:[%s3011_s4 + $0x1b0] sm:$0xff] %v252_v54  ;;  %255 = vst [vmem:[%s3011_s4 + $0x1b8] sm:$0xff] %v254_v55  ;;  %v258_v57 = vld [vmem:[%s3006_s3 + $0x548] sm:$0xff]  ;;  %v260_v58 = vld [vmem:[%s3006_s3 + $0x570] sm:$0xff] }
  0x36   : > { %257 = vst [vmem:[%s3011_s4 + $0x1c0] sm:$0xff] %v256_v56  ;;  %v262_v59 = vld [vmem:[%s3006_s3 + $0x578] sm:$0xff]  ;;  %259 = vst [vmem:[%s3011_s4 + $0x1c8] sm:$0xff] %v258_v57  ;;  %v264_v60 = vld [vmem:[%s3006_s3 + $0x5a0] sm:$0xff] }
  0x37   : > { %261 = vst [vmem:[%s3011_s4 + $0x1d0] sm:$0xff] %v260_v58  ;;  %263 = vst [vmem:[%s3011_s4 + $0x1d8] sm:$0xff] %v262_v59  ;;  %v266_v61 = vld [vmem:[%s3006_s3 + $0x5a8] sm:$0xff]  ;;  %v268_v62 = vld [vmem:[%s3006_s3 + $0x5d0] sm:$0xff] }
  0x38   : > { %265 = vst [vmem:[%s3011_s4 + $0x1e0] sm:$0xff] %v264_v60  ;;  %267 = vst [vmem:[%s3011_s4 + $0x1e8] sm:$0xff] %v266_v61  ;;  %v270_v63 = vld [vmem:[%s3006_s3 + $0x5d8] sm:$0xff]  ;;  %v272_v0 = vld [vmem:[%s3006_s3 + $0x600] sm:$0xff] }
  0x39   : > { %269 = vst [vmem:[%s3011_s4 + $0x1f0] sm:$0xff] %v268_v62  ;;  %v274_v1 = vld [vmem:[%s3006_s3 + $0x608] sm:$0xff]  ;;  %271 = vst [vmem:[%s3011_s4 + $0x1f8] sm:$0xff] %v270_v63  ;;  %v276_v2 = vld [vmem:[%s3006_s3 + $0x630] sm:$0xff] }
  0x3a   : > { %273 = vst [vmem:[%s3011_s4 + $0x200] sm:$0xff] %v272_v0  ;;  %275 = vst [vmem:[%s3011_s4 + $0x208] sm:$0xff] %v274_v1  ;;  %v278_v3 = vld [vmem:[%s3006_s3 + $0x638] sm:$0xff]  ;;  %v280_v4 = vld [vmem:[%s3006_s3 + $0x660] sm:$0xff] }
  0x3b   : > { %277 = vst [vmem:[%s3011_s4 + $0x210] sm:$0xff] %v276_v2  ;;  %279 = vst [vmem:[%s3011_s4 + $0x218] sm:$0xff] %v278_v3  ;;  %v282_v5 = vld [vmem:[%s3006_s3 + $0x668] sm:$0xff]  ;;  %v284_v6 = vld [vmem:[%s3006_s3 + $0x690] sm:$0xff] }
  0x3c   : > { %281 = vst [vmem:[%s3011_s4 + $0x220] sm:$0xff] %v280_v4  ;;  %v286_v7 = vld [vmem:[%s3006_s3 + $0x698] sm:$0xff]  ;;  %283 = vst [vmem:[%s3011_s4 + $0x228] sm:$0xff] %v282_v5  ;;  %v288_v8 = vld [vmem:[%s3006_s3 + $0x6c0] sm:$0xff] }
  0x3d   : > { %285 = vst [vmem:[%s3011_s4 + $0x230] sm:$0xff] %v284_v6  ;;  %287 = vst [vmem:[%s3011_s4 + $0x238] sm:$0xff] %v286_v7  ;;  %v290_v9 = vld [vmem:[%s3006_s3 + $0x6c8] sm:$0xff]  ;;  %v292_v10 = vld [vmem:[%s3006_s3 + $0x6f0] sm:$0xff] }
  0x3e   : > { %289 = vst [vmem:[%s3011_s4 + $0x240] sm:$0xff] %v288_v8  ;;  %291 = vst [vmem:[%s3011_s4 + $0x248] sm:$0xff] %v290_v9  ;;  %v294_v11 = vld [vmem:[%s3006_s3 + $0x6f8] sm:$0xff]  ;;  %v296_v12 = vld [vmem:[%s3006_s3 + $0x720] sm:$0xff] }
  0x3f   : > { %293 = vst [vmem:[%s3011_s4 + $0x250] sm:$0xff] %v292_v10  ;;  %v298_v13 = vld [vmem:[%s3006_s3 + $0x728] sm:$0xff]  ;;  %295 = vst [vmem:[%s3011_s4 + $0x258] sm:$0xff] %v294_v11  ;;  %v300_v14 = vld [vmem:[%s3006_s3 + $0x750] sm:$0xff] }
  0x40   : > { %297 = vst [vmem:[%s3011_s4 + $0x260] sm:$0xff] %v296_v12  ;;  %299 = vst [vmem:[%s3011_s4 + $0x268] sm:$0xff] %v298_v13  ;;  %v302_v15 = vld [vmem:[%s3006_s3 + $0x758] sm:$0xff]  ;;  %v304_v16 = vld [vmem:[%s3006_s3 + $0x780] sm:$0xff] }
  0x41   : > { %301 = vst [vmem:[%s3011_s4 + $0x270] sm:$0xff] %v300_v14  ;;  %303 = vst [vmem:[%s3011_s4 + $0x278] sm:$0xff] %v302_v15  ;;  %v306_v17 = vld [vmem:[%s3006_s3 + $0x788] sm:$0xff]  ;;  %v308_v18 = vld [vmem:[%s3006_s3 + $0x7b0] sm:$0xff] }
  0x42   : > { %305 = vst [vmem:[%s3011_s4 + $0x280] sm:$0xff] %v304_v16  ;;  %v310_v19 = vld [vmem:[%s3006_s3 + $0x7b8] sm:$0xff]  ;;  %307 = vst [vmem:[%s3011_s4 + $0x288] sm:$0xff] %v306_v17  ;;  %v312_v20 = vld [vmem:[%s3006_s3 + $0x7e0] sm:$0xff] }
  0x43   : > { %309 = vst [vmem:[%s3011_s4 + $0x290] sm:$0xff] %v308_v18  ;;  %311 = vst [vmem:[%s3011_s4 + $0x298] sm:$0xff] %v310_v19  ;;  %v314_v21 = vld [vmem:[%s3006_s3 + $0x7e8] sm:$0xff]  ;;  %v316_v22 = vld [vmem:[%s3006_s3 + $0x810] sm:$0xff] }
  0x44   : > { %313 = vst [vmem:[%s3011_s4 + $0x2a0] sm:$0xff] %v312_v20  ;;  %315 = vst [vmem:[%s3011_s4 + $0x2a8] sm:$0xff] %v314_v21  ;;  %v318_v23 = vld [vmem:[%s3006_s3 + $0x818] sm:$0xff]  ;;  %v320_v24 = vld [vmem:[%s3006_s3 + $0x840] sm:$0xff] }
  0x45   : > { %317 = vst [vmem:[%s3011_s4 + $0x2b0] sm:$0xff] %v316_v22  ;;  %v322_v25 = vld [vmem:[%s3006_s3 + $0x848] sm:$0xff]  ;;  %319 = vst [vmem:[%s3011_s4 + $0x2b8] sm:$0xff] %v318_v23  ;;  %v324_v26 = vld [vmem:[%s3006_s3 + $0x870] sm:$0xff] }
  0x46   : > { %321 = vst [vmem:[%s3011_s4 + $0x2c0] sm:$0xff] %v320_v24  ;;  %323 = vst [vmem:[%s3011_s4 + $0x2c8] sm:$0xff] %v322_v25  ;;  %v326_v27 = vld [vmem:[%s3006_s3 + $0x878] sm:$0xff]  ;;  %v328_v28 = vld [vmem:[%s3006_s3 + $0x8a0] sm:$0xff] }
  0x47   : > { %325 = vst [vmem:[%s3011_s4 + $0x2d0] sm:$0xff] %v324_v26  ;;  %327 = vst [vmem:[%s3011_s4 + $0x2d8] sm:$0xff] %v326_v27  ;;  %v330_v29 = vld [vmem:[%s3006_s3 + $0x8a8] sm:$0xff]  ;;  %v332_v30 = vld [vmem:[%s3006_s3 + $0x8d0] sm:$0xff] }
  0x48   : > { %329 = vst [vmem:[%s3011_s4 + $0x2e0] sm:$0xff] %v328_v28  ;;  %v334_v31 = vld [vmem:[%s3006_s3 + $0x8d8] sm:$0xff]  ;;  %331 = vst [vmem:[%s3011_s4 + $0x2e8] sm:$0xff] %v330_v29  ;;  %v336_v32 = vld [vmem:[%s3006_s3 + $0x900] sm:$0xff] }
  0x49   : > { %333 = vst [vmem:[%s3011_s4 + $0x2f0] sm:$0xff] %v332_v30  ;;  %335 = vst [vmem:[%s3011_s4 + $0x2f8] sm:$0xff] %v334_v31  ;;  %v338_v33 = vld [vmem:[%s3006_s3 + $0x908] sm:$0xff]  ;;  %v340_v34 = vld [vmem:[%s3006_s3 + $0x930] sm:$0xff] }
  0x4a   : > { %337 = vst [vmem:[%s3011_s4 + $0x300] sm:$0xff] %v336_v32  ;;  %339 = vst [vmem:[%s3011_s4 + $0x308] sm:$0xff] %v338_v33  ;;  %v342_v35 = vld [vmem:[%s3006_s3 + $0x938] sm:$0xff]  ;;  %v344_v36 = vld [vmem:[%s3006_s3 + $0x960] sm:$0xff] }
  0x4b   : > { %341 = vst [vmem:[%s3011_s4 + $0x310] sm:$0xff] %v340_v34  ;;  %v346_v37 = vld [vmem:[%s3006_s3 + $0x968] sm:$0xff]  ;;  %343 = vst [vmem:[%s3011_s4 + $0x318] sm:$0xff] %v342_v35  ;;  %v348_v38 = vld [vmem:[%s3006_s3 + $0x990] sm:$0xff] }
  0x4c   : > { %345 = vst [vmem:[%s3011_s4 + $0x320] sm:$0xff] %v344_v36  ;;  %347 = vst [vmem:[%s3011_s4 + $0x328] sm:$0xff] %v346_v37  ;;  %v350_v39 = vld [vmem:[%s3006_s3 + $0x998] sm:$0xff]  ;;  %v352_v40 = vld [vmem:[%s3006_s3 + $0x9c0] sm:$0xff] }
  0x4d   : > { %349 = vst [vmem:[%s3011_s4 + $0x330] sm:$0xff] %v348_v38  ;;  %351 = vst [vmem:[%s3011_s4 + $0x338] sm:$0xff] %v350_v39  ;;  %v354_v41 = vld [vmem:[%s3006_s3 + $0x9c8] sm:$0xff]  ;;  %v356_v42 = vld [vmem:[%s3006_s3 + $0x9f0] sm:$0xff] }
  0x4e   : > { %353 = vst [vmem:[%s3011_s4 + $0x340] sm:$0xff] %v352_v40  ;;  %v358_v43 = vld [vmem:[%s3006_s3 + $0x9f8] sm:$0xff]  ;;  %355 = vst [vmem:[%s3011_s4 + $0x348] sm:$0xff] %v354_v41  ;;  %v360_v44 = vld [vmem:[%s3006_s3 + $0xa20] sm:$0xff] }
  0x4f   : > { %357 = vst [vmem:[%s3011_s4 + $0x350] sm:$0xff] %v356_v42  ;;  %359 = vst [vmem:[%s3011_s4 + $0x358] sm:$0xff] %v358_v43  ;;  %v362_v45 = vld [vmem:[%s3006_s3 + $0xa28] sm:$0xff]  ;;  %v364_v46 = vld [vmem:[%s3006_s3 + $0xa50] sm:$0xff] }
  0x50   : > { %361 = vst [vmem:[%s3011_s4 + $0x360] sm:$0xff] %v360_v44  ;;  %363 = vst [vmem:[%s3011_s4 + $0x368] sm:$0xff] %v362_v45  ;;  %v366_v47 = vld [vmem:[%s3006_s3 + $0xa58] sm:$0xff]  ;;  %v368_v48 = vld [vmem:[%s3006_s3 + $0xa80] sm:$0xff] }
  0x51   : > { %365 = vst [vmem:[%s3011_s4 + $0x370] sm:$0xff] %v364_v46  ;;  %v370_v49 = vld [vmem:[%s3006_s3 + $0xa88] sm:$0xff]  ;;  %367 = vst [vmem:[%s3011_s4 + $0x378] sm:$0xff] %v366_v47  ;;  %v372_v50 = vld [vmem:[%s3006_s3 + $0xab0] sm:$0xff] }
  0x52   : > { %369 = vst [vmem:[%s3011_s4 + $0x380] sm:$0xff] %v368_v48  ;;  %371 = vst [vmem:[%s3011_s4 + $0x388] sm:$0xff] %v370_v49  ;;  %v374_v51 = vld [vmem:[%s3006_s3 + $0xab8] sm:$0xff]  ;;  %v376_v52 = vld [vmem:[%s3006_s3 + $0xae0] sm:$0xff] }
  0x53   : > { %373 = vst [vmem:[%s3011_s4 + $0x390] sm:$0xff] %v372_v50  ;;  %375 = vst [vmem:[%s3011_s4 + $0x398] sm:$0xff] %v374_v51  ;;  %v378_v53 = vld [vmem:[%s3006_s3 + $0xae8] sm:$0xff]  ;;  %v380_v54 = vld [vmem:[%s3006_s3 + $0xb10] sm:$0xff] }
  0x54   : > { %377 = vst [vmem:[%s3011_s4 + $0x3a0] sm:$0xff] %v376_v52  ;;  %v382_v55 = vld [vmem:[%s3006_s3 + $0xb18] sm:$0xff]  ;;  %379 = vst [vmem:[%s3011_s4 + $0x3a8] sm:$0xff] %v378_v53  ;;  %v384_v56 = vld [vmem:[%s3006_s3 + $0xb40] sm:$0xff] }
  0x55   : > { %381 = vst [vmem:[%s3011_s4 + $0x3b0] sm:$0xff] %v380_v54  ;;  %383 = vst [vmem:[%s3011_s4 + $0x3b8] sm:$0xff] %v382_v55  ;;  %v386_v57 = vld [vmem:[%s3006_s3 + $0xb48] sm:$0xff]  ;;  %v388_v58 = vld [vmem:[%s3006_s3 + $0xb70] sm:$0xff] }
  0x56   : > { %385 = vst [vmem:[%s3011_s4 + $0x3c0] sm:$0xff] %v384_v56  ;;  %387 = vst [vmem:[%s3011_s4 + $0x3c8] sm:$0xff] %v386_v57  ;;  %v390_v59 = vld [vmem:[%s3006_s3 + $0xb78] sm:$0xff]  ;;  %v392_v60 = vld [vmem:[%s3006_s3 + $0xba0] sm:$0xff] }
  0x57   : > { %389 = vst [vmem:[%s3011_s4 + $0x3d0] sm:$0xff] %v388_v58  ;;  %v394_v61 = vld [vmem:[%s3006_s3 + $0xba8] sm:$0xff]  ;;  %391 = vst [vmem:[%s3011_s4 + $0x3d8] sm:$0xff] %v390_v59  ;;  %v396_v62 = vld [vmem:[%s3006_s3 + $0xbd0] sm:$0xff] }
  0x58   : > { %393 = vst [vmem:[%s3011_s4 + $0x3e0] sm:$0xff] %v392_v60  ;;  %395 = vst [vmem:[%s3011_s4 + $0x3e8] sm:$0xff] %v394_v61  ;;  %v398_v63 = vld [vmem:[%s3006_s3 + $0xbd8] sm:$0xff] }
  0x59   : > { %397 = vst [vmem:[%s3011_s4 + $0x3f0] sm:$0xff] %v396_v62  ;;  %399 = vst [vmem:[%s3011_s4 + $0x3f8] sm:$0xff] %v398_v63 }
  0x5a PF: > { %p2421_p7 = scmp.ge.s32.totalorder %s2927_s15, 1  ;;  %p413_p8 = scmp.lt.s32.totalorder %s2927_s15, 10 }
  0x5c   : > { %p414_p9 = pnand %p2421_p7, %p413_p8 }
  0x5d   : > { %s420_s5 = sand.u32 (!%p414_p9), 1, %s2903_s9   ;;  %s2423_s6 = sshll.u32 (!%p414_p9), %s2911_s11, 6 }
  0x5e   : > { %417 = sbr.rel (%p414_p9) target bundleno = 668 (0x29c), region = 47  ;;  %s2422_s7 = sshll.u32 (!%p414_p9), %s420_s5, 10 }
  0x5f   : > { %p449_p10 = scmp.lt.s32.totalorder (!%p414_p9), %s2423_s6, 191  ;;  %s2425_s8 = sshll.u32 (!%p414_p9), %s2915_s12, 6 }
  0x60   : > { %p455_p11 = scmp.lt.s32.totalorder (!%p414_p9), %s2425_s8, 191  ;;  %s3281_s9 = scalar_lea.vmem (!%p414_p9), [#allocation2], %s2422_s7 }
  0x61   : > { %p2427_p12 = scmp.ne.s32.totalorder (!%p414_p9), %s2911_s11, 0 }
  0x65   : > { %s3769_s6 = smov (!%p449_p10, %s2423_s6), 191  ;;  %s3771_s8 = smov (!%p455_p11, %s2425_s8), 191 }
  0x66   : > { %s2424_s18 = sshll.u32 %s3769_s6, 2  ;;  %s2426_s23 = sshll.u32 %s3771_s8, 3  ;;  %v2929_v0 = vmov (!%p2427_p12), 0.0  }
  0x67   : > { %s3274_s21 = scalar_lea.vmem %s3754_s1, %s2424_s18  ;;  %s3279_s26 = scalar_lea.vmem %s3755_s2, %s2426_s23 }
  0x68   : > { %464 = sbr.rel (%p2427_p12) target bundleno = 136 (0x88), region = 55  ;;  %465 = vst [vmem:[%s3279_s26] sm:$0xff] (!%p2427_p12), %v2929_v0  ;;  %466 = vst [vmem:[%s3279_s26 + $0x8] sm:$0xff] (!%p2427_p12), %v2929_v0 }
  0x69   : > { %467 = vst [vmem:[%s3279_s26 + $0x10] sm:$0xff] (!%p2427_p12), %v2929_v0  ;;  %468 = vst [vmem:[%s3279_s26 + $0x18] sm:$0xff] (!%p2427_p12), %v2929_v0 }
  0x6a   : > { %469 = vst [vmem:[%s3279_s26 + $0x20] sm:$0xff] (!%p2427_p12), %v2929_v0  ;;  %470 = vst [vmem:[%s3279_s26 + $0x28] sm:$0xff] (!%p2427_p12), %v2929_v0 }
  0x6b   : > { %471 = vst [vmem:[%s3279_s26 + $0x30] sm:$0xff] (!%p2427_p12), %v2929_v0  ;;  %472 = vst [vmem:[%s3279_s26 + $0x38] sm:$0xff] (!%p2427_p12), %v2929_v0 }
  0x6c   : > { %473 = vst [vmem:[%s3279_s26 + $0x40] sm:$0xff] (!%p2427_p12), %v2929_v0  ;;  %474 = vst [vmem:[%s3279_s26 + $0x48] sm:$0xff] (!%p2427_p12), %v2929_v0 }
  0x6d   : > { %475 = vst [vmem:[%s3279_s26 + $0x50] sm:$0xff] (!%p2427_p12), %v2929_v0  ;;  %476 = vst [vmem:[%s3279_s26 + $0x58] sm:$0xff] (!%p2427_p12), %v2929_v0 }
  0x6e   : > { %477 = vst [vmem:[%s3279_s26 + $0x60] sm:$0xff] (!%p2427_p12), %v2929_v0  ;;  %478 = vst [vmem:[%s3279_s26 + $0x68] sm:$0xff] (!%p2427_p12), %v2929_v0 }
  0x6f   : > { %479 = vst [vmem:[%s3279_s26 + $0x70] sm:$0xff] %v2929_v0  ;;  %480 = vst [vmem:[%s3279_s26 + $0x78] sm:$0xff] %v2929_v0 }
  0x70   : > { %481 = vst [vmem:[%s3279_s26 + $0x80] sm:$0xff] %v2929_v0  ;;  %482 = vst [vmem:[%s3279_s26 + $0x88] sm:$0xff] %v2929_v0 }
  0x71   : > { %483 = vst [vmem:[%s3279_s26 + $0x90] sm:$0xff] %v2929_v0  ;;  %484 = vst [vmem:[%s3279_s26 + $0x98] sm:$0xff] %v2929_v0 }
  0x72   : > { %485 = vst [vmem:[%s3279_s26 + $0xa0] sm:$0xff] %v2929_v0  ;;  %486 = vst [vmem:[%s3279_s26 + $0xa8] sm:$0xff] %v2929_v0 }
  0x73   : > { %487 = vst [vmem:[%s3279_s26 + $0xb0] sm:$0xff] %v2929_v0  ;;  %488 = vst [vmem:[%s3279_s26 + $0xb8] sm:$0xff] %v2929_v0 }
  0x74   : > { %489 = vst [vmem:[%s3279_s26 + $0xc0] sm:$0xff] %v2929_v0  ;;  %490 = vst [vmem:[%s3279_s26 + $0xc8] sm:$0xff] %v2929_v0 }
  0x75   : > { %491 = vst [vmem:[%s3279_s26 + $0xd0] sm:$0xff] %v2929_v0  ;;  %492 = vst [vmem:[%s3279_s26 + $0xd8] sm:$0xff] %v2929_v0 }
  0x76   : > { %493 = vst [vmem:[%s3279_s26 + $0xe0] sm:$0xff] %v2929_v0  ;;  %494 = vst [vmem:[%s3279_s26 + $0xe8] sm:$0xff] %v2929_v0 }
  0x77   : > { %495 = vst [vmem:[%s3279_s26 + $0xf0] sm:$0xff] %v2929_v0  ;;  %496 = vst [vmem:[%s3279_s26 + $0xf8] sm:$0xff] %v2929_v0 }
  0x78   : > { %497 = vst [vmem:[%s3279_s26 + $0x100] sm:$0xff] %v2929_v0  ;;  %498 = vst [vmem:[%s3279_s26 + $0x108] sm:$0xff] %v2929_v0 }
  0x79   : > { %499 = vst [vmem:[%s3279_s26 + $0x110] sm:$0xff] %v2929_v0  ;;  %500 = vst [vmem:[%s3279_s26 + $0x118] sm:$0xff] %v2929_v0 }
  0x7a   : > { %501 = vst [vmem:[%s3279_s26 + $0x120] sm:$0xff] %v2929_v0  ;;  %502 = vst [vmem:[%s3279_s26 + $0x128] sm:$0xff] %v2929_v0 }
  0x7b   : > { %503 = vst [vmem:[%s3279_s26 + $0x130] sm:$0xff] %v2929_v0  ;;  %504 = vst [vmem:[%s3279_s26 + $0x138] sm:$0xff] %v2929_v0 }
  0x7c   : > { %505 = vst [vmem:[%s3279_s26 + $0x140] sm:$0xff] %v2929_v0  ;;  %506 = vst [vmem:[%s3279_s26 + $0x148] sm:$0xff] %v2929_v0 }
  0x7d   : > { %507 = vst [vmem:[%s3279_s26 + $0x150] sm:$0xff] %v2929_v0  ;;  %508 = vst [vmem:[%s3279_s26 + $0x158] sm:$0xff] %v2929_v0 }
  0x7e   : > { %509 = vst [vmem:[%s3279_s26 + $0x160] sm:$0xff] %v2929_v0  ;;  %510 = vst [vmem:[%s3279_s26 + $0x168] sm:$0xff] %v2929_v0 }
  0x7f   : > { %511 = vst [vmem:[%s3279_s26 + $0x170] sm:$0xff] %v2929_v0  ;;  %512 = vst [vmem:[%s3279_s26 + $0x178] sm:$0xff] %v2929_v0 }
  0x80   : > { %513 = vst [vmem:[%s3279_s26 + $0x180] sm:$0xff] %v2929_v0  ;;  %514 = vst [vmem:[%s3279_s26 + $0x188] sm:$0xff] %v2929_v0 }
  0x81   : > { %515 = vst [vmem:[%s3279_s26 + $0x190] sm:$0xff] %v2929_v0  ;;  %516 = vst [vmem:[%s3279_s26 + $0x198] sm:$0xff] %v2929_v0 }
  0x82   : > { %517 = vst [vmem:[%s3279_s26 + $0x1a0] sm:$0xff] %v2929_v0  ;;  %518 = vst [vmem:[%s3279_s26 + $0x1a8] sm:$0xff] %v2929_v0 }
  0x83   : > { %519 = vst [vmem:[%s3279_s26 + $0x1b0] sm:$0xff] %v2929_v0  ;;  %520 = vst [vmem:[%s3279_s26 + $0x1b8] sm:$0xff] %v2929_v0 }
  0x84   : > { %521 = vst [vmem:[%s3279_s26 + $0x1c0] sm:$0xff] %v2929_v0  ;;  %522 = vst [vmem:[%s3279_s26 + $0x1c8] sm:$0xff] %v2929_v0 }
  0x85   : > { %523 = vst [vmem:[%s3279_s26 + $0x1d0] sm:$0xff] %v2929_v0  ;;  %524 = vst [vmem:[%s3279_s26 + $0x1d8] sm:$0xff] %v2929_v0 }
  0x86   : > { %525 = vst [vmem:[%s3279_s26 + $0x1e0] sm:$0xff] %v2929_v0  ;;  %526 = vst [vmem:[%s3279_s26 + $0x1e8] sm:$0xff] %v2929_v0 }
  0x87   : > { %527 = vst [vmem:[%s3279_s26 + $0x1f0] sm:$0xff] %v2929_v0  ;;  %528 = vst [vmem:[%s3279_s26 + $0x1f8] sm:$0xff] %v2929_v0 }
  0x88 PF: > { %v2649_v1 = vld [vmem:[%s3274_s21] sm:$0xff]   ;;  %v2930_v2 = vmov 0   ;;  %v2651_v4 = vld [vmem:[%s3274_s21 + $0x8] sm:$0xff]   ;;  %v2653_v6 = vld [vmem:[%s3274_s21 + $0x10] sm:$0xff]  }
  0x89   : > { %1617 = vmatprep.subr.bf16.mxu0 %v2930_v2  ;;  %1906 = vmatprep.subr.bf16.mxu1 %v2930_v2  ;;  %v2650_v3 = vld [vmem:[%s3274_s21 + $0x80] sm:$0xff]   ;;  %v2652_v5 = vld [vmem:[%s3274_s21 + $0x88] sm:$0xff]   ;;  %v2654_v7 = vld [vmem:[%s3274_s21 + $0x90] sm:$0xff]  }
  0x8a   : > { %1618 = vmatpush1.bf16.msra.mxu0 %v2649_v1  ;;  %1907 = vmatpush1.bf16.msra.mxu1 %v2650_v3  ;;  %v2655_v8 = vld [vmem:[%s3274_s21 + $0x18] sm:$0xff]   ;;  %v2657_v10 = vld [vmem:[%s3274_s21 + $0x20] sm:$0xff]   ;;  %v2659_v12 = vld [vmem:[%s3274_s21 + $0x28] sm:$0xff]  }
  0x8b   : > { %1619 = vmatprep.subr.bf16.mxu0 %v2930_v2  ;;  %1908 = vmatprep.subr.bf16.mxu1 %v2930_v2  ;;  %v2656_v9 = vld [vmem:[%s3274_s21 + $0x98] sm:$0xff]   ;;  %v2658_v11 = vld [vmem:[%s3274_s21 + $0xa0] sm:$0xff]   ;;  %v2660_v13 = vld [vmem:[%s3274_s21 + $0xa8] sm:$0xff]  }
  0x8c   : > { %v2661_v14 = vld [vmem:[%s3274_s21 + $0x30] sm:$0xff]   ;;  %v2663_v16 = vld [vmem:[%s3274_s21 + $0x38] sm:$0xff]   ;;  %v2665_v18 = vld [vmem:[%s3274_s21 + $0x40] sm:$0xff]  }
  0x8d   : > { %v2662_v15 = vld [vmem:[%s3274_s21 + $0xb0] sm:$0xff]   ;;  %v2664_v17 = vld [vmem:[%s3274_s21 + $0xb8] sm:$0xff]   ;;  %v2666_v19 = vld [vmem:[%s3274_s21 + $0xc0] sm:$0xff]  }
  0x8e   : > { %1620 = vmatpush1.bf16.msra.mxu0 %v2651_v4  ;;  %1909 = vmatpush1.bf16.msra.mxu1 %v2652_v5  ;;  %v2683_v20 = vld [vmem:[%s3281_s9 + $0x4] ss:$16 sps:$4 sm:$0xff]   ;;  %v2667_v21 = vld [vmem:[%s3274_s21 + $0x48] sm:$0xff]   ;;  %v2671_v26 = vld [vmem:[%s3274_s21 + $0x58] sm:$0xff]  }
  0x8f   : > { %1621 = vmatprep.subr.bf16.mxu0 %v2930_v2  ;;  %1910 = vmatprep.subr.bf16.mxu1 %v2930_v2  ;;  %v2686_v22 = vld [vmem:[%s3281_s9 + $0xc] ss:$16 sps:$4 sm:$0xff]   ;;  %v2669_v24 = vld [vmem:[%s3274_s21 + $0x50] sm:$0xff]   ;;  %v2673_v28 = vld [vmem:[%s3274_s21 + $0x60] sm:$0xff]  }
  0x90   : > { %v2668_v23 = vld [vmem:[%s3274_s21 + $0xc8] sm:$0xff]   ;;  %1649 = vmatprep.mubr.bf16.mxu0 %v2683_v20  ;;  %1938 = vmatprep.mubr.bf16.mxu1 %v2686_v22  ;;  %v2670_v25 = vld [vmem:[%s3274_s21 + $0xd0] sm:$0xff]   ;;  %v2672_v27 = vld [vmem:[%s3274_s21 + $0xd8] sm:$0xff]  }
  0x91   : > { %v2674_v29 = vld [vmem:[%s3274_s21 + $0xe0] sm:$0xff]   ;;  %v2675_v30 = vld [vmem:[%s3274_s21 + $0x68] sm:$0xff]   ;;  %v2677_v32 = vld [vmem:[%s3274_s21 + $0x70] sm:$0xff]  }
  0x92   : > { %1622 = vmatpush1.bf16.msra.mxu0 %v2653_v6  ;;  %1911 = vmatpush1.bf16.msra.mxu1 %v2654_v7  ;;  %v2676_v31 = vld [vmem:[%s3274_s21 + $0xe8] sm:$0xff]   ;;  %v2678_v33 = vld [vmem:[%s3274_s21 + $0xf0] sm:$0xff]   ;;  %v2679_v34 = vld [vmem:[%s3274_s21 + $0x78] sm:$0xff]  }
  0x93   : > { %1623 = vmatprep.subr.bf16.mxu0 %v2930_v2  ;;  %1912 = vmatprep.subr.bf16.mxu1 %v2930_v2  ;;  %v2680_v35 = vld [vmem:[%s3274_s21 + $0xf8] sm:$0xff]   ;;  %v2681_v36 = vld [vmem:[%s3281_s9] ss:$16 sps:$4 sm:$0xff]   ;;  %v2687_v38 = vld [vmem:[%s3281_s9 + $0x24] ss:$16 sps:$4 sm:$0xff]  }
  0x94   : > { %v2684_v37 = vld [vmem:[%s3281_s9 + $0x8] ss:$16 sps:$4 sm:$0xff]   ;;  %v2689_v39 = vld [vmem:[%s3281_s9 + $0x2c] ss:$16 sps:$4 sm:$0xff]   ;;  %v2691_v40 = vld [vmem:[%s3281_s9 + $0x20] ss:$16 sps:$4 sm:$0xff]  }
  0x95   : > { %v2692_v41 = vld [vmem:[%s3281_s9 + $0x28] ss:$16 sps:$4 sm:$0xff]   ;;  %v2693_v42 = vld [vmem:[%s3281_s9 + $0x44] ss:$16 sps:$4 sm:$0xff]   ;;  %v2695_v43 = vld [vmem:[%s3281_s9 + $0x4c] ss:$16 sps:$4 sm:$0xff]  }
  0x96   : > { %1624 = vmatpush1.bf16.msra.mxu0 %v2655_v8  ;;  %1913 = vmatpush1.bf16.msra.mxu1 %v2656_v9  ;;  %v2697_v44 = vld [vmem:[%s3281_s9 + $0x40] ss:$16 sps:$4 sm:$0xff]   ;;  %v2698_v45 = vld [vmem:[%s3281_s9 + $0x48] ss:$16 sps:$4 sm:$0xff]   ;;  %v2699_v46 = vld [vmem:[%s3281_s9 + $0x64] ss:$16 sps:$4 sm:$0xff]  }
  0x97   : > { %1625 = vmatprep.subr.bf16.mxu0 %v2930_v2  ;;  %1914 = vmatprep.subr.bf16.mxu1 %v2930_v2  ;;  %v2701_v47 = vld [vmem:[%s3281_s9 + $0x6c] ss:$16 sps:$4 sm:$0xff]   ;;  %v2703_v48 = vld [vmem:[%s3281_s9 + $0x60] ss:$16 sps:$4 sm:$0xff]   ;;  %v2704_v49 = vld [vmem:[%s3281_s9 + $0x68] ss:$16 sps:$4 sm:$0xff]  }
  0x98   : > { %v2705_v50 = vld [vmem:[%s3281_s9 + $0x84] ss:$16 sps:$4 sm:$0xff]   ;;  %v2707_v51 = vld [vmem:[%s3281_s9 + $0x8c] ss:$16 sps:$4 sm:$0xff]   ;;  %v2709_v52 = vld [vmem:[%s3281_s9 + $0x80] ss:$16 sps:$4 sm:$0xff]  }
  0x99   : > { %v2710_v53 = vld [vmem:[%s3281_s9 + $0x88] ss:$16 sps:$4 sm:$0xff]   ;;  %v2711_v54 = vld [vmem:[%s3281_s9 + $0xa4] ss:$16 sps:$4 sm:$0xff]   ;;  %v2713_v55 = vld [vmem:[%s3281_s9 + $0xac] ss:$16 sps:$4 sm:$0xff]  }
  0x9a   : > { %1626 = vmatpush1.bf16.msra.mxu0 %v2657_v10  ;;  %1915 = vmatpush1.bf16.msra.mxu1 %v2658_v11  ;;  %v2715_v56 = vld [vmem:[%s3281_s9 + $0xa0] ss:$16 sps:$4 sm:$0xff]   ;;  %v2716_v57 = vld [vmem:[%s3281_s9 + $0xa8] ss:$16 sps:$4 sm:$0xff]   ;;  %v2717_v58 = vld [vmem:[%s3281_s9 + $0xc4] ss:$16 sps:$4 sm:$0xff]  }
  0x9b   : > { %1627 = vmatprep.subr.bf16.mxu0 %v2930_v2  ;;  %1916 = vmatprep.subr.bf16.mxu1 %v2930_v2  ;;  %v2719_v59 = vld [vmem:[%s3281_s9 + $0xcc] ss:$16 sps:$4 sm:$0xff]   ;;  %v2721_v60 = vld [vmem:[%s3281_s9 + $0xc0] ss:$16 sps:$4 sm:$0xff]   ;;  %v2722_v61 = vld [vmem:[%s3281_s9 + $0xc8] ss:$16 sps:$4 sm:$0xff]  }
  0x9c   : > { %v2723_v62 = vld [vmem:[%s3281_s9 + $0xe4] ss:$16 sps:$4 sm:$0xff]   ;;  %v2725_v63 = vld [vmem:[%s3281_s9 + $0xec] ss:$16 sps:$4 sm:$0xff]   ;;  %v2727_v0 = vld [vmem:[%s3281_s9 + $0xe0] ss:$16 sps:$4 sm:$0xff]  }
  0x9d   : > { %v2728_v1 = vld [vmem:[%s3281_s9 + $0xe8] ss:$16 sps:$4 sm:$0xff]   ;;  %v2731_v3 = vld [vmem:[%s3281_s9 + $0x10c] ss:$16 sps:$4 sm:$0xff]   ;;  %v2733_v4 = vld [vmem:[%s3281_s9 + $0x100] ss:$16 sps:$4 sm:$0xff]  }
  0x9e   : > { %1628 = vmatpush1.bf16.msra.mxu0 %v2659_v12  ;;  %1917 = vmatpush1.bf16.msra.mxu1 %v2660_v13  ;;  %v2734_v5 = vld [vmem:[%s3281_s9 + $0x108] ss:$16 sps:$4 sm:$0xff]   ;;  %v2735_v6 = vld [vmem:[%s3281_s9 + $0x124] ss:$16 sps:$4 sm:$0xff]   ;;  %v2737_v7 = vld [vmem:[%s3281_s9 + $0x12c] ss:$16 sps:$4 sm:$0xff]  }
  0x9f   : > { %1629 = vmatprep.subr.bf16.mxu0 %v2930_v2  ;;  %1918 = vmatprep.subr.bf16.mxu1 %v2930_v2  ;;  %v2739_v8 = vld [vmem:[%s3281_s9 + $0x120] ss:$16 sps:$4 sm:$0xff]   ;;  %v2740_v9 = vld [vmem:[%s3281_s9 + $0x128] ss:$16 sps:$4 sm:$0xff]   ;;  %v2741_v10 = vld [vmem:[%s3281_s9 + $0x144] ss:$16 sps:$4 sm:$0xff]  }
  0xa0   : > { %v2743_v11 = vld [vmem:[%s3281_s9 + $0x14c] ss:$16 sps:$4 sm:$0xff]   ;;  %v2745_v12 = vld [vmem:[%s3281_s9 + $0x140] ss:$16 sps:$4 sm:$0xff]   ;;  %v2746_v13 = vld [vmem:[%s3281_s9 + $0x148] ss:$16 sps:$4 sm:$0xff]  }
  0xa1   : > { %v2757_v20 = vld [vmem:[%s3281_s9 + $0x180] ss:$16 sps:$4 sm:$0xff]   ;;  %v2759_v22 = vld [vmem:[%s3281_s9 + $0x1a4] ss:$16 sps:$4 sm:$0xff]  }
  0xa2   : > { %1630 = vmatpush1.bf16.msra.mxu0 %v2661_v14  ;;  %1919 = vmatpush1.bf16.msra.mxu1 %v2662_v15  ;;  %v2747_v14 = vld [vmem:[%s3281_s9 + $0x164] ss:$16 sps:$4 sm:$0xff]   ;;  %v2749_v15 = vld [vmem:[%s3281_s9 + $0x16c] ss:$16 sps:$4 sm:$0xff]  }
  0xa3   : > { %1631 = vmatprep.subr.bf16.mxu0 %v2930_v2  ;;  %1920 = vmatprep.subr.bf16.mxu1 %v2930_v2 }
  0xa6   : > { %1632 = vmatpush1.bf16.msra.mxu0 %v2663_v16  ;;  %1921 = vmatpush1.bf16.msra.mxu1 %v2664_v17  ;;  %v2751_v16 = vld [vmem:[%s3281_s9 + $0x160] ss:$16 sps:$4 sm:$0xff]   ;;  %v2752_v17 = vld [vmem:[%s3281_s9 + $0x168] ss:$16 sps:$4 sm:$0xff]  }
  0xa7   : > { %1633 = vmatprep.subr.bf16.mxu0 %v2930_v2  ;;  %1922 = vmatprep.subr.bf16.mxu1 %v2930_v2 }
  0xaa   : > { %1634 = vmatpush1.bf16.msra.mxu0 %v2665_v18  ;;  %1923 = vmatpush1.bf16.msra.mxu1 %v2666_v19  ;;  %v2753_v18 = vld [vmem:[%s3281_s9 + $0x184] ss:$16 sps:$4 sm:$0xff]   ;;  %v2755_v19 = vld [vmem:[%s3281_s9 + $0x18c] ss:$16 sps:$4 sm:$0xff]  }
  0xab   : > { %1635 = vmatprep.subr.bf16.mxu0 %v2930_v2  ;;  %1924 = vmatprep.subr.bf16.mxu1 %v2930_v2 }
  0xae   : > { %1636 = vmatpush1.bf16.msra.mxu0 %v2667_v21  ;;  %1925 = vmatpush1.bf16.msra.mxu1 %v2668_v23  ;;  %v2758_v21 = vld [vmem:[%s3281_s9 + $0x188] ss:$16 sps:$4 sm:$0xff]   ;;  %v2761_v23 = vld [vmem:[%s3281_s9 + $0x1ac] ss:$16 sps:$4 sm:$0xff]  }
  0xaf   : > { %1637 = vmatprep.subr.bf16.mxu0 %v2930_v2  ;;  %1926 = vmatprep.subr.bf16.mxu1 %v2930_v2 }
  0xb2   : > { %1638 = vmatpush1.bf16.msra.mxu0 %v2669_v24  ;;  %1927 = vmatpush1.bf16.msra.mxu1 %v2670_v25  ;;  %v2763_v24 = vld [vmem:[%s3281_s9 + $0x1a0] ss:$16 sps:$4 sm:$0xff]   ;;  %v2764_v25 = vld [vmem:[%s3281_s9 + $0x1a8] ss:$16 sps:$4 sm:$0xff]  }
  0xb3   : > { %1639 = vmatprep.subr.bf16.mxu0 %v2930_v2  ;;  %1928 = vmatprep.subr.bf16.mxu1 %v2930_v2 }
  0xb6   : > { %1640 = vmatpush1.bf16.msra.mxu0 %v2671_v26  ;;  %1929 = vmatpush1.bf16.msra.mxu1 %v2672_v27  ;;  %v2765_v26 = vld [vmem:[%s3281_s9 + $0x1c4] ss:$16 sps:$4 sm:$0xff]   ;;  %v2767_v27 = vld [vmem:[%s3281_s9 + $0x1cc] ss:$16 sps:$4 sm:$0xff]  }
  0xb7   : > { %1641 = vmatprep.subr.bf16.mxu0 %v2930_v2  ;;  %1930 = vmatprep.subr.bf16.mxu1 %v2930_v2 }
  0xba   : > { %1642 = vmatpush1.bf16.msra.mxu0 %v2673_v28  ;;  %1931 = vmatpush1.bf16.msra.mxu1 %v2674_v29  ;;  %v2769_v28 = vld [vmem:[%s3281_s9 + $0x1c0] ss:$16 sps:$4 sm:$0xff]   ;;  %v2770_v29 = vld [vmem:[%s3281_s9 + $0x1c8] ss:$16 sps:$4 sm:$0xff]  }
  0xbb   : > { %1643 = vmatprep.subr.bf16.mxu0 %v2930_v2  ;;  %1932 = vmatprep.subr.bf16.mxu1 %v2930_v2 }
  0xbe   : > { %1644 = vmatpush1.bf16.msra.mxu0 %v2675_v30  ;;  %1933 = vmatpush1.bf16.msra.mxu1 %v2676_v31  ;;  %v2771_v30 = vld [vmem:[%s3281_s9 + $0x1e4] ss:$16 sps:$4 sm:$0xff]   ;;  %v2773_v31 = vld [vmem:[%s3281_s9 + $0x1ec] ss:$16 sps:$4 sm:$0xff]  }
  0xbf   : > { %1645 = vmatprep.subr.bf16.mxu0 %v2930_v2  ;;  %1934 = vmatprep.subr.bf16.mxu1 %v2930_v2 }
  0xc2   : > { %1646 = vmatpush1.bf16.msra.mxu0 %v2677_v32  ;;  %1935 = vmatpush1.bf16.msra.mxu1 %v2678_v33  ;;  %v2775_v32 = vld [vmem:[%s3281_s9 + $0x1e0] ss:$16 sps:$4 sm:$0xff]   ;;  %v2776_v33 = vld [vmem:[%s3281_s9 + $0x1e8] ss:$16 sps:$4 sm:$0xff]  }
  0xc3   : > { %1647 = vmatprep.subr.bf16.mxu0 %v2930_v2  ;;  %1936 = vmatprep.subr.bf16.mxu1 %v2930_v2  ;;  %v2729_v2 = vld [vmem:[%s3281_s9 + $0x104] ss:$16 sps:$4 sm:$0xff]  }
  0xc6   : > { %1648 = vmatpush1.bf16.msra.mxu0 %v2679_v34  ;;  %1937 = vmatpush1.bf16.msra.mxu1 %v2680_v35  ;;  %v2777_v34 = vld [vmem:[%s3281_s9 + $0x204] ss:$16 sps:$4 sm:$0xff]   ;;  %v2779_v35 = vld [vmem:[%s3281_s9 + $0x20c] ss:$16 sps:$4 sm:$0xff]  }
  0xc9   : > { %1650 = vmatmul.mubr.bf16.vlgmr.msra.gmra.mrb[0].mxu0 %v2681_v36  ;;  %1939 = vmatmul.mubr.bf16.vlgmr.msra.gmra.mrb[0].mxu1 %v2684_v37  ;;  %v2781_v36 = vld [vmem:[%s3281_s9 + $0x200] ss:$16 sps:$4 sm:$0xff]   ;;  %v2782_v37 = vld [vmem:[%s3281_s9 + $0x208] ss:$16 sps:$4 sm:$0xff]  }
  0xca   : > { %1657 = vmatprep.mubr.bf16.mxu0 %v2687_v38  ;;  %1946 = vmatprep.mubr.bf16.mxu1 %v2689_v39  ;;  %v2783_v38 = vld [vmem:[%s3281_s9 + $0x224] ss:$16 sps:$4 sm:$0xff]   ;;  %v2785_v39 = vld [vmem:[%s3281_s9 + $0x22c] ss:$16 sps:$4 sm:$0xff]  }
  0xd1   : > { %1658 = vmatmul.mubr.bf16.gmra.mrb[4].mxu0 %v2691_v40  ;;  %1947 = vmatmul.mubr.bf16.gmra.mrb[4].mxu1 %v2692_v41  ;;  %v2787_v40 = vld [vmem:[%s3281_s9 + $0x220] ss:$16 sps:$4 sm:$0xff]   ;;  %v2788_v41 = vld [vmem:[%s3281_s9 + $0x228] ss:$16 sps:$4 sm:$0xff]  }
  0xd2   : > { %1665 = vmatprep.mubr.bf16.mxu0 %v2693_v42  ;;  %1954 = vmatprep.mubr.bf16.mxu1 %v2695_v43  ;;  %v2789_v42 = vld [vmem:[%s3281_s9 + $0x244] ss:$16 sps:$4 sm:$0xff]   ;;  %v2791_v43 = vld [vmem:[%s3281_s9 + $0x24c] ss:$16 sps:$4 sm:$0xff]  }
  0xd9   : > { %1666 = vmatmul.mubr.bf16.gmra.mrb[8].mxu0 %v2697_v44  ;;  %1955 = vmatmul.mubr.bf16.gmra.mrb[8].mxu1 %v2698_v45  ;;  %v2793_v44 = vld [vmem:[%s3281_s9 + $0x240] ss:$16 sps:$4 sm:$0xff]   ;;  %v2794_v45 = vld [vmem:[%s3281_s9 + $0x248] ss:$16 sps:$4 sm:$0xff]  }
  0xda   : > { %1673 = vmatprep.mubr.bf16.mxu0 %v2699_v46  ;;  %1962 = vmatprep.mubr.bf16.mxu1 %v2701_v47  ;;  %v2795_v46 = vld [vmem:[%s3281_s9 + $0x264] ss:$16 sps:$4 sm:$0xff]   ;;  %v2797_v47 = vld [vmem:[%s3281_s9 + $0x26c] ss:$16 sps:$4 sm:$0xff]  }
  0xe1   : > { %1674 = vmatmul.mubr.bf16.gmra.mrb[12].mxu0 %v2703_v48  ;;  %1963 = vmatmul.mubr.bf16.gmra.mrb[12].mxu1 %v2704_v49  ;;  %v2799_v48 = vld [vmem:[%s3281_s9 + $0x260] ss:$16 sps:$4 sm:$0xff]   ;;  %v2800_v49 = vld [vmem:[%s3281_s9 + $0x268] ss:$16 sps:$4 sm:$0xff]  }
  0xe2   : > { %1681 = vmatprep.mubr.bf16.mxu0 %v2705_v50  ;;  %1970 = vmatprep.mubr.bf16.mxu1 %v2707_v51  ;;  %v2801_v50 = vld [vmem:[%s3281_s9 + $0x284] ss:$16 sps:$4 sm:$0xff]   ;;  %v2803_v51 = vld [vmem:[%s3281_s9 + $0x28c] ss:$16 sps:$4 sm:$0xff]  }
  0xe9   : > { %1682 = vmatmul.mubr.bf16.gmra.mrb[16].mxu0 %v2709_v52  ;;  %1971 = vmatmul.mubr.bf16.gmra.mrb[16].mxu1 %v2710_v53  ;;  %v2805_v52 = vld [vmem:[%s3281_s9 + $0x280] ss:$16 sps:$4 sm:$0xff]   ;;  %v2806_v53 = vld [vmem:[%s3281_s9 + $0x288] ss:$16 sps:$4 sm:$0xff]  }
  0xea   : > { %1689 = vmatprep.mubr.bf16.mxu0 %v2711_v54  ;;  %1978 = vmatprep.mubr.bf16.mxu1 %v2713_v55  ;;  %v2807_v54 = vld [vmem:[%s3281_s9 + $0x2a4] ss:$16 sps:$4 sm:$0xff]   ;;  %v2809_v55 = vld [vmem:[%s3281_s9 + $0x2ac] ss:$16 sps:$4 sm:$0xff]  }
  0xf1   : > { %1690 = vmatmul.mubr.bf16.gmra.mrb[20].mxu0 %v2715_v56  ;;  %1979 = vmatmul.mubr.bf16.gmra.mrb[20].mxu1 %v2716_v57  ;;  %v2811_v56 = vld [vmem:[%s3281_s9 + $0x2a0] ss:$16 sps:$4 sm:$0xff]   ;;  %v2812_v57 = vld [vmem:[%s3281_s9 + $0x2a8] ss:$16 sps:$4 sm:$0xff]  }
  0xf2   : > { %1697 = vmatprep.mubr.bf16.mxu0 %v2717_v58  ;;  %1986 = vmatprep.mubr.bf16.mxu1 %v2719_v59  ;;  %v2813_v58 = vld [vmem:[%s3281_s9 + $0x2c4] ss:$16 sps:$4 sm:$0xff]   ;;  %v2815_v59 = vld [vmem:[%s3281_s9 + $0x2cc] ss:$16 sps:$4 sm:$0xff]  }
  0xf9   : > { %1698 = vmatmul.mubr.bf16.gmra.mrb[24].mxu0 %v2721_v60  ;;  %1987 = vmatmul.mubr.bf16.gmra.mrb[24].mxu1 %v2722_v61  ;;  %v2817_v60 = vld [vmem:[%s3281_s9 + $0x2c0] ss:$16 sps:$4 sm:$0xff]   ;;  %v2818_v61 = vld [vmem:[%s3281_s9 + $0x2c8] ss:$16 sps:$4 sm:$0xff]  }
  0xfa   : > { %1705 = vmatprep.mubr.bf16.mxu0 %v2723_v62  ;;  %1994 = vmatprep.mubr.bf16.mxu1 %v2725_v63  ;;  %v2819_v62 = vld [vmem:[%s3281_s9 + $0x2e4] ss:$16 sps:$4 sm:$0xff]   ;;  %v2821_v63 = vld [vmem:[%s3281_s9 + $0x2ec] ss:$16 sps:$4 sm:$0xff]  }
 0x101   : > { %1706 = vmatmul.mubr.bf16.gmra.mrb[28].mxu0 %v2727_v0  ;;  %1995 = vmatmul.mubr.bf16.gmra.mrb[28].mxu1 %v2728_v1  ;;  %v2823_v0 = vld [vmem:[%s3281_s9 + $0x2e0] ss:$16 sps:$4 sm:$0xff]   ;;  %v2824_v1 = vld [vmem:[%s3281_s9 + $0x2e8] ss:$16 sps:$4 sm:$0xff]  }
 0x102   : > { %1713 = vmatprep.mubr.bf16.mxu0 %v2729_v2  ;;  %2002 = vmatprep.mubr.bf16.mxu1 %v2731_v3  ;;  %v2825_v2 = vld [vmem:[%s3281_s9 + $0x304] ss:$16 sps:$4 sm:$0xff]   ;;  %v2827_v3 = vld [vmem:[%s3281_s9 + $0x30c] ss:$16 sps:$4 sm:$0xff]  }
 0x109   : > { %1714 = vmatmul.mubr.bf16.gmra.mrb[32].mxu0 %v2733_v4  ;;  %2003 = vmatmul.mubr.bf16.gmra.mrb[32].mxu1 %v2734_v5  ;;  %v2829_v4 = vld [vmem:[%s3281_s9 + $0x300] ss:$16 sps:$4 sm:$0xff]   ;;  %v2830_v5 = vld [vmem:[%s3281_s9 + $0x308] ss:$16 sps:$4 sm:$0xff]  }
 0x10a   : > { %1721 = vmatprep.mubr.bf16.mxu0 %v2735_v6  ;;  %2010 = vmatprep.mubr.bf16.mxu1 %v2737_v7  ;;  %v2831_v6 = vld [vmem:[%s3281_s9 + $0x324] ss:$16 sps:$4 sm:$0xff]   ;;  %v2833_v7 = vld [vmem:[%s3281_s9 + $0x32c] ss:$16 sps:$4 sm:$0xff]  }
 0x111   : > { %1722 = vmatmul.mubr.bf16.gmra.mrb[36].mxu0 %v2739_v8  ;;  %2011 = vmatmul.mubr.bf16.gmra.mrb[36].mxu1 %v2740_v9  ;;  %v2835_v8 = vld [vmem:[%s3281_s9 + $0x320] ss:$16 sps:$4 sm:$0xff]   ;;  %v2836_v9 = vld [vmem:[%s3281_s9 + $0x328] ss:$16 sps:$4 sm:$0xff]  }
 0x112   : > { %1729 = vmatprep.mubr.bf16.mxu0 %v2741_v10  ;;  %2018 = vmatprep.mubr.bf16.mxu1 %v2743_v11  ;;  %v2837_v10 = vld [vmem:[%s3281_s9 + $0x344] ss:$16 sps:$4 sm:$0xff]   ;;  %v2839_v11 = vld [vmem:[%s3281_s9 + $0x34c] ss:$16 sps:$4 sm:$0xff]  }
 0x119   : > { %1730 = vmatmul.mubr.bf16.gmra.mrb[40].mxu0 %v2745_v12  ;;  %2019 = vmatmul.mubr.bf16.gmra.mrb[40].mxu1 %v2746_v13  ;;  %v2841_v12 = vld [vmem:[%s3281_s9 + $0x340] ss:$16 sps:$4 sm:$0xff]   ;;  %v2842_v13 = vld [vmem:[%s3281_s9 + $0x348] ss:$16 sps:$4 sm:$0xff]  }
 0x11a   : > { %1737 = vmatprep.mubr.bf16.mxu0 %v2747_v14  ;;  %2026 = vmatprep.mubr.bf16.mxu1 %v2749_v15  ;;  %v2843_v14 = vld [vmem:[%s3281_s9 + $0x364] ss:$16 sps:$4 sm:$0xff]   ;;  %v2845_v15 = vld [vmem:[%s3281_s9 + $0x36c] ss:$16 sps:$4 sm:$0xff]  }
 0x121   : > { %1738 = vmatmul.mubr.bf16.gmra.mrb[44].mxu0 %v2751_v16  ;;  %2027 = vmatmul.mubr.bf16.gmra.mrb[44].mxu1 %v2752_v17  ;;  %v529_v17 = vld [vmem:[%s3279_s26] sm:$0xff] }
 0x122   : > { %1745 = vmatprep.mubr.bf16.mxu0 %v2753_v18  ;;  %2034 = vmatprep.mubr.bf16.mxu1 %v2755_v19 }
 0x129   : > { %1746 = vmatmul.mubr.bf16.gmra.mrb[48].mxu0 %v2757_v20  ;;  %2035 = vmatmul.mubr.bf16.gmra.mrb[48].mxu1 %v2758_v21  ;;  %v2847_v20 = vld [vmem:[%s3281_s9 + $0x360] ss:$16 sps:$4 sm:$0xff]  }
 0x12a   : > { %1753 = vmatprep.mubr.bf16.mxu0 %v2759_v22  ;;  %2042 = vmatprep.mubr.bf16.mxu1 %v2761_v23 }
 0x131   : > { %1754 = vmatmul.mubr.bf16.gmra.mrb[52].mxu0 %v2763_v24  ;;  %2043 = vmatmul.mubr.bf16.gmra.mrb[52].mxu1 %v2764_v25  ;;  %v2848_v24 = vld [vmem:[%s3281_s9 + $0x368] ss:$16 sps:$4 sm:$0xff]   ;;  %v2849_v25 = vld [vmem:[%s3281_s9 + $0x384] ss:$16 sps:$4 sm:$0xff]  }
 0x132   : > { %1761 = vmatprep.mubr.bf16.mxu0 %v2765_v26  ;;  %2050 = vmatprep.mubr.bf16.mxu1 %v2767_v27  ;;  %v530_v26 = vld [vmem:[%s3279_s26 + $0x8] sm:$0xff] }
 0x139   : > { %1762 = vmatmul.mubr.bf16.gmra.mrb[56].mxu0 %v2769_v28  ;;  %2051 = vmatmul.mubr.bf16.gmra.mrb[56].mxu1 %v2770_v29  ;;  %v2851_v29 = vld [vmem:[%s3281_s9 + $0x38c] ss:$16 sps:$4 sm:$0xff]  }
 0x13a   : > { %1769 = vmatprep.mubr.bf16.mxu0 %v2771_v30  ;;  %2058 = vmatprep.mubr.bf16.mxu1 %v2773_v31 }
 0x141   : > { %1770 = vmatmul.mubr.bf16.gmra.mrb[60].mxu0 %v2775_v32  ;;  %2059 = vmatmul.mubr.bf16.gmra.mrb[60].mxu1 %v2776_v33 }
 0x142   : > { %1777 = vmatprep.mubr.bf16.mxu0 %v2777_v34  ;;  %2066 = vmatprep.mubr.bf16.mxu1 %v2779_v35  ;;  %v531_v35 = vld [vmem:[%s3279_s26 + $0x10] sm:$0xff] }
 0x149   : > { %1778 = vmatmul.mubr.bf16.gmra.mrb[64].mxu0 %v2781_v36  ;;  %2067 = vmatmul.mubr.bf16.gmra.mrb[64].mxu1 %v2782_v37 }
 0x14a   : > { %1785 = vmatprep.mubr.bf16.mxu0 %v2783_v38  ;;  %2074 = vmatprep.mubr.bf16.mxu1 %v2785_v39  ;;  %v2853_v38 = vld [vmem:[%s3281_s9 + $0x380] ss:$16 sps:$4 sm:$0xff]  }
 0x151   : > { %1786 = vmatmul.mubr.bf16.gmra.mrb[68].mxu0 %v2787_v40  ;;  %2075 = vmatmul.mubr.bf16.gmra.mrb[68].mxu1 %v2788_v41 }
 0x152   : > { %1793 = vmatprep.mubr.bf16.mxu0 %v2789_v42  ;;  %2082 = vmatprep.mubr.bf16.mxu1 %v2791_v43  ;;  %v2854_v42 = vld [vmem:[%s3281_s9 + $0x388] ss:$16 sps:$4 sm:$0xff]   ;;  %v2855_v43 = vld [vmem:[%s3281_s9 + $0x3a4] ss:$16 sps:$4 sm:$0xff]  }
 0x159   : > { %1794 = vmatmul.mubr.bf16.gmra.mrb[72].mxu0 %v2793_v44  ;;  %2083 = vmatmul.mubr.bf16.gmra.mrb[72].mxu1 %v2794_v45  ;;  %v532_v44 = vld [vmem:[%s3279_s26 + $0x18] sm:$0xff] }
 0x15a   : > { %1801 = vmatprep.mubr.bf16.mxu0 %v2795_v46  ;;  %2090 = vmatprep.mubr.bf16.mxu1 %v2797_v47  ;;  %v2857_v47 = vld [vmem:[%s3281_s9 + $0x3ac] ss:$16 sps:$4 sm:$0xff]  }
 0x161   : > { %1802 = vmatmul.mubr.bf16.gmra.mrb[76].mxu0 %v2799_v48  ;;  %2091 = vmatmul.mubr.bf16.gmra.mrb[76].mxu1 %v2800_v49 }
 0x162   : > { %1809 = vmatprep.mubr.bf16.mxu0 %v2801_v50  ;;  %2098 = vmatprep.mubr.bf16.mxu1 %v2803_v51 }
 0x169   : > { %1810 = vmatmul.mubr.bf16.gmra.mrb[80].mxu0 %v2805_v52  ;;  %2099 = vmatmul.mubr.bf16.gmra.mrb[80].mxu1 %v2806_v53  ;;  %v533_v53 = vld [vmem:[%s3279_s26 + $0x20] sm:$0xff] }
 0x16a   : > { %1817 = vmatprep.mubr.bf16.mxu0 %v2807_v54  ;;  %2106 = vmatprep.mubr.bf16.mxu1 %v2809_v55 }
 0x171   : > { %1818 = vmatmul.mubr.bf16.gmra.mrb[84].mxu0 %v2811_v56  ;;  %2107 = vmatmul.mubr.bf16.gmra.mrb[84].mxu1 %v2812_v57  ;;  %v2859_v56 = vld [vmem:[%s3281_s9 + $0x3a0] ss:$16 sps:$4 sm:$0xff]  }
 0x172   : > { %1825 = vmatprep.mubr.bf16.mxu0 %v2813_v58  ;;  %2114 = vmatprep.mubr.bf16.mxu1 %v2815_v59 }
 0x179   : > { %1826 = vmatmul.mubr.bf16.gmra.mrb[88].mxu0 %v2817_v60  ;;  %2115 = vmatmul.mubr.bf16.gmra.mrb[88].mxu1 %v2818_v61  ;;  %v2860_v60 = vld [vmem:[%s3281_s9 + $0x3a8] ss:$16 sps:$4 sm:$0xff]   ;;  %v2861_v61 = vld [vmem:[%s3281_s9 + $0x3c4] ss:$16 sps:$4 sm:$0xff]  }
 0x17a   : > { %1833 = vmatprep.mubr.bf16.mxu0 %v2819_v62  ;;  %2122 = vmatprep.mubr.bf16.mxu1 %v2821_v63  ;;  %v534_v62 = vld [vmem:[%s3279_s26 + $0x28] sm:$0xff] }
 0x181   : > { %1834 = vmatmul.mubr.bf16.gmra.mrb[92].mxu0 %v2823_v0  ;;  %2123 = vmatmul.mubr.bf16.gmra.mrb[92].mxu1 %v2824_v1  ;;  %v2863_v1 = vld [vmem:[%s3281_s9 + $0x3cc] ss:$16 sps:$4 sm:$0xff]  }
 0x182   : > { %1841 = vmatprep.mubr.bf16.mxu0 %v2825_v2  ;;  %2130 = vmatprep.mubr.bf16.mxu1 %v2827_v3 }
 0x189   : > { %1842 = vmatmul.mubr.bf16.gmra.mrb[96].mxu0 %v2829_v4  ;;  %2131 = vmatmul.mubr.bf16.gmra.mrb[96].mxu1 %v2830_v5 }
 0x18a   : > { %1849 = vmatprep.mubr.bf16.mxu0 %v2831_v6  ;;  %2138 = vmatprep.mubr.bf16.mxu1 %v2833_v7  ;;  %v535_v7 = vld [vmem:[%s3279_s26 + $0x30] sm:$0xff] }
 0x191   : > { %1850 = vmatmul.mubr.bf16.gmra.mrb[100].mxu0 %v2835_v8  ;;  %2139 = vmatmul.mubr.bf16.gmra.mrb[100].mxu1 %v2836_v9 }
 0x192   : > { %1857 = vmatprep.mubr.bf16.mxu0 %v2837_v10  ;;  %2146 = vmatprep.mubr.bf16.mxu1 %v2839_v11  ;;  %v2865_v10 = vld [vmem:[%s3281_s9 + $0x3c0] ss:$16 sps:$4 sm:$0xff]  }
 0x199   : > { %1858 = vmatmul.mubr.bf16.gmra.mrb[104].mxu0 %v2841_v12  ;;  %2147 = vmatmul.mubr.bf16.gmra.mrb[104].mxu1 %v2842_v13 }
 0x19a   : > { %1865 = vmatprep.mubr.bf16.mxu0 %v2843_v14  ;;  %2154 = vmatprep.mubr.bf16.mxu1 %v2845_v15  ;;  %v2866_v14 = vld [vmem:[%s3281_s9 + $0x3c8] ss:$16 sps:$4 sm:$0xff]   ;;  %v2867_v15 = vld [vmem:[%s3281_s9 + $0x3e4] ss:$16 sps:$4 sm:$0xff]  }
 0x19c   : > { %v1651_v16 = vpop.f32.mrb[0].mxu0  ;;  %v1940_v18 = vpop.f32.mrb[0].mxu1 }
 0x19d   : > { %v1653_v19 = vpop.f32.mrb[1].mxu0  ;;  %v1941_v21 = vadd.f32 %v1940_v18, %v1651_v16  ;;  %v1942_v22 = vpop.f32.mrb[1].mxu1  ;;  %v536_v16 = vld [vmem:[%s3279_s26 + $0x38] sm:$0xff] }
 0x19e   : > { %v1654_v23 = vpop.f32.mrb[2].mxu0  ;;  %v1943_v27 = vpop.f32.mrb[2].mxu1  ;;  %v2869_v19 = vld [vmem:[%s3281_s9 + $0x3ec] ss:$16 sps:$4 sm:$0xff]  }
 0x19f   : > { %v1656_v28 = vpop.f32.mrb[3].mxu0  ;;  %v2195_v30 = vadd.f32 %v1941_v21, %v529_v17  ;;  %v1944_v31 = vadd.f32 %v1943_v27, %v1654_v23  ;;  %v1945_v32 = vpop.f32.mrb[3].mxu1 }
 0x1a0   : > { %v2871_v28 = vld [vmem:[%s3281_s9 + $0x3e0] ss:$16 sps:$4 sm:$0xff]   ;;  %v2872_v32 = vld [vmem:[%s3281_s9 + $0x3e8] ss:$16 sps:$4 sm:$0xff]  }
 0x1a1   : > { %1866 = vmatmul.mubr.bf16.gmra.mrb[108].mxu0 %v2847_v20  ;;  %2259 = vst [vmem:[%s3279_s26] sm:$0xff] %v2195_v30  ;;  %v2196_v33 = vadd.f32 %v1944_v31, %v530_v26  ;;  %2155 = vmatmul.mubr.bf16.gmra.mrb[108].mxu1 %v2848_v24 }
 0x1a2   : > { %1873 = vmatprep.mubr.bf16.mxu0 %v2849_v25  ;;  %2162 = vmatprep.mubr.bf16.mxu1 %v2851_v29  ;;  %v537_v25 = vld [vmem:[%s3279_s26 + $0x40] sm:$0xff] }
 0x1a3   : > { %2260 = vst [vmem:[%s3279_s26 + $0x8] sm:$0xff] %v2196_v33  ;;  %v538_v33 = vld [vmem:[%s3279_s26 + $0x48] sm:$0xff] }
 0x1a4   : > { %v1659_v34 = vpop.f32.mrb[4].mxu0  ;;  %v1948_v36 = vpop.f32.mrb[4].mxu1 }
 0x1a5   : > { %v1661_v37 = vpop.f32.mrb[5].mxu0  ;;  %v1949_v39 = vadd.f32 %v1948_v36, %v1659_v34  ;;  %v1950_v40 = vpop.f32.mrb[5].mxu1 }
 0x1a6   : > { %v1662_v41 = vpop.f32.mrb[6].mxu0  ;;  %v1951_v45 = vpop.f32.mrb[6].mxu1 }
 0x1a7   : > { %v1664_v46 = vpop.f32.mrb[7].mxu0  ;;  %v2197_v48 = vadd.f32 %v1949_v39, %v531_v35  ;;  %v1952_v49 = vadd.f32 %v1951_v45, %v1662_v41  ;;  %v1953_v50 = vpop.f32.mrb[7].mxu1  ;;  %v539_v41 = vld [vmem:[%s3279_s26 + $0x50] sm:$0xff] }
 0x1a9   : > { %1874 = vmatmul.mubr.bf16.gmra.mrb[112].mxu0 %v2853_v38  ;;  %2261 = vst [vmem:[%s3279_s26 + $0x10] sm:$0xff] %v2197_v48  ;;  %v2198_v51 = vadd.f32 %v1952_v49, %v532_v44  ;;  %2163 = vmatmul.mubr.bf16.gmra.mrb[112].mxu1 %v2854_v42 }
 0x1aa   : > { %1881 = vmatprep.mubr.bf16.mxu0 %v2855_v43  ;;  %2170 = vmatprep.mubr.bf16.mxu1 %v2857_v47  ;;  %v540_v47 = vld [vmem:[%s3279_s26 + $0x58] sm:$0xff] }
 0x1ab   : > { %2262 = vst [vmem:[%s3279_s26 + $0x18] sm:$0xff] %v2198_v51 }
 0x1ac   : > { %v1667_v52 = vpop.f32.mrb[8].mxu0  ;;  %v1956_v54 = vpop.f32.mrb[8].mxu1 }
 0x1ad   : > { %v1669_v55 = vpop.f32.mrb[9].mxu0  ;;  %v1957_v57 = vadd.f32 %v1956_v54, %v1667_v52  ;;  %v1958_v58 = vpop.f32.mrb[9].mxu1 }
 0x1ae   : > { %v1670_v59 = vpop.f32.mrb[10].mxu0  ;;  %v1959_v63 = vpop.f32.mrb[10].mxu1  ;;  %v541_v55 = vld [vmem:[%s3279_s26 + $0x60] sm:$0xff] }
 0x1af   : > { %v1672_v0 = vpop.f32.mrb[11].mxu0  ;;  %v2199_v2 = vadd.f32 %v1957_v57, %v533_v53  ;;  %v1960_v3 = vadd.f32 %v1959_v63, %v1670_v59  ;;  %v1961_v4 = vpop.f32.mrb[11].mxu1 }
 0x1b1   : > { %1882 = vmatmul.mubr.bf16.gmra.mrb[116].mxu0 %v2859_v56  ;;  %2263 = vst [vmem:[%s3279_s26 + $0x20] sm:$0xff] %v2199_v2  ;;  %v2200_v5 = vadd.f32 %v1960_v3, %v534_v62  ;;  %2171 = vmatmul.mubr.bf16.gmra.mrb[116].mxu1 %v2860_v60 }
 0x1b2   : > { %1889 = vmatprep.mubr.bf16.mxu0 %v2861_v61  ;;  %2178 = vmatprep.mubr.bf16.mxu1 %v2863_v1  ;;  %v542_v61 = vld [vmem:[%s3279_s26 + $0x68] sm:$0xff] }
 0x1b3   : > { %2264 = vst [vmem:[%s3279_s26 + $0x28] sm:$0xff] %v2200_v5  ;;  %v543_v5 = vld [vmem:[%s3279_s26 + $0x70] sm:$0xff] }
 0x1b4   : > { %v1675_v6 = vpop.f32.mrb[12].mxu0  ;;  %v1964_v8 = vpop.f32.mrb[12].mxu1 }
 0x1b5   : > { %v1677_v9 = vpop.f32.mrb[13].mxu0  ;;  %v1965_v11 = vadd.f32 %v1964_v8, %v1675_v6  ;;  %v1966_v12 = vpop.f32.mrb[13].mxu1 }
 0x1b6   : > { %v1678_v13 = vpop.f32.mrb[14].mxu0  ;;  %v1967_v17 = vpop.f32.mrb[14].mxu1 }
 0x1b7   : > { %v1680_v18 = vpop.f32.mrb[15].mxu0  ;;  %v2201_v20 = vadd.f32 %v1965_v11, %v535_v7  ;;  %v1968_v21 = vadd.f32 %v1967_v17, %v1678_v13  ;;  %v1969_v22 = vpop.f32.mrb[15].mxu1  ;;  %v544_v11 = vld [vmem:[%s3279_s26 + $0x78] sm:$0xff] }
 0x1b9   : > { %1890 = vmatmul.mubr.bf16.gmra.mrb[120].mxu0 %v2865_v10  ;;  %2265 = vst [vmem:[%s3279_s26 + $0x30] sm:$0xff] %v2201_v20  ;;  %v2202_v23 = vadd.f32 %v1968_v21, %v536_v16  ;;  %2179 = vmatmul.mubr.bf16.gmra.mrb[120].mxu1 %v2866_v14 }
 0x1ba   : > { %1897 = vmatprep.mubr.bf16.mxu0 %v2867_v15  ;;  %2186 = vmatprep.mubr.bf16.mxu1 %v2869_v19  ;;  %v545_v19 = vld [vmem:[%s3279_s26 + $0x80] sm:$0xff] }
 0x1bb   : > { %2266 = vst [vmem:[%s3279_s26 + $0x38] sm:$0xff] %v2202_v23 }
 0x1bc   : > { %v1683_v24 = vpop.f32.mrb[16].mxu0  ;;  %v1972_v26 = vpop.f32.mrb[16].mxu1 }
 0x1bd   : > { %v1685_v27 = vpop.f32.mrb[17].mxu0  ;;  %v1973_v29 = vadd.f32 %v1972_v26, %v1683_v24  ;;  %v1974_v30 = vpop.f32.mrb[17].mxu1 }
 0x1be   : > { %v1686_v31 = vpop.f32.mrb[18].mxu0  ;;  %v1975_v34 = vpop.f32.mrb[18].mxu1 }
 0x1bf   : > { %v1688_v35 = vpop.f32.mrb[19].mxu0  ;;  %v2203_v36 = vadd.f32 %v1973_v29, %v537_v25  ;;  %v1976_v37 = vadd.f32 %v1975_v34, %v1686_v31  ;;  %v1977_v38 = vpop.f32.mrb[19].mxu1  ;;  %v546_v25 = vld [vmem:[%s3279_s26 + $0x88] sm:$0xff] }
 0x1c1   : > { %1898 = vmatmul.mubr.bf16.gmra.mrb[124].mxu0 %v2871_v28  ;;  %2267 = vst [vmem:[%s3279_s26 + $0x40] sm:$0xff] %v2203_v36  ;;  %v2204_v39 = vadd.f32 %v1976_v37, %v538_v33  ;;  %2187 = vmatmul.mubr.bf16.gmra.mrb[124].mxu1 %v2872_v32  ;;  %v547_v33 = vld [vmem:[%s3279_s26 + $0x90] sm:$0xff] }
 0x1c3   : > { %2268 = vst [vmem:[%s3279_s26 + $0x48] sm:$0xff] %v2204_v39  ;;  %v548_v39 = vld [vmem:[%s3279_s26 + $0x98] sm:$0xff] }
 0x1c4   : > { %v1691_v40 = vpop.f32.mrb[20].mxu0  ;;  %v1980_v42 = vpop.f32.mrb[20].mxu1 }
 0x1c5   : > { %v1693_v43 = vpop.f32.mrb[21].mxu0  ;;  %v1981_v44 = vadd.f32 %v1980_v42, %v1691_v40  ;;  %v1982_v45 = vpop.f32.mrb[21].mxu1 }
 0x1c6   : > { %v1694_v46 = vpop.f32.mrb[22].mxu0  ;;  %v1983_v48 = vpop.f32.mrb[22].mxu1 }
 0x1c7   : > { %v1696_v49 = vpop.f32.mrb[23].mxu0  ;;  %v2205_v50 = vadd.f32 %v1981_v44, %v539_v41  ;;  %v1984_v51 = vadd.f32 %v1983_v48, %v1694_v46  ;;  %v1985_v52 = vpop.f32.mrb[23].mxu1 }
 0x1c9   : > { %2269 = vst [vmem:[%s3279_s26 + $0x50] sm:$0xff] %v2205_v50  ;;  %v2206_v53 = vadd.f32 %v1984_v51, %v540_v47  ;;  %v549_v47 = vld [vmem:[%s3279_s26 + $0xa0] sm:$0xff] }
 0x1cb   : > { %2270 = vst [vmem:[%s3279_s26 + $0x58] sm:$0xff] %v2206_v53  ;;  %v550_v53 = vld [vmem:[%s3279_s26 + $0xa8] sm:$0xff] }
 0x1cc   : > { %v1699_v54 = vpop.f32.mrb[24].mxu0  ;;  %v1988_v56 = vpop.f32.mrb[24].mxu1 }
 0x1cd   : > { %v1701_v57 = vpop.f32.mrb[25].mxu0  ;;  %v1989_v58 = vadd.f32 %v1988_v56, %v1699_v54  ;;  %v1990_v59 = vpop.f32.mrb[25].mxu1 }
 0x1ce   : > { %v1702_v60 = vpop.f32.mrb[26].mxu0  ;;  %v1991_v62 = vpop.f32.mrb[26].mxu1 }
 0x1cf   : > { %v1704_v63 = vpop.f32.mrb[27].mxu0  ;;  %v2207_v0 = vadd.f32 %v1989_v58, %v541_v55  ;;  %v1992_v1 = vadd.f32 %v1991_v62, %v1702_v60  ;;  %v1993_v2 = vpop.f32.mrb[27].mxu1 }
 0x1d1   : > { %2271 = vst [vmem:[%s3279_s26 + $0x60] sm:$0xff] %v2207_v0  ;;  %v2208_v3 = vadd.f32 %v1992_v1, %v542_v61  ;;  %v551_v61 = vld [vmem:[%s3279_s26 + $0xb0] sm:$0xff] }
 0x1d3   : > { %2272 = vst [vmem:[%s3279_s26 + $0x68] sm:$0xff] %v2208_v3  ;;  %v552_v3 = vld [vmem:[%s3279_s26 + $0xb8] sm:$0xff] }
 0x1d4   : > { %v1707_v4 = vpop.f32.mrb[28].mxu0  ;;  %v1996_v6 = vpop.f32.mrb[28].mxu1 }
 0x1d5   : > { %v1709_v7 = vpop.f32.mrb[29].mxu0  ;;  %v1997_v8 = vadd.f32 %v1996_v6, %v1707_v4  ;;  %v1998_v9 = vpop.f32.mrb[29].mxu1 }
 0x1d6   : > { %v1710_v10 = vpop.f32.mrb[30].mxu0  ;;  %v1999_v12 = vpop.f32.mrb[30].mxu1 }
 0x1d7   : > { %v1712_v13 = vpop.f32.mrb[31].mxu0  ;;  %v2209_v14 = vadd.f32 %v1997_v8, %v543_v5  ;;  %v2000_v15 = vadd.f32 %v1999_v12, %v1710_v10  ;;  %v2001_v16 = vpop.f32.mrb[31].mxu1 }
 0x1d9   : > { %2273 = vst [vmem:[%s3279_s26 + $0x70] sm:$0xff] %v2209_v14  ;;  %v2210_v17 = vadd.f32 %v2000_v15, %v544_v11  ;;  %v553_v11 = vld [vmem:[%s3279_s26 + $0xc0] sm:$0xff] }
 0x1db   : > { %2274 = vst [vmem:[%s3279_s26 + $0x78] sm:$0xff] %v2210_v17  ;;  %v554_v17 = vld [vmem:[%s3279_s26 + $0xc8] sm:$0xff] }
 0x1dc   : > { %v1715_v18 = vpop.f32.mrb[32].mxu0  ;;  %v2004_v20 = vpop.f32.mrb[32].mxu1 }
 0x1dd   : > { %v1717_v21 = vpop.f32.mrb[33].mxu0  ;;  %v2005_v22 = vadd.f32 %v2004_v20, %v1715_v18  ;;  %v2006_v23 = vpop.f32.mrb[33].mxu1 }
 0x1de   : > { %v1718_v24 = vpop.f32.mrb[34].mxu0  ;;  %v2007_v26 = vpop.f32.mrb[34].mxu1 }
 0x1df   : > { %v1720_v27 = vpop.f32.mrb[35].mxu0  ;;  %v2211_v28 = vadd.f32 %v2005_v22, %v545_v19  ;;  %v2008_v29 = vadd.f32 %v2007_v26, %v1718_v24  ;;  %v2009_v30 = vpop.f32.mrb[35].mxu1 }
 0x1e1   : > { %2275 = vst [vmem:[%s3279_s26 + $0x80] sm:$0xff] %v2211_v28  ;;  %v2212_v31 = vadd.f32 %v2008_v29, %v546_v25  ;;  %v555_v25 = vld [vmem:[%s3279_s26 + $0xd0] sm:$0xff] }
 0x1e3   : > { %2276 = vst [vmem:[%s3279_s26 + $0x88] sm:$0xff] %v2212_v31  ;;  %v556_v31 = vld [vmem:[%s3279_s26 + $0xd8] sm:$0xff] }
 0x1e4   : > { %v1723_v32 = vpop.f32.mrb[36].mxu0  ;;  %v2012_v34 = vpop.f32.mrb[36].mxu1 }
 0x1e5   : > { %v1725_v35 = vpop.f32.mrb[37].mxu0  ;;  %v2013_v36 = vadd.f32 %v2012_v34, %v1723_v32  ;;  %v2014_v37 = vpop.f32.mrb[37].mxu1 }
 0x1e6   : > { %v1726_v38 = vpop.f32.mrb[38].mxu0  ;;  %v2015_v40 = vpop.f32.mrb[38].mxu1 }
 0x1e7   : > { %v1728_v41 = vpop.f32.mrb[39].mxu0  ;;  %v2213_v42 = vadd.f32 %v2013_v36, %v547_v33  ;;  %v2016_v43 = vadd.f32 %v2015_v40, %v1726_v38  ;;  %v2017_v44 = vpop.f32.mrb[39].mxu1 }
 0x1e9   : > { %2277 = vst [vmem:[%s3279_s26 + $0x90] sm:$0xff] %v2213_v42  ;;  %v2214_v45 = vadd.f32 %v2016_v43, %v548_v39  ;;  %v557_v39 = vld [vmem:[%s3279_s26 + $0xe0] sm:$0xff] }
 0x1eb   : > { %2278 = vst [vmem:[%s3279_s26 + $0x98] sm:$0xff] %v2214_v45  ;;  %v558_v45 = vld [vmem:[%s3279_s26 + $0xe8] sm:$0xff] }
 0x1ec   : > { %v1731_v46 = vpop.f32.mrb[40].mxu0  ;;  %v2020_v48 = vpop.f32.mrb[40].mxu1 }
 0x1ed   : > { %v1733_v49 = vpop.f32.mrb[41].mxu0  ;;  %v2021_v50 = vadd.f32 %v2020_v48, %v1731_v46  ;;  %v2022_v51 = vpop.f32.mrb[41].mxu1 }
 0x1ee   : > { %v1734_v52 = vpop.f32.mrb[42].mxu0  ;;  %v2023_v54 = vpop.f32.mrb[42].mxu1 }
 0x1ef   : > { %v1736_v55 = vpop.f32.mrb[43].mxu0  ;;  %v2215_v56 = vadd.f32 %v2021_v50, %v549_v47  ;;  %v2024_v57 = vadd.f32 %v2023_v54, %v1734_v52  ;;  %v2025_v58 = vpop.f32.mrb[43].mxu1 }
 0x1f1   : > { %2279 = vst [vmem:[%s3279_s26 + $0xa0] sm:$0xff] %v2215_v56  ;;  %v2216_v59 = vadd.f32 %v2024_v57, %v550_v53  ;;  %v559_v53 = vld [vmem:[%s3279_s26 + $0xf0] sm:$0xff] }
 0x1f3   : > { %2280 = vst [vmem:[%s3279_s26 + $0xa8] sm:$0xff] %v2216_v59  ;;  %v560_v59 = vld [vmem:[%s3279_s26 + $0xf8] sm:$0xff] }
 0x1f4   : > { %v1739_v60 = vpop.f32.mrb[44].mxu0  ;;  %v2028_v62 = vpop.f32.mrb[44].mxu1 }
 0x1f5   : > { %v1741_v63 = vpop.f32.mrb[45].mxu0  ;;  %v2029_v0 = vadd.f32 %v2028_v62, %v1739_v60  ;;  %v2030_v1 = vpop.f32.mrb[45].mxu1 }
 0x1f6   : > { %v1742_v2 = vpop.f32.mrb[46].mxu0  ;;  %v2031_v4 = vpop.f32.mrb[46].mxu1 }
 0x1f7   : > { %v1744_v5 = vpop.f32.mrb[47].mxu0  ;;  %v2217_v6 = vadd.f32 %v2029_v0, %v551_v61  ;;  %v2032_v7 = vadd.f32 %v2031_v4, %v1742_v2  ;;  %v2033_v8 = vpop.f32.mrb[47].mxu1 }
 0x1f9   : > { %2281 = vst [vmem:[%s3279_s26 + $0xb0] sm:$0xff] %v2217_v6  ;;  %v2218_v9 = vadd.f32 %v2032_v7, %v552_v3  ;;  %v561_v3 = vld [vmem:[%s3279_s26 + $0x100] sm:$0xff] }
 0x1fb   : > { %2282 = vst [vmem:[%s3279_s26 + $0xb8] sm:$0xff] %v2218_v9  ;;  %v562_v9 = vld [vmem:[%s3279_s26 + $0x108] sm:$0xff] }
 0x1fc   : > { %v1747_v10 = vpop.f32.mrb[48].mxu0  ;;  %v2036_v12 = vpop.f32.mrb[48].mxu1 }
 0x1fd   : > { %v1749_v13 = vpop.f32.mrb[49].mxu0  ;;  %v2037_v14 = vadd.f32 %v2036_v12, %v1747_v10  ;;  %v2038_v15 = vpop.f32.mrb[49].mxu1 }
 0x1fe   : > { %v1750_v16 = vpop.f32.mrb[50].mxu0  ;;  %v2039_v18 = vpop.f32.mrb[50].mxu1 }
 0x1ff   : > { %v1752_v19 = vpop.f32.mrb[51].mxu0  ;;  %v2219_v20 = vadd.f32 %v2037_v14, %v553_v11  ;;  %v2040_v21 = vadd.f32 %v2039_v18, %v1750_v16  ;;  %v2041_v22 = vpop.f32.mrb[51].mxu1 }
 0x201   : > { %2283 = vst [vmem:[%s3279_s26 + $0xc0] sm:$0xff] %v2219_v20  ;;  %v2220_v23 = vadd.f32 %v2040_v21, %v554_v17  ;;  %v563_v17 = vld [vmem:[%s3279_s26 + $0x110] sm:$0xff] }
 0x203   : > { %2284 = vst [vmem:[%s3279_s26 + $0xc8] sm:$0xff] %v2220_v23  ;;  %v564_v23 = vld [vmem:[%s3279_s26 + $0x118] sm:$0xff] }
 0x204   : > { %v1755_v24 = vpop.f32.mrb[52].mxu0  ;;  %v2044_v26 = vpop.f32.mrb[52].mxu1 }
 0x205   : > { %v1757_v27 = vpop.f32.mrb[53].mxu0  ;;  %v2045_v28 = vadd.f32 %v2044_v26, %v1755_v24  ;;  %v2046_v29 = vpop.f32.mrb[53].mxu1 }
 0x206   : > { %v1758_v30 = vpop.f32.mrb[54].mxu0  ;;  %v2047_v32 = vpop.f32.mrb[54].mxu1 }
 0x207   : > { %v1760_v33 = vpop.f32.mrb[55].mxu0  ;;  %v2221_v34 = vadd.f32 %v2045_v28, %v555_v25  ;;  %v2048_v35 = vadd.f32 %v2047_v32, %v1758_v30  ;;  %v2049_v36 = vpop.f32.mrb[55].mxu1 }
 0x209   : > { %2285 = vst [vmem:[%s3279_s26 + $0xd0] sm:$0xff] %v2221_v34  ;;  %v2222_v37 = vadd.f32 %v2048_v35, %v556_v31  ;;  %v565_v31 = vld [vmem:[%s3279_s26 + $0x120] sm:$0xff] }
 0x20b   : > { %2286 = vst [vmem:[%s3279_s26 + $0xd8] sm:$0xff] %v2222_v37  ;;  %v566_v37 = vld [vmem:[%s3279_s26 + $0x128] sm:$0xff] }
 0x20c   : > { %v1763_v38 = vpop.f32.mrb[56].mxu0  ;;  %v2052_v40 = vpop.f32.mrb[56].mxu1 }
 0x20d   : > { %v1765_v41 = vpop.f32.mrb[57].mxu0  ;;  %v2053_v42 = vadd.f32 %v2052_v40, %v1763_v38  ;;  %v2054_v43 = vpop.f32.mrb[57].mxu1 }
 0x20e   : > { %v1766_v44 = vpop.f32.mrb[58].mxu0  ;;  %v2055_v46 = vpop.f32.mrb[58].mxu1 }
 0x20f   : > { %v1768_v47 = vpop.f32.mrb[59].mxu0  ;;  %v2223_v48 = vadd.f32 %v2053_v42, %v557_v39  ;;  %v2056_v49 = vadd.f32 %v2055_v46, %v1766_v44  ;;  %v2057_v50 = vpop.f32.mrb[59].mxu1 }
 0x211   : > { %2287 = vst [vmem:[%s3279_s26 + $0xe0] sm:$0xff] %v2223_v48  ;;  %v2224_v51 = vadd.f32 %v2056_v49, %v558_v45  ;;  %v567_v45 = vld [vmem:[%s3279_s26 + $0x130] sm:$0xff] }
 0x213   : > { %2288 = vst [vmem:[%s3279_s26 + $0xe8] sm:$0xff] %v2224_v51  ;;  %v568_v51 = vld [vmem:[%s3279_s26 + $0x138] sm:$0xff] }
 0x214   : > { %v1771_v52 = vpop.f32.mrb[60].mxu0  ;;  %v2060_v54 = vpop.f32.mrb[60].mxu1 }
 0x215   : > { %v1773_v55 = vpop.f32.mrb[61].mxu0  ;;  %v2061_v56 = vadd.f32 %v2060_v54, %v1771_v52  ;;  %v2062_v57 = vpop.f32.mrb[61].mxu1 }
 0x216   : > { %v1774_v58 = vpop.f32.mrb[62].mxu0  ;;  %v2063_v60 = vpop.f32.mrb[62].mxu1 }
 0x217   : > { %v1776_v61 = vpop.f32.mrb[63].mxu0  ;;  %v2225_v62 = vadd.f32 %v2061_v56, %v559_v53  ;;  %v2064_v63 = vadd.f32 %v2063_v60, %v1774_v58  ;;  %v2065_v0 = vpop.f32.mrb[63].mxu1 }
 0x219   : > { %2289 = vst [vmem:[%s3279_s26 + $0xf0] sm:$0xff] %v2225_v62  ;;  %v2226_v1 = vadd.f32 %v2064_v63, %v560_v59  ;;  %v569_v59 = vld [vmem:[%s3279_s26 + $0x140] sm:$0xff] }
 0x21b   : > { %2290 = vst [vmem:[%s3279_s26 + $0xf8] sm:$0xff] %v2226_v1  ;;  %v570_v1 = vld [vmem:[%s3279_s26 + $0x148] sm:$0xff] }
 0x21c   : > { %v1779_v2 = vpop.f32.mrb[64].mxu0  ;;  %v2068_v4 = vpop.f32.mrb[64].mxu1 }
 0x21d   : > { %v1781_v5 = vpop.f32.mrb[65].mxu0  ;;  %v2069_v6 = vadd.f32 %v2068_v4, %v1779_v2  ;;  %v2070_v7 = vpop.f32.mrb[65].mxu1 }
 0x21e   : > { %v1782_v8 = vpop.f32.mrb[66].mxu0  ;;  %v2071_v10 = vpop.f32.mrb[66].mxu1 }
 0x21f   : > { %v1784_v11 = vpop.f32.mrb[67].mxu0  ;;  %v2227_v12 = vadd.f32 %v2069_v6, %v561_v3  ;;  %v2072_v13 = vadd.f32 %v2071_v10, %v1782_v8  ;;  %v2073_v14 = vpop.f32.mrb[67].mxu1 }
 0x221   : > { %2291 = vst [vmem:[%s3279_s26 + $0x100] sm:$0xff] %v2227_v12  ;;  %v2228_v15 = vadd.f32 %v2072_v13, %v562_v9  ;;  %v571_v9 = vld [vmem:[%s3279_s26 + $0x150] sm:$0xff] }
 0x223   : > { %2292 = vst [vmem:[%s3279_s26 + $0x108] sm:$0xff] %v2228_v15  ;;  %v572_v15 = vld [vmem:[%s3279_s26 + $0x158] sm:$0xff] }
 0x224   : > { %v1787_v16 = vpop.f32.mrb[68].mxu0  ;;  %v2076_v18 = vpop.f32.mrb[68].mxu1 }
 0x225   : > { %v1789_v19 = vpop.f32.mrb[69].mxu0  ;;  %v2077_v20 = vadd.f32 %v2076_v18, %v1787_v16  ;;  %v2078_v21 = vpop.f32.mrb[69].mxu1 }
 0x226   : > { %v1790_v22 = vpop.f32.mrb[70].mxu0  ;;  %v2079_v24 = vpop.f32.mrb[70].mxu1 }
 0x227   : > { %v1792_v25 = vpop.f32.mrb[71].mxu0  ;;  %v2229_v26 = vadd.f32 %v2077_v20, %v563_v17  ;;  %v2080_v27 = vadd.f32 %v2079_v24, %v1790_v22  ;;  %v2081_v28 = vpop.f32.mrb[71].mxu1 }
 0x229   : > { %2293 = vst [vmem:[%s3279_s26 + $0x110] sm:$0xff] %v2229_v26  ;;  %v2230_v29 = vadd.f32 %v2080_v27, %v564_v23  ;;  %v573_v23 = vld [vmem:[%s3279_s26 + $0x160] sm:$0xff] }
 0x22b   : > { %2294 = vst [vmem:[%s3279_s26 + $0x118] sm:$0xff] %v2230_v29  ;;  %v574_v29 = vld [vmem:[%s3279_s26 + $0x168] sm:$0xff] }
 0x22c   : > { %v1795_v30 = vpop.f32.mrb[72].mxu0  ;;  %v2084_v32 = vpop.f32.mrb[72].mxu1 }
 0x22d   : > { %v1797_v33 = vpop.f32.mrb[73].mxu0  ;;  %v2085_v34 = vadd.f32 %v2084_v32, %v1795_v30  ;;  %v2086_v35 = vpop.f32.mrb[73].mxu1 }
 0x22e   : > { %v1798_v36 = vpop.f32.mrb[74].mxu0  ;;  %v2087_v38 = vpop.f32.mrb[74].mxu1 }
 0x22f   : > { %v1800_v39 = vpop.f32.mrb[75].mxu0  ;;  %v2231_v40 = vadd.f32 %v2085_v34, %v565_v31  ;;  %v2088_v41 = vadd.f32 %v2087_v38, %v1798_v36  ;;  %v2089_v42 = vpop.f32.mrb[75].mxu1 }
 0x231   : > { %2295 = vst [vmem:[%s3279_s26 + $0x120] sm:$0xff] %v2231_v40  ;;  %v2232_v43 = vadd.f32 %v2088_v41, %v566_v37  ;;  %v575_v37 = vld [vmem:[%s3279_s26 + $0x170] sm:$0xff] }
 0x233   : > { %2296 = vst [vmem:[%s3279_s26 + $0x128] sm:$0xff] %v2232_v43  ;;  %v576_v43 = vld [vmem:[%s3279_s26 + $0x178] sm:$0xff] }
 0x234   : > { %v1803_v44 = vpop.f32.mrb[76].mxu0  ;;  %v2092_v46 = vpop.f32.mrb[76].mxu1 }
 0x235   : > { %v1805_v47 = vpop.f32.mrb[77].mxu0  ;;  %v2093_v48 = vadd.f32 %v2092_v46, %v1803_v44  ;;  %v2094_v49 = vpop.f32.mrb[77].mxu1 }
 0x236   : > { %v1806_v50 = vpop.f32.mrb[78].mxu0  ;;  %v2095_v52 = vpop.f32.mrb[78].mxu1 }
 0x237   : > { %v1808_v53 = vpop.f32.mrb[79].mxu0  ;;  %v2233_v54 = vadd.f32 %v2093_v48, %v567_v45  ;;  %v2096_v55 = vadd.f32 %v2095_v52, %v1806_v50  ;;  %v2097_v56 = vpop.f32.mrb[79].mxu1 }
 0x239   : > { %2297 = vst [vmem:[%s3279_s26 + $0x130] sm:$0xff] %v2233_v54  ;;  %v2234_v57 = vadd.f32 %v2096_v55, %v568_v51  ;;  %v577_v51 = vld [vmem:[%s3279_s26 + $0x180] sm:$0xff] }
 0x23b   : > { %2298 = vst [vmem:[%s3279_s26 + $0x138] sm:$0xff] %v2234_v57  ;;  %v578_v57 = vld [vmem:[%s3279_s26 + $0x188] sm:$0xff] }
 0x23c   : > { %v1811_v58 = vpop.f32.mrb[80].mxu0  ;;  %v2100_v60 = vpop.f32.mrb[80].mxu1 }
 0x23d   : > { %v1813_v61 = vpop.f32.mrb[81].mxu0  ;;  %v2101_v62 = vadd.f32 %v2100_v60, %v1811_v58  ;;  %v2102_v63 = vpop.f32.mrb[81].mxu1 }
 0x23e   : > { %v1814_v0 = vpop.f32.mrb[82].mxu0  ;;  %v2103_v2 = vpop.f32.mrb[82].mxu1 }
 0x23f   : > { %v1816_v3 = vpop.f32.mrb[83].mxu0  ;;  %v2235_v4 = vadd.f32 %v2101_v62, %v569_v59  ;;  %v2104_v5 = vadd.f32 %v2103_v2, %v1814_v0  ;;  %v2105_v6 = vpop.f32.mrb[83].mxu1 }
 0x241   : > { %2299 = vst [vmem:[%s3279_s26 + $0x140] sm:$0xff] %v2235_v4  ;;  %v2236_v7 = vadd.f32 %v2104_v5, %v570_v1  ;;  %v579_v1 = vld [vmem:[%s3279_s26 + $0x190] sm:$0xff] }
 0x243   : > { %2300 = vst [vmem:[%s3279_s26 + $0x148] sm:$0xff] %v2236_v7  ;;  %v580_v7 = vld [vmem:[%s3279_s26 + $0x198] sm:$0xff] }
 0x244   : > { %v1819_v8 = vpop.f32.mrb[84].mxu0  ;;  %v2108_v10 = vpop.f32.mrb[84].mxu1 }
 0x245   : > { %v1821_v11 = vpop.f32.mrb[85].mxu0  ;;  %v2109_v12 = vadd.f32 %v2108_v10, %v1819_v8  ;;  %v2110_v13 = vpop.f32.mrb[85].mxu1 }
 0x246   : > { %v1822_v14 = vpop.f32.mrb[86].mxu0  ;;  %v2111_v16 = vpop.f32.mrb[86].mxu1 }
 0x247   : > { %v1824_v17 = vpop.f32.mrb[87].mxu0  ;;  %v2237_v18 = vadd.f32 %v2109_v12, %v571_v9  ;;  %v2112_v19 = vadd.f32 %v2111_v16, %v1822_v14  ;;  %v2113_v20 = vpop.f32.mrb[87].mxu1 }
 0x249   : > { %2301 = vst [vmem:[%s3279_s26 + $0x150] sm:$0xff] %v2237_v18  ;;  %v2238_v21 = vadd.f32 %v2112_v19, %v572_v15  ;;  %v581_v15 = vld [vmem:[%s3279_s26 + $0x1a0] sm:$0xff] }
 0x24b   : > { %2302 = vst [vmem:[%s3279_s26 + $0x158] sm:$0xff] %v2238_v21  ;;  %v582_v21 = vld [vmem:[%s3279_s26 + $0x1a8] sm:$0xff] }
 0x24c   : > { %v1827_v22 = vpop.f32.mrb[88].mxu0  ;;  %v2116_v24 = vpop.f32.mrb[88].mxu1 }
 0x24d   : > { %v1829_v25 = vpop.f32.mrb[89].mxu0  ;;  %v2117_v26 = vadd.f32 %v2116_v24, %v1827_v22  ;;  %v2118_v27 = vpop.f32.mrb[89].mxu1 }
 0x24e   : > { %v1830_v28 = vpop.f32.mrb[90].mxu0  ;;  %v2119_v30 = vpop.f32.mrb[90].mxu1 }
 0x24f   : > { %v1832_v31 = vpop.f32.mrb[91].mxu0  ;;  %v2239_v32 = vadd.f32 %v2117_v26, %v573_v23  ;;  %v2120_v33 = vadd.f32 %v2119_v30, %v1830_v28  ;;  %v2121_v34 = vpop.f32.mrb[91].mxu1 }
 0x251   : > { %2303 = vst [vmem:[%s3279_s26 + $0x160] sm:$0xff] %v2239_v32  ;;  %v2240_v35 = vadd.f32 %v2120_v33, %v574_v29  ;;  %v583_v29 = vld [vmem:[%s3279_s26 + $0x1b0] sm:$0xff] }
 0x253   : > { %2304 = vst [vmem:[%s3279_s26 + $0x168] sm:$0xff] %v2240_v35  ;;  %v584_v35 = vld [vmem:[%s3279_s26 + $0x1b8] sm:$0xff] }
 0x254   : > { %v1835_v36 = vpop.f32.mrb[92].mxu0  ;;  %v2124_v38 = vpop.f32.mrb[92].mxu1 }
 0x255   : > { %v1837_v39 = vpop.f32.mrb[93].mxu0  ;;  %v2125_v40 = vadd.f32 %v2124_v38, %v1835_v36  ;;  %v2126_v41 = vpop.f32.mrb[93].mxu1 }
 0x256   : > { %v1838_v42 = vpop.f32.mrb[94].mxu0  ;;  %v2127_v44 = vpop.f32.mrb[94].mxu1 }
 0x257   : > { %v1840_v45 = vpop.f32.mrb[95].mxu0  ;;  %v2241_v46 = vadd.f32 %v2125_v40, %v575_v37  ;;  %v2128_v47 = vadd.f32 %v2127_v44, %v1838_v42  ;;  %v2129_v48 = vpop.f32.mrb[95].mxu1 }
 0x259   : > { %2305 = vst [vmem:[%s3279_s26 + $0x170] sm:$0xff] %v2241_v46  ;;  %v2242_v49 = vadd.f32 %v2128_v47, %v576_v43  ;;  %v585_v43 = vld [vmem:[%s3279_s26 + $0x1c0] sm:$0xff] }
 0x25b   : > { %2306 = vst [vmem:[%s3279_s26 + $0x178] sm:$0xff] %v2242_v49  ;;  %v586_v49 = vld [vmem:[%s3279_s26 + $0x1c8] sm:$0xff] }
 0x25c   : > { %v1843_v50 = vpop.f32.mrb[96].mxu0  ;;  %v2132_v52 = vpop.f32.mrb[96].mxu1 }
 0x25d   : > { %v1845_v53 = vpop.f32.mrb[97].mxu0  ;;  %v2133_v54 = vadd.f32 %v2132_v52, %v1843_v50  ;;  %v2134_v55 = vpop.f32.mrb[97].mxu1 }
 0x25e   : > { %v1846_v56 = vpop.f32.mrb[98].mxu0  ;;  %v2135_v58 = vpop.f32.mrb[98].mxu1 }
 0x25f   : > { %v1848_v59 = vpop.f32.mrb[99].mxu0  ;;  %v2243_v60 = vadd.f32 %v2133_v54, %v577_v51  ;;  %v2136_v61 = vadd.f32 %v2135_v58, %v1846_v56  ;;  %v2137_v62 = vpop.f32.mrb[99].mxu1 }
 0x261   : > { %2307 = vst [vmem:[%s3279_s26 + $0x180] sm:$0xff] %v2243_v60  ;;  %v2244_v63 = vadd.f32 %v2136_v61, %v578_v57  ;;  %v587_v57 = vld [vmem:[%s3279_s26 + $0x1d0] sm:$0xff] }
 0x263   : > { %2308 = vst [vmem:[%s3279_s26 + $0x188] sm:$0xff] %v2244_v63  ;;  %v588_v63 = vld [vmem:[%s3279_s26 + $0x1d8] sm:$0xff] }
 0x264   : > { %v1851_v0 = vpop.f32.mrb[100].mxu0  ;;  %v2140_v2 = vpop.f32.mrb[100].mxu1 }
 0x265   : > { %v1853_v3 = vpop.f32.mrb[101].mxu0  ;;  %v2141_v4 = vadd.f32 %v2140_v2, %v1851_v0  ;;  %v2142_v5 = vpop.f32.mrb[101].mxu1 }
 0x266   : > { %v1854_v6 = vpop.f32.mrb[102].mxu0  ;;  %v2143_v8 = vpop.f32.mrb[102].mxu1 }
 0x267   : > { %v1856_v9 = vpop.f32.mrb[103].mxu0  ;;  %v2245_v10 = vadd.f32 %v2141_v4, %v579_v1  ;;  %v2144_v11 = vadd.f32 %v2143_v8, %v1854_v6  ;;  %v2145_v12 = vpop.f32.mrb[103].mxu1 }
 0x269   : > { %2309 = vst [vmem:[%s3279_s26 + $0x190] sm:$0xff] %v2245_v10  ;;  %v2246_v13 = vadd.f32 %v2144_v11, %v580_v7  ;;  %v589_v7 = vld [vmem:[%s3279_s26 + $0x1e0] sm:$0xff] }
 0x26b   : > { %2310 = vst [vmem:[%s3279_s26 + $0x198] sm:$0xff] %v2246_v13  ;;  %v590_v13 = vld [vmem:[%s3279_s26 + $0x1e8] sm:$0xff] }
 0x26c   : > { %v1859_v14 = vpop.f32.mrb[104].mxu0  ;;  %v2148_v16 = vpop.f32.mrb[104].mxu1 }
 0x26d   : > { %v1861_v17 = vpop.f32.mrb[105].mxu0  ;;  %v2149_v18 = vadd.f32 %v2148_v16, %v1859_v14  ;;  %v2150_v19 = vpop.f32.mrb[105].mxu1 }
 0x26e   : > { %v1862_v20 = vpop.f32.mrb[106].mxu0  ;;  %v2151_v22 = vpop.f32.mrb[106].mxu1 }
 0x26f   : > { %v1864_v23 = vpop.f32.mrb[107].mxu0  ;;  %v2247_v24 = vadd.f32 %v2149_v18, %v581_v15  ;;  %v2152_v25 = vadd.f32 %v2151_v22, %v1862_v20  ;;  %v2153_v26 = vpop.f32.mrb[107].mxu1 }
 0x271   : > { %2311 = vst [vmem:[%s3279_s26 + $0x1a0] sm:$0xff] %v2247_v24  ;;  %v2248_v27 = vadd.f32 %v2152_v25, %v582_v21  ;;  %v591_v21 = vld [vmem:[%s3279_s26 + $0x1f0] sm:$0xff] }
 0x273   : > { %2312 = vst [vmem:[%s3279_s26 + $0x1a8] sm:$0xff] %v2248_v27  ;;  %v592_v27 = vld [vmem:[%s3279_s26 + $0x1f8] sm:$0xff] }
 0x274   : > { %v1867_v28 = vpop.f32.mrb[108].mxu0  ;;  %v2156_v30 = vpop.f32.mrb[108].mxu1 }
 0x275   : > { %v1869_v31 = vpop.f32.mrb[109].mxu0  ;;  %v2157_v32 = vadd.f32 %v2156_v30, %v1867_v28  ;;  %v2158_v33 = vpop.f32.mrb[109].mxu1 }
 0x276   : > { %v1870_v34 = vpop.f32.mrb[110].mxu0  ;;  %v2159_v36 = vpop.f32.mrb[110].mxu1 }
 0x277   : > { %v1872_v37 = vpop.f32.mrb[111].mxu0  ;;  %v2249_v38 = vadd.f32 %v2157_v32, %v583_v29  ;;  %v2160_v39 = vadd.f32 %v2159_v36, %v1870_v34  ;;  %v2161_v40 = vpop.f32.mrb[111].mxu1 }
 0x279   : > { %2313 = vst [vmem:[%s3279_s26 + $0x1b0] sm:$0xff] %v2249_v38  ;;  %v2250_v41 = vadd.f32 %v2160_v39, %v584_v35 }
 0x27b   : > { %2314 = vst [vmem:[%s3279_s26 + $0x1b8] sm:$0xff] %v2250_v41 }
 0x27c   : > { %v1875_v42 = vpop.f32.mrb[112].mxu0  ;;  %v2164_v44 = vpop.f32.mrb[112].mxu1 }
 0x27d   : > { %v1877_v45 = vpop.f32.mrb[113].mxu0  ;;  %v2165_v46 = vadd.f32 %v2164_v44, %v1875_v42  ;;  %v2166_v47 = vpop.f32.mrb[113].mxu1 }
 0x27e   : > { %v1878_v48 = vpop.f32.mrb[114].mxu0  ;;  %v2167_v50 = vpop.f32.mrb[114].mxu1 }
 0x27f   : > { %v1880_v51 = vpop.f32.mrb[115].mxu0  ;;  %v2251_v52 = vadd.f32 %v2165_v46, %v585_v43  ;;  %v2168_v53 = vadd.f32 %v2167_v50, %v1878_v48  ;;  %v2169_v54 = vpop.f32.mrb[115].mxu1 }
 0x281   : > { %2315 = vst [vmem:[%s3279_s26 + $0x1c0] sm:$0xff] %v2251_v52  ;;  %v2252_v55 = vadd.f32 %v2168_v53, %v586_v49 }
 0x283   : > { %2316 = vst [vmem:[%s3279_s26 + $0x1c8] sm:$0xff] %v2252_v55 }
 0x284   : > { %v1883_v56 = vpop.f32.mrb[116].mxu0  ;;  %v2172_v58 = vpop.f32.mrb[116].mxu1 }
 0x285   : > { %v1885_v59 = vpop.f32.mrb[117].mxu0  ;;  %v2173_v60 = vadd.f32 %v2172_v58, %v1883_v56  ;;  %v2174_v61 = vpop.f32.mrb[117].mxu1 }
 0x286   : > { %v1886_v62 = vpop.f32.mrb[118].mxu0  ;;  %v2175_v0 = vpop.f32.mrb[118].mxu1 }
 0x287   : > { %v1888_v1 = vpop.f32.mrb[119].mxu0  ;;  %v2253_v2 = vadd.f32 %v2173_v60, %v587_v57  ;;  %v2176_v3 = vadd.f32 %v2175_v0, %v1886_v62  ;;  %v2177_v4 = vpop.f32.mrb[119].mxu1 }
 0x289   : > { %2317 = vst [vmem:[%s3279_s26 + $0x1d0] sm:$0xff] %v2253_v2  ;;  %v2254_v5 = vadd.f32 %v2176_v3, %v588_v63 }
 0x28b   : > { %2318 = vst [vmem:[%s3279_s26 + $0x1d8] sm:$0xff] %v2254_v5 }
 0x28c   : > { %v1891_v6 = vpop.f32.mrb[120].mxu0  ;;  %v2180_v8 = vpop.f32.mrb[120].mxu1 }
 0x28d   : > { %v1893_v9 = vpop.f32.mrb[121].mxu0  ;;  %v2181_v10 = vadd.f32 %v2180_v8, %v1891_v6  ;;  %v2182_v11 = vpop.f32.mrb[121].mxu1 }
 0x28e   : > { %v1894_v12 = vpop.f32.mrb[122].mxu0  ;;  %v2183_v14 = vpop.f32.mrb[122].mxu1 }
 0x28f   : > { %v1896_v15 = vpop.f32.mrb[123].mxu0  ;;  %v2255_v16 = vadd.f32 %v2181_v10, %v589_v7  ;;  %v2184_v17 = vadd.f32 %v2183_v14, %v1894_v12  ;;  %v2185_v18 = vpop.f32.mrb[123].mxu1 }
 0x291   : > { %2319 = vst [vmem:[%s3279_s26 + $0x1e0] sm:$0xff] %v2255_v16  ;;  %v2256_v19 = vadd.f32 %v2184_v17, %v590_v13 }
 0x293   : > { %2320 = vst [vmem:[%s3279_s26 + $0x1e8] sm:$0xff] %v2256_v19 }
 0x294   : > { %v1899_v20 = vpop.f32.mrb[124].mxu0  ;;  %v2188_v22 = vpop.f32.mrb[124].mxu1 }
 0x295   : > { %v1901_v23 = vpop.f32.mrb[125].mxu0  ;;  %v2189_v24 = vadd.f32 %v2188_v22, %v1899_v20  ;;  %v2190_v25 = vpop.f32.mrb[125].mxu1 }
 0x296   : > { %v1902_v26 = vpop.f32.mrb[126].mxu0  ;;  %v2191_v28 = vpop.f32.mrb[126].mxu1 }
 0x297   : > { %v1904_v29 = vpop.f32.mrb[127].mxu0  ;;  %v2257_v30 = vadd.f32 %v2189_v24, %v591_v21  ;;  %v2192_v31 = vadd.f32 %v2191_v28, %v1902_v26  ;;  %v2193_v32 = vpop.f32.mrb[127].mxu1 }
 0x299   : > { %2321 = vst [vmem:[%s3279_s26 + $0x1f0] sm:$0xff] %v2257_v30  ;;  %v2258_v33 = vadd.f32 %v2192_v31, %v592_v27 }
 0x29b   : > { %2322 = vst [vmem:[%s3279_s26 + $0x1f8] sm:$0xff] %v2258_v33 }
 0x29c PF: > { %s12_s15 = sadd.s32 1, %s2927_s15   ;;  %s3756_s9 = smov %s2907_s10 }
 0x29d   : > { %p9_p13 = scmp.ge.s32.totalorder %s12_s15, 11   ;;  %s3757_s10 = smov %s2997_s22 }
 0x29e   : > { %s3758_s11 = smov %s2919_s13  ;;  %s3759_s12 = smov %s2923_s14 }
 0x29f   : > { %s3760_s13 = smov %s3763_s16  ;;  %s3761_s14 = smov %s3767_s17 }
 0x2a0   :  { %11 = sbr.rel (!%p9_p13) target bundleno = 4 (0x4), region = 93 }

// kernel: igae_encoder.11
= control target key start
LH: loop header
LB: loop body
LE: loop exit
PB: predicated region body
PF: predicated region fallthrough
CT: control target
= control target key end

     0   :  { %s1486_s9 = smov 0   ;;  %s1631_s0 = inlined_call_operand.vmem [shape: f32[1536,128], index: 0, kind: input, shape index: {}]   ;;  %s1632_s1 = inlined_call_operand.vmem [shape: bf16[128,128], index: 1, kind: input, shape index: {}]   ;;  %s1633_s2 = inlined_call_operand.vmem [shape: bf16[1536,128], index: 2, kind: output, shape index: {}]  }
   0x1 LB: > { %s973_s10 = sadd.s32 4294967295, %s1469_s9   ;;  %p977_p0 = scmp.ge.s32.totalorder %s1469_s9, 1  ;;  %s1469_s9 = sphi %s1486_s9, %s12_s9  }
   0x2   : > { %p113_p1 = scmp.lt.s32.totalorder %s1469_s9, 4 }
   0x4   : > { %p114_p2 = pnand %p977_p0, %p113_p1 }
   0x5   : > { %v1455_v0 = vld [vmem:[%s1632_s1] sm:$0xff] (!%p114_p2)   ;;  %s978_s13 = sshll.u32 (!%p114_p2), %s973_s10, 6  ;;  %v1456_v1 = vld [vmem:[%s1632_s1 + $0x8] sm:$0xff] (!%p114_p2)   ;;  %v1457_v2 = vld [vmem:[%s1632_s1 + $0x10] sm:$0xff] (!%p114_p2)  }
   0x6   : > { %117 = sbr.rel (%p114_p2) target bundleno = 313 (0x139), region = 28  ;;  %p136_p3 = scmp.lt.s32.totalorder (!%p114_p2), %s978_s13, 191  ;;  %1351 = vmatprep.subr.bf16.mxu0 (!%p114_p2), %v1455_v0  ;;  %1431 = vmatprep.subr.bf16.mxu1 (!%p114_p2), %v1455_v0  ;;  %v1458_v3 = vld [vmem:[%s1632_s1 + $0x18] sm:$0xff] (!%p114_p2)   ;;  %v1459_v10 = vld [vmem:[%s1632_s1 + $0x20] sm:$0xff] (!%p114_p2)   ;;  %v1460_v11 = vld [vmem:[%s1632_s1 + $0x28] sm:$0xff] (!%p114_p2)  }
   0x7   : > { %1352 = vmatpush3.bf16.msra.mxu0 (!%p114_p2), %v1455_v0  ;;  %1439 = vmatpush3.bf16.msra.mxu1 (!%p114_p2), %v1455_v0  ;;  %v1461_v12 = vld [vmem:[%s1632_s1 + $0x30] sm:$0xff] (!%p114_p2)   ;;  %v1462_v13 = vld [vmem:[%s1632_s1 + $0x38] sm:$0xff] (!%p114_p2)  }
   0x8   : > { %1353 = vmatprep.subr.bf16.mxu0 (!%p114_p2), %v1456_v1  ;;  %1432 = vmatprep.subr.bf16.mxu1 (!%p114_p2), %v1456_v1 }
   0xb   : > { %1354 = vmatpush3.bf16.msra.mxu0 (!%p114_p2), %v1456_v1  ;;  %1440 = vmatpush3.bf16.msra.mxu1 (!%p114_p2), %v1456_v1 }
   0xc   : > { %1355 = vmatprep.subr.bf16.mxu0 (!%p114_p2), %v1457_v2  ;;  %1433 = vmatprep.subr.bf16.mxu1 (!%p114_p2), %v1457_v2 }
   0xd   : > { %s1635_s13 = smov (!%p136_p3, %s978_s13), 191 }
   0xe   : > { %s979_s18 = sshll.u32 %s1635_s13, 3  ;;  %s981_s4 = sshll.u32 %s1635_s13, 2 }
   0xf   : > { %s1509_s21 = scalar_lea.vmem %s1631_s0, %s979_s18  ;;  %1356 = vmatpush3.bf16.msra.mxu0 %v1457_v2  ;;  %1441 = vmatpush3.bf16.msra.mxu1 %v1457_v2  ;;  %s1594_s7 = scalar_lea.vmem %s1633_s2, %s981_s4 }
  0x10   : > { %v148_v4 = vld [vmem:[%s1509_s21] sm:$0xff]  ;;  %v149_v5 = vld [vmem:[%s1509_s21 + $0x8] sm:$0xff]  ;;  %1357 = vmatprep.subr.bf16.mxu0 %v1458_v3  ;;  %1434 = vmatprep.subr.bf16.mxu1 %v1458_v3  ;;  %v150_v14 = vld [vmem:[%s1509_s21 + $0x10] sm:$0xff] }
  0x11   : > { %v180_v6 = vld [vmem:[%s1509_s21 + $0x100] sm:$0xff]  ;;  %v212_v7 = vpack.c.bf16 %v149_v5, %v148_v4  ;;  %v181_v8 = vld [vmem:[%s1509_s21 + $0x108] sm:$0xff]  ;;  %v151_v15 = vld [vmem:[%s1509_s21 + $0x18] sm:$0xff] }
  0x12   : > { %v228_v9 = vpack.c.bf16 %v181_v8, %v180_v6  ;;  %v182_v16 = vld [vmem:[%s1509_s21 + $0x110] sm:$0xff]  ;;  %v183_v17 = vld [vmem:[%s1509_s21 + $0x118] sm:$0xff]  ;;  %v152_v18 = vld [vmem:[%s1509_s21 + $0x20] sm:$0xff]  ;;  %v213_v22 = vpack.c.bf16 %v151_v15, %v150_v14 }
  0x13   : > { %1367 = vmatprep.mubr.bf16.mxu0 %v212_v7  ;;  %1358 = vmatpush3.bf16.msra.mxu0 %v1458_v3  ;;  %v153_v19 = vld [vmem:[%s1509_s21 + $0x28] sm:$0xff]  ;;  %v184_v20 = vld [vmem:[%s1509_s21 + $0x120] sm:$0xff]  ;;  %v229_v23 = vpack.c.bf16 %v183_v17, %v182_v16  ;;  %v154_v26 = vld [vmem:[%s1509_s21 + $0x30] sm:$0xff] }
  0x14   : > { %1399 = vmatprep.mubr.bf16.mxu1 %v228_v9  ;;  %1442 = vmatpush3.bf16.msra.mxu1 %v1458_v3  ;;  %v185_v21 = vld [vmem:[%s1509_s21 + $0x128] sm:$0xff]  ;;  %v214_v24 = vpack.c.bf16 %v153_v19, %v152_v18  ;;  %v155_v27 = vld [vmem:[%s1509_s21 + $0x38] sm:$0xff]  ;;  %v186_v28 = vld [vmem:[%s1509_s21 + $0x130] sm:$0xff] }
  0x15   : > { %1359 = vmatprep.subr.bf16.mxu0 %v1459_v10  ;;  %1435 = vmatprep.subr.bf16.mxu1 %v1459_v10  ;;  %v230_v25 = vpack.c.bf16 %v185_v21, %v184_v20  ;;  %v187_v29 = vld [vmem:[%s1509_s21 + $0x138] sm:$0xff]  ;;  %v156_v30 = vld [vmem:[%s1509_s21 + $0x40] sm:$0xff]  ;;  %v157_v31 = vld [vmem:[%s1509_s21 + $0x48] sm:$0xff]  ;;  %v215_v34 = vpack.c.bf16 %v155_v27, %v154_v26 }
  0x16   : > { %v188_v32 = vld [vmem:[%s1509_s21 + $0x140] sm:$0xff]  ;;  %v189_v33 = vld [vmem:[%s1509_s21 + $0x148] sm:$0xff]  ;;  %v231_v35 = vpack.c.bf16 %v187_v29, %v186_v28  ;;  %v216_v36 = vpack.c.bf16 %v157_v31, %v156_v30  ;;  %v158_v38 = vld [vmem:[%s1509_s21 + $0x50] sm:$0xff] }
  0x17   : > { %1360 = vmatpush3.bf16.msra.mxu0 %v1459_v10  ;;  %v232_v37 = vpack.c.bf16 %v189_v33, %v188_v32  ;;  %v159_v39 = vld [vmem:[%s1509_s21 + $0x58] sm:$0xff]  ;;  %v190_v40 = vld [vmem:[%s1509_s21 + $0x150] sm:$0xff]  ;;  %v160_v42 = vld [vmem:[%s1509_s21 + $0x60] sm:$0xff] }
  0x18   : > { %1443 = vmatpush3.bf16.msra.mxu1 %v1459_v10  ;;  %1361 = vmatprep.subr.bf16.mxu0 %v1460_v11  ;;  %v191_v41 = vld [vmem:[%s1509_s21 + $0x158] sm:$0xff]  ;;  %v161_v43 = vld [vmem:[%s1509_s21 + $0x68] sm:$0xff]  ;;  %v192_v44 = vld [vmem:[%s1509_s21 + $0x160] sm:$0xff]  ;;  %v217_v46 = vpack.c.bf16 %v159_v39, %v158_v38 }
  0x19   : > { %1436 = vmatprep.subr.bf16.mxu1 %v1460_v11  ;;  %v193_v45 = vld [vmem:[%s1509_s21 + $0x168] sm:$0xff]  ;;  %v233_v47 = vpack.c.bf16 %v191_v41, %v190_v40  ;;  %v218_v48 = vpack.c.bf16 %v161_v43, %v160_v42  ;;  %v162_v50 = vld [vmem:[%s1509_s21 + $0x70] sm:$0xff]  ;;  %v163_v51 = vld [vmem:[%s1509_s21 + $0x78] sm:$0xff] }
  0x1a   : > { %v234_v49 = vpack.c.bf16 %v193_v45, %v192_v44  ;;  %v194_v52 = vld [vmem:[%s1509_s21 + $0x170] sm:$0xff]  ;;  %v195_v53 = vld [vmem:[%s1509_s21 + $0x178] sm:$0xff]  ;;  %v164_v54 = vld [vmem:[%s1509_s21 + $0x80] sm:$0xff]  ;;  %v219_v58 = vpack.c.bf16 %v163_v51, %v162_v50 }
  0x1b   : > { %1362 = vmatpush3.bf16.msra.mxu0 %v1460_v11  ;;  %v165_v55 = vld [vmem:[%s1509_s21 + $0x88] sm:$0xff]  ;;  %v196_v56 = vld [vmem:[%s1509_s21 + $0x180] sm:$0xff]  ;;  %v235_v59 = vpack.c.bf16 %v195_v53, %v194_v52  ;;  %v166_v62 = vld [vmem:[%s1509_s21 + $0x90] sm:$0xff] }
  0x1c   : > { %1444 = vmatpush3.bf16.msra.mxu1 %v1460_v11  ;;  %1363 = vmatprep.subr.bf16.mxu0 %v1461_v12  ;;  %v197_v57 = vld [vmem:[%s1509_s21 + $0x188] sm:$0xff]  ;;  %v220_v60 = vpack.c.bf16 %v165_v55, %v164_v54  ;;  %v167_v63 = vld [vmem:[%s1509_s21 + $0x98] sm:$0xff]  ;;  %v198_v0 = vld [vmem:[%s1509_s21 + $0x190] sm:$0xff] }
  0x1d   : > { %1437 = vmatprep.subr.bf16.mxu1 %v1461_v12  ;;  %v236_v61 = vpack.c.bf16 %v197_v57, %v196_v56  ;;  %v199_v1 = vld [vmem:[%s1509_s21 + $0x198] sm:$0xff]  ;;  %v168_v2 = vld [vmem:[%s1509_s21 + $0xa0] sm:$0xff]  ;;  %v169_v3 = vld [vmem:[%s1509_s21 + $0xa8] sm:$0xff]  ;;  %v221_v6 = vpack.c.bf16 %v167_v63, %v166_v62 }
  0x1e   : > { %v200_v4 = vld [vmem:[%s1509_s21 + $0x1a0] sm:$0xff]  ;;  %v201_v5 = vld [vmem:[%s1509_s21 + $0x1a8] sm:$0xff]  ;;  %v237_v7 = vpack.c.bf16 %v199_v1, %v198_v0  ;;  %v222_v8 = vpack.c.bf16 %v169_v3, %v168_v2  ;;  %v170_v10 = vld [vmem:[%s1509_s21 + $0xb0] sm:$0xff] }
  0x1f   : > { %1364 = vmatpush3.bf16.msra.mxu0 %v1461_v12  ;;  %v238_v9 = vpack.c.bf16 %v201_v5, %v200_v4  ;;  %v171_v11 = vld [vmem:[%s1509_s21 + $0xb8] sm:$0xff]  ;;  %v172_v14 = vld [vmem:[%s1509_s21 + $0xc0] sm:$0xff]  ;;  %v173_v15 = vld [vmem:[%s1509_s21 + $0xc8] sm:$0xff] }
  0x20   : > { %1445 = vmatpush3.bf16.msra.mxu1 %v1461_v12  ;;  %1365 = vmatprep.subr.bf16.mxu0 %v1462_v13  ;;  %v202_v12 = vld [vmem:[%s1509_s21 + $0x1b0] sm:$0xff]  ;;  %v204_v16 = vld [vmem:[%s1509_s21 + $0x1c0] sm:$0xff]  ;;  %v205_v17 = vld [vmem:[%s1509_s21 + $0x1c8] sm:$0xff]  ;;  %v223_v18 = vpack.c.bf16 %v171_v11, %v170_v10  ;;  %v224_v20 = vpack.c.bf16 %v173_v15, %v172_v14 }
  0x21   : > { %1438 = vmatprep.subr.bf16.mxu1 %v1462_v13  ;;  %v240_v21 = vpack.c.bf16 %v205_v17, %v204_v16  ;;  %v176_v26 = vld [vmem:[%s1509_s21 + $0xe0] sm:$0xff]  ;;  %v177_v27 = vld [vmem:[%s1509_s21 + $0xe8] sm:$0xff] }
  0x22   : > { %v208_v28 = vld [vmem:[%s1509_s21 + $0x1e0] sm:$0xff]  ;;  %v209_v29 = vld [vmem:[%s1509_s21 + $0x1e8] sm:$0xff]  ;;  %v226_v32 = vpack.c.bf16 %v177_v27, %v176_v26 }
  0x23   : > { %1366 = vmatpush3.bf16.msra.mxu0 %v1462_v13  ;;  %v242_v33 = vpack.c.bf16 %v209_v29, %v208_v28 }
  0x24   : > { %1446 = vmatpush3.bf16.msra.mxu1 %v1462_v13  ;;  %v203_v13 = vld [vmem:[%s1509_s21 + $0x1b8] sm:$0xff] }
  0x25   : > { %v239_v19 = vpack.c.bf16 %v203_v13, %v202_v12 }
  0x26   : > { %1368 = vmatmul.mubr.bf16.vlgmr.msra.gmra.mrb[0].mxu0 %v213_v22  ;;  %v174_v22 = vld [vmem:[%s1509_s21 + $0xd0] sm:$0xff] }
  0x27   : > { %1400 = vmatmul.mubr.bf16.vlgmr.msra.gmra.mrb[0].mxu1 %v229_v23  ;;  %1371 = vmatprep.mubr.bf16.mxu0 %v214_v24  ;;  %v175_v23 = vld [vmem:[%s1509_s21 + $0xd8] sm:$0xff]  ;;  %v206_v24 = vld [vmem:[%s1509_s21 + $0x1d0] sm:$0xff] }
  0x28   : > { %1403 = vmatprep.mubr.bf16.mxu1 %v230_v25  ;;  %v207_v25 = vld [vmem:[%s1509_s21 + $0x1d8] sm:$0xff]  ;;  %v225_v30 = vpack.c.bf16 %v175_v23, %v174_v22 }
  0x29   : > { %v241_v31 = vpack.c.bf16 %v207_v25, %v206_v24 }
  0x2e   : > { %1372 = vmatmul.mubr.bf16.gmra.mrb[4].mxu0 %v215_v34  ;;  %v178_v34 = vld [vmem:[%s1509_s21 + $0xf0] sm:$0xff] }
  0x2f   : > { %1404 = vmatmul.mubr.bf16.gmra.mrb[4].mxu1 %v231_v35  ;;  %1375 = vmatprep.mubr.bf16.mxu0 %v216_v36  ;;  %v179_v35 = vld [vmem:[%s1509_s21 + $0xf8] sm:$0xff]  ;;  %v210_v36 = vld [vmem:[%s1509_s21 + $0x1f0] sm:$0xff] }
  0x30   : > { %1407 = vmatprep.mubr.bf16.mxu1 %v232_v37  ;;  %v211_v37 = vld [vmem:[%s1509_s21 + $0x1f8] sm:$0xff]  ;;  %v227_v38 = vpack.c.bf16 %v179_v35, %v178_v34 }
  0x31   : > { %v243_v39 = vpack.c.bf16 %v211_v37, %v210_v36 }
  0x36   : > { %1376 = vmatmul.mubr.bf16.gmra.mrb[8].mxu0 %v217_v46 }
  0x37   : > { %1408 = vmatmul.mubr.bf16.gmra.mrb[8].mxu1 %v233_v47  ;;  %1379 = vmatprep.mubr.bf16.mxu0 %v218_v48 }
  0x38   : > { %1411 = vmatprep.mubr.bf16.mxu1 %v234_v49 }
  0x3e   : > { %1380 = vmatmul.mubr.bf16.gmra.mrb[12].mxu0 %v219_v58 }
  0x3f   : > { %1412 = vmatmul.mubr.bf16.gmra.mrb[12].mxu1 %v235_v59  ;;  %1383 = vmatprep.mubr.bf16.mxu0 %v220_v60 }
  0x40   : > { %1415 = vmatprep.mubr.bf16.mxu1 %v236_v61 }
  0x46   : > { %1384 = vmatmul.mubr.bf16.gmra.mrb[16].mxu0 %v221_v6 }
  0x47   : > { %1416 = vmatmul.mubr.bf16.gmra.mrb[16].mxu1 %v237_v7  ;;  %1387 = vmatprep.mubr.bf16.mxu0 %v222_v8 }
  0x48   : > { %1419 = vmatprep.mubr.bf16.mxu1 %v238_v9 }
  0x4e   : > { %1388 = vmatmul.mubr.bf16.gmra.mrb[20].mxu0 %v223_v18 }
  0x4f   : > { %1420 = vmatmul.mubr.bf16.gmra.mrb[20].mxu1 %v239_v19  ;;  %1391 = vmatprep.mubr.bf16.mxu0 %v224_v20 }
  0x50   : > { %1423 = vmatprep.mubr.bf16.mxu1 %v240_v21 }
  0x56   : > { %1392 = vmatmul.mubr.bf16.gmra.mrb[24].mxu0 %v225_v30 }
  0x57   : > { %1424 = vmatmul.mubr.bf16.gmra.mrb[24].mxu1 %v241_v31  ;;  %1395 = vmatprep.mubr.bf16.mxu0 %v226_v32 }
  0x58   : > { %1427 = vmatprep.mubr.bf16.mxu1 %v242_v33 }
  0x5e   : > { %1396 = vmatmul.mubr.bf16.gmra.mrb[28].mxu0 %v227_v38 }
  0x5f   : > { %1428 = vmatmul.mubr.bf16.gmra.mrb[28].mxu1 %v243_v39 }
  0xf9   : > { %v1369_v40 = vpop.f32.mrb[0].mxu0 }
  0xfa   : > { %v1401_v41 = vpop.f32.mrb[0].mxu1  ;;  %v342_v42 = vpop.f32.mrb[1].mxu0 }
  0xfb   : > { %v470_v43 = vpop.f32.mrb[1].mxu1  ;;  %v1370_v44 = vpop.f32.mrb[2].mxu0 }
  0xfc   : > { %v1402_v45 = vpop.f32.mrb[2].mxu1  ;;  %v1128_v46 = vpack.c.bf16 %v1370_v44, %v1369_v40  ;;  %v345_v48 = vpop.f32.mrb[3].mxu0 }
  0xfd   : > { %v1208_v47 = vpack.c.bf16 %v1402_v45, %v1401_v41  ;;  %v473_v49 = vpop.f32.mrb[3].mxu1  ;;  %v1123_v50 = vpack.c.bf16 %v345_v48, %v342_v42 }
  0xfe   : > { %v1203_v51 = vpack.c.bf16 %v473_v49, %v470_v43  ;;  %1280 = vst [vmem:[%s1594_s7 + $0x8] sm:$0xff] %v1128_v46  }
  0xff   : > { %1296 = vst [vmem:[%s1594_s7 + $0x88] sm:$0xff] %v1208_v47   ;;  %1124 = vst [vmem:[%s1594_s7] sm:$0xff] %v1123_v50  }
 0x100   : > { %1295 = vst [vmem:[%s1594_s7 + $0x80] sm:$0xff] %v1203_v51  }
 0x101   : > { %v1373_v52 = vpop.f32.mrb[4].mxu0 }
 0x102   : > { %v1405_v53 = vpop.f32.mrb[4].mxu1  ;;  %v358_v54 = vpop.f32.mrb[5].mxu0 }
 0x103   : > { %v486_v55 = vpop.f32.mrb[5].mxu1  ;;  %v1374_v56 = vpop.f32.mrb[6].mxu0 }
 0x104   : > { %v1406_v57 = vpop.f32.mrb[6].mxu1  ;;  %v1138_v58 = vpack.c.bf16 %v1374_v56, %v1373_v52  ;;  %v361_v60 = vpop.f32.mrb[7].mxu0 }
 0x105   : > { %v1218_v59 = vpack.c.bf16 %v1406_v57, %v1405_v53  ;;  %v489_v61 = vpop.f32.mrb[7].mxu1  ;;  %v1133_v62 = vpack.c.bf16 %v361_v60, %v358_v54 }
 0x106   : > { %v1213_v63 = vpack.c.bf16 %v489_v61, %v486_v55  ;;  %1282 = vst [vmem:[%s1594_s7 + $0x18] sm:$0xff] %v1138_v58  }
 0x107   : > { %1298 = vst [vmem:[%s1594_s7 + $0x98] sm:$0xff] %v1218_v59   ;;  %1281 = vst [vmem:[%s1594_s7 + $0x10] sm:$0xff] %v1133_v62  }
 0x108   : > { %1297 = vst [vmem:[%s1594_s7 + $0x90] sm:$0xff] %v1213_v63  }
 0x109   : > { %v1377_v0 = vpop.f32.mrb[8].mxu0 }
 0x10a   : > { %v1409_v1 = vpop.f32.mrb[8].mxu1  ;;  %v374_v2 = vpop.f32.mrb[9].mxu0 }
 0x10b   : > { %v502_v3 = vpop.f32.mrb[9].mxu1  ;;  %v1378_v4 = vpop.f32.mrb[10].mxu0 }
 0x10c   : > { %v1410_v5 = vpop.f32.mrb[10].mxu1  ;;  %v1148_v6 = vpack.c.bf16 %v1378_v4, %v1377_v0  ;;  %v377_v8 = vpop.f32.mrb[11].mxu0 }
 0x10d   : > { %v1228_v7 = vpack.c.bf16 %v1410_v5, %v1409_v1  ;;  %v505_v9 = vpop.f32.mrb[11].mxu1  ;;  %v1143_v10 = vpack.c.bf16 %v377_v8, %v374_v2 }
 0x10e   : > { %v1223_v11 = vpack.c.bf16 %v505_v9, %v502_v3  ;;  %1284 = vst [vmem:[%s1594_s7 + $0x28] sm:$0xff] %v1148_v6  }
 0x10f   : > { %1300 = vst [vmem:[%s1594_s7 + $0xa8] sm:$0xff] %v1228_v7   ;;  %1283 = vst [vmem:[%s1594_s7 + $0x20] sm:$0xff] %v1143_v10  }
 0x110   : > { %1299 = vst [vmem:[%s1594_s7 + $0xa0] sm:$0xff] %v1223_v11  }
 0x111   : > { %v1381_v12 = vpop.f32.mrb[12].mxu0 }
 0x112   : > { %v1413_v13 = vpop.f32.mrb[12].mxu1  ;;  %v390_v14 = vpop.f32.mrb[13].mxu0 }
 0x113   : > { %v518_v15 = vpop.f32.mrb[13].mxu1  ;;  %v1382_v16 = vpop.f32.mrb[14].mxu0 }
 0x114   : > { %v1414_v17 = vpop.f32.mrb[14].mxu1  ;;  %v1158_v18 = vpack.c.bf16 %v1382_v16, %v1381_v12  ;;  %v393_v20 = vpop.f32.mrb[15].mxu0 }
 0x115   : > { %v1238_v19 = vpack.c.bf16 %v1414_v17, %v1413_v13  ;;  %v521_v21 = vpop.f32.mrb[15].mxu1  ;;  %v1153_v22 = vpack.c.bf16 %v393_v20, %v390_v14 }
 0x116   : > { %v1233_v23 = vpack.c.bf16 %v521_v21, %v518_v15  ;;  %1286 = vst [vmem:[%s1594_s7 + $0x38] sm:$0xff] %v1158_v18  }
 0x117   : > { %1302 = vst [vmem:[%s1594_s7 + $0xb8] sm:$0xff] %v1238_v19   ;;  %1285 = vst [vmem:[%s1594_s7 + $0x30] sm:$0xff] %v1153_v22  }
 0x118   : > { %1301 = vst [vmem:[%s1594_s7 + $0xb0] sm:$0xff] %v1233_v23  }
 0x119   : > { %v1385_v24 = vpop.f32.mrb[16].mxu0 }
 0x11a   : > { %v1417_v25 = vpop.f32.mrb[16].mxu1  ;;  %v406_v26 = vpop.f32.mrb[17].mxu0 }
 0x11b   : > { %v534_v27 = vpop.f32.mrb[17].mxu1  ;;  %v1386_v28 = vpop.f32.mrb[18].mxu0 }
 0x11c   : > { %v1418_v29 = vpop.f32.mrb[18].mxu1  ;;  %v1168_v30 = vpack.c.bf16 %v1386_v28, %v1385_v24  ;;  %v409_v32 = vpop.f32.mrb[19].mxu0 }
 0x11d   : > { %v1248_v31 = vpack.c.bf16 %v1418_v29, %v1417_v25  ;;  %v537_v33 = vpop.f32.mrb[19].mxu1  ;;  %v1163_v34 = vpack.c.bf16 %v409_v32, %v406_v26 }
 0x11e   : > { %v1243_v35 = vpack.c.bf16 %v537_v33, %v534_v27  ;;  %1288 = vst [vmem:[%s1594_s7 + $0x48] sm:$0xff] %v1168_v30  }
 0x11f   : > { %1304 = vst [vmem:[%s1594_s7 + $0xc8] sm:$0xff] %v1248_v31   ;;  %1287 = vst [vmem:[%s1594_s7 + $0x40] sm:$0xff] %v1163_v34  }
 0x120   : > { %1303 = vst [vmem:[%s1594_s7 + $0xc0] sm:$0xff] %v1243_v35  }
 0x121   : > { %v1389_v36 = vpop.f32.mrb[20].mxu0 }
 0x122   : > { %v1421_v37 = vpop.f32.mrb[20].mxu1  ;;  %v422_v38 = vpop.f32.mrb[21].mxu0 }
 0x123   : > { %v550_v39 = vpop.f32.mrb[21].mxu1  ;;  %v1390_v40 = vpop.f32.mrb[22].mxu0 }
 0x124   : > { %v1422_v41 = vpop.f32.mrb[22].mxu1  ;;  %v1178_v42 = vpack.c.bf16 %v1390_v40, %v1389_v36  ;;  %v425_v44 = vpop.f32.mrb[23].mxu0 }
 0x125   : > { %v1258_v43 = vpack.c.bf16 %v1422_v41, %v1421_v37  ;;  %v553_v45 = vpop.f32.mrb[23].mxu1  ;;  %v1173_v46 = vpack.c.bf16 %v425_v44, %v422_v38 }
 0x126   : > { %v1253_v47 = vpack.c.bf16 %v553_v45, %v550_v39  ;;  %1290 = vst [vmem:[%s1594_s7 + $0x58] sm:$0xff] %v1178_v42  }
 0x127   : > { %1306 = vst [vmem:[%s1594_s7 + $0xd8] sm:$0xff] %v1258_v43   ;;  %1289 = vst [vmem:[%s1594_s7 + $0x50] sm:$0xff] %v1173_v46  }
 0x128   : > { %1305 = vst [vmem:[%s1594_s7 + $0xd0] sm:$0xff] %v1253_v47  }
 0x129   : > { %v1393_v48 = vpop.f32.mrb[24].mxu0 }
 0x12a   : > { %v1425_v49 = vpop.f32.mrb[24].mxu1  ;;  %v438_v50 = vpop.f32.mrb[25].mxu0 }
 0x12b   : > { %v566_v51 = vpop.f32.mrb[25].mxu1  ;;  %v1394_v52 = vpop.f32.mrb[26].mxu0 }
 0x12c   : > { %v1426_v53 = vpop.f32.mrb[26].mxu1  ;;  %v1188_v54 = vpack.c.bf16 %v1394_v52, %v1393_v48  ;;  %v441_v56 = vpop.f32.mrb[27].mxu0 }
 0x12d   : > { %v1268_v55 = vpack.c.bf16 %v1426_v53, %v1425_v49  ;;  %v569_v57 = vpop.f32.mrb[27].mxu1  ;;  %v1183_v58 = vpack.c.bf16 %v441_v56, %v438_v50 }
 0x12e   : > { %v1263_v59 = vpack.c.bf16 %v569_v57, %v566_v51  ;;  %1292 = vst [vmem:[%s1594_s7 + $0x68] sm:$0xff] %v1188_v54  }
 0x12f   : > { %1308 = vst [vmem:[%s1594_s7 + $0xe8] sm:$0xff] %v1268_v55   ;;  %1291 = vst [vmem:[%s1594_s7 + $0x60] sm:$0xff] %v1183_v58  }
 0x130   : > { %1307 = vst [vmem:[%s1594_s7 + $0xe0] sm:$0xff] %v1263_v59  }
 0x131   : > { %v1397_v60 = vpop.f32.mrb[28].mxu0 }
 0x132   : > { %v1429_v61 = vpop.f32.mrb[28].mxu1  ;;  %v454_v62 = vpop.f32.mrb[29].mxu0 }
 0x133   : > { %v582_v63 = vpop.f32.mrb[29].mxu1  ;;  %v1398_v0 = vpop.f32.mrb[30].mxu0 }
 0x134   : > { %v1430_v1 = vpop.f32.mrb[30].mxu1  ;;  %v1198_v2 = vpack.c.bf16 %v1398_v0, %v1397_v60  ;;  %v457_v4 = vpop.f32.mrb[31].mxu0 }
 0x135   : > { %v1278_v3 = vpack.c.bf16 %v1430_v1, %v1429_v61  ;;  %v585_v5 = vpop.f32.mrb[31].mxu1  ;;  %v1193_v6 = vpack.c.bf16 %v457_v4, %v454_v62 }
 0x136   : > { %v1273_v7 = vpack.c.bf16 %v585_v5, %v582_v63  ;;  %1294 = vst [vmem:[%s1594_s7 + $0x78] sm:$0xff] %v1198_v2  }
 0x137   : > { %1310 = vst [vmem:[%s1594_s7 + $0xf8] sm:$0xff] %v1278_v3   ;;  %1293 = vst [vmem:[%s1594_s7 + $0x70] sm:$0xff] %v1193_v6  }
 0x138   : > { %1309 = vst [vmem:[%s1594_s7 + $0xf0] sm:$0xff] %v1273_v7  }
 0x139 PF: > { %s12_s9 = sadd.s32 1, %s1469_s9  }
 0x13a   : > { %p9_p4 = scmp.ge.s32.totalorder %s12_s9, 5  }
 0x13c   :  { %11 = sbr.rel (!%p9_p4) target bundleno = 1 (0x1), region = 58 }

// kernel: igae_encoder.13
= control target key start
LH: loop header
LB: loop body
LE: loop exit
PB: predicated region body
PF: predicated region fallthrough
CT: control target
= control target key end

     0   :  { %s5519_s9 = smov 0   ;;  %s5521_s10 = smov 0   ;;  %s7187_s0 = inlined_call_operand.vmem [shape: bf16[1536,128], index: 0, kind: input, shape index: {}, may-alias: {0,1}]   ;;  %s7188_s1 = inlined_call_operand.vmem [shape: bf16[1536,128], index: 1, kind: input, shape index: {}, may-alias: {0,1}]   ;;  %s7189_s2 = inlined_call_operand.vmem [shape: f32[1536,1536], index: 2, kind: output, shape index: {}]  }
   0x1   :  { %s5523_s11 = smov 0   ;;  %s5525_s12 = smov 0  }
   0x2   :  { %s5527_s13 = smov 0   ;;  %s5529_s14 = smov 0  }
   0x3   :  { %s5531_s15 = smov 0  }
   0x4 LB: > { %s21_s16 = sadd.s32 1, %s5494_s13  ;;  %s24_s17 = sadd.s32 1, %s5498_s14  ;;  %s5502_s15 = sphi %s5531_s15, %s12_s15   ;;  %s5498_s14 = sphi %s5529_s14, %s7284_s14   ;;  %s5494_s13 = sphi %s5527_s13, %s7283_s13   ;;  %s5490_s12 = sphi %s5525_s12, %s7282_s12   ;;  %s5486_s11 = sphi %s5523_s11, %s7281_s11   ;;  %s5482_s10 = sphi %s5521_s10, %s7280_s10   ;;  %s5478_s9 = sphi %s5519_s9, %s7279_s9  }
   0x5   : > { %p22_p0 = scmp.ge.s32.totalorder %s21_s16, 3  ;;  %s3806_s18 = sadd.s32 4294967295, %s5502_s15  }
   0x6   : > { %p95_p1 = scmp.ne.s32.totalorder %s5482_s10, %s5478_s9  ;;  %p96_p2 = scmp.eq.s32.totalorder %s3806_s18, 8 }
   0x7   : > { %s7286_s16 = smov (%p22_p0, %s21_s16), 0  ;;  %s7288_s17 = smov (!%p22_p0, %s24_s17), %s5498_s14 }
   0x8   : > { %s81_s19 = ssub.s32 %s5494_s13, %s7286_s16  ;;  %p26_p3 = scmp.ge.s32.totalorder %s7288_s17, 3 }
   0x9   : > { %p3810_p4 = scmp.ge.s32.totalorder %s5502_s15, 1  ;;  %p5565_p5 = por %p96_p2, %p95_p1 }
   0xa   : > { %p138_p6 = scmp.lt.s32.totalorder %s5502_s15, 10  ;;  %s7290_s17 = smov (%p26_p3, %s7288_s17), 0 }
   0xb   : > { %s80_s21 = ssub.s32 %s5498_s14, %s7290_s17  ;;  %s85_s23 = sadd.s32 1, %s5482_s10 }
   0xc   : > { %p139_p7 = pnand %p3810_p4, %p138_p6  ;;  %s82_s22 = sor.u32 %s81_s19, %s80_s21 }
   0xd   : > { %p83_p8 = scmp.eq.s32.totalorder %s82_s22, 0 }
   0xe   : > { %142 = sbr.rel (%p139_p7) target bundleno = 927 (0x39f), region = 28 }
   0xf   : > { %s5576_s24 = scalar_select %p83_p8, %s5482_s10, %s85_s23  }
  0x15   : > { %s3814_s25 = sshll.u32 %s5486_s11, 6  ;;  %s3812_s30 = sshll.u32 %s5490_s12, 6 }
  0x16   : > { %p171_p9 = scmp.lt.s32.totalorder %s3814_s25, 191  ;;  %p165_p10 = scmp.lt.s32.totalorder %s3812_s30, 191 }
  0x17   : > { %s161_s7 = sand.u32 1, %s5478_s9   ;;  %s4138_s18 = sshll.u32 (%p5565_p5), %s5486_s11, 2 }
  0x18   : > { %s7292_s25 = smov (!%p171_p9, %s3814_s25), 191  ;;  %s7294_s30 = smov (!%p165_p10, %s3812_s30), 191 }
  0x19   : > { %s3815_s26 = sshll.u32 %s7292_s25, 2  ;;  %s3813_s3 = sshll.u32 %s7294_s30, 2 }
  0x1a   : > { %s5582_s29 = scalar_lea.vmem %s7188_s1, %s3815_s26  ;;  %s5606_s6 = scalar_lea.vmem %s7187_s0, %s3813_s3 }
  0x1b   : > { %v4360_v0 = vld [vmem:[%s5582_s29 + $0x40] sm:$0xff]   ;;  %v4364_v4 = vld [vmem:[%s5582_s29 + $0x48] sm:$0xff]   ;;  %v4368_v8 = vld [vmem:[%s5582_s29 + $0x50] sm:$0xff]   ;;  %s5670_s8 = sshll.u32 %s161_s7, 11  ;;  %s4303_s19 = smul.u32 (%p5565_p5), 768, %s5490_s12 }
  0x1c   : > { %v4361_v1 = vld [vmem:[%s5582_s29 + $0xc0] sm:$0xff]   ;;  %4143 = vmatprep.subr.bf16.mxu0 %v4360_v0  ;;  %v4365_v5 = vld [vmem:[%s5582_s29 + $0xc8] sm:$0xff]   ;;  %v4369_v9 = vld [vmem:[%s5582_s29 + $0xd0] sm:$0xff]   ;;  %s5687_s9 = scalar_lea.vmem [#allocation2], %s5670_s8 }
  0x1d   : > { %v4362_v2 = vld [vmem:[%s5582_s29] sm:$0xff]   ;;  %4223 = vmatprep.subr.bf16.mxu1 %v4361_v1  ;;  %v4366_v6 = vld [vmem:[%s5582_s29 + $0x8] sm:$0xff]   ;;  %v4370_v10 = vld [vmem:[%s5582_s29 + $0x10] sm:$0xff]   ;;  %s3199_s20 = sadd.s32 (%p5565_p5), %s4303_s19, %s4138_s18 }
  0x1e   : > { %v4363_v3 = vld [vmem:[%s5582_s29 + $0x80] sm:$0xff]   ;;  %4144 = vmatpush3.bf16.xpose.msra.mxu0 %v4362_v2  ;;  %v4367_v7 = vld [vmem:[%s5582_s29 + $0x88] sm:$0xff]   ;;  %v4371_v11 = vld [vmem:[%s5582_s29 + $0x90] sm:$0xff]   ;;  %s4140_s21 = sshll.u32 (%p5565_p5), %s3199_s20, 3 }
  0x1f   : > { %4224 = vmatpush3.bf16.xpose.msra.mxu1 %v4363_v3  ;;  %4145 = vmatprep.subr.bf16.mxu0 %v4364_v4  ;;  %v4372_v12 = vld [vmem:[%s5582_s29 + $0x58] sm:$0xff]   ;;  %v4376_v16 = vld [vmem:[%s5582_s29 + $0x60] sm:$0xff]   ;;  %v4380_v21 = vld [vmem:[%s5582_s29 + $0x68] sm:$0xff]   ;;  %s6664_s12 = scalar_lea.vmem (%p5565_p5), %s7189_s2, %s4140_s21 }
  0x20   : > { %4225 = vmatprep.subr.bf16.mxu1 %v4365_v5  ;;  %v4373_v13 = vld [vmem:[%s5582_s29 + $0xd8] sm:$0xff]   ;;  %v4377_v17 = vld [vmem:[%s5582_s29 + $0xe0] sm:$0xff]   ;;  %v4381_v22 = vld [vmem:[%s5582_s29 + $0xe8] sm:$0xff]  }
  0x21   : > { %v4374_v14 = vld [vmem:[%s5582_s29 + $0x18] sm:$0xff]   ;;  %v4378_v18 = vld [vmem:[%s5582_s29 + $0x20] sm:$0xff]   ;;  %v4382_v23 = vld [vmem:[%s5582_s29 + $0x28] sm:$0xff]  }
  0x22   : > { %v4375_v15 = vld [vmem:[%s5582_s29 + $0x98] sm:$0xff]   ;;  %v4379_v19 = vld [vmem:[%s5582_s29 + $0xa0] sm:$0xff]   ;;  %v4383_v24 = vld [vmem:[%s5582_s29 + $0xa8] sm:$0xff]  }
  0x23   : > { %v4392_v20 = vld [vmem:[%s5606_s6] sm:$0xff]   ;;  %v4384_v25 = vld [vmem:[%s5582_s29 + $0x70] sm:$0xff]   ;;  %v4388_v29 = vld [vmem:[%s5582_s29 + $0x78] sm:$0xff]  }
  0x24   : > { %4159 = vmatprep.mubr.bf16.mxu0 %v4392_v20  ;;  %4239 = vmatprep.mubr.bf16.mxu1 %v4392_v20  ;;  %v4385_v26 = vld [vmem:[%s5582_s29 + $0xf0] sm:$0xff]   ;;  %v4389_v30 = vld [vmem:[%s5582_s29 + $0xf8] sm:$0xff]   ;;  %v4393_v33 = vld [vmem:[%s5606_s6 + $0x8] sm:$0xff]  }
  0x25   : > { %v4386_v27 = vld [vmem:[%s5582_s29 + $0x30] sm:$0xff]   ;;  %v4390_v31 = vld [vmem:[%s5582_s29 + $0x38] sm:$0xff]   ;;  %v4396_v36 = vld [vmem:[%s5606_s6 + $0x20] sm:$0xff]  }
  0x26   : > { %4146 = vmatpush3.bf16.xpose.msra.mxu0 %v4366_v6  ;;  %v4387_v28 = vld [vmem:[%s5582_s29 + $0xb0] sm:$0xff]   ;;  %v4391_v32 = vld [vmem:[%s5582_s29 + $0xb8] sm:$0xff]   ;;  %v4397_v37 = vld [vmem:[%s5606_s6 + $0x28] sm:$0xff]  }
  0x27   : > { %4226 = vmatpush3.bf16.xpose.msra.mxu1 %v4367_v7  ;;  %4147 = vmatprep.subr.bf16.mxu0 %v4368_v8  ;;  %v4394_v34 = vld [vmem:[%s5606_s6 + $0x10] sm:$0xff]   ;;  %v4395_v35 = vld [vmem:[%s5606_s6 + $0x18] sm:$0xff]   ;;  %v4400_v40 = vld [vmem:[%s5606_s6 + $0x40] sm:$0xff]  }
  0x28   : > { %4227 = vmatprep.subr.bf16.mxu1 %v4369_v9  ;;  %v4398_v38 = vld [vmem:[%s5606_s6 + $0x30] sm:$0xff]   ;;  %v4399_v39 = vld [vmem:[%s5606_s6 + $0x38] sm:$0xff]   ;;  %v4401_v41 = vld [vmem:[%s5606_s6 + $0x48] sm:$0xff]  }
  0x29   : > { %v4402_v42 = vld [vmem:[%s5606_s6 + $0x50] sm:$0xff]   ;;  %v4403_v43 = vld [vmem:[%s5606_s6 + $0x58] sm:$0xff]   ;;  %v4404_v44 = vld [vmem:[%s5606_s6 + $0x60] sm:$0xff]  }
  0x2a   : > { %v4405_v45 = vld [vmem:[%s5606_s6 + $0x68] sm:$0xff]   ;;  %v4406_v46 = vld [vmem:[%s5606_s6 + $0x70] sm:$0xff]   ;;  %v4407_v47 = vld [vmem:[%s5606_s6 + $0x78] sm:$0xff]  }
  0x2b   : > { %v4408_v48 = vld [vmem:[%s5606_s6 + $0x80] sm:$0xff]   ;;  %v4409_v49 = vld [vmem:[%s5606_s6 + $0x88] sm:$0xff]   ;;  %v4410_v50 = vld [vmem:[%s5606_s6 + $0x90] sm:$0xff]  }
  0x2c   : > { %v4411_v51 = vld [vmem:[%s5606_s6 + $0x98] sm:$0xff]   ;;  %v4412_v52 = vld [vmem:[%s5606_s6 + $0xa0] sm:$0xff]   ;;  %v4413_v53 = vld [vmem:[%s5606_s6 + $0xa8] sm:$0xff]  }
  0x2d   : > { %v4414_v54 = vld [vmem:[%s5606_s6 + $0xb0] sm:$0xff]   ;;  %v4415_v55 = vld [vmem:[%s5606_s6 + $0xb8] sm:$0xff]   ;;  %v4416_v56 = vld [vmem:[%s5606_s6 + $0xc0] sm:$0xff]  }
  0x2e   : > { %4148 = vmatpush3.bf16.xpose.msra.mxu0 %v4370_v10  ;;  %v4417_v57 = vld [vmem:[%s5606_s6 + $0xc8] sm:$0xff]   ;;  %v4418_v58 = vld [vmem:[%s5606_s6 + $0xd0] sm:$0xff]   ;;  %v4419_v59 = vld [vmem:[%s5606_s6 + $0xd8] sm:$0xff]  }
  0x2f   : > { %4228 = vmatpush3.bf16.xpose.msra.mxu1 %v4371_v11  ;;  %4149 = vmatprep.subr.bf16.mxu0 %v4372_v12  ;;  %v4420_v0 = vld [vmem:[%s5606_s6 + $0xe0] sm:$0xff]  }
  0x30   : > { %4229 = vmatprep.subr.bf16.mxu1 %v4373_v13 }
  0x36   : > { %4150 = vmatpush3.bf16.xpose.msra.mxu0 %v4374_v14 }
  0x37   : > { %4230 = vmatpush3.bf16.xpose.msra.mxu1 %v4375_v15  ;;  %4151 = vmatprep.subr.bf16.mxu0 %v4376_v16 }
  0x38   : > { %4231 = vmatprep.subr.bf16.mxu1 %v4377_v17  ;;  %v4421_v17 = vld [vmem:[%s5606_s6 + $0xe8] sm:$0xff]  }
  0x3e   : > { %4152 = vmatpush3.bf16.xpose.msra.mxu0 %v4378_v18 }
  0x3f   : > { %4232 = vmatpush3.bf16.xpose.msra.mxu1 %v4379_v19  ;;  %4153 = vmatprep.subr.bf16.mxu0 %v4380_v21 }
  0x40   : > { %4233 = vmatprep.subr.bf16.mxu1 %v4381_v22 }
  0x46   : > { %4154 = vmatpush3.bf16.xpose.msra.mxu0 %v4382_v23 }
  0x47   : > { %4234 = vmatpush3.bf16.xpose.msra.mxu1 %v4383_v24  ;;  %4155 = vmatprep.subr.bf16.mxu0 %v4384_v25 }
  0x48   : > { %4235 = vmatprep.subr.bf16.mxu1 %v4385_v26 }
  0x4e   : > { %4156 = vmatpush3.bf16.xpose.msra.mxu0 %v4386_v27 }
  0x4f   : > { %4236 = vmatpush3.bf16.xpose.msra.mxu1 %v4387_v28  ;;  %4157 = vmatprep.subr.bf16.mxu0 %v4388_v29 }
  0x50   : > { %4237 = vmatprep.subr.bf16.mxu1 %v4389_v30 }
  0x56   : > { %4158 = vmatpush3.bf16.xpose.msra.mxu0 %v4390_v31 }
  0x57   : > { %4238 = vmatpush3.bf16.xpose.msra.mxu1 %v4391_v32 }
  0x5d   : > { %4160 = vmatmul.mubr.bf16.vlgmr.msra.gmra.mrb[0].mxu0 %v4392_v20 }
  0x5e   : > { %4240 = vmatmul.mubr.bf16.vlgmr.msra.gmra.mrb[0].mxu1 %v4392_v20  ;;  %4161 = vmatprep.mubr.bf16.mxu0 %v4393_v33 }
  0x5f   : > { %4241 = vmatprep.mubr.bf16.mxu1 %v4393_v33 }
  0x65   : > { %4162 = vmatmul.mubr.bf16.gmra.mrb[4].mxu0 %v4393_v33 }
  0x66   : > { %4242 = vmatmul.mubr.bf16.gmra.mrb[4].mxu1 %v4393_v33  ;;  %4163 = vmatprep.mubr.bf16.mxu0 %v4394_v34 }
  0x67   : > { %4243 = vmatprep.mubr.bf16.mxu1 %v4394_v34 }
  0x6d   : > { %4164 = vmatmul.mubr.bf16.gmra.mrb[8].mxu0 %v4394_v34 }
  0x6e   : > { %4244 = vmatmul.mubr.bf16.gmra.mrb[8].mxu1 %v4394_v34  ;;  %4165 = vmatprep.mubr.bf16.mxu0 %v4395_v35 }
  0x6f   : > { %4245 = vmatprep.mubr.bf16.mxu1 %v4395_v35 }
  0x75   : > { %4166 = vmatmul.mubr.bf16.gmra.mrb[12].mxu0 %v4395_v35 }
  0x76   : > { %4246 = vmatmul.mubr.bf16.gmra.mrb[12].mxu1 %v4395_v35  ;;  %4167 = vmatprep.mubr.bf16.mxu0 %v4396_v36 }
  0x77   : > { %4247 = vmatprep.mubr.bf16.mxu1 %v4396_v36 }
  0x7d   : > { %4168 = vmatmul.mubr.bf16.gmra.mrb[16].mxu0 %v4396_v36 }
  0x7e   : > { %4248 = vmatmul.mubr.bf16.gmra.mrb[16].mxu1 %v4396_v36  ;;  %4169 = vmatprep.mubr.bf16.mxu0 %v4397_v37 }
  0x7f   : > { %4249 = vmatprep.mubr.bf16.mxu1 %v4397_v37 }
  0x85   : > { %4170 = vmatmul.mubr.bf16.gmra.mrb[20].mxu0 %v4397_v37 }
  0x86   : > { %4250 = vmatmul.mubr.bf16.gmra.mrb[20].mxu1 %v4397_v37  ;;  %4171 = vmatprep.mubr.bf16.mxu0 %v4398_v38 }
  0x87   : > { %4251 = vmatprep.mubr.bf16.mxu1 %v4398_v38 }
  0x8d   : > { %4172 = vmatmul.mubr.bf16.gmra.mrb[24].mxu0 %v4398_v38 }
  0x8e   : > { %4252 = vmatmul.mubr.bf16.gmra.mrb[24].mxu1 %v4398_v38  ;;  %4173 = vmatprep.mubr.bf16.mxu0 %v4399_v39 }
  0x8f   : > { %4253 = vmatprep.mubr.bf16.mxu1 %v4399_v39 }
  0x95   : > { %4174 = vmatmul.mubr.bf16.gmra.mrb[28].mxu0 %v4399_v39 }
  0x96   : > { %4254 = vmatmul.mubr.bf16.gmra.mrb[28].mxu1 %v4399_v39  ;;  %4175 = vmatprep.mubr.bf16.mxu0 %v4400_v40 }
  0x97   : > { %4255 = vmatprep.mubr.bf16.mxu1 %v4400_v40 }
  0x9d   : > { %4176 = vmatmul.mubr.bf16.gmra.mrb[32].mxu0 %v4400_v40 }
  0x9e   : > { %4256 = vmatmul.mubr.bf16.gmra.mrb[32].mxu1 %v4400_v40  ;;  %4177 = vmatprep.mubr.bf16.mxu0 %v4401_v41 }
  0x9f   : > { %4257 = vmatprep.mubr.bf16.mxu1 %v4401_v41 }
  0xa5   : > { %4178 = vmatmul.mubr.bf16.gmra.mrb[36].mxu0 %v4401_v41 }
  0xa6   : > { %4258 = vmatmul.mubr.bf16.gmra.mrb[36].mxu1 %v4401_v41  ;;  %4179 = vmatprep.mubr.bf16.mxu0 %v4402_v42 }
  0xa7   : > { %4259 = vmatprep.mubr.bf16.mxu1 %v4402_v42 }
  0xad   : > { %4180 = vmatmul.mubr.bf16.gmra.mrb[40].mxu0 %v4402_v42 }
  0xae   : > { %4260 = vmatmul.mubr.bf16.gmra.mrb[40].mxu1 %v4402_v42  ;;  %4181 = vmatprep.mubr.bf16.mxu0 %v4403_v43  ;;  %v4422_v42 = vld [vmem:[%s5606_s6 + $0xf0] sm:$0xff]  }
  0xaf   : > { %4261 = vmatprep.mubr.bf16.mxu1 %v4403_v43 }
  0xb5   : > { %4182 = vmatmul.mubr.bf16.gmra.mrb[44].mxu0 %v4403_v43 }
  0xb6   : > { %4262 = vmatmul.mubr.bf16.gmra.mrb[44].mxu1 %v4403_v43  ;;  %4183 = vmatprep.mubr.bf16.mxu0 %v4404_v44 }
  0xb7   : > { %4263 = vmatprep.mubr.bf16.mxu1 %v4404_v44 }
  0xbd   : > { %4184 = vmatmul.mubr.bf16.gmra.mrb[48].mxu0 %v4404_v44 }
  0xbe   : > { %4264 = vmatmul.mubr.bf16.gmra.mrb[48].mxu1 %v4404_v44  ;;  %4185 = vmatprep.mubr.bf16.mxu0 %v4405_v45 }
  0xbf   : > { %4265 = vmatprep.mubr.bf16.mxu1 %v4405_v45 }
  0xc5   : > { %4186 = vmatmul.mubr.bf16.gmra.mrb[52].mxu0 %v4405_v45 }
  0xc6   : > { %4266 = vmatmul.mubr.bf16.gmra.mrb[52].mxu1 %v4405_v45  ;;  %4187 = vmatprep.mubr.bf16.mxu0 %v4406_v46 }
  0xc7   : > { %4267 = vmatprep.mubr.bf16.mxu1 %v4406_v46 }
  0xcd   : > { %4188 = vmatmul.mubr.bf16.gmra.mrb[56].mxu0 %v4406_v46 }
  0xce   : > { %4268 = vmatmul.mubr.bf16.gmra.mrb[56].mxu1 %v4406_v46  ;;  %4189 = vmatprep.mubr.bf16.mxu0 %v4407_v47 }
  0xcf   : > { %4269 = vmatprep.mubr.bf16.mxu1 %v4407_v47 }
  0xd5   : > { %4190 = vmatmul.mubr.bf16.gmra.mrb[60].mxu0 %v4407_v47 }
  0xd6   : > { %4270 = vmatmul.mubr.bf16.gmra.mrb[60].mxu1 %v4407_v47  ;;  %4191 = vmatprep.mubr.bf16.mxu0 %v4408_v48 }
  0xd7   : > { %4271 = vmatprep.mubr.bf16.mxu1 %v4408_v48 }
  0xdd   : > { %4192 = vmatmul.mubr.bf16.gmra.mrb[64].mxu0 %v4408_v48 }
  0xde   : > { %4272 = vmatmul.mubr.bf16.gmra.mrb[64].mxu1 %v4408_v48  ;;  %4193 = vmatprep.mubr.bf16.mxu0 %v4409_v49 }
  0xdf   : > { %4273 = vmatprep.mubr.bf16.mxu1 %v4409_v49 }
  0xe5   : > { %4194 = vmatmul.mubr.bf16.gmra.mrb[68].mxu0 %v4409_v49 }
  0xe6   : > { %4274 = vmatmul.mubr.bf16.gmra.mrb[68].mxu1 %v4409_v49  ;;  %4195 = vmatprep.mubr.bf16.mxu0 %v4410_v50 }
  0xe7   : > { %4275 = vmatprep.mubr.bf16.mxu1 %v4410_v50 }
  0xed   : > { %4196 = vmatmul.mubr.bf16.gmra.mrb[72].mxu0 %v4410_v50 }
  0xee   : > { %4276 = vmatmul.mubr.bf16.gmra.mrb[72].mxu1 %v4410_v50  ;;  %4197 = vmatprep.mubr.bf16.mxu0 %v4411_v51 }
  0xef   : > { %4277 = vmatprep.mubr.bf16.mxu1 %v4411_v51 }
  0xf5   : > { %4198 = vmatmul.mubr.bf16.gmra.mrb[76].mxu0 %v4411_v51 }
  0xf6   : > { %4278 = vmatmul.mubr.bf16.gmra.mrb[76].mxu1 %v4411_v51  ;;  %4199 = vmatprep.mubr.bf16.mxu0 %v4412_v52 }
  0xf7   : > { %4279 = vmatprep.mubr.bf16.mxu1 %v4412_v52 }
  0xfd   : > { %4200 = vmatmul.mubr.bf16.gmra.mrb[80].mxu0 %v4412_v52 }
  0xfe   : > { %4280 = vmatmul.mubr.bf16.gmra.mrb[80].mxu1 %v4412_v52  ;;  %4201 = vmatprep.mubr.bf16.mxu0 %v4413_v53 }
  0xff   : > { %4281 = vmatprep.mubr.bf16.mxu1 %v4413_v53 }
 0x105   : > { %4202 = vmatmul.mubr.bf16.gmra.mrb[84].mxu0 %v4413_v53 }
 0x106   : > { %4282 = vmatmul.mubr.bf16.gmra.mrb[84].mxu1 %v4413_v53  ;;  %4203 = vmatprep.mubr.bf16.mxu0 %v4414_v54 }
 0x107   : > { %4283 = vmatprep.mubr.bf16.mxu1 %v4414_v54 }
 0x10d   : > { %4204 = vmatmul.mubr.bf16.gmra.mrb[88].mxu0 %v4414_v54 }
 0x10e   : > { %4284 = vmatmul.mubr.bf16.gmra.mrb[88].mxu1 %v4414_v54  ;;  %4205 = vmatprep.mubr.bf16.mxu0 %v4415_v55 }
 0x10f   : > { %4285 = vmatprep.mubr.bf16.mxu1 %v4415_v55 }
 0x115   : > { %4206 = vmatmul.mubr.bf16.gmra.mrb[92].mxu0 %v4415_v55 }
 0x116   : > { %4286 = vmatmul.mubr.bf16.gmra.mrb[92].mxu1 %v4415_v55  ;;  %4207 = vmatprep.mubr.bf16.mxu0 %v4416_v56 }
 0x117   : > { %4287 = vmatprep.mubr.bf16.mxu1 %v4416_v56 }
 0x11d   : > { %4208 = vmatmul.mubr.bf16.gmra.mrb[96].mxu0 %v4416_v56 }
 0x11e   : > { %4288 = vmatmul.mubr.bf16.gmra.mrb[96].mxu1 %v4416_v56  ;;  %4209 = vmatprep.mubr.bf16.mxu0 %v4417_v57 }
 0x11f   : > { %4289 = vmatprep.mubr.bf16.mxu1 %v4417_v57 }
 0x125   : > { %4210 = vmatmul.mubr.bf16.gmra.mrb[100].mxu0 %v4417_v57 }
 0x126   : > { %4290 = vmatmul.mubr.bf16.gmra.mrb[100].mxu1 %v4417_v57  ;;  %4211 = vmatprep.mubr.bf16.mxu0 %v4418_v58 }
 0x127   : > { %4291 = vmatprep.mubr.bf16.mxu1 %v4418_v58 }
 0x12d   : > { %4212 = vmatmul.mubr.bf16.gmra.mrb[104].mxu0 %v4418_v58 }
 0x12e   : > { %4292 = vmatmul.mubr.bf16.gmra.mrb[104].mxu1 %v4418_v58  ;;  %4213 = vmatprep.mubr.bf16.mxu0 %v4419_v59 }
 0x12f   : > { %4293 = vmatprep.mubr.bf16.mxu1 %v4419_v59 }
 0x130   : > { %v725_v60 = vpop.f32.mrb[0].mxu0 }
 0x131   : > { %v3880_v61 = vmul.f32 -1.442695, %v725_v60  ;;  %v1078_v62 = vpop.f32.mrb[0].mxu1  ;;  %v727_v63 = vpop.f32.mrb[1].mxu0 }
 0x132   : > { %v3882_v1 = vmul.f32 -1.442695, %v1078_v62  ;;  %v3881_v2 = vmul.f32 -1.442695, %v727_v63  ;;  %v1080_v3 = vpop.f32.mrb[1].mxu1  ;;  %v729_v4 = vpop.f32.mrb[2].mxu0 }
 0x133   : > { %4424 = vpow2.f32 %v3880_v61  ;;  %v3883_v5 = vmul.f32 -1.442695, %v1080_v3  ;;  %v3884_v6 = vmul.f32 -1.442695, %v729_v4  ;;  %v1082_v7 = vpop.f32.mrb[2].mxu1  ;;  %v731_v8 = vpop.f32.mrb[3].mxu0 }
 0x134   : > { %4426 = vpow2.f32 %v3882_v1  ;;  %v3886_v9 = vmul.f32 -1.442695, %v1082_v7  ;;  %v1084_v10 = vpop.f32.mrb[3].mxu1  ;;  %v3885_v11 = vmul.f32 -1.442695, %v731_v8 }
 0x135   : > { %4428 = vpow2.f32 %v3881_v2  ;;  %4214 = vmatmul.mubr.bf16.gmra.mrb[108].mxu0 %v4419_v59  ;;  %v3887_v12 = vmul.f32 -1.442695, %v1084_v10 }
 0x136   : > { %4430 = vpow2.f32 %v3883_v5  ;;  %4294 = vmatmul.mubr.bf16.gmra.mrb[108].mxu1 %v4419_v59  ;;  %4215 = vmatprep.mubr.bf16.mxu0 %v4420_v0  ;;  %v5684_v5 = vld [vmem:[%s5606_s6 + $0xf8] sm:$0xff]  }
 0x137   : > { %4432 = vpow2.f32 %v3884_v6  ;;  %4295 = vmatprep.mubr.bf16.mxu1 %v4420_v0 }
 0x138   : > { %4434 = vpow2.f32 %v3886_v9  ;;  %v735_v13 = vpop.f32.mrb[4].mxu0 }
 0x139   : > { %4436 = vpow2.f32 %v3885_v11  ;;  %v3888_v14 = vmul.f32 -1.442695, %v735_v13  ;;  %v1088_v15 = vpop.f32.mrb[4].mxu1  ;;  %v737_v16 = vpop.f32.mrb[5].mxu0 }
 0x13a   : > { %4438 = vpow2.f32 %v3887_v12  ;;  %v3890_v18 = vmul.f32 -1.442695, %v1088_v15  ;;  %v3889_v19 = vmul.f32 -1.442695, %v737_v16  ;;  %v1090_v20 = vpop.f32.mrb[5].mxu1  ;;  %v739_v21 = vpop.f32.mrb[6].mxu0 }
 0x13b   : > { %4440 = vpow2.f32 %v3888_v14  ;;  %v3891_v22 = vmul.f32 -1.442695, %v1090_v20  ;;  %v3892_v23 = vmul.f32 -1.442695, %v739_v21  ;;  %v1092_v24 = vpop.f32.mrb[6].mxu1  ;;  %v5652_v25 = vpop.f32.mrb[7].mxu0 }
 0x13c   : > { %4442 = vpow2.f32 %v3890_v18  ;;  %v5654_v26 = vpop.f32.mrb[7].mxu1  ;;  %v3894_v62 = vmul.f32 -1.442695, %v1092_v24  ;;  %v3893_v3 = vmul.f32 -1.442695, %v5652_v25 }
 0x13d   : > { %v4425_v27 = vpop.eup %4424  ;;  %4444 = vpow2.f32 %v3889_v19  ;;  %4216 = vmatmul.mubr.bf16.gmra.mrb[112].mxu0 %v4420_v0  ;;  %v3895_v7 = vmul.f32 -1.442695, %v5654_v26 }
 0x13e   : > { %v4427_v28 = vpop.eup %4426  ;;  %v2165_v29 = vadd.f32 1.0, %v4425_v27  ;;  %4446 = vpow2.f32 %v3891_v22  ;;  %4296 = vmatmul.mubr.bf16.gmra.mrb[112].mxu1 %v4420_v0  ;;  %4217 = vmatprep.mubr.bf16.mxu0 %v4421_v17 }
 0x13f   : > { %v4429_v30 = vpop.eup %4428  ;;  %v2167_v31 = vadd.f32 1.0, %v4427_v28  ;;  %4448 = vpow2.f32 %v3892_v23  ;;  %4297 = vmatprep.mubr.bf16.mxu1 %v4421_v17 }
 0x140   : > { %v4431_v32 = vpop.eup %4430  ;;  %4450 = vrcp.f32 %v2165_v29  ;;  %v2166_v33 = vadd.f32 1.0, %v4429_v30  ;;  %v745_v34 = vpop.f32.mrb[8].mxu0 }
 0x141   : > { %v4433_v35 = vpop.eup %4432  ;;  %4452 = vrcp.f32 %v2167_v31  ;;  %v2168_v36 = vadd.f32 1.0, %v4431_v32  ;;  %v5656_v37 = vpop.f32.mrb[8].mxu1  ;;  %v3896_v11 = vmul.f32 -1.442695, %v745_v34 }
 0x142   : > { %v5658_v38 = vpop.f32.mrb[9].mxu0  ;;  %v4435_v39 = vpop.eup %4434  ;;  %4454 = vrcp.f32 %v2166_v33  ;;  %v2169_v40 = vadd.f32 1.0, %v4433_v35  ;;  %v3898_v15 = vmul.f32 -1.442695, %v5656_v37 }
 0x143   : > { %v5661_v41 = vpop.f32.mrb[9].mxu1  ;;  %v4437_v43 = vpop.eup %4436  ;;  %4456 = vrcp.f32 %v2168_v36  ;;  %v2171_v44 = vadd.f32 1.0, %v4435_v39 }
 0x144   : > { %v5664_v45 = vpop.f32.mrb[10].mxu0  ;;  %v5666_v46 = vpop.f32.mrb[10].mxu1  ;;  %4458 = vrcp.f32 %v2169_v40  ;;  %v2170_v48 = vadd.f32 1.0, %v4437_v43  ;;  %v3899_v19 = vmul.f32 -1.442695, %v5661_v41 }
 0x145   : > { %v4439_v47 = vpop.eup %4438  ;;  %v5668_v49 = vpop.f32.mrb[11].mxu0  ;;  %4460 = vrcp.f32 %v2171_v44  ;;  %4218 = vmatmul.mubr.bf16.gmra.mrb[116].mxu0 %v4421_v17  ;;  %v3900_v21 = vmul.f32 -1.442695, %v5664_v45  ;;  %v3902_v24 = vmul.f32 -1.442695, %v5666_v46 }
 0x146   : > { %v4441_v50 = vpop.eup %4440  ;;  %v2172_v51 = vadd.f32 1.0, %v4439_v47  ;;  %v5672_v52 = vpop.f32.mrb[11].mxu1  ;;  %4462 = vrcp.f32 %v2170_v48  ;;  %4298 = vmatmul.mubr.bf16.gmra.mrb[116].mxu1 %v4421_v17  ;;  %4219 = vmatprep.mubr.bf16.mxu0 %v4422_v42  ;;  %v3897_v17 = vmul.f32 -1.442695, %v5658_v38  ;;  %v3901_v28 = vmul.f32 -1.442695, %v5668_v49 }
 0x147   : > { %v4443_v53 = vpop.eup %4442  ;;  %v2173_v54 = vadd.f32 1.0, %v4441_v50  ;;  %4299 = vmatprep.mubr.bf16.mxu1 %v4422_v42  ;;  %v3903_v32 = vmul.f32 -1.442695, %v5672_v52 }
 0x148   : > { %v4445_v55 = vpop.eup %4444  ;;  %4464 = vrcp.f32 %v2172_v51  ;;  %v2175_v56 = vadd.f32 1.0, %v4443_v53  ;;  %v5674_v59 = vpop.f32.mrb[12].mxu0 }
 0x149   : > { %v4447_v57 = vpop.eup %4446  ;;  %4466 = vrcp.f32 %v2173_v54  ;;  %v2174_v58 = vadd.f32 1.0, %v4445_v55  ;;  %v5676_v63 = vpop.f32.mrb[12].mxu1  ;;  %v3904_v36 = vmul.f32 -1.442695, %v5674_v59 }
 0x14a   : > { %v4449_v60 = vpop.eup %4448  ;;  %4468 = vrcp.f32 %v2175_v56  ;;  %v2176_v61 = vadd.f32 1.0, %v4447_v57  ;;  %v5678_v0 = vpop.f32.mrb[13].mxu0  ;;  %v3906_v39 = vmul.f32 -1.442695, %v5676_v63 }
 0x14b   : > { %v4451_v1 = vpop.eup %4450  ;;  %4470 = vrcp.f32 %v2174_v58  ;;  %v2177_v2 = vadd.f32 1.0, %v4449_v60  ;;  %v5681_v4 = vpop.f32.mrb[13].mxu1 }
 0x14c   : > { %v4453_v6 = vpop.eup %4452  ;;  %2933 = vst [vmem:[%s5687_s9] sm:$0xff] %v4451_v1  ;;  %4472 = vrcp.f32 %v2176_v61  ;;  %v5691_v8 = vpop.f32.mrb[14].mxu0 }
 0x14d   : > { %v5693_v9 = vpop.f32.mrb[14].mxu1  ;;  %v4455_v10 = vpop.eup %4454  ;;  %2935 = vst [vmem:[%s5687_s9 + $0x10] sm:$0xff] %v4453_v6  ;;  %4474 = vrcp.f32 %v2177_v2  ;;  %4220 = vmatmul.mubr.bf16.gmra.mrb[120].mxu0 %v4422_v42 }
 0x14e   : > { %v5696_v12 = vpop.f32.mrb[15].mxu0  ;;  %v5698_v13 = vpop.f32.mrb[15].mxu1  ;;  %2934 = vst [vmem:[%s5687_s9 + $0x8] sm:$0xff] %v4455_v10  ;;  %4476 = vpow2.f32 %v3894_v62  ;;  %4300 = vmatmul.mubr.bf16.gmra.mrb[120].mxu1 %v4422_v42  ;;  %4221 = vmatprep.mubr.bf16.mxu0 %v5684_v5 }
 0x14f   : > { %v4457_v14 = vpop.eup %4456  ;;  %4478 = vpow2.f32 %v3893_v3  ;;  %4301 = vmatprep.mubr.bf16.mxu1 %v5684_v5 }
 0x150   : > { %v4459_v16 = vpop.eup %4458  ;;  %2936 = vst [vmem:[%s5687_s9 + $0x18] sm:$0xff] %v4457_v14  ;;  %4480 = vpow2.f32 %v3895_v7  ;;  %v5710_v22 = vpop.f32.mrb[16].mxu0 }
 0x151   : > { %v4461_v18 = vpop.eup %4460  ;;  %2937 = vst [vmem:[%s5687_s9 + $0x20] sm:$0xff] %v4459_v16  ;;  %4482 = vpow2.f32 %v3896_v11  ;;  %v5714_v25 = vpop.f32.mrb[16].mxu1 }
 0x152   : > { %v4463_v20 = vpop.eup %4462  ;;  %2939 = vst [vmem:[%s5687_s9 + $0x30] sm:$0xff] %v4461_v18  ;;  %4484 = vpow2.f32 %v3898_v15  ;;  %v5716_v26 = vpop.f32.mrb[17].mxu0 }
 0x153   : > { %v4465_v23 = vpop.eup %4464  ;;  %2938 = vst [vmem:[%s5687_s9 + $0x28] sm:$0xff] %v4463_v20  ;;  %4486 = vpow2.f32 %v3897_v17  ;;  %v5720_v29 = vpop.f32.mrb[17].mxu1  ;;  %v3905_v20 = vmul.f32 -1.442695, %v5678_v0 }
 0x154   : > { %v4467_v27 = vpop.eup %4466  ;;  %2940 = vst [vmem:[%s5687_s9 + $0x38] sm:$0xff] %v4465_v23  ;;  %v5722_v30 = vpop.f32.mrb[18].mxu0  ;;  %4488 = vpow2.f32 %v3899_v19 }
 0x155   : > { %v4469_v31 = vpop.eup %4468  ;;  %2941 = vst [vmem:[%s5687_s9 + $0x40] sm:$0xff] %v4467_v27  ;;  %v5726_v33 = vpop.f32.mrb[18].mxu1  ;;  %4490 = vpow2.f32 %v3900_v21  ;;  %4222 = vmatmul.mubr.bf16.gmra.mrb[124].mxu0 %v5684_v5 }
 0x156   : > { %v5728_v34 = vpop.f32.mrb[19].mxu0  ;;  %v4471_v35 = vpop.eup %4470  ;;  %2943 = vst [vmem:[%s5687_s9 + $0x50] sm:$0xff] %v4469_v31  ;;  %4492 = vpow2.f32 %v3902_v24  ;;  %4302 = vmatmul.mubr.bf16.gmra.mrb[124].mxu1 %v5684_v5 }
 0x157   : > { %v5732_v37 = vpop.f32.mrb[19].mxu1  ;;  %v4473_v38 = vpop.eup %4472  ;;  %2942 = vst [vmem:[%s5687_s9 + $0x48] sm:$0xff] %v4471_v35  ;;  %4494 = vpow2.f32 %v3901_v28  ;;  %v3907_v28 = vmul.f32 -1.442695, %v5681_v4  ;;  %v3908_v35 = vmul.f32 -1.442695, %v5691_v8 }
 0x158   : > { %v4475_v40 = vpop.eup %4474  ;;  %2944 = vst [vmem:[%s5687_s9 + $0x58] sm:$0xff] %v4473_v38  ;;  %4496 = vpow2.f32 %v3903_v32  ;;  %v5740_v44 = vpop.f32.mrb[20].mxu0  ;;  %v3910_v38 = vmul.f32 -1.442695, %v5693_v9  ;;  %v3909_v4 = vmul.f32 -1.442695, %v5696_v12 }
 0x159   : > { %v4477_v41 = vpop.eup %4476  ;;  %2945 = vst [vmem:[%s5687_s9 + $0x60] sm:$0xff] %v4475_v40  ;;  %4498 = vpow2.f32 %v3904_v36  ;;  %v5742_v47 = vpop.f32.mrb[20].mxu1  ;;  %v3911_v8 = vmul.f32 -1.442695, %v5698_v13  ;;  %v3914_v12 = vmul.f32 -1.442695, %v5714_v25 }
 0x15a   : > { %v4479_v42 = vpop.eup %4478  ;;  %v2179_v43 = vadd.f32 1.0, %v4477_v41  ;;  %4500 = vpow2.f32 %v3906_v39  ;;  %v5744_v48 = vpop.f32.mrb[21].mxu0  ;;  %v3915_v25 = vmul.f32 -1.442695, %v5720_v29 }
 0x15b   : > { %v4481_v45 = vpop.eup %4480  ;;  %v2178_v46 = vadd.f32 1.0, %v4479_v42  ;;  %v5746_v51 = vpop.f32.mrb[21].mxu1 }
 0x15c   : > { %v4483_v49 = vpop.eup %4482  ;;  %4502 = vrcp.f32 %v2179_v43  ;;  %v2180_v50 = vadd.f32 1.0, %v4481_v45  ;;  %v5748_v54 = vpop.f32.mrb[22].mxu0  ;;  %v3912_v43 = vmul.f32 -1.442695, %v5710_v22  ;;  %v3913_v22 = vmul.f32 -1.442695, %v5716_v26 }
 0x15d   : > { %v4485_v52 = vpop.eup %4484  ;;  %4504 = vrcp.f32 %v2178_v46  ;;  %v2181_v53 = vadd.f32 1.0, %v4483_v49  ;;  %v5750_v55 = vpop.f32.mrb[22].mxu1 }
 0x15e   : > { %v4487_v56 = vpop.eup %4486  ;;  %4506 = vrcp.f32 %v2180_v50  ;;  %v2183_v57 = vadd.f32 1.0, %v4485_v52  ;;  %v5752_v58 = vpop.f32.mrb[23].mxu0 }
 0x15f   : > { %v4489_v59 = vpop.eup %4488  ;;  %4508 = vrcp.f32 %v2181_v53  ;;  %v2182_v60 = vadd.f32 1.0, %v4487_v56  ;;  %v5754_v61 = vpop.f32.mrb[23].mxu1 }
 0x160   : > { %v4491_v62 = vpop.eup %4490  ;;  %4510 = vrcp.f32 %v2183_v57  ;;  %v2184_v63 = vadd.f32 1.0, %v4489_v59  ;;  %v5756_v6 = vpop.f32.mrb[24].mxu0 }
 0x161   : > { %v4493_v1 = vpop.eup %4492  ;;  %4512 = vrcp.f32 %v2182_v60  ;;  %v2185_v2 = vadd.f32 1.0, %v4491_v62  ;;  %v5758_v11 = vpop.f32.mrb[24].mxu1  ;;  %v3916_v60 = vmul.f32 -1.442695, %v5722_v30  ;;  %v3918_v62 = vmul.f32 -1.442695, %v5726_v33 }
 0x162   : > { %v4495_v3 = vpop.eup %4494  ;;  %4514 = vrcp.f32 %v2184_v63  ;;  %v2187_v5 = vadd.f32 1.0, %v4493_v1  ;;  %v5760_v14 = vpop.f32.mrb[25].mxu0  ;;  %v3917_v1 = vmul.f32 -1.442695, %v5728_v34 }
 0x163   : > { %v4497_v7 = vpop.eup %4496  ;;  %4516 = vrcp.f32 %v2185_v2  ;;  %v2186_v10 = vadd.f32 1.0, %v4495_v3  ;;  %v5762_v17 = vpop.f32.mrb[25].mxu1 }
 0x164   : > { %v4499_v15 = vpop.eup %4498  ;;  %4518 = vrcp.f32 %v2187_v5  ;;  %v2188_v16 = vadd.f32 1.0, %v4497_v7  ;;  %v5765_v21 = vpop.f32.mrb[26].mxu0 }
 0x165   : > { %v4501_v18 = vpop.eup %4500  ;;  %4520 = vrcp.f32 %v2186_v10  ;;  %v2189_v19 = vadd.f32 1.0, %v4499_v15  ;;  %v5767_v23 = vpop.f32.mrb[26].mxu1 }
 0x166   : > { %v4503_v24 = vpop.eup %4502  ;;  %4522 = vrcp.f32 %v2188_v16  ;;  %v2191_v27 = vadd.f32 1.0, %v4501_v18  ;;  %v5770_v31 = vpop.f32.mrb[27].mxu0 }
 0x167   : > { %v4505_v32 = vpop.eup %4504  ;;  %2947 = vst [vmem:[%s5687_s9 + $0x70] sm:$0xff] %v4503_v24  ;;  %4524 = vrcp.f32 %v2189_v19  ;;  %v5774_v0 = vpop.f32.mrb[27].mxu1 }
 0x168   : > { %v4507_v36 = vpop.eup %4506  ;;  %2946 = vst [vmem:[%s5687_s9 + $0x68] sm:$0xff] %v4505_v32  ;;  %4526 = vrcp.f32 %v2191_v27  ;;  %v5782_v41 = vpop.f32.mrb[28].mxu0 }
 0x169   : > { %v4509_v39 = vpop.eup %4508  ;;  %2948 = vst [vmem:[%s5687_s9 + $0x78] sm:$0xff] %v4507_v36  ;;  %4528 = vpow2.f32 %v3905_v20  ;;  %v5786_v9 = vpop.f32.mrb[28].mxu1 }
 0x16a   : > { %v4511_v40 = vpop.eup %4510  ;;  %2949 = vst [vmem:[%s5687_s9 + $0x80] sm:$0xff] %v4509_v39  ;;  %4530 = vpow2.f32 %v3907_v28  ;;  %v5788_v45 = vpop.f32.mrb[29].mxu0 }
 0x16b   : > { %v4513_v42 = vpop.eup %4512  ;;  %2951 = vst [vmem:[%s5687_s9 + $0x90] sm:$0xff] %v4511_v40  ;;  %4532 = vpow2.f32 %v3908_v35  ;;  %v5792_v49 = vpop.f32.mrb[29].mxu1 }
 0x16c   : > { %v4515_v46 = vpop.eup %4514  ;;  %2950 = vst [vmem:[%s5687_s9 + $0x88] sm:$0xff] %v4513_v42  ;;  %4534 = vpow2.f32 %v3910_v38  ;;  %v5794_v13 = vpop.f32.mrb[30].mxu0 }
 0x16d   : > { %v4517_v50 = vpop.eup %4516  ;;  %2952 = vst [vmem:[%s5687_s9 + $0x98] sm:$0xff] %v4515_v46  ;;  %4536 = vpow2.f32 %v3909_v4  ;;  %v5798_v52 = vpop.f32.mrb[30].mxu1 }
 0x16e   : > { %v5800_v53 = vpop.f32.mrb[31].mxu0  ;;  %v4519_v56 = vpop.eup %4518  ;;  %2953 = vst [vmem:[%s5687_s9 + $0xa0] sm:$0xff] %v4517_v50  ;;  %4538 = vpow2.f32 %v3911_v8 }
 0x16f   : > { %v5804_v57 = vpop.f32.mrb[31].mxu1  ;;  %v4521_v59 = vpop.eup %4520  ;;  %2955 = vst [vmem:[%s5687_s9 + $0xb0] sm:$0xff] %v4519_v56  ;;  %4540 = vpow2.f32 %v3912_v43 }
 0x170   : > { %v4523_v26 = vpop.eup %4522  ;;  %2954 = vst [vmem:[%s5687_s9 + $0xa8] sm:$0xff] %v4521_v59  ;;  %4542 = vpow2.f32 %v3914_v12  ;;  %v5813_v29 = vpop.f32.mrb[32].mxu0 }
 0x171   : > { %v4525_v63 = vpop.eup %4524  ;;  %2956 = vst [vmem:[%s5687_s9 + $0xb8] sm:$0xff] %v4523_v26  ;;  %4544 = vpow2.f32 %v3913_v22  ;;  %v5816_v5 = vpop.f32.mrb[32].mxu1 }
 0x172   : > { %v4527_v2 = vpop.eup %4526  ;;  %2957 = vst [vmem:[%s5687_s9 + $0xc0] sm:$0xff] %v4525_v63  ;;  %4546 = vpow2.f32 %v3915_v25  ;;  %v5818_v30 = vpop.f32.mrb[33].mxu0 }
 0x173   : > { %v4529_v3 = vpop.eup %4528  ;;  %2959 = vst [vmem:[%s5687_s9 + $0xd0] sm:$0xff] %v4527_v2  ;;  %4548 = vpow2.f32 %v3916_v60  ;;  %v5820_v33 = vpop.f32.mrb[33].mxu1 }
 0x174   : > { %v4531_v7 = vpop.eup %4530  ;;  %v2190_v10 = vadd.f32 1.0, %v4529_v3  ;;  %4550 = vpow2.f32 %v3918_v62  ;;  %v5822_v34 = vpop.f32.mrb[34].mxu0 }
 0x175   : > { %v4533_v15 = vpop.eup %4532  ;;  %v2192_v16 = vadd.f32 1.0, %v4531_v7  ;;  %4552 = vpow2.f32 %v3917_v1  ;;  %v5824_v18 = vpop.f32.mrb[34].mxu1  ;;  %v3919_v7 = vmul.f32 -1.442695, %v5732_v37  ;;  %v3921_v37 = vmul.f32 -1.442695, %v5744_v48 }
 0x176   : > { %v4535_v19 = vpop.eup %4534  ;;  %4554 = vrcp.f32 %v2190_v10  ;;  %v2193_v20 = vadd.f32 1.0, %v4533_v15  ;;  %v5826_v24 = vpop.f32.mrb[35].mxu0 }
 0x177   : > { %v4537_v27 = vpop.eup %4536  ;;  %4556 = vrcp.f32 %v2192_v16  ;;  %v2195_v28 = vadd.f32 1.0, %v4535_v19  ;;  %v5828_v32 = vpop.f32.mrb[35].mxu1  ;;  %v3920_v19 = vmul.f32 -1.442695, %v5740_v44 }
 0x178   : > { %v4539_v35 = vpop.eup %4538  ;;  %4558 = vrcp.f32 %v2193_v20  ;;  %v2194_v36 = vadd.f32 1.0, %v4537_v27  ;;  %v5830_v8 = vpop.f32.mrb[36].mxu0  ;;  %v3922_v27 = vmul.f32 -1.442695, %v5742_v47  ;;  %v3924_v47 = vmul.f32 -1.442695, %v5748_v54 }
 0x179   : > { %v4541_v38 = vpop.eup %4540  ;;  %4560 = vrcp.f32 %v2195_v28  ;;  %v2196_v39 = vadd.f32 1.0, %v4539_v35  ;;  %v5832_v46 = vpop.f32.mrb[36].mxu1  ;;  %v3925_v54 = vmul.f32 -1.442695, %v5752_v58 }
 0x17a   : > { %v4543_v4 = vpop.eup %4542  ;;  %4562 = vrcp.f32 %v2194_v36  ;;  %v2197_v40 = vadd.f32 1.0, %v4541_v38  ;;  %v5834_v12 = vpop.f32.mrb[37].mxu0  ;;  %v3923_v38 = vmul.f32 -1.442695, %v5746_v51  ;;  %v3926_v51 = vmul.f32 -1.442695, %v5750_v55 }
 0x17b   : > { %v4545_v42 = vpop.eup %4544  ;;  %4564 = vrcp.f32 %v2196_v39  ;;  %v2199_v43 = vadd.f32 1.0, %v4543_v4  ;;  %v5836_v56 = vpop.f32.mrb[37].mxu1 }
 0x17c   : > { %v4547_v50 = vpop.eup %4546  ;;  %4566 = vrcp.f32 %v2197_v40  ;;  %v2198_v22 = vadd.f32 1.0, %v4545_v42  ;;  %v5838_v60 = vpop.f32.mrb[38].mxu0 }
 0x17d   : > { %v4549_v25 = vpop.eup %4548  ;;  %4568 = vrcp.f32 %v2199_v43  ;;  %v2200_v59 = vadd.f32 1.0, %v4547_v50  ;;  %v5840_v26 = vpop.f32.mrb[38].mxu1 }
 0x17e   : > { %v4551_v62 = vpop.eup %4550  ;;  %4570 = vrcp.f32 %v2198_v22  ;;  %v2201_v63 = vadd.f32 1.0, %v4549_v25  ;;  %v5842_v1 = vpop.f32.mrb[39].mxu0 }
 0x17f   : > { %v4553_v2 = vpop.eup %4552  ;;  %4572 = vrcp.f32 %v2200_v59  ;;  %v2203_v3 = vadd.f32 1.0, %v4551_v62  ;;  %v5845_v10 = vpop.f32.mrb[39].mxu1  ;;  %v3927_v62 = vmul.f32 -1.442695, %v5754_v61 }
 0x180   : > { %v4555_v15 = vpop.eup %4554  ;;  %4574 = vrcp.f32 %v2201_v63  ;;  %v2202_v16 = vadd.f32 1.0, %v4553_v2  ;;  %v5852_v35 = vpop.f32.mrb[40].mxu0  ;;  %v3928_v63 = vmul.f32 -1.442695, %v5756_v6 }
 0x181   : > { %v4557_v20 = vpop.eup %4556  ;;  %2958 = vst [vmem:[%s5687_s9 + $0xc8] sm:$0xff] %v4555_v15  ;;  %4576 = vrcp.f32 %v2203_v3  ;;  %v5856_v44 = vpop.f32.mrb[40].mxu1  ;;  %v3930_v3 = vmul.f32 -1.442695, %v5758_v11 }
 0x182   : > { %v4559_v28 = vpop.eup %4558  ;;  %2960 = vst [vmem:[%s5687_s9 + $0xd8] sm:$0xff] %v4557_v20  ;;  %4578 = vrcp.f32 %v2202_v16  ;;  %v5858_v39 = vpop.f32.mrb[41].mxu0  ;;  %v3931_v16 = vmul.f32 -1.442695, %v5762_v17 }
 0x183   : > { %v4561_v36 = vpop.eup %4560  ;;  %2961 = vst [vmem:[%s5687_s9 + $0xe0] sm:$0xff] %v4559_v28  ;;  %4580 = vpow2.f32 %v3919_v7  ;;  %v5862_v40 = vpop.f32.mrb[41].mxu1  ;;  %v3929_v7 = vmul.f32 -1.442695, %v5760_v14 }
 0x184   : > { %v4563_v4 = vpop.eup %4562  ;;  %2963 = vst [vmem:[%s5687_s9 + $0xf0] sm:$0xff] %v4561_v36  ;;  %4582 = vpow2.f32 %v3920_v19  ;;  %v5864_v48 = vpop.f32.mrb[42].mxu0 }
 0x185   : > { %v4565_v42 = vpop.eup %4564  ;;  %2962 = vst [vmem:[%s5687_s9 + $0xe8] sm:$0xff] %v4563_v4  ;;  %4584 = vpow2.f32 %v3922_v27  ;;  %v5868_v43 = vpop.f32.mrb[42].mxu1 }
 0x186   : > { %v5870_v50 = vpop.f32.mrb[43].mxu0  ;;  %v4567_v22 = vpop.eup %4566  ;;  %2964 = vst [vmem:[%s5687_s9 + $0xf8] sm:$0xff] %v4565_v42  ;;  %4586 = vpow2.f32 %v3921_v37 }
 0x187   : > { %v5874_v25 = vpop.f32.mrb[43].mxu1  ;;  %v4569_v59 = vpop.eup %4568  ;;  %2965 = vst [vmem:[%s5687_s9 + $0x100] sm:$0xff] %v4567_v22  ;;  %4588 = vpow2.f32 %v3923_v38 }
 0x188   : > { %v4571_v55 = vpop.eup %4570  ;;  %2967 = vst [vmem:[%s5687_s9 + $0x110] sm:$0xff] %v4569_v59  ;;  %4590 = vpow2.f32 %v3924_v47  ;;  %v5884_v15 = vpop.f32.mrb[44].mxu0 }
 0x189   : > { %v4573_v2 = vpop.eup %4572  ;;  %2966 = vst [vmem:[%s5687_s9 + $0x108] sm:$0xff] %v4571_v55  ;;  %4592 = vpow2.f32 %v3926_v51  ;;  %v5888_v6 = vpop.f32.mrb[44].mxu1 }
 0x18a   : > { %v4575_v58 = vpop.eup %4574  ;;  %2968 = vst [vmem:[%s5687_s9 + $0x118] sm:$0xff] %v4573_v2  ;;  %4594 = vpow2.f32 %v3925_v54  ;;  %v5890_v19 = vpop.f32.mrb[45].mxu0 }
 0x18b   : > { %v4577_v61 = vpop.eup %4576  ;;  %2969 = vst [vmem:[%s5687_s9 + $0x120] sm:$0xff] %v4575_v58  ;;  %4596 = vpow2.f32 %v3927_v62  ;;  %v5893_v11 = vpop.f32.mrb[45].mxu1 }
 0x18c   : > { %v4579_v20 = vpop.eup %4578  ;;  %2971 = vst [vmem:[%s5687_s9 + $0x130] sm:$0xff] %v4577_v61  ;;  %4598 = vpow2.f32 %v3928_v63  ;;  %v5895_v27 = vpop.f32.mrb[46].mxu0 }
 0x18d   : > { %v4581_v28 = vpop.eup %4580  ;;  %2970 = vst [vmem:[%s5687_s9 + $0x128] sm:$0xff] %v4579_v20  ;;  %4600 = vpow2.f32 %v3930_v3  ;;  %v5898_v14 = vpop.f32.mrb[46].mxu1 }
 0x18e   : > { %v5900_v37 = vpop.f32.mrb[47].mxu0  ;;  %v4583_v36 = vpop.eup %4582  ;;  %v2204_v17 = vadd.f32 1.0, %v4581_v28  ;;  %4602 = vpow2.f32 %v3929_v7 }
 0x18f   : > { %v5902_v38 = vpop.f32.mrb[47].mxu1  ;;  %v4585_v4 = vpop.eup %4584  ;;  %v2205_v47 = vadd.f32 1.0, %v4583_v36  ;;  %4604 = vpow2.f32 %v3931_v16 }
 0x190   : > { %v4587_v42 = vpop.eup %4586  ;;  %4606 = vrcp.f32 %v2204_v17  ;;  %v2207_v51 = vadd.f32 1.0, %v4585_v4  ;;  %v5904_v55 = vpop.f32.mrb[48].mxu0 }
 0x191   : > { %v4589_v22 = vpop.eup %4588  ;;  %4608 = vrcp.f32 %v2205_v47  ;;  %v2206_v54 = vadd.f32 1.0, %v4587_v42  ;;  %v5906_v3 = vpop.f32.mrb[48].mxu1 }
 0x192   : > { %v4591_v59 = vpop.eup %4590  ;;  %4610 = vrcp.f32 %v2207_v51  ;;  %v2208_v62 = vadd.f32 1.0, %v4589_v22  ;;  %v5908_v58 = vpop.f32.mrb[49].mxu0 }
 0x193   : > { %v4593_v63 = vpop.eup %4592  ;;  %4612 = vrcp.f32 %v2206_v54  ;;  %v2209_v2 = vadd.f32 1.0, %v4591_v59  ;;  %v5910_v16 = vpop.f32.mrb[49].mxu1 }
 0x194   : > { %v4595_v7 = vpop.eup %4594  ;;  %4614 = vrcp.f32 %v2208_v62  ;;  %v2211_v61 = vadd.f32 1.0, %v4593_v63  ;;  %v5912_v36 = vpop.f32.mrb[50].mxu0 }
 0x195   : > { %v4597_v20 = vpop.eup %4596  ;;  %4616 = vrcp.f32 %v2209_v2  ;;  %v2210_v28 = vadd.f32 1.0, %v4595_v7  ;;  %v5914_v17 = vpop.f32.mrb[50].mxu1  ;;  %v3932_v7 = vmul.f32 -1.442695, %v5765_v21  ;;  %v3935_v21 = vmul.f32 -1.442695, %v5774_v0 }
 0x196   : > { %7191 = vst [vmem:[#allocation3_spill] sm:$0xff] %v5914_v17  ;;  %v4599_v4 = vpop.eup %4598  ;;  %4618 = vrcp.f32 %v2211_v61  ;;  %v2212_v47 = vadd.f32 1.0, %v4597_v20  ;;  %v5916_v42 = vpop.f32.mrb[51].mxu0  ;;  %v3934_v20 = vmul.f32 -1.442695, %v5767_v23 }
 0x197   : > { %v4601_v51 = vpop.eup %4600  ;;  %4620 = vrcp.f32 %v2210_v28  ;;  %v2213_v22 = vadd.f32 1.0, %v4599_v4  ;;  %v5918_v54 = vpop.f32.mrb[51].mxu1  ;;  %v3938_v0 = vmul.f32 -1.442695, %v5786_v9 }
 0x198   : > { %v4603_v59 = vpop.eup %4602  ;;  %4622 = vrcp.f32 %v2212_v47  ;;  %v2215_v62 = vadd.f32 1.0, %v4601_v51  ;;  %v5922_v28 = vpop.f32.mrb[52].mxu0  ;;  %v3933_v47 = vmul.f32 -1.442695, %v5770_v31  ;;  %v3936_v31 = vmul.f32 -1.442695, %v5782_v41 }
 0x199   : > { %v4605_v63 = vpop.eup %4604  ;;  %4624 = vrcp.f32 %v2213_v22  ;;  %v2214_v2 = vadd.f32 1.0, %v4603_v59  ;;  %v5926_v51 = vpop.f32.mrb[52].mxu1 }
 0x19a   : > { %v4607_v17 = vpop.eup %4606  ;;  %4626 = vrcp.f32 %v2215_v62  ;;  %v2216_v61 = vadd.f32 1.0, %v4605_v63  ;;  %v5928_v22 = vpop.f32.mrb[53].mxu0 }
 0x19b   : > { %v4609_v4 = vpop.eup %4608  ;;  %2972 = vst [vmem:[%s5687_s9 + $0x138] sm:$0xff] %v4607_v17  ;;  %4628 = vrcp.f32 %v2214_v2  ;;  %v5932_v62 = vpop.f32.mrb[53].mxu1 }
 0x19c   : > { %v4611_v59 = vpop.eup %4610  ;;  %2973 = vst [vmem:[%s5687_s9 + $0x140] sm:$0xff] %v4609_v4  ;;  %4630 = vrcp.f32 %v2216_v61  ;;  %v5934_v23 = vpop.f32.mrb[54].mxu0 }
 0x19d   : > { %7192 = vst [vmem:[#allocation4_spill] sm:$0xff] %v5934_v23  ;;  %v4613_v63 = vpop.eup %4612  ;;  %2975 = vst [vmem:[%s5687_s9 + $0x150] sm:$0xff] %v4611_v59  ;;  %4632 = vpow2.f32 %v3932_v7  ;;  %v5938_v17 = vpop.f32.mrb[54].mxu1  ;;  %v3937_v7 = vmul.f32 -1.442695, %v5788_v45 }
 0x19e   : > { %v5940_v2 = vpop.f32.mrb[55].mxu0  ;;  %v4615_v4 = vpop.eup %4614  ;;  %2974 = vst [vmem:[%s5687_s9 + $0x148] sm:$0xff] %v4613_v63  ;;  %4634 = vpow2.f32 %v3934_v20  ;;  %v3939_v59 = vmul.f32 -1.442695, %v5792_v49  ;;  %v3940_v20 = vmul.f32 -1.442695, %v5794_v13 }
 0x19f   : > { %7193 = vst [vmem:[#allocation5_spill] sm:$0xff] %v5940_v2  ;;  %v5944_v61 = vpop.f32.mrb[55].mxu1  ;;  %v4617_v23 = vpop.eup %4616  ;;  %2976 = vst [vmem:[%s5687_s9 + $0x158] sm:$0xff] %v4615_v4  ;;  %4636 = vpow2.f32 %v3933_v47  ;;  %v3942_v47 = vmul.f32 -1.442695, %v5798_v52 }
 0x1a0   : > { %v4619_v41 = vpop.eup %4618  ;;  %2977 = vst [vmem:[%s5687_s9 + $0x160] sm:$0xff] %v4617_v23  ;;  %4638 = vpow2.f32 %v3935_v21  ;;  %v5954_v63 = vpop.f32.mrb[56].mxu0  ;;  %v3941_v21 = vmul.f32 -1.442695, %v5800_v53  ;;  %v3943_v13 = vmul.f32 -1.442695, %v5804_v57 }
 0x1a1   : > { %v4621_v2 = vpop.eup %4620  ;;  %2979 = vst [vmem:[%s5687_s9 + $0x170] sm:$0xff] %v4619_v41  ;;  %4640 = vpow2.f32 %v3936_v31  ;;  %v5958_v49 = vpop.f32.mrb[56].mxu1  ;;  %v3944_v53 = vmul.f32 -1.442695, %v5813_v29 }
 0x1a2   : > { %v4623_v9 = vpop.eup %4622  ;;  %2978 = vst [vmem:[%s5687_s9 + $0x168] sm:$0xff] %v4621_v2  ;;  %4642 = vpow2.f32 %v3938_v0  ;;  %v5960_v23 = vpop.f32.mrb[57].mxu0 }
 0x1a3   : > { %v4625_v45 = vpop.eup %4624  ;;  %2980 = vst [vmem:[%s5687_s9 + $0x178] sm:$0xff] %v4623_v9  ;;  %4644 = vpow2.f32 %v3937_v7  ;;  %v5964_v2 = vpop.f32.mrb[57].mxu1 }
 0x1a4   : > { %v4627_v31 = vpop.eup %4626  ;;  %2981 = vst [vmem:[%s5687_s9 + $0x180] sm:$0xff] %v4625_v45  ;;  %4646 = vpow2.f32 %v3939_v59  ;;  %v5966_v52 = vpop.f32.mrb[58].mxu0 }
 0x1a5   : > { %7194 = vst [vmem:[#allocation6_spill] sm:$0xff] %v5966_v52  ;;  %v4629_v4 = vpop.eup %4628  ;;  %2983 = vst [vmem:[%s5687_s9 + $0x190] sm:$0xff] %v4627_v31  ;;  %4648 = vpow2.f32 %v3940_v20  ;;  %v5970_v0 = vpop.f32.mrb[58].mxu1 }
 0x1a6   : > { %7195 = vst [vmem:[#allocation7_spill] sm:$0xff] %v5970_v0  ;;  %v5972_v7 = vpop.f32.mrb[59].mxu0  ;;  %v4631_v41 = vpop.eup %4630  ;;  %2982 = vst [vmem:[%s5687_s9 + $0x188] sm:$0xff] %v4629_v4  ;;  %4650 = vpow2.f32 %v3942_v47 }
 0x1a7   : > { %7196 = vst [vmem:[#allocation8_spill] sm:$0xff] %v5972_v7  ;;  %v5975_v9 = vpop.f32.mrb[59].mxu1  ;;  %v4633_v59 = vpop.eup %4632  ;;  %2984 = vst [vmem:[%s5687_s9 + $0x198] sm:$0xff] %v4631_v41  ;;  %4652 = vpow2.f32 %v3941_v21 }
 0x1a8   : > { %7197 = vst [vmem:[#allocation9_spill] sm:$0xff] %v5975_v9  ;;  %v4635_v57 = vpop.eup %4634  ;;  %v2217_v45 = vadd.f32 1.0, %v4633_v59  ;;  %4654 = vpow2.f32 %v3943_v13  ;;  %v5978_v0 = vpop.f32.mrb[60].mxu0 }
 0x1a9   : > { %v4637_v52 = vpop.eup %4636  ;;  %v2219_v31 = vadd.f32 1.0, %v4635_v57  ;;  %4656 = vpow2.f32 %v3944_v53  ;;  %7198 = vst [vmem:[#allocation10_spill] sm:$0xff] %v5978_v0  ;;  %v5980_v47 = vpop.f32.mrb[60].mxu1 }
 0x1aa   : > { %v4639_v20 = vpop.eup %4638  ;;  %4658 = vrcp.f32 %v2217_v45  ;;  %v2218_v29 = vadd.f32 1.0, %v4637_v52  ;;  %7199 = vst [vmem:[#allocation11_spill] sm:$0xff] %v5980_v47  ;;  %v5982_v9 = vpop.f32.mrb[61].mxu0 }
 0x1ab   : > { %v4641_v7 = vpop.eup %4640  ;;  %4660 = vrcp.f32 %v2219_v31  ;;  %v2220_v4 = vadd.f32 1.0, %v4639_v20  ;;  %7200 = vst [vmem:[#allocation12_spill] sm:$0xff] %v5982_v9  ;;  %v5984_v59 = vpop.f32.mrb[61].mxu1 }
 0x1ac   : > { %v4643_v41 = vpop.eup %4642  ;;  %4662 = vrcp.f32 %v2218_v29  ;;  %v2221_v21 = vadd.f32 1.0, %v4641_v7  ;;  %7201 = vst [vmem:[#allocation13_spill] sm:$0xff] %v5984_v59  ;;  %v5986_v57 = vpop.f32.mrb[62].mxu0 }
 0x1ad   : > { %v4645_v13 = vpop.eup %4644  ;;  %4664 = vrcp.f32 %v2220_v4  ;;  %v2223_v53 = vadd.f32 1.0, %v4643_v41  ;;  %7202 = vst [vmem:[#allocation14_spill] sm:$0xff] %v5986_v57  ;;  %v5988_v52 = vpop.f32.mrb[62].mxu1 }
 0x1ae   : > { %7203 = vst [vmem:[#allocation15_spill] sm:$0xff] %v5988_v52  ;;  %v4647_v45 = vpop.eup %4646  ;;  %4666 = vrcp.f32 %v2221_v21  ;;  %v2222_v31 = vadd.f32 1.0, %v4645_v13  ;;  %v5990_v20 = vpop.f32.mrb[63].mxu0 }
 0x1af   : > { %v4649_v47 = vpop.eup %4648  ;;  %4668 = vrcp.f32 %v2223_v53  ;;  %v2224_v9 = vadd.f32 1.0, %v4647_v45  ;;  %v5992_v0 = vpop.f32.mrb[63].mxu1  ;;  %v3946_v53 = vmul.f32 -1.442695, %v5816_v5  ;;  %v3948_v5 = vmul.f32 -1.442695, %v5822_v34 }
 0x1b0   : > { %v4651_v7 = vpop.eup %4650  ;;  %4670 = vrcp.f32 %v2222_v31  ;;  %v2225_v29 = vadd.f32 1.0, %v4649_v47  ;;  %v5994_v57 = vpop.f32.mrb[64].mxu0 }
 0x1b1   : > { %v4653_v59 = vpop.eup %4652  ;;  %4672 = vrcp.f32 %v2224_v9  ;;  %v2227_v4 = vadd.f32 1.0, %v4651_v7  ;;  %v5997_v45 = vpop.f32.mrb[64].mxu1  ;;  %v3945_v7 = vmul.f32 -1.442695, %v5818_v30 }
 0x1b2   : > { %v4655_v41 = vpop.eup %4654  ;;  %4674 = vrcp.f32 %v2225_v29  ;;  %v2226_v52 = vadd.f32 1.0, %v4653_v59  ;;  %v5999_v31 = vpop.f32.mrb[65].mxu0  ;;  %v3947_v29 = vmul.f32 -1.442695, %v5820_v33  ;;  %v3949_v33 = vmul.f32 -1.442695, %v5826_v24 }
 0x1b3   : > { %v4657_v21 = vpop.eup %4656  ;;  %4676 = vrcp.f32 %v2227_v4  ;;  %v2228_v13 = vadd.f32 1.0, %v4655_v41  ;;  %7204 = vst [vmem:[#allocation16_spill] sm:$0xff] %v5999_v31  ;;  %v6006_v41 = vpop.f32.mrb[65].mxu1 }
 0x1b4   : > { %v4659_v47 = vpop.eup %4658  ;;  %4678 = vrcp.f32 %v2226_v52  ;;  %v2229_v9 = vadd.f32 1.0, %v4657_v21  ;;  %v3950_v52 = vmul.f32 -1.442695, %v5824_v18  ;;  %v6012_v21 = vpop.f32.mrb[66].mxu0  ;;  %v3952_v18 = vmul.f32 -1.442695, %v5830_v8 }
 0x1b5   : > { %v4661_v59 = vpop.eup %4660  ;;  %2985 = vst [vmem:[%s5687_s9 + $0x1a0] sm:$0xff] %v4659_v47  ;;  %4680 = vrcp.f32 %v2228_v13  ;;  %v6014_v13 = vpop.f32.mrb[66].mxu1  ;;  %v3951_v47 = vmul.f32 -1.442695, %v5828_v32  ;;  %v3953_v32 = vmul.f32 -1.442695, %v5834_v12 }
 0x1b6   : > { %v4663_v4 = vpop.eup %4662  ;;  %2987 = vst [vmem:[%s5687_s9 + $0x1b0] sm:$0xff] %v4661_v59  ;;  %4682 = vrcp.f32 %v2229_v9  ;;  %v6022_v24 = vpop.f32.mrb[67].mxu1  ;;  %v3955_v8 = vmul.f32 -1.442695, %v5836_v56 }
 0x1b7   : > { %v4665_v31 = vpop.eup %4664  ;;  %2986 = vst [vmem:[%s5687_s9 + $0x1a8] sm:$0xff] %v4663_v4  ;;  %4684 = vpow2.f32 %v3946_v53 }
 0x1b8   : > { %v4667_v30 = vpop.eup %4666  ;;  %2988 = vst [vmem:[%s5687_s9 + $0x1b8] sm:$0xff] %v4665_v31  ;;  %4686 = vpow2.f32 %v3945_v7  ;;  %v6020_v31 = vpop.f32.mrb[67].mxu0  ;;  %v3954_v7 = vmul.f32 -1.442695, %v5832_v46  ;;  %v3958_v46 = vmul.f32 -1.442695, %v5840_v26 }
 0x1b9   : > { %v4669_v34 = vpop.eup %4668  ;;  %2989 = vst [vmem:[%s5687_s9 + $0x1c0] sm:$0xff] %v4667_v30  ;;  %4688 = vpow2.f32 %v3947_v29  ;;  %v6035_v12 = vpop.f32.mrb[68].mxu0 }
 0x1ba   : > { %v4671_v53 = vpop.eup %4670  ;;  %2991 = vst [vmem:[%s5687_s9 + $0x1d0] sm:$0xff] %v4669_v34  ;;  %4690 = vpow2.f32 %v3948_v5  ;;  %v3956_v5 = vmul.f32 -1.442695, %v5838_v60  ;;  %v6040_v56 = vpop.f32.mrb[69].mxu0 }
 0x1bb   : > { %v4673_v9 = vpop.eup %4672  ;;  %2990 = vst [vmem:[%s5687_s9 + $0x1c8] sm:$0xff] %v4671_v53  ;;  %4692 = vpow2.f32 %v3950_v52 }
 0x1bc   : > { %v4675_v59 = vpop.eup %4674  ;;  %2992 = vst [vmem:[%s5687_s9 + $0x1d8] sm:$0xff] %v4673_v9  ;;  %4694 = vpow2.f32 %v3949_v33  ;;  %v6037_v33 = vpop.f32.mrb[68].mxu1 }
 0x1bd   : > { %v4677_v29 = vpop.eup %4676  ;;  %2993 = vst [vmem:[%s5687_s9 + $0x1e0] sm:$0xff] %v4675_v59  ;;  %4696 = vpow2.f32 %v3951_v47  ;;  %v6042_v47 = vpop.f32.mrb[69].mxu1 }
 0x1be   : > { %v4679_v4 = vpop.eup %4678  ;;  %2995 = vst [vmem:[%s5687_s9 + $0x1f0] sm:$0xff] %v4677_v29  ;;  %4698 = vpow2.f32 %v3952_v18  ;;  %7205 = vst [vmem:[#allocation17_spill] sm:$0xff] %v6042_v47  ;;  %v6044_v18 = vpop.f32.mrb[70].mxu0 }
 0x1bf   : > { %v4681_v52 = vpop.eup %4680  ;;  %2994 = vst [vmem:[%s5687_s9 + $0x1e8] sm:$0xff] %v4679_v4  ;;  %4700 = vpow2.f32 %v3954_v7  ;;  %7206 = vst [vmem:[#allocation18_spill] sm:$0xff] %v6044_v18  ;;  %v6046_v7 = vpop.f32.mrb[70].mxu1 }
 0x1c0   : > { %v4683_v30 = vpop.eup %4682  ;;  %2996 = vst [vmem:[%s5687_s9 + $0x1f8] sm:$0xff] %v4681_v52  ;;  %4702 = vpow2.f32 %v3953_v32  ;;  %7207 = vst [vmem:[#allocation19_spill] sm:$0xff] %v6046_v7  ;;  %v6048_v59 = vpop.f32.mrb[71].mxu0 }
 0x1c1   : > { %v4685_v34 = vpop.eup %4684  ;;  %2997 = vst [vmem:[%s5687_s9 + $0x200] sm:$0xff] %v4683_v30  ;;  %4704 = vpow2.f32 %v3955_v8  ;;  %7208 = vst [vmem:[#allocation20_spill] sm:$0xff] %v6048_v59  ;;  %v6050_v8 = vpop.f32.mrb[71].mxu1 }
 0x1c2   : > { %v4687_v60 = vpop.eup %4686  ;;  %v2231_v53 = vadd.f32 1.0, %v4685_v34  ;;  %4706 = vpow2.f32 %v3956_v5 }
 0x1c3   : > { %v4689_v26 = vpop.eup %4688  ;;  %v2230_v9 = vadd.f32 1.0, %v4687_v60  ;;  %4708 = vpow2.f32 %v3958_v46 }
 0x1c4   : > { %v4691_v32 = vpop.eup %4690  ;;  %4710 = vrcp.f32 %v2231_v53  ;;  %v2232_v29 = vadd.f32 1.0, %v4689_v26 }
 0x1c5   : > { %v4693_v4 = vpop.eup %4692  ;;  %4712 = vrcp.f32 %v2230_v9  ;;  %v2233_v52 = vadd.f32 1.0, %v4691_v32 }
 0x1c6   : > { %v4695_v30 = vpop.eup %4694  ;;  %4714 = vrcp.f32 %v2232_v29  ;;  %v2235_v5 = vadd.f32 1.0, %v4693_v4 }
 0x1c7   : > { %v4697_v34 = vpop.eup %4696  ;;  %4716 = vrcp.f32 %v2233_v52  ;;  %v2234_v18 = vadd.f32 1.0, %v4695_v30  ;;  %v3957_v30 = vmul.f32 -1.442695, %v5842_v1  ;;  %v3961_v1 = vmul.f32 -1.442695, %v5858_v39 }
 0x1c8   : > { %v4699_v60 = vpop.eup %4698  ;;  %4718 = vrcp.f32 %v2235_v5  ;;  %v2236_v46 = vadd.f32 1.0, %v4697_v34  ;;  %v3965_v39 = vmul.f32 -1.442695, %v5870_v50  ;;  %v3968_v50 = vmul.f32 -1.442695, %v5884_v15 }
 0x1c9   : > { %v4701_v7 = vpop.eup %4700  ;;  %4720 = vrcp.f32 %v2234_v18  ;;  %v2237_v59 = vadd.f32 1.0, %v4699_v60  ;;  %v3962_v60 = vmul.f32 -1.442695, %v5856_v44  ;;  %v3966_v44 = vmul.f32 -1.442695, %v5868_v43 }
 0x1ca   : > { %v4703_v47 = vpop.eup %4702  ;;  %4722 = vrcp.f32 %v2236_v46  ;;  %v2239_v53 = vadd.f32 1.0, %v4701_v7  ;;  %v3959_v7 = vmul.f32 -1.442695, %v5845_v10  ;;  %v3963_v10 = vmul.f32 -1.442695, %v5862_v40  ;;  %v6070_v40 = vpop.f32.mrb[72].mxu1 }
 0x1cb   : > { %v4705_v26 = vpop.eup %4704  ;;  %4724 = vrcp.f32 %v2237_v59  ;;  %v2238_v9 = vadd.f32 1.0, %v4703_v47  ;;  %v3960_v47 = vmul.f32 -1.442695, %v5852_v35  ;;  %v3964_v35 = vmul.f32 -1.442695, %v5864_v48 }
 0x1cc   : > { %v4707_v32 = vpop.eup %4706  ;;  %4726 = vrcp.f32 %v2239_v53  ;;  %v2240_v29 = vadd.f32 1.0, %v4705_v26  ;;  %v3967_v48 = vmul.f32 -1.442695, %v5874_v25  ;;  %v3970_v25 = vmul.f32 -1.442695, %v5888_v6 }
 0x1cd   : > { %v4709_v4 = vpop.eup %4708  ;;  %4728 = vrcp.f32 %v2238_v9  ;;  %v2241_v52 = vadd.f32 1.0, %v4707_v32 }
 0x1ce   : > { %v4711_v5 = vpop.eup %4710  ;;  %4730 = vrcp.f32 %v2240_v29  ;;  %v2243_v18 = vadd.f32 1.0, %v4709_v4  ;;  %v6068_v29 = vpop.f32.mrb[72].mxu0 }
 0x1cf   : > { %v4713_v34 = vpop.eup %4712  ;;  %2999 = vst [vmem:[%s5687_s9 + $0x210] sm:$0xff] %v4711_v5  ;;  %4732 = vrcp.f32 %v2241_v52  ;;  %v6074_v52 = vpop.f32.mrb[73].mxu0 }
 0x1d0   : > { %v4715_v59 = vpop.eup %4714  ;;  %2998 = vst [vmem:[%s5687_s9 + $0x208] sm:$0xff] %v4713_v34  ;;  %4734 = vrcp.f32 %v2243_v18  ;;  %v6080_v5 = vpop.f32.mrb[74].mxu0 }
 0x1d1   : > { %v4717_v46 = vpop.eup %4716  ;;  %3000 = vst [vmem:[%s5687_s9 + $0x218] sm:$0xff] %v4715_v59  ;;  %4736 = vpow2.f32 %v3957_v30  ;;  %v6076_v30 = vpop.f32.mrb[73].mxu1 }
 0x1d2   : > { %v4719_v53 = vpop.eup %4718  ;;  %3001 = vst [vmem:[%s5687_s9 + $0x220] sm:$0xff] %v4717_v46  ;;  %4738 = vpow2.f32 %v3959_v7  ;;  %v6082_v18 = vpop.f32.mrb[74].mxu1 }
 0x1d3   : > { %v4721_v26 = vpop.eup %4720  ;;  %3003 = vst [vmem:[%s5687_s9 + $0x230] sm:$0xff] %v4719_v53  ;;  %4740 = vpow2.f32 %v3960_v47  ;;  %v6086_v34 = vpop.f32.mrb[75].mxu0 }
 0x1d4   : > { %v4723_v9 = vpop.eup %4722  ;;  %3002 = vst [vmem:[%s5687_s9 + $0x228] sm:$0xff] %v4721_v26  ;;  %4742 = vpow2.f32 %v3962_v60  ;;  %v6088_v47 = vpop.f32.mrb[75].mxu1  ;;  %v3969_v60 = vmul.f32 -1.442695, %v5890_v19 }
 0x1d5   : > { %v4725_v32 = vpop.eup %4724  ;;  %3004 = vst [vmem:[%s5687_s9 + $0x238] sm:$0xff] %v4723_v9  ;;  %4744 = vpow2.f32 %v3961_v1  ;;  %v6094_v26 = vpop.f32.mrb[76].mxu0 }
 0x1d6   : > { %v4727_v4 = vpop.eup %4726  ;;  %3005 = vst [vmem:[%s5687_s9 + $0x240] sm:$0xff] %v4725_v32  ;;  %4746 = vpow2.f32 %v3963_v10  ;;  %v6098_v19 = vpop.f32.mrb[77].mxu0 }
 0x1d7   : > { %v4729_v43 = vpop.eup %4728  ;;  %3007 = vst [vmem:[%s5687_s9 + $0x250] sm:$0xff] %v4727_v4  ;;  %4748 = vpow2.f32 %v3964_v35  ;;  %v6096_v35 = vpop.f32.mrb[76].mxu1 }
 0x1d8   : > { %v4731_v7 = vpop.eup %4730  ;;  %3006 = vst [vmem:[%s5687_s9 + $0x248] sm:$0xff] %v4729_v43  ;;  %4750 = vpow2.f32 %v3966_v44  ;;  %v6100_v4 = vpop.f32.mrb[77].mxu1 }
 0x1d9   : > { %v4733_v59 = vpop.eup %4732  ;;  %3008 = vst [vmem:[%s5687_s9 + $0x258] sm:$0xff] %v4731_v7  ;;  %4752 = vpow2.f32 %v3965_v39 }
 0x1da   : > { %v4735_v15 = vpop.eup %4734  ;;  %3009 = vst [vmem:[%s5687_s9 + $0x260] sm:$0xff] %v4733_v59  ;;  %4754 = vpow2.f32 %v3967_v48  ;;  %v6102_v48 = vpop.f32.mrb[78].mxu0 }
 0x1db   : > { %v4737_v46 = vpop.eup %4736  ;;  %3011 = vst [vmem:[%s5687_s9 + $0x270] sm:$0xff] %v4735_v15  ;;  %4756 = vpow2.f32 %v3968_v50 }
 0x1dc   : > { %v4739_v1 = vpop.eup %4738  ;;  %v2242_v53 = vadd.f32 1.0, %v4737_v46  ;;  %4758 = vpow2.f32 %v3970_v25 }
 0x1dd   : > { %v4741_v10 = vpop.eup %4740  ;;  %v2244_v6 = vadd.f32 1.0, %v4739_v1  ;;  %4760 = vpow2.f32 %v3969_v60 }
 0x1de   : > { %v4743_v9 = vpop.eup %4742  ;;  %4762 = vrcp.f32 %v2242_v53  ;;  %v2245_v44 = vadd.f32 1.0, %v4741_v10 }
 0x1df   : > { %v4745_v32 = vpop.eup %4744  ;;  %4764 = vrcp.f32 %v2244_v6  ;;  %v2247_v39 = vadd.f32 1.0, %v4743_v9 }
 0x1e0   : > { %v4747_v43 = vpop.eup %4746  ;;  %4766 = vrcp.f32 %v2245_v44  ;;  %v2246_v50 = vadd.f32 1.0, %v4745_v32 }
 0x1e1   : > { %v4749_v7 = vpop.eup %4748  ;;  %4768 = vrcp.f32 %v2247_v39  ;;  %v2248_v25 = vadd.f32 1.0, %v4747_v43  ;;  %v3971_v43 = vmul.f32 -1.442695, %v5893_v11 }
 0x1e2   : > { %v4751_v59 = vpop.eup %4750  ;;  %4770 = vrcp.f32 %v2246_v50  ;;  %v2249_v60 = vadd.f32 1.0, %v4749_v7 }
 0x1e3   : > { %v4753_v15 = vpop.eup %4752  ;;  %4772 = vrcp.f32 %v2248_v25  ;;  %v2251_v46 = vadd.f32 1.0, %v4751_v59  ;;  %v3972_v25 = vmul.f32 -1.442695, %v5895_v27 }
 0x1e4   : > { %v4755_v1 = vpop.eup %4754  ;;  %4774 = vrcp.f32 %v2249_v60  ;;  %v2250_v53 = vadd.f32 1.0, %v4753_v15  ;;  %v3974_v60 = vmul.f32 -1.442695, %v5898_v14  ;;  %v3976_v14 = vmul.f32 -1.442695, %v5904_v55 }
 0x1e5   : > { %v4757_v10 = vpop.eup %4756  ;;  %4776 = vrcp.f32 %v2251_v46  ;;  %v2252_v6 = vadd.f32 1.0, %v4755_v1  ;;  %v3973_v46 = vmul.f32 -1.442695, %v5900_v37  ;;  %v6110_v1 = vpop.f32.mrb[78].mxu1  ;;  %v3979_v55 = vmul.f32 -1.442695, %v5910_v16 }
 0x1e6   : > { %v4759_v9 = vpop.eup %4758  ;;  %4778 = vrcp.f32 %v2250_v53  ;;  %v2253_v44 = vadd.f32 1.0, %v4757_v10  ;;  %v3975_v53 = vmul.f32 -1.442695, %v5902_v38  ;;  %v6116_v10 = vpop.f32.mrb[79].mxu0  ;;  %v3977_v38 = vmul.f32 -1.442695, %v5908_v58 }
 0x1e7   : > { %v4761_v32 = vpop.eup %4760  ;;  %4780 = vrcp.f32 %v2252_v6  ;;  %v2255_v39 = vadd.f32 1.0, %v4759_v9  ;;  %v6118_v6 = vpop.f32.mrb[79].mxu1  ;;  %v3978_v9 = vmul.f32 -1.442695, %v5906_v3  ;;  %v7209_v3 = vld [vmem:[#allocation3_spill] sm:$0xff] }
 0x1e8   : > { %v4763_v50 = vpop.eup %4762  ;;  %4782 = vrcp.f32 %v2253_v44  ;;  %v2254_v7 = vadd.f32 1.0, %v4761_v32  ;;  %v3981_v58 = vmul.f32 -1.442695, %v5916_v42  ;;  %v6134_v16 = vpop.f32.mrb[80].mxu1 }
 0x1e9   : > { %v4765_v59 = vpop.eup %4764  ;;  %3010 = vst [vmem:[%s5687_s9 + $0x268] sm:$0xff] %v4763_v50  ;;  %4784 = vrcp.f32 %v2255_v39 }
 0x1ea   : > { %v4767_v15 = vpop.eup %4766  ;;  %3012 = vst [vmem:[%s5687_s9 + $0x278] sm:$0xff] %v4765_v59  ;;  %4786 = vrcp.f32 %v2254_v7  ;;  %v3982_v7 = vmul.f32 -1.442695, %v7209_v3  ;;  %v6132_v59 = vpop.f32.mrb[80].mxu0 }
 0x1eb   : > { %v4769_v11 = vpop.eup %4768  ;;  %3013 = vst [vmem:[%s5687_s9 + $0x280] sm:$0xff] %v4767_v15  ;;  %4788 = vpow2.f32 %v3971_v43  ;;  %v3980_v43 = vmul.f32 -1.442695, %v5912_v36  ;;  %v3983_v36 = vmul.f32 -1.442695, %v5918_v54  ;;  %v6138_v15 = vpop.f32.mrb[81].mxu0 }
 0x1ec   : > { %v4771_v27 = vpop.eup %4770  ;;  %3015 = vst [vmem:[%s5687_s9 + $0x290] sm:$0xff] %v4769_v11  ;;  %4790 = vpow2.f32 %v3972_v25 }
 0x1ed   : > { %v4773_v37 = vpop.eup %4772  ;;  %3014 = vst [vmem:[%s5687_s9 + $0x288] sm:$0xff] %v4771_v27  ;;  %4792 = vpow2.f32 %v3974_v60 }
 0x1ee   : > { %v4775_v44 = vpop.eup %4774  ;;  %3016 = vst [vmem:[%s5687_s9 + $0x298] sm:$0xff] %v4773_v37  ;;  %4794 = vpow2.f32 %v3973_v46  ;;  %v6140_v46 = vpop.f32.mrb[81].mxu1 }
 0x1ef   : > { %v4777_v32 = vpop.eup %4776  ;;  %3017 = vst [vmem:[%s5687_s9 + $0x2a0] sm:$0xff] %v4775_v44  ;;  %4796 = vpow2.f32 %v3975_v53  ;;  %v6143_v53 = vpop.f32.mrb[82].mxu0 }
 0x1f0   : > { %v4779_v39 = vpop.eup %4778  ;;  %3019 = vst [vmem:[%s5687_s9 + $0x2b0] sm:$0xff] %v4777_v32  ;;  %4798 = vpow2.f32 %v3976_v14  ;;  %v6145_v27 = vpop.f32.mrb[82].mxu1 }
 0x1f1   : > { %v4781_v50 = vpop.eup %4780  ;;  %3018 = vst [vmem:[%s5687_s9 + $0x2a8] sm:$0xff] %v4779_v39  ;;  %4800 = vpow2.f32 %v3978_v9  ;;  %v6148_v14 = vpop.f32.mrb[83].mxu0 }
 0x1f2   : > { %v4783_v25 = vpop.eup %4782  ;;  %3020 = vst [vmem:[%s5687_s9 + $0x2b8] sm:$0xff] %v4781_v50  ;;  %4802 = vpow2.f32 %v3977_v38  ;;  %v6150_v37 = vpop.f32.mrb[83].mxu1 }
 0x1f3   : > { %v4785_v60 = vpop.eup %4784  ;;  %3021 = vst [vmem:[%s5687_s9 + $0x2c0] sm:$0xff] %v4783_v25  ;;  %4804 = vpow2.f32 %v3979_v55  ;;  %v6154_v25 = vpop.f32.mrb[84].mxu1 }
 0x1f4   : > { %v4787_v11 = vpop.eup %4786  ;;  %3023 = vst [vmem:[%s5687_s9 + $0x2d0] sm:$0xff] %v4785_v60  ;;  %4806 = vpow2.f32 %v3980_v43  ;;  %7210 = vst [vmem:[#allocation3_spill] sm:$0xff] %v6154_v25 }
 0x1f5   : > { %v4789_v42 = vpop.eup %4788  ;;  %3022 = vst [vmem:[%s5687_s9 + $0x2c8] sm:$0xff] %v4787_v11  ;;  %4808 = vpow2.f32 %v3982_v7  ;;  %v6152_v7 = vpop.f32.mrb[84].mxu0 }
 0x1f6   : > { %v4791_v9 = vpop.eup %4790  ;;  %v2256_v54 = vadd.f32 1.0, %v4789_v42  ;;  %4810 = vpow2.f32 %v3981_v58 }
 0x1f7   : > { %v4793_v44 = vpop.eup %4792  ;;  %v2257_v38 = vadd.f32 1.0, %v4791_v9  ;;  %4812 = vpow2.f32 %v3983_v36 }
 0x1f8   : > { %v4795_v32 = vpop.eup %4794  ;;  %4814 = vrcp.f32 %v2256_v54  ;;  %v2259_v55 = vadd.f32 1.0, %v4793_v44 }
 0x1f9   : > { %v4797_v39 = vpop.eup %4796  ;;  %4816 = vrcp.f32 %v2257_v38  ;;  %v2258_v43 = vadd.f32 1.0, %v4795_v32 }
 0x1fa   : > { %v4799_v50 = vpop.eup %4798  ;;  %4818 = vrcp.f32 %v2259_v55  ;;  %v2260_v3 = vadd.f32 1.0, %v4797_v39 }
 0x1fb   : > { %v4801_v60 = vpop.eup %4800  ;;  %4820 = vrcp.f32 %v2258_v43  ;;  %v2261_v11 = vadd.f32 1.0, %v4799_v50  ;;  %v3984_v50 = vmul.f32 -1.442695, %v5922_v28  ;;  %v7211_v28 = vld [vmem:[#allocation4_spill] sm:$0xff] }
 0x1fc   : > { %v4803_v58 = vpop.eup %4802  ;;  %4822 = vrcp.f32 %v2260_v3  ;;  %v2263_v42 = vadd.f32 1.0, %v4801_v60 }
 0x1fd   : > { %v4805_v36 = vpop.eup %4804  ;;  %4824 = vrcp.f32 %v2261_v11  ;;  %v2262_v9 = vadd.f32 1.0, %v4803_v58  ;;  %v3986_v11 = vmul.f32 -1.442695, %v5926_v51  ;;  %v6166_v51 = vpop.f32.mrb[85].mxu1 }
 0x1fe   : > { %v4807_v54 = vpop.eup %4806  ;;  %4826 = vrcp.f32 %v2263_v42  ;;  %v2264_v44 = vadd.f32 1.0, %v4805_v36  ;;  %v3985_v42 = vmul.f32 -1.442695, %v5928_v22  ;;  %v3990_v22 = vmul.f32 -1.442695, %v5938_v17 }
 0x1ff   : > { %v4809_v38 = vpop.eup %4808  ;;  %4828 = vrcp.f32 %v2262_v9  ;;  %v2265_v32 = vadd.f32 1.0, %v4807_v54  ;;  %v3987_v9 = vmul.f32 -1.442695, %v5932_v62  ;;  %v7212_v62 = vld [vmem:[#allocation5_spill] sm:$0xff]  ;;  %v3992_v17 = vmul.f32 -1.442695, %v5954_v63 }
 0x200   : > { %v4811_v55 = vpop.eup %4810  ;;  %4830 = vrcp.f32 %v2264_v44  ;;  %v2267_v39 = vadd.f32 1.0, %v4809_v38  ;;  %v6164_v44 = vpop.f32.mrb[85].mxu0  ;;  %v3995_v63 = vmul.f32 -1.442695, %v5964_v2 }
 0x201   : > { %v4813_v25 = vpop.eup %4812  ;;  %4832 = vrcp.f32 %v2265_v32  ;;  %v2266_v43 = vadd.f32 1.0, %v4811_v55  ;;  %v3989_v55 = vmul.f32 -1.442695, %v7212_v62 }
 0x202   : > { %v4815_v3 = vpop.eup %4814  ;;  %4834 = vrcp.f32 %v2267_v39  ;;  %v2268_v60 = vadd.f32 1.0, %v4813_v25  ;;  %v3988_v25 = vmul.f32 -1.442695, %v7211_v28  ;;  %v6172_v39 = vpop.f32.mrb[86].mxu0 }
 0x203   : > { %v4817_v58 = vpop.eup %4816  ;;  %3024 = vst [vmem:[%s5687_s9 + $0x2d8] sm:$0xff] %v4815_v3  ;;  %4836 = vrcp.f32 %v2266_v43  ;;  %v6174_v43 = vpop.f32.mrb[86].mxu1  ;;  %v3991_v3 = vmul.f32 -1.442695, %v5944_v61  ;;  %v3993_v61 = vmul.f32 -1.442695, %v5960_v23 }
 0x204   : > { %v4819_v36 = vpop.eup %4818  ;;  %3025 = vst [vmem:[%s5687_s9 + $0x2e0] sm:$0xff] %v4817_v58  ;;  %4838 = vrcp.f32 %v2268_v60  ;;  %v6182_v58 = vpop.f32.mrb[87].mxu1 }
 0x205   : > { %v4821_v54 = vpop.eup %4820  ;;  %3027 = vst [vmem:[%s5687_s9 + $0x2f0] sm:$0xff] %v4819_v36  ;;  %4840 = vpow2.f32 %v3984_v50  ;;  %v3994_v36 = vmul.f32 -1.442695, %v5958_v49  ;;  %v6196_v62 = vpop.f32.mrb[88].mxu1 }
 0x206   : > { %v4823_v38 = vpop.eup %4822  ;;  %3026 = vst [vmem:[%s5687_s9 + $0x2e8] sm:$0xff] %v4821_v54  ;;  %4842 = vpow2.f32 %v3986_v11  ;;  %v6180_v11 = vpop.f32.mrb[87].mxu0 }
 0x207   : > { %v4825_v32 = vpop.eup %4824  ;;  %3028 = vst [vmem:[%s5687_s9 + $0x2f8] sm:$0xff] %v4823_v38  ;;  %4844 = vpow2.f32 %v3985_v42 }
 0x208   : > { %v4827_v50 = vpop.eup %4826  ;;  %3029 = vst [vmem:[%s5687_s9 + $0x300] sm:$0xff] %v4825_v32  ;;  %4846 = vpow2.f32 %v3987_v9 }
 0x209   : > { %v4829_v60 = vpop.eup %4828  ;;  %3031 = vst [vmem:[%s5687_s9 + $0x310] sm:$0xff] %v4827_v50  ;;  %4848 = vpow2.f32 %v3988_v25  ;;  %v7213_v25 = vld [vmem:[#allocation6_spill] sm:$0xff] }
 0x20a   : > { %v4831_v42 = vpop.eup %4830  ;;  %3030 = vst [vmem:[%s5687_s9 + $0x308] sm:$0xff] %v4829_v60  ;;  %4850 = vpow2.f32 %v3990_v22  ;;  %v3996_v38 = vmul.f32 -1.442695, %v7213_v25  ;;  %v6194_v22 = vpop.f32.mrb[88].mxu0 }
 0x20b   : > { %v4833_v9 = vpop.eup %4832  ;;  %3032 = vst [vmem:[%s5687_s9 + $0x318] sm:$0xff] %v4831_v42  ;;  %4852 = vpow2.f32 %v3989_v55  ;;  %v6198_v50 = vpop.f32.mrb[89].mxu0 }
 0x20c   : > { %v4835_v54 = vpop.eup %4834  ;;  %3033 = vst [vmem:[%s5687_s9 + $0x320] sm:$0xff] %v4833_v9  ;;  %4854 = vpow2.f32 %v3991_v3  ;;  %v6200_v60 = vpop.f32.mrb[89].mxu1 }
 0x20d   : > { %v4837_v28 = vpop.eup %4836  ;;  %3035 = vst [vmem:[%s5687_s9 + $0x330] sm:$0xff] %v4835_v54  ;;  %4856 = vpow2.f32 %v3992_v17  ;;  %v6202_v17 = vpop.f32.mrb[90].mxu0 }
 0x20e   : > { %v4839_v32 = vpop.eup %4838  ;;  %3034 = vst [vmem:[%s5687_s9 + $0x328] sm:$0xff] %v4837_v28  ;;  %4858 = vpow2.f32 %v3994_v36  ;;  %7214 = vst [vmem:[#allocation4_spill] sm:$0xff] %v6202_v17  ;;  %v6204_v9 = vpop.f32.mrb[90].mxu1 }
 0x20f   : > { %v4841_v49 = vpop.eup %4840  ;;  %3036 = vst [vmem:[%s5687_s9 + $0x338] sm:$0xff] %v4839_v32  ;;  %4860 = vpow2.f32 %v3993_v61  ;;  %7215 = vst [vmem:[#allocation5_spill] sm:$0xff] %v6204_v9  ;;  %v6206_v28 = vpop.f32.mrb[91].mxu0 }
 0x210   : > { %v4843_v23 = vpop.eup %4842  ;;  %v2269_v55 = vadd.f32 1.0, %v4841_v49  ;;  %4862 = vpow2.f32 %v3995_v63  ;;  %7216 = vst [vmem:[#allocation6_spill] sm:$0xff] %v6206_v28 }
 0x211   : > { %v4845_v2 = vpop.eup %4844  ;;  %v2271_v3 = vadd.f32 1.0, %v4843_v23  ;;  %4864 = vpow2.f32 %v3996_v38 }
 0x212   : > { %v4847_v42 = vpop.eup %4846  ;;  %4866 = vrcp.f32 %v2269_v55  ;;  %v2270_v36 = vadd.f32 1.0, %v4845_v2 }
 0x213   : > { %v4849_v61 = vpop.eup %4848  ;;  %4868 = vrcp.f32 %v2271_v3  ;;  %v2272_v54 = vadd.f32 1.0, %v4847_v42 }
 0x214   : > { %v4851_v63 = vpop.eup %4850  ;;  %4870 = vrcp.f32 %v2270_v36  ;;  %v2273_v25 = vadd.f32 1.0, %v4849_v61 }
 0x215   : > { %v4853_v32 = vpop.eup %4852  ;;  %4872 = vrcp.f32 %v2272_v54  ;;  %v2275_v38 = vadd.f32 1.0, %v4851_v63  ;;  %v7217_v63 = vld [vmem:[#allocation7_spill] sm:$0xff] }
 0x216   : > { %v4855_v49 = vpop.eup %4854  ;;  %4874 = vrcp.f32 %v2273_v25  ;;  %v2274_v23 = vadd.f32 1.0, %v4853_v32  ;;  %v3998_v25 = vmul.f32 -1.442695, %v7217_v63 }
 0x217   : > { %v4857_v17 = vpop.eup %4856  ;;  %4876 = vrcp.f32 %v2275_v38  ;;  %v2276_v55 = vadd.f32 1.0, %v4855_v49  ;;  %v7218_v49 = vld [vmem:[#allocation8_spill] sm:$0xff] }
 0x218   : > { %v4859_v2 = vpop.eup %4858  ;;  %4878 = vrcp.f32 %v2274_v23  ;;  %v2277_v9 = vadd.f32 1.0, %v4857_v17  ;;  %v3997_v17 = vmul.f32 -1.442695, %v7218_v49 }
 0x219   : > { %v4861_v3 = vpop.eup %4860  ;;  %4880 = vrcp.f32 %v2276_v55  ;;  %v2279_v42 = vadd.f32 1.0, %v4859_v2  ;;  %v7219_v55 = vld [vmem:[#allocation9_spill] sm:$0xff] }
 0x21a   : > { %v4863_v28 = vpop.eup %4862  ;;  %4882 = vrcp.f32 %v2277_v9  ;;  %v2278_v36 = vadd.f32 1.0, %v4861_v3  ;;  %v3999_v2 = vmul.f32 -1.442695, %v7219_v55  ;;  %v7220_v3 = vld [vmem:[#allocation10_spill] sm:$0xff] }
 0x21b   : > { %v4865_v61 = vpop.eup %4864  ;;  %4884 = vrcp.f32 %v2279_v42  ;;  %v2280_v54 = vadd.f32 1.0, %v4863_v28  ;;  %v4000_v28 = vmul.f32 -1.442695, %v7220_v3  ;;  %v6214_v42 = vpop.f32.mrb[91].mxu1 }
 0x21c   : > { %v4867_v32 = vpop.eup %4866  ;;  %4886 = vrcp.f32 %v2278_v36  ;;  %v2281_v38 = vadd.f32 1.0, %v4865_v61  ;;  %7221 = vst [vmem:[#allocation7_spill] sm:$0xff] %v6214_v42  ;;  %v7222_v36 = vld [vmem:[#allocation11_spill] sm:$0xff] }
 0x21d   : > { %v4869_v23 = vpop.eup %4868  ;;  %3037 = vst [vmem:[%s5687_s9 + $0x340] sm:$0xff] %v4867_v32  ;;  %4888 = vrcp.f32 %v2280_v54  ;;  %v4002_v61 = vmul.f32 -1.442695, %v7222_v36  ;;  %v7223_v54 = vld [vmem:[#allocation12_spill] sm:$0xff] }
 0x21e   : > { %v4871_v9 = vpop.eup %4870  ;;  %3039 = vst [vmem:[%s5687_s9 + $0x350] sm:$0xff] %v4869_v23  ;;  %4890 = vrcp.f32 %v2281_v38  ;;  %v4001_v32 = vmul.f32 -1.442695, %v7223_v54  ;;  %v7224_v38 = vld [vmem:[#allocation13_spill] sm:$0xff]  ;;  %v6230_v54 = vpop.f32.mrb[92].mxu1 }
 0x21f   : > { %v4873_v63 = vpop.eup %4872  ;;  %3038 = vst [vmem:[%s5687_s9 + $0x348] sm:$0xff] %v4871_v9  ;;  %4892 = vpow2.f32 %v3998_v25  ;;  %v4003_v23 = vmul.f32 -1.442695, %v7224_v38  ;;  %v7225_v9 = vld [vmem:[#allocation14_spill] sm:$0xff] }
 0x220   : > { %v4875_v49 = vpop.eup %4874  ;;  %3040 = vst [vmem:[%s5687_s9 + $0x358] sm:$0xff] %v4873_v63  ;;  %4894 = vpow2.f32 %v3997_v17  ;;  %v4004_v42 = vmul.f32 -1.442695, %v7225_v9  ;;  %v7226_v63 = vld [vmem:[#allocation15_spill] sm:$0xff] }
 0x221   : > { %v4877_v55 = vpop.eup %4876  ;;  %3041 = vst [vmem:[%s5687_s9 + $0x360] sm:$0xff] %v4875_v49  ;;  %4896 = vpow2.f32 %v3999_v2  ;;  %v4006_v36 = vmul.f32 -1.442695, %v7226_v63  ;;  %v4005_v49 = vmul.f32 -1.442695, %v5990_v20  ;;  %v6228_v2 = vpop.f32.mrb[92].mxu0 }
 0x222   : > { %v4879_v3 = vpop.eup %4878  ;;  %3043 = vst [vmem:[%s5687_s9 + $0x370] sm:$0xff] %v4877_v55  ;;  %4898 = vpow2.f32 %v4000_v28  ;;  %v4007_v28 = vmul.f32 -1.442695, %v5992_v0  ;;  %v6234_v38 = vpop.f32.mrb[93].mxu0  ;;  %v4008_v20 = vmul.f32 -1.442695, %v5994_v57 }
 0x223   : > { %v4881_v25 = vpop.eup %4880  ;;  %3042 = vst [vmem:[%s5687_s9 + $0x368] sm:$0xff] %v4879_v3  ;;  %4900 = vpow2.f32 %v4002_v61  ;;  %v6236_v61 = vpop.f32.mrb[93].mxu1  ;;  %v4010_v0 = vmul.f32 -1.442695, %v5997_v45 }
 0x224   : > { %v4883_v17 = vpop.eup %4882  ;;  %3044 = vst [vmem:[%s5687_s9 + $0x378] sm:$0xff] %v4881_v25  ;;  %4902 = vpow2.f32 %v4001_v32  ;;  %v6240_v32 = vpop.f32.mrb[94].mxu0 }
 0x225   : > { %v4885_v55 = vpop.eup %4884  ;;  %3045 = vst [vmem:[%s5687_s9 + $0x380] sm:$0xff] %v4883_v17  ;;  %4904 = vpow2.f32 %v4003_v23  ;;  %7227 = vst [vmem:[#allocation8_spill] sm:$0xff] %v6240_v32  ;;  %v6242_v9 = vpop.f32.mrb[94].mxu1 }
 0x226   : > { %v4887_v3 = vpop.eup %4886  ;;  %3047 = vst [vmem:[%s5687_s9 + $0x390] sm:$0xff] %v4885_v55  ;;  %4906 = vpow2.f32 %v4004_v42  ;;  %7228 = vst [vmem:[#allocation9_spill] sm:$0xff] %v6242_v9  ;;  %v6246_v23 = vpop.f32.mrb[95].mxu0 }
 0x227   : > { %v4889_v25 = vpop.eup %4888  ;;  %3046 = vst [vmem:[%s5687_s9 + $0x388] sm:$0xff] %v4887_v3  ;;  %4908 = vpow2.f32 %v4006_v36  ;;  %7229 = vst [vmem:[#allocation10_spill] sm:$0xff] %v6246_v23  ;;  %v6248_v63 = vpop.f32.mrb[95].mxu1 }
 0x228   : > { %7230 = vst [vmem:[#allocation11_spill] sm:$0xff] %v6248_v63  ;;  %v4891_v17 = vpop.eup %4890  ;;  %3048 = vst [vmem:[%s5687_s9 + $0x398] sm:$0xff] %v4889_v25  ;;  %4910 = vpow2.f32 %v4005_v49  ;;  %v6252_v45 = vpop.f32.mrb[96].mxu0 }
 0x229   : > { %v4893_v55 = vpop.eup %4892  ;;  %3049 = vst [vmem:[%s5687_s9 + $0x3a0] sm:$0xff] %v4891_v17  ;;  %4912 = vpow2.f32 %v4007_v28  ;;  %7231 = vst [vmem:[#allocation12_spill] sm:$0xff] %v6252_v45  ;;  %v6254_v23 = vpop.f32.mrb[96].mxu1 }
 0x22a   : > { %v4895_v57 = vpop.eup %4894  ;;  %v2283_v42 = vadd.f32 1.0, %v4893_v55  ;;  %4914 = vpow2.f32 %v4008_v20  ;;  %7232 = vst [vmem:[#allocation13_spill] sm:$0xff] %v6254_v23  ;;  %v6256_v49 = vpop.f32.mrb[97].mxu0 }
 0x22b   : > { %v4897_v32 = vpop.eup %4896  ;;  %v2282_v9 = vadd.f32 1.0, %v4895_v57  ;;  %4916 = vpow2.f32 %v4010_v0  ;;  %7233 = vst [vmem:[#allocation14_spill] sm:$0xff] %v6256_v49  ;;  %v6258_v55 = vpop.f32.mrb[97].mxu1 }
 0x22c   : > { %v4899_v3 = vpop.eup %4898  ;;  %4918 = vrcp.f32 %v2283_v42  ;;  %v2284_v36 = vadd.f32 1.0, %v4897_v32  ;;  %7234 = vst [vmem:[#allocation15_spill] sm:$0xff] %v6258_v55 }
 0x22d   : > { %v4901_v63 = vpop.eup %4900  ;;  %4920 = vrcp.f32 %v2282_v9  ;;  %v2285_v25 = vadd.f32 1.0, %v4899_v3 }
 0x22e   : > { %v4903_v17 = vpop.eup %4902  ;;  %4922 = vrcp.f32 %v2284_v36  ;;  %v2287_v28 = vadd.f32 1.0, %v4901_v63 }
 0x22f   : > { %v4905_v20 = vpop.eup %4904  ;;  %4924 = vrcp.f32 %v2285_v25  ;;  %v2286_v0 = vadd.f32 1.0, %v4903_v17  ;;  %v7235_v17 = vld [vmem:[#allocation16_spill] sm:$0xff] }
 0x230   : > { %v4907_v57 = vpop.eup %4906  ;;  %4926 = vrcp.f32 %v2287_v28  ;;  %v2288_v32 = vadd.f32 1.0, %v4905_v20  ;;  %v4009_v28 = vmul.f32 -1.442695, %v7235_v17  ;;  %v4018_v17 = vmul.f32 -1.442695, %v6037_v33  ;;  %v7238_v33 = vld [vmem:[#allocation19_spill] sm:$0xff] }
 0x231   : > { %v4909_v42 = vpop.eup %4908  ;;  %4928 = vrcp.f32 %v2286_v0  ;;  %v2289_v45 = vadd.f32 1.0, %v4907_v57  ;;  %v4011_v57 = vmul.f32 -1.442695, %v6006_v41  ;;  %v6270_v41 = vpop.f32.mrb[98].mxu1 }
 0x232   : > { %v4911_v23 = vpop.eup %4910  ;;  %4930 = vrcp.f32 %v2288_v32  ;;  %v2291_v9 = vadd.f32 1.0, %v4909_v42 }
 0x233   : > { %v4913_v3 = vpop.eup %4912  ;;  %4932 = vrcp.f32 %v2289_v45  ;;  %v2290_v49 = vadd.f32 1.0, %v4911_v23  ;;  %v4012_v23 = vmul.f32 -1.442695, %v6012_v21  ;;  %v4015_v21 = vmul.f32 -1.442695, %v6022_v24 }
 0x234   : > { %v4915_v36 = vpop.eup %4914  ;;  %4934 = vrcp.f32 %v2291_v9  ;;  %v2292_v63 = vadd.f32 1.0, %v4913_v3  ;;  %v6268_v9 = vpop.f32.mrb[98].mxu0  ;;  %v4017_v24 = vmul.f32 -1.442695, %v6040_v56  ;;  %v7239_v56 = vld [vmem:[#allocation20_spill] sm:$0xff] }
 0x235   : > { %v4917_v55 = vpop.eup %4916  ;;  %4936 = vrcp.f32 %v2290_v49  ;;  %v2293_v25 = vadd.f32 1.0, %v4915_v36  ;;  %v4014_v49 = vmul.f32 -1.442695, %v6014_v13  ;;  %v4016_v13 = vmul.f32 -1.442695, %v6035_v12  ;;  %v7236_v12 = vld [vmem:[#allocation17_spill] sm:$0xff] }
 0x236   : > { %v4919_v20 = vpop.eup %4918  ;;  %4938 = vrcp.f32 %v2292_v63  ;;  %v2295_v0 = vadd.f32 1.0, %v4917_v55  ;;  %v4013_v55 = vmul.f32 -1.442695, %v6020_v31  ;;  %v6276_v63 = vpop.f32.mrb[99].mxu0 }
 0x237   : > { %v4921_v32 = vpop.eup %4920  ;;  %3051 = vst [vmem:[%s5687_s9 + $0x3b0] sm:$0xff] %v4919_v20  ;;  %4940 = vrcp.f32 %v2293_v25  ;;  %v6278_v31 = vpop.f32.mrb[99].mxu1 }
 0x238   : > { %v4923_v45 = vpop.eup %4922  ;;  %3050 = vst [vmem:[%s5687_s9 + $0x3a8] sm:$0xff] %v4921_v32  ;;  %4942 = vrcp.f32 %v2295_v0  ;;  %v4019_v0 = vmul.f32 -1.442695, %v7236_v12  ;;  %v7237_v32 = vld [vmem:[#allocation18_spill] sm:$0xff] }
 0x239   : > { %v4925_v42 = vpop.eup %4924  ;;  %3052 = vst [vmem:[%s5687_s9 + $0x3b8] sm:$0xff] %v4923_v45  ;;  %4944 = vpow2.f32 %v4009_v28 }
 0x23a   : > { %v4927_v3 = vpop.eup %4926  ;;  %3053 = vst [vmem:[%s5687_s9 + $0x3c0] sm:$0xff] %v4925_v42  ;;  %4946 = vpow2.f32 %v4011_v57 }
 0x23b   : > { %v4929_v36 = vpop.eup %4928  ;;  %3055 = vst [vmem:[%s5687_s9 + $0x3d0] sm:$0xff] %v4927_v3  ;;  %4948 = vpow2.f32 %v4012_v23  ;;  %v4020_v23 = vmul.f32 -1.442695, %v7237_v32  ;;  %v6292_v3 = vpop.f32.mrb[100].mxu0 }
 0x23c   : > { %v4931_v25 = vpop.eup %4930  ;;  %3054 = vst [vmem:[%s5687_s9 + $0x3c8] sm:$0xff] %v4929_v36  ;;  %4950 = vpow2.f32 %v4014_v49  ;;  %v4022_v49 = vmul.f32 -1.442695, %v7238_v33 }
 0x23d   : > { %v4933_v28 = vpop.eup %4932  ;;  %3056 = vst [vmem:[%s5687_s9 + $0x3d8] sm:$0xff] %v4931_v25  ;;  %4952 = vpow2.f32 %v4013_v55  ;;  %v4021_v55 = vmul.f32 -1.442695, %v7239_v56 }
 0x23e   : > { %v4935_v20 = vpop.eup %4934  ;;  %3057 = vst [vmem:[%s5687_s9 + $0x3e0] sm:$0xff] %v4933_v28  ;;  %4954 = vpow2.f32 %v4015_v21  ;;  %v6294_v21 = vpop.f32.mrb[100].mxu1 }
 0x23f   : > { %v4937_v57 = vpop.eup %4936  ;;  %3059 = vst [vmem:[%s5687_s9 + $0x3f0] sm:$0xff] %v4935_v20  ;;  %4956 = vpow2.f32 %v4016_v13  ;;  %v6297_v13 = vpop.f32.mrb[101].mxu0 }
 0x240   : > { %v4939_v45 = vpop.eup %4938  ;;  %3058 = vst [vmem:[%s5687_s9 + $0x3e8] sm:$0xff] %v4937_v57  ;;  %4958 = vpow2.f32 %v4018_v17  ;;  %v6299_v25 = vpop.f32.mrb[101].mxu1 }
 0x241   : > { %v4941_v42 = vpop.eup %4940  ;;  %3060 = vst [vmem:[%s5687_s9 + $0x3f8] sm:$0xff] %v4939_v45  ;;  %4960 = vpow2.f32 %v4017_v24  ;;  %7240 = vst [vmem:[#allocation16_spill] sm:$0xff] %v6299_v25  ;;  %v6302_v17 = vpop.f32.mrb[102].mxu0 }
 0x242   : > { %v4943_v36 = vpop.eup %4942  ;;  %3061 = vst [vmem:[%s5687_s9 + $0x400] sm:$0xff] %v4941_v42  ;;  %4962 = vpow2.f32 %v4019_v0  ;;  %7241 = vst [vmem:[#allocation17_spill] sm:$0xff] %v6302_v17  ;;  %v6304_v20 = vpop.f32.mrb[102].mxu1 }
 0x243   : > { %v4945_v28 = vpop.eup %4944  ;;  %3063 = vst [vmem:[%s5687_s9 + $0x410] sm:$0xff] %v4943_v36  ;;  %4964 = vpow2.f32 %v4020_v23  ;;  %7242 = vst [vmem:[#allocation18_spill] sm:$0xff] %v6304_v20  ;;  %v6306_v57 = vpop.f32.mrb[103].mxu0 }
 0x244   : > { %v4947_v24 = vpop.eup %4946  ;;  %v2294_v12 = vadd.f32 1.0, %v4945_v28  ;;  %4966 = vpow2.f32 %v4022_v49  ;;  %7243 = vst [vmem:[#allocation19_spill] sm:$0xff] %v6306_v57  ;;  %v6308_v0 = vpop.f32.mrb[103].mxu1 }
 0x245   : > { %v4949_v32 = vpop.eup %4948  ;;  %v2296_v45 = vadd.f32 1.0, %v4947_v24  ;;  %4968 = vpow2.f32 %v4021_v55  ;;  %7244 = vst [vmem:[#allocation20_spill] sm:$0xff] %v6308_v0  ;;  %v6310_v49 = vpop.f32.mrb[104].mxu0 }
 0x246   : > { %v4951_v33 = vpop.eup %4950  ;;  %4970 = vrcp.f32 %v2294_v12  ;;  %v2297_v42 = vadd.f32 1.0, %v4949_v32 }
 0x247   : > { %v4953_v56 = vpop.eup %4952  ;;  %4972 = vrcp.f32 %v2296_v45  ;;  %v2299_v23 = vadd.f32 1.0, %v4951_v33 }
 0x248   : > { %v4955_v36 = vpop.eup %4954  ;;  %4974 = vrcp.f32 %v2297_v42  ;;  %v2298_v17 = vadd.f32 1.0, %v4953_v56 }
 0x249   : > { %v4957_v20 = vpop.eup %4956  ;;  %4976 = vrcp.f32 %v2299_v23  ;;  %v2300_v28 = vadd.f32 1.0, %v4955_v36  ;;  %v4024_v36 = vmul.f32 -1.442695, %v6068_v29 }
 0x24a   : > { %v4959_v57 = vpop.eup %4958  ;;  %4978 = vrcp.f32 %v2298_v17  ;;  %v2301_v24 = vadd.f32 1.0, %v4957_v20  ;;  %v4023_v17 = vmul.f32 -1.442695, %v6050_v8 }
 0x24b   : > { %v4961_v55 = vpop.eup %4960  ;;  %4980 = vrcp.f32 %v2300_v28  ;;  %v2303_v0 = vadd.f32 1.0, %v4959_v57 }
 0x24c   : > { %v4963_v25 = vpop.eup %4962  ;;  %4982 = vrcp.f32 %v2301_v24  ;;  %v2302_v12 = vadd.f32 1.0, %v4961_v55  ;;  %v4025_v24 = vmul.f32 -1.442695, %v6074_v52  ;;  %v6318_v55 = vpop.f32.mrb[104].mxu1 }
 0x24d   : > { %v4965_v32 = vpop.eup %4964  ;;  %4984 = vrcp.f32 %v2303_v0  ;;  %v2304_v45 = vadd.f32 1.0, %v4963_v25  ;;  %v4026_v25 = vmul.f32 -1.442695, %v6070_v40  ;;  %v4028_v40 = vmul.f32 -1.442695, %v6080_v5 }
 0x24e   : > { %v4967_v33 = vpop.eup %4966  ;;  %4986 = vrcp.f32 %v2302_v12  ;;  %v2305_v42 = vadd.f32 1.0, %v4965_v32  ;;  %v4027_v12 = vmul.f32 -1.442695, %v6076_v30  ;;  %v6324_v32 = vpop.f32.mrb[105].mxu0  ;;  %v4029_v30 = vmul.f32 -1.442695, %v6086_v34 }
 0x24f   : > { %v4969_v56 = vpop.eup %4968  ;;  %4988 = vrcp.f32 %v2304_v45  ;;  %v2307_v23 = vadd.f32 1.0, %v4967_v33  ;;  %v6326_v45 = vpop.f32.mrb[105].mxu1  ;;  %v4030_v33 = vmul.f32 -1.442695, %v6082_v18  ;;  %v4032_v18 = vmul.f32 -1.442695, %v6094_v26 }
 0x250   : > { %v4971_v20 = vpop.eup %4970  ;;  %4990 = vrcp.f32 %v2305_v42  ;;  %v2306_v57 = vadd.f32 1.0, %v4969_v56  ;;  %v6332_v56 = vpop.f32.mrb[106].mxu0  ;;  %v4035_v26 = vmul.f32 -1.442695, %v6100_v4 }
 0x251   : > { %v4973_v28 = vpop.eup %4972  ;;  %3062 = vst [vmem:[%s5687_s9 + $0x408] sm:$0xff] %v4971_v20  ;;  %4992 = vrcp.f32 %v2307_v23  ;;  %v6334_v23 = vpop.f32.mrb[106].mxu1 }
 0x252   : > { %v4975_v0 = vpop.eup %4974  ;;  %3064 = vst [vmem:[%s5687_s9 + $0x418] sm:$0xff] %v4973_v28  ;;  %4994 = vrcp.f32 %v2306_v57  ;;  %v6340_v57 = vpop.f32.mrb[107].mxu0  ;;  %v4034_v28 = vmul.f32 -1.442695, %v6096_v35 }
 0x253   : > { %v4977_v8 = vpop.eup %4976  ;;  %3065 = vst [vmem:[%s5687_s9 + $0x420] sm:$0xff] %v4975_v0  ;;  %4996 = vpow2.f32 %v4023_v17  ;;  %v4031_v17 = vmul.f32 -1.442695, %v6088_v47  ;;  %v6342_v34 = vpop.f32.mrb[107].mxu1  ;;  %v4033_v47 = vmul.f32 -1.442695, %v6098_v19 }
 0x254   : > { %v4979_v29 = vpop.eup %4978  ;;  %3067 = vst [vmem:[%s5687_s9 + $0x430] sm:$0xff] %v4977_v8  ;;  %4998 = vpow2.f32 %v4024_v36  ;;  %v6352_v35 = vpop.f32.mrb[108].mxu0 }
 0x255   : > { %v4981_v52 = vpop.eup %4980  ;;  %3066 = vst [vmem:[%s5687_s9 + $0x428] sm:$0xff] %v4979_v29  ;;  %5000 = vpow2.f32 %v4026_v25 }
 0x256   : > { %v4983_v42 = vpop.eup %4982  ;;  %3068 = vst [vmem:[%s5687_s9 + $0x438] sm:$0xff] %v4981_v52  ;;  %5002 = vpow2.f32 %v4025_v24 }
 0x257   : > { %v4985_v5 = vpop.eup %4984  ;;  %3069 = vst [vmem:[%s5687_s9 + $0x440] sm:$0xff] %v4983_v42  ;;  %5004 = vpow2.f32 %v4027_v12 }
 0x258   : > { %v4987_v20 = vpop.eup %4986  ;;  %3071 = vst [vmem:[%s5687_s9 + $0x450] sm:$0xff] %v4985_v5  ;;  %5006 = vpow2.f32 %v4028_v40  ;;  %v6354_v40 = vpop.f32.mrb[108].mxu1 }
 0x259   : > { %v4989_v36 = vpop.eup %4988  ;;  %3070 = vst [vmem:[%s5687_s9 + $0x448] sm:$0xff] %v4987_v20  ;;  %5008 = vpow2.f32 %v4030_v33  ;;  %v6356_v33 = vpop.f32.mrb[109].mxu0 }
 0x25a   : > { %v4991_v25 = vpop.eup %4990  ;;  %3072 = vst [vmem:[%s5687_s9 + $0x458] sm:$0xff] %v4989_v36  ;;  %5010 = vpow2.f32 %v4029_v30  ;;  %v6358_v30 = vpop.f32.mrb[109].mxu1 }
 0x25b   : > { %v4993_v0 = vpop.eup %4992  ;;  %3073 = vst [vmem:[%s5687_s9 + $0x460] sm:$0xff] %v4991_v25  ;;  %5012 = vpow2.f32 %v4031_v17  ;;  %v6360_v5 = vpop.f32.mrb[110].mxu0 }
 0x25c   : > { %v4995_v24 = vpop.eup %4994  ;;  %3075 = vst [vmem:[%s5687_s9 + $0x470] sm:$0xff] %v4993_v0  ;;  %5014 = vpow2.f32 %v4032_v18  ;;  %v6362_v18 = vpop.f32.mrb[110].mxu1 }
 0x25d   : > { %v4997_v8 = vpop.eup %4996  ;;  %3074 = vst [vmem:[%s5687_s9 + $0x468] sm:$0xff] %v4995_v24  ;;  %5016 = vpow2.f32 %v4034_v28 }
 0x25e   : > { %v4999_v12 = vpop.eup %4998  ;;  %v2308_v29 = vadd.f32 1.0, %v4997_v8  ;;  %5018 = vpow2.f32 %v4033_v47 }
 0x25f   : > { %v5001_v52 = vpop.eup %5000  ;;  %v2309_v19 = vadd.f32 1.0, %v4999_v12  ;;  %5020 = vpow2.f32 %v4035_v26 }
 0x260   : > { %v5003_v42 = vpop.eup %5002  ;;  %5022 = vrcp.f32 %v2308_v29  ;;  %v2311_v4 = vadd.f32 1.0, %v5001_v52 }
 0x261   : > { %v5005_v17 = vpop.eup %5004  ;;  %5024 = vrcp.f32 %v2309_v19  ;;  %v2310_v20 = vadd.f32 1.0, %v5003_v42 }
 0x262   : > { %v5007_v36 = vpop.eup %5006  ;;  %5026 = vrcp.f32 %v2311_v4  ;;  %v2312_v28 = vadd.f32 1.0, %v5005_v17 }
 0x263   : > { %v5009_v25 = vpop.eup %5008  ;;  %5028 = vrcp.f32 %v2310_v20  ;;  %v2313_v47 = vadd.f32 1.0, %v5007_v36  ;;  %v4036_v36 = vmul.f32 -1.442695, %v6102_v48  ;;  %v4040_v48 = vmul.f32 -1.442695, %v6132_v59 }
 0x264   : > { %v5011_v0 = vpop.eup %5010  ;;  %5030 = vrcp.f32 %v2312_v28  ;;  %v2315_v26 = vadd.f32 1.0, %v5009_v25  ;;  %v4043_v59 = vmul.f32 -1.442695, %v6140_v46 }
 0x265   : > { %v5013_v24 = vpop.eup %5012  ;;  %5032 = vrcp.f32 %v2313_v47  ;;  %v2314_v8 = vadd.f32 1.0, %v5011_v0  ;;  %v4038_v47 = vmul.f32 -1.442695, %v6110_v1  ;;  %v6372_v1 = vpop.f32.mrb[111].mxu0 }
 0x266   : > { %v5015_v12 = vpop.eup %5014  ;;  %5034 = vrcp.f32 %v2315_v26  ;;  %v2316_v29 = vadd.f32 1.0, %v5013_v24  ;;  %v4037_v26 = vmul.f32 -1.442695, %v6116_v10  ;;  %v4042_v10 = vmul.f32 -1.442695, %v6134_v16 }
 0x267   : > { %v5017_v52 = vpop.eup %5016  ;;  %5036 = vrcp.f32 %v2314_v8  ;;  %v2317_v19 = vadd.f32 1.0, %v5015_v12  ;;  %v4039_v8 = vmul.f32 -1.442695, %v6118_v6  ;;  %v4041_v6 = vmul.f32 -1.442695, %v6138_v15 }
 0x268   : > { %v5019_v42 = vpop.eup %5018  ;;  %5038 = vrcp.f32 %v2316_v29  ;;  %v2319_v4 = vadd.f32 1.0, %v5017_v52  ;;  %v6374_v29 = vpop.f32.mrb[111].mxu1  ;;  %v4046_v16 = vmul.f32 -1.442695, %v6145_v27  ;;  %v4045_v15 = vmul.f32 -1.442695, %v6148_v14 }
 0x269   : > { %v5021_v17 = vpop.eup %5020  ;;  %5040 = vrcp.f32 %v2317_v19  ;;  %v2318_v20 = vadd.f32 1.0, %v5019_v42  ;;  %v6390_v46 = vpop.f32.mrb[112].mxu1  ;;  %v4048_v14 = vmul.f32 -1.442695, %v6152_v7 }
 0x26a   : > { %v5023_v28 = vpop.eup %5022  ;;  %5042 = vrcp.f32 %v2319_v4  ;;  %v2320_v25 = vadd.f32 1.0, %v5021_v17  ;;  %v4044_v17 = vmul.f32 -1.442695, %v6143_v53  ;;  %v4047_v53 = vmul.f32 -1.442695, %v6150_v37 }
 0x26b   : > { %v5025_v0 = vpop.eup %5024  ;;  %3076 = vst [vmem:[%s5687_s9 + $0x478] sm:$0xff] %v5023_v28  ;;  %5044 = vrcp.f32 %v2318_v20  ;;  %v6388_v28 = vpop.f32.mrb[112].mxu0 }
 0x26c   : > { %v5027_v24 = vpop.eup %5026  ;;  %3077 = vst [vmem:[%s5687_s9 + $0x480] sm:$0xff] %v5025_v0  ;;  %5046 = vrcp.f32 %v2320_v25  ;;  %v6396_v0 = vpop.f32.mrb[113].mxu1 }
 0x26d   : > { %v5029_v12 = vpop.eup %5028  ;;  %3079 = vst [vmem:[%s5687_s9 + $0x490] sm:$0xff] %v5027_v24  ;;  %5048 = vpow2.f32 %v4036_v36  ;;  %v6402_v24 = vpop.f32.mrb[114].mxu1 }
 0x26e   : > { %v5031_v52 = vpop.eup %5030  ;;  %3078 = vst [vmem:[%s5687_s9 + $0x488] sm:$0xff] %v5029_v12  ;;  %5050 = vpow2.f32 %v4038_v47  ;;  %v6394_v47 = vpop.f32.mrb[113].mxu0 }
 0x26f   : > { %v5033_v19 = vpop.eup %5032  ;;  %3080 = vst [vmem:[%s5687_s9 + $0x498] sm:$0xff] %v5031_v52  ;;  %5052 = vpow2.f32 %v4037_v26  ;;  %v6400_v26 = vpop.f32.mrb[114].mxu0 }
 0x270   : > { %v5035_v42 = vpop.eup %5034  ;;  %3081 = vst [vmem:[%s5687_s9 + $0x4a0] sm:$0xff] %v5033_v19  ;;  %5054 = vpow2.f32 %v4039_v8  ;;  %v6405_v12 = vpop.f32.mrb[115].mxu0 }
 0x271   : > { %v5037_v4 = vpop.eup %5036  ;;  %3083 = vst [vmem:[%s5687_s9 + $0x4b0] sm:$0xff] %v5035_v42  ;;  %5056 = vpow2.f32 %v4040_v48  ;;  %v6407_v48 = vpop.f32.mrb[115].mxu1 }
 0x272   : > { %v5039_v20 = vpop.eup %5038  ;;  %3082 = vst [vmem:[%s5687_s9 + $0x4a8] sm:$0xff] %v5037_v4  ;;  %5058 = vpow2.f32 %v4042_v10 }
 0x273   : > { %v5041_v36 = vpop.eup %5040  ;;  %3084 = vst [vmem:[%s5687_s9 + $0x4b8] sm:$0xff] %v5039_v20  ;;  %5060 = vpow2.f32 %v4041_v6  ;;  %v6412_v20 = vpop.f32.mrb[116].mxu1 }
 0x274   : > { %v5043_v25 = vpop.eup %5042  ;;  %3085 = vst [vmem:[%s5687_s9 + $0x4c0] sm:$0xff] %v5041_v36  ;;  %5062 = vpow2.f32 %v4043_v59 }
 0x275   : > { %v5045_v27 = vpop.eup %5044  ;;  %3087 = vst [vmem:[%s5687_s9 + $0x4d0] sm:$0xff] %v5043_v25  ;;  %5064 = vpow2.f32 %v4044_v17  ;;  %v6410_v17 = vpop.f32.mrb[116].mxu0 }
 0x276   : > { %v5047_v8 = vpop.eup %5046  ;;  %3086 = vst [vmem:[%s5687_s9 + $0x4c8] sm:$0xff] %v5045_v27  ;;  %5066 = vpow2.f32 %v4046_v16 }
 0x277   : > { %v5049_v37 = vpop.eup %5048  ;;  %3088 = vst [vmem:[%s5687_s9 + $0x4d8] sm:$0xff] %v5047_v8  ;;  %5068 = vpow2.f32 %v4045_v15  ;;  %v6414_v15 = vpop.f32.mrb[117].mxu0 }
 0x278   : > { %v5051_v52 = vpop.eup %5050  ;;  %v2321_v10 = vadd.f32 1.0, %v5049_v37  ;;  %5070 = vpow2.f32 %v4047_v53 }
 0x279   : > { %v5053_v19 = vpop.eup %5052  ;;  %v2323_v6 = vadd.f32 1.0, %v5051_v52  ;;  %5072 = vpow2.f32 %v4048_v14 }
 0x27a   : > { %v5055_v7 = vpop.eup %5054  ;;  %5074 = vrcp.f32 %v2321_v10  ;;  %v2322_v42 = vadd.f32 1.0, %v5053_v19 }
 0x27b   : > { %v5057_v59 = vpop.eup %5056  ;;  %5076 = vrcp.f32 %v2323_v6  ;;  %v2324_v4 = vadd.f32 1.0, %v5055_v7 }
 0x27c   : > { %v5059_v16 = vpop.eup %5058  ;;  %5078 = vrcp.f32 %v2322_v42  ;;  %v2325_v36 = vadd.f32 1.0, %v5057_v59 }
 0x27d   : > { %v5061_v25 = vpop.eup %5060  ;;  %5080 = vrcp.f32 %v2324_v4  ;;  %v2327_v53 = vadd.f32 1.0, %v5059_v16  ;;  %v7245_v16 = vld [vmem:[#allocation3_spill] sm:$0xff] }
 0x27e   : > { %v5063_v27 = vpop.eup %5062  ;;  %5082 = vrcp.f32 %v2325_v36  ;;  %v2326_v14 = vadd.f32 1.0, %v5061_v25  ;;  %v4050_v36 = vmul.f32 -1.442695, %v7245_v16 }
 0x27f   : > { %v5065_v8 = vpop.eup %5064  ;;  %5084 = vrcp.f32 %v2327_v53  ;;  %v2328_v37 = vadd.f32 1.0, %v5063_v27  ;;  %v4049_v27 = vmul.f32 -1.442695, %v6164_v44 }
 0x280   : > { %v5067_v52 = vpop.eup %5066  ;;  %5086 = vrcp.f32 %v2326_v14  ;;  %v2329_v10 = vadd.f32 1.0, %v5065_v8  ;;  %v4051_v8 = vmul.f32 -1.442695, %v6166_v51  ;;  %v4053_v51 = vmul.f32 -1.442695, %v6180_v11 }
 0x281   : > { %v5069_v19 = vpop.eup %5068  ;;  %5088 = vrcp.f32 %v2328_v37  ;;  %v2331_v6 = vadd.f32 1.0, %v5067_v52  ;;  %v4052_v52 = vmul.f32 -1.442695, %v6172_v39 }
 0x282   : > { %v5071_v7 = vpop.eup %5070  ;;  %5090 = vrcp.f32 %v2329_v10  ;;  %v2330_v42 = vadd.f32 1.0, %v5069_v19  ;;  %v6422_v10 = vpop.f32.mrb[117].mxu1 }
 0x283   : > { %v5073_v59 = vpop.eup %5072  ;;  %5092 = vrcp.f32 %v2331_v6  ;;  %v2332_v4 = vadd.f32 1.0, %v5071_v7  ;;  %v4054_v6 = vmul.f32 -1.442695, %v6174_v43  ;;  %v6428_v7 = vpop.f32.mrb[118].mxu0  ;;  %v4056_v43 = vmul.f32 -1.442695, %v6194_v22 }
 0x284   : > { %v5075_v25 = vpop.eup %5074  ;;  %5094 = vrcp.f32 %v2330_v42  ;;  %v2333_v53 = vadd.f32 1.0, %v5073_v59  ;;  %v6430_v42 = vpop.f32.mrb[118].mxu1  ;;  %v4055_v59 = vmul.f32 -1.442695, %v6182_v58  ;;  %v4057_v58 = vmul.f32 -1.442695, %v6198_v50 }
 0x285   : > { %v5077_v14 = vpop.eup %5076  ;;  %3089 = vst [vmem:[%s5687_s9 + $0x4e0] sm:$0xff] %v5075_v25  ;;  %5096 = vrcp.f32 %v2332_v4  ;;  %v6436_v16 = vpop.f32.mrb[119].mxu0  ;;  %v4058_v25 = vmul.f32 -1.442695, %v6196_v62  ;;  %v4059_v22 = vmul.f32 -1.442695, %v6200_v60 }
 0x286   : > { %v5079_v37 = vpop.eup %5078  ;;  %3091 = vst [vmem:[%s5687_s9 + $0x4f0] sm:$0xff] %v5077_v14  ;;  %5098 = vrcp.f32 %v2333_v53  ;;  %v6438_v11 = vpop.f32.mrb[119].mxu1  ;;  %v7247_v62 = vld [vmem:[#allocation5_spill] sm:$0xff] }
 0x287   : > { %v5081_v19 = vpop.eup %5080  ;;  %3090 = vst [vmem:[%s5687_s9 + $0x4e8] sm:$0xff] %v5079_v37  ;;  %5100 = vpow2.f32 %v4050_v36  ;;  %v6451_v50 = vpop.f32.mrb[120].mxu0 }
 0x288   : > { %v5083_v44 = vpop.eup %5082  ;;  %3092 = vst [vmem:[%s5687_s9 + $0x4f8] sm:$0xff] %v5081_v19  ;;  %5102 = vpow2.f32 %v4049_v27  ;;  %v4062_v19 = vmul.f32 -1.442695, %v7247_v62  ;;  %v6456_v60 = vpop.f32.mrb[121].mxu0 }
 0x289   : > { %v5085_v39 = vpop.eup %5084  ;;  %3093 = vst [vmem:[%s5687_s9 + $0x500] sm:$0xff] %v5083_v44  ;;  %5104 = vpow2.f32 %v4051_v8  ;;  %v7246_v8 = vld [vmem:[#allocation4_spill] sm:$0xff]  ;;  %v6453_v44 = vpop.f32.mrb[120].mxu1 }
 0x28a   : > { %v5087_v4 = vpop.eup %5086  ;;  %3095 = vst [vmem:[%s5687_s9 + $0x510] sm:$0xff] %v5085_v39  ;;  %5106 = vpow2.f32 %v4052_v52  ;;  %v4060_v37 = vmul.f32 -1.442695, %v7246_v8  ;;  %v6458_v39 = vpop.f32.mrb[121].mxu1 }
 0x28b   : > { %v5089_v36 = vpop.eup %5088  ;;  %3094 = vst [vmem:[%s5687_s9 + $0x508] sm:$0xff] %v5087_v4  ;;  %5108 = vpow2.f32 %v4054_v6 }
 0x28c   : > { %v5091_v53 = vpop.eup %5090  ;;  %3096 = vst [vmem:[%s5687_s9 + $0x518] sm:$0xff] %v5089_v36  ;;  %5110 = vpow2.f32 %v4053_v51 }
 0x28d   : > { %v5093_v27 = vpop.eup %5092  ;;  %3097 = vst [vmem:[%s5687_s9 + $0x520] sm:$0xff] %v5091_v53  ;;  %5112 = vpow2.f32 %v4055_v59  ;;  %v6462_v53 = vpop.f32.mrb[122].mxu1 }
 0x28e   : > { %v5095_v14 = vpop.eup %5094  ;;  %3099 = vst [vmem:[%s5687_s9 + $0x530] sm:$0xff] %v5093_v27  ;;  %5114 = vpow2.f32 %v4056_v43  ;;  %v6460_v43 = vpop.f32.mrb[122].mxu0  ;;  %7249 = vst [vmem:[#allocation4_spill] sm:$0xff] %v6462_v53 }
 0x28f   : > { %v5097_v52 = vpop.eup %5096  ;;  %3098 = vst [vmem:[%s5687_s9 + $0x528] sm:$0xff] %v5095_v14  ;;  %5116 = vpow2.f32 %v4058_v25  ;;  %7248 = vst [vmem:[#allocation3_spill] sm:$0xff] %v6460_v43 }
 0x290   : > { %v5099_v6 = vpop.eup %5098  ;;  %3100 = vst [vmem:[%s5687_s9 + $0x538] sm:$0xff] %v5097_v52  ;;  %5118 = vpow2.f32 %v4057_v58  ;;  %v6464_v58 = vpop.f32.mrb[123].mxu0 }
 0x291   : > { %v5101_v51 = vpop.eup %5100  ;;  %3101 = vst [vmem:[%s5687_s9 + $0x540] sm:$0xff] %v5099_v6  ;;  %5120 = vpow2.f32 %v4059_v22  ;;  %7250 = vst [vmem:[#allocation5_spill] sm:$0xff] %v6464_v58  ;;  %v6466_v22 = vpop.f32.mrb[123].mxu1 }
 0x292   : > { %v5103_v59 = vpop.eup %5102  ;;  %v2335_v4 = vadd.f32 1.0, %v5101_v51  ;;  %5122 = vpow2.f32 %v4060_v37 }
 0x293   : > { %v5105_v36 = vpop.eup %5104  ;;  %v2334_v25 = vadd.f32 1.0, %v5103_v59  ;;  %5124 = vpow2.f32 %v4062_v19 }
 0x294   : > { %v5107_v27 = vpop.eup %5106  ;;  %5126 = vrcp.f32 %v2335_v4  ;;  %v2336_v14 = vadd.f32 1.0, %v5105_v36 }
 0x295   : > { %v5109_v8 = vpop.eup %5108  ;;  %5128 = vrcp.f32 %v2334_v25  ;;  %v2337_v52 = vadd.f32 1.0, %v5107_v27 }
 0x296   : > { %v5111_v62 = vpop.eup %5110  ;;  %5130 = vrcp.f32 %v2336_v14  ;;  %v2339_v37 = vadd.f32 1.0, %v5109_v8 }
 0x297   : > { %v5113_v6 = vpop.eup %5112  ;;  %5132 = vrcp.f32 %v2337_v52  ;;  %v2338_v51 = vadd.f32 1.0, %v5111_v62  ;;  %v7251_v62 = vld [vmem:[#allocation6_spill] sm:$0xff] }
 0x298   : > { %v5115_v59 = vpop.eup %5114  ;;  %5134 = vrcp.f32 %v2339_v37  ;;  %v2340_v19 = vadd.f32 1.0, %v5113_v6  ;;  %v4061_v37 = vmul.f32 -1.442695, %v7251_v62 }
 0x299   : > { %v5117_v53 = vpop.eup %5116  ;;  %5136 = vrcp.f32 %v2338_v51  ;;  %v2341_v58 = vadd.f32 1.0, %v5115_v59  ;;  %v7252_v59 = vld [vmem:[#allocation7_spill] sm:$0xff] }
 0x29a   : > { %v5119_v43 = vpop.eup %5118  ;;  %5138 = vrcp.f32 %v2340_v19  ;;  %v2343_v4 = vadd.f32 1.0, %v5117_v53  ;;  %v4063_v53 = vmul.f32 -1.442695, %v7252_v59  ;;  %v6484_v59 = vpop.f32.mrb[124].mxu0 }
 0x29b   : > { %v5121_v36 = vpop.eup %5120  ;;  %5140 = vrcp.f32 %v2341_v58  ;;  %v2342_v25 = vadd.f32 1.0, %v5119_v43  ;;  %v4064_v43 = vmul.f32 -1.442695, %v6228_v2  ;;  %v7253_v2 = vld [vmem:[#allocation8_spill] sm:$0xff] }
 0x29c   : > { %v5123_v27 = vpop.eup %5122  ;;  %5142 = vrcp.f32 %v2343_v4  ;;  %v2344_v14 = vadd.f32 1.0, %v5121_v36  ;;  %v4066_v4 = vmul.f32 -1.442695, %v6230_v54  ;;  %v7254_v54 = vld [vmem:[#allocation9_spill] sm:$0xff] }
 0x29d   : > { %v5125_v8 = vpop.eup %5124  ;;  %5144 = vrcp.f32 %v2342_v25  ;;  %v2345_v52 = vadd.f32 1.0, %v5123_v27  ;;  %v4065_v25 = vmul.f32 -1.442695, %v6234_v38  ;;  %v7255_v38 = vld [vmem:[#allocation10_spill] sm:$0xff] }
 0x29e   : > { %v5127_v6 = vpop.eup %5126  ;;  %5146 = vrcp.f32 %v2344_v14  ;;  %v2347_v51 = vadd.f32 1.0, %v5125_v8  ;;  %v4067_v14 = vmul.f32 -1.442695, %v6236_v61  ;;  %v6486_v61 = vpop.f32.mrb[124].mxu1 }
 0x29f   : > { %v5129_v19 = vpop.eup %5128  ;;  %3103 = vst [vmem:[%s5687_s9 + $0x550] sm:$0xff] %v5127_v6  ;;  %5148 = vrcp.f32 %v2345_v52  ;;  %v4068_v52 = vmul.f32 -1.442695, %v7253_v2  ;;  %v4070_v6 = vmul.f32 -1.442695, %v7254_v54 }
 0x2a0   : > { %v5131_v58 = vpop.eup %5130  ;;  %3102 = vst [vmem:[%s5687_s9 + $0x548] sm:$0xff] %v5129_v19  ;;  %5150 = vrcp.f32 %v2347_v51  ;;  %v4069_v51 = vmul.f32 -1.442695, %v7255_v38  ;;  %v7256_v19 = vld [vmem:[#allocation11_spill] sm:$0xff] }
 0x2a1   : > { %v5133_v36 = vpop.eup %5132  ;;  %3104 = vst [vmem:[%s5687_s9 + $0x558] sm:$0xff] %v5131_v58  ;;  %5152 = vpow2.f32 %v4061_v37  ;;  %v6490_v58 = vpop.f32.mrb[125].mxu0 }
 0x2a2   : > { %v5135_v27 = vpop.eup %5134  ;;  %3105 = vst [vmem:[%s5687_s9 + $0x560] sm:$0xff] %v5133_v36  ;;  %5154 = vpow2.f32 %v4063_v53 }
 0x2a3   : > { %v5137_v8 = vpop.eup %5136  ;;  %3107 = vst [vmem:[%s5687_s9 + $0x570] sm:$0xff] %v5135_v27  ;;  %5156 = vpow2.f32 %v4064_v43  ;;  %v4071_v43 = vmul.f32 -1.442695, %v7256_v19 }
 0x2a4   : > { %v5139_v62 = vpop.eup %5138  ;;  %3106 = vst [vmem:[%s5687_s9 + $0x568] sm:$0xff] %v5137_v8  ;;  %5158 = vpow2.f32 %v4066_v4  ;;  %v6492_v4 = vpop.f32.mrb[125].mxu1 }
 0x2a5   : > { %v5141_v37 = vpop.eup %5140  ;;  %3108 = vst [vmem:[%s5687_s9 + $0x578] sm:$0xff] %v5139_v62  ;;  %5160 = vpow2.f32 %v4065_v25  ;;  %7257 = vst [vmem:[#allocation6_spill] sm:$0xff] %v6492_v4  ;;  %v7258_v25 = vld [vmem:[#allocation12_spill] sm:$0xff]  ;;  %v6496_v8 = vpop.f32.mrb[126].mxu0 }
 0x2a6   : > { %v5143_v53 = vpop.eup %5142  ;;  %3109 = vst [vmem:[%s5687_s9 + $0x580] sm:$0xff] %v5141_v37  ;;  %5162 = vpow2.f32 %v4067_v14  ;;  %v4072_v27 = vmul.f32 -1.442695, %v7258_v25  ;;  %7259 = vst [vmem:[#allocation7_spill] sm:$0xff] %v6496_v8  ;;  %v6498_v2 = vpop.f32.mrb[126].mxu1  ;;  %v7261_v14 = vld [vmem:[#allocation13_spill] sm:$0xff] }
 0x2a7   : > { %v5145_v36 = vpop.eup %5144  ;;  %3111 = vst [vmem:[%s5687_s9 + $0x590] sm:$0xff] %v5143_v53  ;;  %5164 = vpow2.f32 %v4068_v52  ;;  %7260 = vst [vmem:[#allocation8_spill] sm:$0xff] %v6498_v2  ;;  %v4074_v54 = vmul.f32 -1.442695, %v7261_v14  ;;  %v6502_v37 = vpop.f32.mrb[127].mxu0  ;;  %v7264_v52 = vld [vmem:[#allocation14_spill] sm:$0xff] }
 0x2a8   : > { %v5147_v62 = vpop.eup %5146  ;;  %3110 = vst [vmem:[%s5687_s9 + $0x588] sm:$0xff] %v5145_v36  ;;  %5166 = vpow2.f32 %v4070_v6  ;;  %7262 = vst [vmem:[#allocation9_spill] sm:$0xff] %v6502_v37  ;;  %v6504_v38 = vpop.f32.mrb[127].mxu1  ;;  %v4073_v53 = vmul.f32 -1.442695, %v7264_v52 }
 0x2a9   : > { %7263 = vst [vmem:[#allocation10_spill] sm:$0xff] %v6504_v38  ;;  %v5149_v19 = vpop.eup %5148  ;;  %3112 = vst [vmem:[%s5687_s9 + $0x598] sm:$0xff] %v5147_v62  ;;  %5168 = vpow2.f32 %v4069_v51 }
 0x2aa   : > { %v5151_v25 = vpop.eup %5150  ;;  %3113 = vst [vmem:[%s5687_s9 + $0x5a0] sm:$0xff] %v5149_v19  ;;  %5170 = vpow2.f32 %v4071_v43 }
 0x2ab   : > { %v5153_v8 = vpop.eup %5152  ;;  %3115 = vst [vmem:[%s5687_s9 + $0x5b0] sm:$0xff] %v5151_v25  ;;  %5172 = vpow2.f32 %v4072_v27 }
 0x2ac   : > { %v5155_v2 = vpop.eup %5154  ;;  %v2346_v36 = vadd.f32 1.0, %v5153_v8  ;;  %5174 = vpow2.f32 %v4074_v54 }
 0x2ad   : > { %v5157_v6 = vpop.eup %5156  ;;  %v2348_v14 = vadd.f32 1.0, %v5155_v2  ;;  %5176 = vpow2.f32 %v4073_v53 }
 0x2ae   : > { %v5159_v37 = vpop.eup %5158  ;;  %5178 = vrcp.f32 %v2346_v36  ;;  %v2349_v38 = vadd.f32 1.0, %v5157_v6 }
 0x2af   : > { %v5161_v4 = vpop.eup %5160  ;;  %5180 = vrcp.f32 %v2348_v14  ;;  %v2351_v51 = vadd.f32 1.0, %v5159_v37 }
 0x2b0   : > { %v5163_v62 = vpop.eup %5162  ;;  %5182 = vrcp.f32 %v2349_v38  ;;  %v2350_v52 = vadd.f32 1.0, %v5161_v4 }
 0x2b1   : > { %v5165_v19 = vpop.eup %5164  ;;  %5184 = vrcp.f32 %v2351_v51  ;;  %v2352_v43 = vadd.f32 1.0, %v5163_v62  ;;  %v7265_v51 = vld [vmem:[#allocation15_spill] sm:$0xff] }
 0x2b2   : > { %v5167_v25 = vpop.eup %5166  ;;  %5186 = vrcp.f32 %v2350_v52  ;;  %v2353_v27 = vadd.f32 1.0, %v5165_v19  ;;  %v4075_v62 = vmul.f32 -1.442695, %v7265_v51 }
 0x2b3   : > { %v5169_v8 = vpop.eup %5168  ;;  %5188 = vrcp.f32 %v2352_v43  ;;  %v2355_v54 = vadd.f32 1.0, %v5167_v25  ;;  %v4076_v43 = vmul.f32 -1.442695, %v6268_v9  ;;  %v4080_v9 = vmul.f32 -1.442695, %v6292_v3  ;;  %v7267_v3 = vld [vmem:[#allocation17_spill] sm:$0xff] }
 0x2b4   : > { %v5171_v2 = vpop.eup %5170  ;;  %5190 = vrcp.f32 %v2353_v27  ;;  %v2354_v53 = vadd.f32 1.0, %v5169_v8  ;;  %v4078_v27 = vmul.f32 -1.442695, %v6270_v41  ;;  %v4082_v41 = vmul.f32 -1.442695, %v6294_v21  ;;  %v7268_v21 = vld [vmem:[#allocation18_spill] sm:$0xff] }
 0x2b5   : > { %v5173_v36 = vpop.eup %5172  ;;  %5192 = vrcp.f32 %v2355_v54  ;;  %v2356_v6 = vadd.f32 1.0, %v5171_v2  ;;  %v4077_v54 = vmul.f32 -1.442695, %v6276_v63  ;;  %v4081_v63 = vmul.f32 -1.442695, %v6297_v13  ;;  %v7269_v13 = vld [vmem:[#allocation19_spill] sm:$0xff] }
 0x2b6   : > { %v5175_v37 = vpop.eup %5174  ;;  %5194 = vrcp.f32 %v2354_v53  ;;  %v2357_v4 = vadd.f32 1.0, %v5173_v36  ;;  %v4079_v53 = vmul.f32 -1.442695, %v6278_v31  ;;  %v7266_v31 = vld [vmem:[#allocation16_spill] sm:$0xff]  ;;  %v4084_v51 = vmul.f32 -1.442695, %v7267_v3 }
 0x2b7   : > { %v5177_v38 = vpop.eup %5176  ;;  %5196 = vrcp.f32 %v2356_v6  ;;  %v2359_v14 = vadd.f32 1.0, %v5175_v37 }
 0x2b8   : > { %v5179_v52 = vpop.eup %5178  ;;  %5198 = vrcp.f32 %v2357_v4  ;;  %v2358_v19 = vadd.f32 1.0, %v5177_v38  ;;  %v4083_v38 = vmul.f32 -1.442695, %v7266_v31 }
 0x2b9   : > { %v5181_v25 = vpop.eup %5180  ;;  %3114 = vst [vmem:[%s5687_s9 + $0x5a8] sm:$0xff] %v5179_v52  ;;  %5200 = vrcp.f32 %v2359_v14  ;;  %v4086_v52 = vmul.f32 -1.442695, %v7268_v21 }
 0x2ba   : > { %v5183_v8 = vpop.eup %5182  ;;  %3116 = vst [vmem:[%s5687_s9 + $0x5b8] sm:$0xff] %v5181_v25  ;;  %5202 = vrcp.f32 %v2358_v19 }
 0x2bb   : > { %v5185_v2 = vpop.eup %5184  ;;  %3117 = vst [vmem:[%s5687_s9 + $0x5c0] sm:$0xff] %v5183_v8  ;;  %5204 = vpow2.f32 %v4075_v62 }
 0x2bc   : > { %v5187_v36 = vpop.eup %5186  ;;  %3119 = vst [vmem:[%s5687_s9 + $0x5d0] sm:$0xff] %v5185_v2  ;;  %5206 = vpow2.f32 %v4076_v43  ;;  %v4085_v43 = vmul.f32 -1.442695, %v7269_v13 }
 0x2bd   : > { %v5189_v6 = vpop.eup %5188  ;;  %3118 = vst [vmem:[%s5687_s9 + $0x5c8] sm:$0xff] %v5187_v36  ;;  %5208 = vpow2.f32 %v4078_v27  ;;  %v7270_v27 = vld [vmem:[#allocation20_spill] sm:$0xff] }
 0x2be   : > { %v5191_v37 = vpop.eup %5190  ;;  %3120 = vst [vmem:[%s5687_s9 + $0x5d8] sm:$0xff] %v5189_v6  ;;  %5210 = vpow2.f32 %v4077_v54  ;;  %v4087_v8 = vmul.f32 -1.442695, %v7270_v27 }
 0x2bf   : > { %v5193_v4 = vpop.eup %5192  ;;  %3121 = vst [vmem:[%s5687_s9 + $0x5e0] sm:$0xff] %v5191_v37  ;;  %5212 = vpow2.f32 %v4079_v53 }
 0x2c0   : > { %v5195_v14 = vpop.eup %5194  ;;  %3123 = vst [vmem:[%s5687_s9 + $0x5f0] sm:$0xff] %v5193_v4  ;;  %5214 = vpow2.f32 %v4080_v9 }
 0x2c1   : > { %v5197_v62 = vpop.eup %5196  ;;  %3122 = vst [vmem:[%s5687_s9 + $0x5e8] sm:$0xff] %v5195_v14  ;;  %5216 = vpow2.f32 %v4082_v41 }
 0x2c2   : > { %v5199_v19 = vpop.eup %5198  ;;  %3124 = vst [vmem:[%s5687_s9 + $0x5f8] sm:$0xff] %v5197_v62  ;;  %5218 = vpow2.f32 %v4081_v63 }
 0x2c3   : > { %v5201_v25 = vpop.eup %5200  ;;  %3125 = vst [vmem:[%s5687_s9 + $0x600] sm:$0xff] %v5199_v19  ;;  %5220 = vpow2.f32 %v4083_v38 }
 0x2c4   : > { %v5203_v54 = vpop.eup %5202  ;;  %3127 = vst [vmem:[%s5687_s9 + $0x610] sm:$0xff] %v5201_v25  ;;  %5222 = vpow2.f32 %v4084_v51 }
 0x2c5   : > { %v5205_v2 = vpop.eup %5204  ;;  %3126 = vst [vmem:[%s5687_s9 + $0x608] sm:$0xff] %v5203_v54  ;;  %5224 = vpow2.f32 %v4086_v52 }
 0x2c6   : > { %v5207_v53 = vpop.eup %5206  ;;  %v2360_v36 = vadd.f32 1.0, %v5205_v2  ;;  %5226 = vpow2.f32 %v4085_v43 }
 0x2c7   : > { %v5209_v9 = vpop.eup %5208  ;;  %v2361_v6 = vadd.f32 1.0, %v5207_v53  ;;  %5228 = vpow2.f32 %v4087_v8  ;;  %v4088_v53 = vmul.f32 -1.442695, %v6310_v49  ;;  %v4092_v49 = vmul.f32 -1.442695, %v6332_v56 }
 0x2c8   : > { %v5211_v41 = vpop.eup %5210  ;;  %5230 = vrcp.f32 %v2360_v36  ;;  %v2363_v37 = vadd.f32 1.0, %v5209_v9  ;;  %v4096_v56 = vmul.f32 -1.442695, %v6352_v35  ;;  %v4100_v35 = vmul.f32 -1.442695, %v6360_v5 }
 0x2c9   : > { %v5213_v63 = vpop.eup %5212  ;;  %5232 = vrcp.f32 %v2361_v6  ;;  %v2362_v4 = vadd.f32 1.0, %v5211_v41  ;;  %v4090_v6 = vmul.f32 -1.442695, %v6318_v55  ;;  %v4094_v55 = vmul.f32 -1.442695, %v6334_v23 }
 0x2ca   : > { %v5215_v31 = vpop.eup %5214  ;;  %5234 = vrcp.f32 %v2363_v37  ;;  %v2364_v38 = vadd.f32 1.0, %v5213_v63  ;;  %v4089_v37 = vmul.f32 -1.442695, %v6324_v32  ;;  %v4093_v32 = vmul.f32 -1.442695, %v6340_v57 }
 0x2cb   : > { %v5217_v14 = vpop.eup %5216  ;;  %5236 = vrcp.f32 %v2362_v4  ;;  %v2365_v3 = vadd.f32 1.0, %v5215_v31  ;;  %v4091_v4 = vmul.f32 -1.442695, %v6326_v45  ;;  %v4095_v45 = vmul.f32 -1.442695, %v6342_v34 }
 0x2cc   : > { %v5219_v51 = vpop.eup %5218  ;;  %5238 = vrcp.f32 %v2364_v38  ;;  %v2367_v62 = vadd.f32 1.0, %v5217_v14  ;;  %v4098_v23 = vmul.f32 -1.442695, %v6354_v40  ;;  %v4097_v57 = vmul.f32 -1.442695, %v6356_v33 }
 0x2cd   : > { %v5221_v21 = vpop.eup %5220  ;;  %5240 = vrcp.f32 %v2365_v3  ;;  %v2366_v52 = vadd.f32 1.0, %v5219_v51  ;;  %v4099_v34 = vmul.f32 -1.442695, %v6358_v30 }
 0x2ce   : > { %v5223_v19 = vpop.eup %5222  ;;  %5242 = vrcp.f32 %v2367_v62  ;;  %v2368_v13 = vadd.f32 1.0, %v5221_v21 }
 0x2cf   : > { %v5225_v43 = vpop.eup %5224  ;;  %5244 = vrcp.f32 %v2366_v52  ;;  %v2369_v25 = vadd.f32 1.0, %v5223_v19 }
 0x2d0   : > { %v5227_v27 = vpop.eup %5226  ;;  %5246 = vrcp.f32 %v2368_v13  ;;  %v2371_v8 = vadd.f32 1.0, %v5225_v43 }
 0x2d1   : > { %v5229_v54 = vpop.eup %5228  ;;  %5248 = vrcp.f32 %v2369_v25  ;;  %v2370_v2 = vadd.f32 1.0, %v5227_v27 }
 0x2d2   : > { %v5231_v36 = vpop.eup %5230  ;;  %5250 = vrcp.f32 %v2371_v8  ;;  %v2372_v9 = vadd.f32 1.0, %v5229_v54 }
 0x2d3   : > { %v5233_v41 = vpop.eup %5232  ;;  %3128 = vst [vmem:[%s5687_s9 + $0x618] sm:$0xff] %v5231_v36  ;;  %5252 = vrcp.f32 %v2370_v2 }
 0x2d4   : > { %v5235_v63 = vpop.eup %5234  ;;  %3129 = vst [vmem:[%s5687_s9 + $0x620] sm:$0xff] %v5233_v41  ;;  %5254 = vrcp.f32 %v2372_v9 }
 0x2d5   : > { %v5237_v31 = vpop.eup %5236  ;;  %3131 = vst [vmem:[%s5687_s9 + $0x630] sm:$0xff] %v5235_v63  ;;  %5256 = vpow2.f32 %v4088_v53 }
 0x2d6   : > { %v5239_v38 = vpop.eup %5238  ;;  %3130 = vst [vmem:[%s5687_s9 + $0x628] sm:$0xff] %v5237_v31  ;;  %5258 = vpow2.f32 %v4090_v6 }
 0x2d7   : > { %v5241_v14 = vpop.eup %5240  ;;  %3132 = vst [vmem:[%s5687_s9 + $0x638] sm:$0xff] %v5239_v38  ;;  %5260 = vpow2.f32 %v4089_v37 }
 0x2d8   : > { %v5243_v3 = vpop.eup %5242  ;;  %3133 = vst [vmem:[%s5687_s9 + $0x640] sm:$0xff] %v5241_v14  ;;  %5262 = vpow2.f32 %v4091_v4 }
 0x2d9   : > { %v5245_v51 = vpop.eup %5244  ;;  %3135 = vst [vmem:[%s5687_s9 + $0x650] sm:$0xff] %v5243_v3  ;;  %5264 = vpow2.f32 %v4092_v49 }
 0x2da   : > { %v5247_v62 = vpop.eup %5246  ;;  %3134 = vst [vmem:[%s5687_s9 + $0x648] sm:$0xff] %v5245_v51  ;;  %5266 = vpow2.f32 %v4094_v55 }
 0x2db   : > { %v5249_v21 = vpop.eup %5248  ;;  %3136 = vst [vmem:[%s5687_s9 + $0x658] sm:$0xff] %v5247_v62  ;;  %5268 = vpow2.f32 %v4093_v32  ;;  %v4101_v62 = vmul.f32 -1.442695, %v6372_v1  ;;  %v4105_v1 = vmul.f32 -1.442695, %v6394_v47 }
 0x2dc   : > { %v5251_v52 = vpop.eup %5250  ;;  %3137 = vst [vmem:[%s5687_s9 + $0x660] sm:$0xff] %v5249_v21  ;;  %5270 = vpow2.f32 %v4095_v45  ;;  %v4102_v45 = vmul.f32 -1.442695, %v6362_v18  ;;  %v4103_v21 = vmul.f32 -1.442695, %v6374_v29 }
 0x2dd   : > { %v5253_v19 = vpop.eup %5252  ;;  %3139 = vst [vmem:[%s5687_s9 + $0x670] sm:$0xff] %v5251_v52  ;;  %5272 = vpow2.f32 %v4096_v56  ;;  %v4104_v52 = vmul.f32 -1.442695, %v6388_v28  ;;  %v4106_v18 = vmul.f32 -1.442695, %v6390_v46 }
 0x2de   : > { %v5255_v13 = vpop.eup %5254  ;;  %3138 = vst [vmem:[%s5687_s9 + $0x668] sm:$0xff] %v5253_v19  ;;  %5274 = vpow2.f32 %v4098_v23  ;;  %v4107_v29 = vmul.f32 -1.442695, %v6396_v0  ;;  %v4108_v28 = vmul.f32 -1.442695, %v6400_v26 }
 0x2df   : > { %v5257_v40 = vpop.eup %5256  ;;  %3140 = vst [vmem:[%s5687_s9 + $0x678] sm:$0xff] %v5255_v13  ;;  %5276 = vpow2.f32 %v4097_v57  ;;  %v4110_v46 = vmul.f32 -1.442695, %v6402_v24  ;;  %v4109_v47 = vmul.f32 -1.442695, %v6405_v12 }
 0x2e0   : > { %v5259_v43 = vpop.eup %5258  ;;  %v2373_v25 = vadd.f32 1.0, %v5257_v40  ;;  %5278 = vpow2.f32 %v4099_v34  ;;  %v4111_v0 = vmul.f32 -1.442695, %v6407_v48  ;;  %v4112_v26 = vmul.f32 -1.442695, %v6410_v17 }
 0x2e1   : > { %v5261_v33 = vpop.eup %5260  ;;  %v2375_v27 = vadd.f32 1.0, %v5259_v43  ;;  %5280 = vpow2.f32 %v4100_v35  ;;  %v4114_v24 = vmul.f32 -1.442695, %v6412_v20 }
 0x2e2   : > { %v5263_v8 = vpop.eup %5262  ;;  %5282 = vrcp.f32 %v2373_v25  ;;  %v2374_v30 = vadd.f32 1.0, %v5261_v33 }
 0x2e3   : > { %v5265_v54 = vpop.eup %5264  ;;  %5284 = vrcp.f32 %v2375_v27  ;;  %v2376_v2 = vadd.f32 1.0, %v5263_v8 }
 0x2e4   : > { %v5267_v53 = vpop.eup %5266  ;;  %5286 = vrcp.f32 %v2374_v30  ;;  %v2377_v5 = vadd.f32 1.0, %v5265_v54 }
 0x2e5   : > { %v5269_v36 = vpop.eup %5268  ;;  %5288 = vrcp.f32 %v2376_v2  ;;  %v2379_v9 = vadd.f32 1.0, %v5267_v53 }
 0x2e6   : > { %v5271_v6 = vpop.eup %5270  ;;  %5290 = vrcp.f32 %v2377_v5  ;;  %v2378_v41 = vadd.f32 1.0, %v5269_v36 }
 0x2e7   : > { %v5273_v37 = vpop.eup %5272  ;;  %5292 = vrcp.f32 %v2379_v9  ;;  %v2380_v63 = vadd.f32 1.0, %v5271_v6 }
 0x2e8   : > { %v5275_v4 = vpop.eup %5274  ;;  %5294 = vrcp.f32 %v2378_v41  ;;  %v2381_v31 = vadd.f32 1.0, %v5273_v37 }
 0x2e9   : > { %v5277_v49 = vpop.eup %5276  ;;  %5296 = vrcp.f32 %v2380_v63  ;;  %v2383_v38 = vadd.f32 1.0, %v5275_v4 }
 0x2ea   : > { %v5279_v55 = vpop.eup %5278  ;;  %5298 = vrcp.f32 %v2381_v31  ;;  %v2382_v14 = vadd.f32 1.0, %v5277_v49 }
 0x2eb   : > { %v5281_v32 = vpop.eup %5280  ;;  %5300 = vrcp.f32 %v2383_v38  ;;  %v2384_v3 = vadd.f32 1.0, %v5279_v55 }
 0x2ec   : > { %v5283_v51 = vpop.eup %5282  ;;  %5302 = vrcp.f32 %v2382_v14  ;;  %v2385_v56 = vadd.f32 1.0, %v5281_v32 }
 0x2ed   : > { %v5285_v23 = vpop.eup %5284  ;;  %3141 = vst [vmem:[%s5687_s9 + $0x680] sm:$0xff] %v5283_v51  ;;  %5304 = vrcp.f32 %v2384_v3 }
 0x2ee   : > { %v5287_v57 = vpop.eup %5286  ;;  %3143 = vst [vmem:[%s5687_s9 + $0x690] sm:$0xff] %v5285_v23  ;;  %5306 = vrcp.f32 %v2385_v56  ;;  %v4113_v56 = vmul.f32 -1.442695, %v6414_v15  ;;  %v4117_v15 = vmul.f32 -1.442695, %v6436_v16 }
 0x2ef   : > { %v5289_v34 = vpop.eup %5288  ;;  %3142 = vst [vmem:[%s5687_s9 + $0x688] sm:$0xff] %v5287_v57  ;;  %5308 = vpow2.f32 %v4102_v45  ;;  %v4121_v16 = vmul.f32 -1.442695, %v6456_v60  ;;  %v7273_v60 = vld [vmem:[#allocation5_spill] sm:$0xff] }
 0x2f0   : > { %v5291_v19 = vpop.eup %5290  ;;  %3144 = vst [vmem:[%s5687_s9 + $0x698] sm:$0xff] %v5289_v34  ;;  %5310 = vpow2.f32 %v4101_v62 }
 0x2f1   : > { %v5293_v35 = vpop.eup %5292  ;;  %3145 = vst [vmem:[%s5687_s9 + $0x6a0] sm:$0xff] %v5291_v19  ;;  %5312 = vpow2.f32 %v4103_v21  ;;  %v4115_v21 = vmul.f32 -1.442695, %v6422_v10  ;;  %v4119_v10 = vmul.f32 -1.442695, %v6438_v11 }
 0x2f2   : > { %v5295_v13 = vpop.eup %5294  ;;  %3147 = vst [vmem:[%s5687_s9 + $0x6b0] sm:$0xff] %v5293_v35  ;;  %5314 = vpow2.f32 %v4104_v52  ;;  %v4116_v52 = vmul.f32 -1.442695, %v6428_v7  ;;  %v4120_v7 = vmul.f32 -1.442695, %v6451_v50  ;;  %v7271_v50 = vld [vmem:[#allocation3_spill] sm:$0xff] }
 0x2f3   : > { %v5297_v40 = vpop.eup %5296  ;;  %3146 = vst [vmem:[%s5687_s9 + $0x6a8] sm:$0xff] %v5295_v13  ;;  %5316 = vpow2.f32 %v4106_v18  ;;  %v4118_v18 = vmul.f32 -1.442695, %v6430_v42  ;;  %v4122_v42 = vmul.f32 -1.442695, %v6453_v44  ;;  %v7272_v44 = vld [vmem:[#allocation4_spill] sm:$0xff] }
 0x2f4   : > { %v5299_v43 = vpop.eup %5298  ;;  %3148 = vst [vmem:[%s5687_s9 + $0x6b8] sm:$0xff] %v5297_v40  ;;  %5318 = vpow2.f32 %v4105_v1  ;;  %v4123_v11 = vmul.f32 -1.442695, %v6458_v39 }
 0x2f5   : > { %v5301_v25 = vpop.eup %5300  ;;  %3149 = vst [vmem:[%s5687_s9 + $0x6c0] sm:$0xff] %v5299_v43  ;;  %5320 = vpow2.f32 %v4107_v29 }
 0x2f6   : > { %v5303_v33 = vpop.eup %5302  ;;  %3151 = vst [vmem:[%s5687_s9 + $0x6d0] sm:$0xff] %v5301_v25  ;;  %5322 = vpow2.f32 %v4108_v28 }
 0x2f7   : > { %v5305_v27 = vpop.eup %5304  ;;  %3150 = vst [vmem:[%s5687_s9 + $0x6c8] sm:$0xff] %v5303_v33  ;;  %5324 = vpow2.f32 %v4110_v46  ;;  %v4124_v46 = vmul.f32 -1.442695, %v7271_v50 }
 0x2f8   : > { %v5307_v8 = vpop.eup %5306  ;;  %3152 = vst [vmem:[%s5687_s9 + $0x6d8] sm:$0xff] %v5305_v27  ;;  %5326 = vpow2.f32 %v4109_v47  ;;  %v4126_v47 = vmul.f32 -1.442695, %v7272_v44 }
 0x2f9   : > { %v5309_v12 = vpop.eup %5308  ;;  %3153 = vst [vmem:[%s5687_s9 + $0x6e0] sm:$0xff] %v5307_v8  ;;  %5328 = vpow2.f32 %v4111_v0  ;;  %v4125_v0 = vmul.f32 -1.442695, %v7273_v60 }
 0x2fa   : > { %v5311_v30 = vpop.eup %5310  ;;  %v2387_v54 = vadd.f32 1.0, %v5309_v12  ;;  %5330 = vpow2.f32 %v4112_v26 }
 0x2fb   : > { %v5313_v48 = vpop.eup %5312  ;;  %v2386_v2 = vadd.f32 1.0, %v5311_v30  ;;  %5332 = vpow2.f32 %v4114_v24 }
 0x2fc   : > { %v5315_v53 = vpop.eup %5314  ;;  %5334 = vrcp.f32 %v2387_v54  ;;  %v2388_v17 = vadd.f32 1.0, %v5313_v48 }
 0x2fd   : > { %v5317_v5 = vpop.eup %5316  ;;  %5336 = vrcp.f32 %v2386_v2  ;;  %v2389_v36 = vadd.f32 1.0, %v5315_v53 }
 0x2fe   : > { %v5319_v9 = vpop.eup %5318  ;;  %5338 = vrcp.f32 %v2388_v17  ;;  %v2391_v20 = vadd.f32 1.0, %v5317_v5 }
 0x2ff   : > { %v5321_v6 = vpop.eup %5320  ;;  %5340 = vrcp.f32 %v2389_v36  ;;  %v2390_v41 = vadd.f32 1.0, %v5319_v9 }
 0x300   : > { %v5323_v37 = vpop.eup %5322  ;;  %5342 = vrcp.f32 %v2391_v20  ;;  %v2392_v63 = vadd.f32 1.0, %v5321_v6 }
 0x301   : > { %v5325_v4 = vpop.eup %5324  ;;  %5344 = vrcp.f32 %v2390_v41  ;;  %v2393_v31 = vadd.f32 1.0, %v5323_v37 }
 0x302   : > { %v5327_v49 = vpop.eup %5326  ;;  %5346 = vrcp.f32 %v2392_v63  ;;  %v2395_v38 = vadd.f32 1.0, %v5325_v4 }
 0x303   : > { %v5329_v55 = vpop.eup %5328  ;;  %5348 = vrcp.f32 %v2393_v31  ;;  %v2394_v14 = vadd.f32 1.0, %v5327_v49 }
 0x304   : > { %v5331_v32 = vpop.eup %5330  ;;  %5350 = vrcp.f32 %v2395_v38  ;;  %v2396_v3 = vadd.f32 1.0, %v5329_v55 }
 0x305   : > { %v5333_v45 = vpop.eup %5332  ;;  %5352 = vrcp.f32 %v2394_v14  ;;  %v2397_v51 = vadd.f32 1.0, %v5331_v32  ;;  %v4127_v14 = vmul.f32 -1.442695, %v6466_v22  ;;  %v7274_v22 = vld [vmem:[#allocation6_spill] sm:$0xff] }
 0x306   : > { %v5335_v62 = vpop.eup %5334  ;;  %5354 = vrcp.f32 %v2396_v3  ;;  %v2399_v23 = vadd.f32 1.0, %v5333_v45  ;;  %v4128_v45 = vmul.f32 -1.442695, %v6484_v59  ;;  %v7275_v59 = vld [vmem:[#allocation7_spill] sm:$0xff] }
 0x307   : > { %v5337_v57 = vpop.eup %5336  ;;  %3155 = vst [vmem:[%s5687_s9 + $0x6f0] sm:$0xff] %v5335_v62  ;;  %5356 = vrcp.f32 %v2397_v51 }
 0x308   : > { %v5339_v34 = vpop.eup %5338  ;;  %3154 = vst [vmem:[%s5687_s9 + $0x6e8] sm:$0xff] %v5337_v57  ;;  %5358 = vrcp.f32 %v2399_v23  ;;  %v4129_v23 = vmul.f32 -1.442695, %v6490_v58  ;;  %v4131_v57 = vmul.f32 -1.442695, %v7274_v22  ;;  %v3250_v22 = vld [vmem:[%s5687_s9 + $0x90] sm:$0xff] (%p5565_p5) }
 0x309   : > { %v5341_v19 = vpop.eup %5340  ;;  %3156 = vst [vmem:[%s5687_s9 + $0x6f8] sm:$0xff] %v5339_v34  ;;  %5360 = vpow2.f32 %v4113_v56  ;;  %v4130_v56 = vmul.f32 -1.442695, %v6486_v61  ;;  %v4132_v34 = vmul.f32 -1.442695, %v7275_v59  ;;  %v7276_v61 = vld [vmem:[#allocation8_spill] sm:$0xff] }
 0x30a   : > { %v5343_v1 = vpop.eup %5342  ;;  %3157 = vst [vmem:[%s5687_s9 + $0x700] sm:$0xff] %v5341_v19  ;;  %5362 = vpow2.f32 %v4115_v21  ;;  %v4134_v19 = vmul.f32 -1.442695, %v7276_v61  ;;  %3251 = vst [vmem:[%s6664_s12 + $0x190] sm:$0xff] (%p5565_p5), %v3250_v22  ;;  %v3256_v59 = vld [vmem:[%s5687_s9 + $0xa8] sm:$0xff] (%p5565_p5)  ;;  %v3262_v61 = vld [vmem:[%s5687_s9 + $0xc0] sm:$0xff] (%p5565_p5) }
 0x30b   : > { %v5345_v35 = vpop.eup %5344  ;;  %3159 = vst [vmem:[%s5687_s9 + $0x710] sm:$0xff] %v5343_v1  ;;  %5364 = vpow2.f32 %v4116_v52  ;;  %3257 = vst [vmem:[%s6664_s12 + $0x1e8] sm:$0xff] (%p5565_p5), %v3256_v59  ;;  %v3378_v22 = vld [vmem:[%s5687_s9 + $0x290] sm:$0xff] (%p5565_p5)  ;;  %v3384_v59 = vld [vmem:[%s5687_s9 + $0x2a8] sm:$0xff] (%p5565_p5) }
 0x30c   : > { %v5347_v29 = vpop.eup %5346  ;;  %3158 = vst [vmem:[%s5687_s9 + $0x708] sm:$0xff] %v5345_v35  ;;  %5366 = vpow2.f32 %v4118_v18  ;;  %v7278_v35 = vld [vmem:[#allocation10_spill] sm:$0xff]  ;;  %3263 = vst [vmem:[%s6664_s12 + $0x240] sm:$0xff] (%p5565_p5), %v3262_v61  ;;  %v3390_v61 = vld [vmem:[%s5687_s9 + $0x2c0] sm:$0xff] (%p5565_p5) }
 0x30d   : > { %v5349_v13 = vpop.eup %5348  ;;  %3160 = vst [vmem:[%s5687_s9 + $0x718] sm:$0xff] %v5347_v29  ;;  %5368 = vpow2.f32 %v4117_v15  ;;  %v7277_v15 = vld [vmem:[#allocation9_spill] sm:$0xff]  ;;  %3379 = vst [vmem:[%s6664_s12 + $0x790] sm:$0xff] (%p5565_p5), %v3378_v22 }
 0x30e   : > { %v5351_v28 = vpop.eup %5350  ;;  %3161 = vst [vmem:[%s5687_s9 + $0x720] sm:$0xff] %v5349_v13  ;;  %5370 = vpow2.f32 %v4119_v10  ;;  %v4133_v1 = vmul.f32 -1.442695, %v7277_v15  ;;  %v3268_v15 = vld [vmem:[%s5687_s9 + $0xd8] sm:$0xff] (%p5565_p5)  ;;  %3385 = vst [vmem:[%s6664_s12 + $0x7e8] sm:$0xff] (%p5565_p5), %v3384_v59  ;;  %v3506_v22 = vld [vmem:[%s5687_s9 + $0x490] sm:$0xff] (%p5565_p5) }
 0x30f   : > { %v5353_v40 = vpop.eup %5352  ;;  %3163 = vst [vmem:[%s5687_s9 + $0x730] sm:$0xff] %v5351_v28  ;;  %5372 = vpow2.f32 %v4120_v7  ;;  %v4135_v7 = vmul.f32 -1.442695, %v7278_v35  ;;  %3269 = vst [vmem:[%s6664_s12 + $0x258] sm:$0xff] (%p5565_p5), %v3268_v15  ;;  %v3274_v35 = vld [vmem:[%s5687_s9 + $0xf0] sm:$0xff] (%p5565_p5)  ;;  %v3396_v15 = vld [vmem:[%s5687_s9 + $0x2d8] sm:$0xff] (%p5565_p5) }
 0x310   : > { %v5355_v43 = vpop.eup %5354  ;;  %3162 = vst [vmem:[%s5687_s9 + $0x728] sm:$0xff] %v5353_v40  ;;  %5374 = vpow2.f32 %v4122_v42  ;;  %3275 = vst [vmem:[%s6664_s12 + $0x2b0] sm:$0xff] (%p5565_p5), %v3274_v35  ;;  %v3402_v35 = vld [vmem:[%s5687_s9 + $0x2f0] sm:$0xff] (%p5565_p5)  ;;  %v3512_v59 = vld [vmem:[%s5687_s9 + $0x4a8] sm:$0xff] (%p5565_p5) }
 0x311   : > { %v5357_v25 = vpop.eup %5356  ;;  %3164 = vst [vmem:[%s5687_s9 + $0x738] sm:$0xff] %v5355_v43  ;;  %5376 = vpow2.f32 %v4121_v16  ;;  %3391 = vst [vmem:[%s6664_s12 + $0x840] sm:$0xff] (%p5565_p5), %v3390_v61  ;;  %v3518_v61 = vld [vmem:[%s5687_s9 + $0x4c0] sm:$0xff] (%p5565_p5) }
 0x312   : > { %v5359_v33 = vpop.eup %5358  ;;  %3165 = vst [vmem:[%s5687_s9 + $0x740] sm:$0xff] %v5357_v25  ;;  %5378 = vpow2.f32 %v4123_v11  ;;  %3397 = vst [vmem:[%s6664_s12 + $0x858] sm:$0xff] (%p5565_p5), %v3396_v15  ;;  %v3524_v15 = vld [vmem:[%s5687_s9 + $0x4d8] sm:$0xff] (%p5565_p5) }
 0x313   : > { %v5361_v39 = vpop.eup %5360  ;;  %3167 = vst [vmem:[%s5687_s9 + $0x750] sm:$0xff] %v5359_v33  ;;  %5380 = vpow2.f32 %v4124_v46  ;;  %3403 = vst [vmem:[%s6664_s12 + $0x8b0] sm:$0xff] (%p5565_p5), %v3402_v35  ;;  %v3530_v35 = vld [vmem:[%s5687_s9 + $0x4f0] sm:$0xff] (%p5565_p5) }
 0x314   : > { %v5363_v26 = vpop.eup %5362  ;;  %v2398_v27 = vadd.f32 1.0, %v5361_v39  ;;  %5382 = vpow2.f32 %v4126_v47  ;;  %3507 = vst [vmem:[%s6664_s12 + $0xd90] sm:$0xff] (%p5565_p5), %v3506_v22  ;;  %3513 = vst [vmem:[%s6664_s12 + $0xde8] sm:$0xff] (%p5565_p5), %v3512_v59  ;;  %v3634_v22 = vld [vmem:[%s5687_s9 + $0x690] sm:$0xff] (%p5565_p5)  ;;  %v3640_v59 = vld [vmem:[%s5687_s9 + $0x6a8] sm:$0xff] (%p5565_p5) }
 0x315   : > { %v5365_v24 = vpop.eup %5364  ;;  %v2400_v8 = vadd.f32 1.0, %v5363_v26  ;;  %5384 = vpow2.f32 %v4125_v0  ;;  %3519 = vst [vmem:[%s6664_s12 + $0xe40] sm:$0xff] (%p5565_p5), %v3518_v61  ;;  %3525 = vst [vmem:[%s6664_s12 + $0xe58] sm:$0xff] (%p5565_p5), %v3524_v15  ;;  %v3646_v61 = vld [vmem:[%s5687_s9 + $0x6c0] sm:$0xff] (%p5565_p5)  ;;  %v3652_v15 = vld [vmem:[%s5687_s9 + $0x6d8] sm:$0xff] (%p5565_p5) }
 0x316   : > { %v5367_v12 = vpop.eup %5366  ;;  %5386 = vrcp.f32 %v2398_v27  ;;  %v2401_v30 = vadd.f32 1.0, %v5365_v24  ;;  %3531 = vst [vmem:[%s6664_s12 + $0xeb0] sm:$0xff] (%p5565_p5), %v3530_v35  ;;  %3635 = vst [vmem:[%s6664_s12 + $0x1390] sm:$0xff] (%p5565_p5), %v3634_v22  ;;  %v3658_v35 = vld [vmem:[%s5687_s9 + $0x6f0] sm:$0xff] (%p5565_p5) }
 0x317   : > { %v5369_v54 = vpop.eup %5368  ;;  %5388 = vrcp.f32 %v2400_v8  ;;  %v2403_v48 = vadd.f32 1.0, %v5367_v12  ;;  %3641 = vst [vmem:[%s6664_s12 + $0x13e8] sm:$0xff] (%p5565_p5), %v3640_v59  ;;  %3647 = vst [vmem:[%s6664_s12 + $0x1440] sm:$0xff] (%p5565_p5), %v3646_v61 }
 0x318   : > { %v5371_v2 = vpop.eup %5370  ;;  %5390 = vrcp.f32 %v2401_v30  ;;  %v2402_v53 = vadd.f32 1.0, %v5369_v54  ;;  %3653 = vst [vmem:[%s6664_s12 + $0x1458] sm:$0xff] (%p5565_p5), %v3652_v15  ;;  %3659 = vst [vmem:[%s6664_s12 + $0x14b0] sm:$0xff] (%p5565_p5), %v3658_v35 }
 0x319   : > { %v5373_v17 = vpop.eup %5372  ;;  %5392 = vrcp.f32 %v2403_v48  ;;  %v2404_v5 = vadd.f32 1.0, %v5371_v2 }
 0x31a   : > { %v5375_v36 = vpop.eup %5374  ;;  %5394 = vrcp.f32 %v2402_v53  ;;  %v2405_v9 = vadd.f32 1.0, %v5373_v17 }
 0x31b   : > { %v5377_v20 = vpop.eup %5376  ;;  %5396 = vrcp.f32 %v2404_v5  ;;  %v2407_v6 = vadd.f32 1.0, %v5375_v36 }
 0x31c   : > { %v5379_v41 = vpop.eup %5378  ;;  %5398 = vrcp.f32 %v2405_v9  ;;  %v2406_v37 = vadd.f32 1.0, %v5377_v20 }
 0x31d   : > { %v5381_v63 = vpop.eup %5380  ;;  %5400 = vrcp.f32 %v2407_v6  ;;  %v2408_v4 = vadd.f32 1.0, %v5379_v41  ;;  %v3214_v6 = vld [vmem:[%s5687_s9] sm:$0xff] (%p5565_p5)  ;;  %v3216_v41 = vld [vmem:[%s5687_s9 + $0x8] sm:$0xff] (%p5565_p5) }
 0x31e   : > { %v5383_v31 = vpop.eup %5382  ;;  %5402 = vrcp.f32 %v2406_v37  ;;  %v2409_v49 = vadd.f32 1.0, %v5381_v63  ;;  %v3218_v37 = vld [vmem:[%s5687_s9 + $0x10] sm:$0xff] (%p5565_p5)  ;;  %v3220_v63 = vld [vmem:[%s5687_s9 + $0x18] sm:$0xff] (%p5565_p5)  ;;  %3215 = vst [vmem:[%s6664_s12] sm:$0xff] (%p5565_p5), %v3214_v6  ;;  %3217 = vst [vmem:[%s6664_s12 + $0x8] sm:$0xff] (%p5565_p5), %v3216_v41 }
 0x31f   : > { %v5385_v38 = vpop.eup %5384  ;;  %5404 = vrcp.f32 %v2408_v4  ;;  %v2411_v55 = vadd.f32 1.0, %v5383_v31  ;;  %v3222_v4 = vld [vmem:[%s5687_s9 + $0x20] sm:$0xff] (%p5565_p5)  ;;  %v3224_v31 = vld [vmem:[%s5687_s9 + $0x28] sm:$0xff] (%p5565_p5)  ;;  %3219 = vst [vmem:[%s6664_s12 + $0x10] sm:$0xff] (%p5565_p5), %v3218_v37  ;;  %3221 = vst [vmem:[%s6664_s12 + $0x18] sm:$0xff] (%p5565_p5), %v3220_v63 }
 0x320   : > { %v5387_v32 = vpop.eup %5386  ;;  %5406 = vrcp.f32 %v2409_v49  ;;  %v2410_v3 = vadd.f32 1.0, %v5385_v38  ;;  %v3226_v49 = vld [vmem:[%s5687_s9 + $0x30] sm:$0xff] (%p5565_p5)  ;;  %v3228_v38 = vld [vmem:[%s5687_s9 + $0x38] sm:$0xff] (%p5565_p5)  ;;  %3223 = vst [vmem:[%s6664_s12 + $0x60] sm:$0xff] (%p5565_p5), %v3222_v4  ;;  %3225 = vst [vmem:[%s6664_s12 + $0x68] sm:$0xff] (%p5565_p5), %v3224_v31 }
 0x321   : > { %v5389_v51 = vpop.eup %5388  ;;  %3166 = vst [vmem:[%s5687_s9 + $0x748] sm:$0xff] %v5387_v32  ;;  %5408 = vrcp.f32 %v2411_v55  ;;  %v3230_v55 = vld [vmem:[%s5687_s9 + $0x40] sm:$0xff] (%p5565_p5)  ;;  %v3234_v32 = vld [vmem:[%s5687_s9 + $0x50] sm:$0xff] (%p5565_p5)  ;;  %3227 = vst [vmem:[%s6664_s12 + $0x70] sm:$0xff] (%p5565_p5), %v3226_v49 }
 0x322   : > { %v5391_v62 = vpop.eup %5390  ;;  %3168 = vst [vmem:[%s5687_s9 + $0x758] sm:$0xff] %v5389_v51  ;;  %5410 = vrcp.f32 %v2410_v3  ;;  %v3236_v3 = vld [vmem:[%s5687_s9 + $0x58] sm:$0xff] (%p5565_p5)  ;;  %v3240_v51 = vld [vmem:[%s5687_s9 + $0x68] sm:$0xff] (%p5565_p5)  ;;  %3229 = vst [vmem:[%s6664_s12 + $0x78] sm:$0xff] (%p5565_p5), %v3228_v38 }
 0x323   : > { %v5393_v21 = vpop.eup %5392  ;;  %3169 = vst [vmem:[%s5687_s9 + $0x760] sm:$0xff] %v5391_v62  ;;  %5412 = vpow2.f32 %v4127_v14  ;;  %v3232_v14 = vld [vmem:[%s5687_s9 + $0x48] sm:$0xff] (%p5565_p5)  ;;  %3231 = vst [vmem:[%s6664_s12 + $0xc0] sm:$0xff] (%p5565_p5), %v3230_v55  ;;  %v3244_v62 = vld [vmem:[%s5687_s9 + $0x78] sm:$0xff] (%p5565_p5) }
 0x324   : > { %v5395_v52 = vpop.eup %5394  ;;  %3171 = vst [vmem:[%s5687_s9 + $0x770] sm:$0xff] %v5393_v21  ;;  %5414 = vpow2.f32 %v4128_v45  ;;  %v3238_v45 = vld [vmem:[%s5687_s9 + $0x60] sm:$0xff] (%p5565_p5)  ;;  %3233 = vst [vmem:[%s6664_s12 + $0xc8] sm:$0xff] (%p5565_p5), %v3232_v14  ;;  %v3248_v21 = vld [vmem:[%s5687_s9 + $0x88] sm:$0xff] (%p5565_p5) }
 0x325   : > { %v5397_v18 = vpop.eup %5396  ;;  %3170 = vst [vmem:[%s5687_s9 + $0x768] sm:$0xff] %v5395_v52  ;;  %5416 = vpow2.f32 %v4130_v56  ;;  %v3242_v56 = vld [vmem:[%s5687_s9 + $0x70] sm:$0xff] (%p5565_p5)  ;;  %3235 = vst [vmem:[%s6664_s12 + $0xd0] sm:$0xff] (%p5565_p5), %v3234_v32  ;;  %v3254_v52 = vld [vmem:[%s5687_s9 + $0xa0] sm:$0xff] (%p5565_p5) }
 0x326   : > { %v5399_v58 = vpop.eup %5398  ;;  %3172 = vst [vmem:[%s5687_s9 + $0x778] sm:$0xff] %v5397_v18  ;;  %5418 = vpow2.f32 %v4129_v23  ;;  %3237 = vst [vmem:[%s6664_s12 + $0xd8] sm:$0xff] (%p5565_p5), %v3236_v3  ;;  %v3246_v23 = vld [vmem:[%s5687_s9 + $0x80] sm:$0xff] (%p5565_p5)  ;;  %v3260_v18 = vld [vmem:[%s5687_s9 + $0xb8] sm:$0xff] (%p5565_p5) }
 0x327   : > { %v5401_v10 = vpop.eup %5400  ;;  %3173 = vst [vmem:[%s5687_s9 + $0x780] sm:$0xff] %v5399_v58  ;;  %5420 = vpow2.f32 %v4131_v57  ;;  %3239 = vst [vmem:[%s6664_s12 + $0x120] sm:$0xff] (%p5565_p5), %v3238_v45  ;;  %v3252_v57 = vld [vmem:[%s5687_s9 + $0x98] sm:$0xff] (%p5565_p5)  ;;  %v3266_v58 = vld [vmem:[%s5687_s9 + $0xd0] sm:$0xff] (%p5565_p5) }
 0x328   : > { %v5403_v29 = vpop.eup %5402  ;;  %3175 = vst [vmem:[%s5687_s9 + $0x790] sm:$0xff] %v5401_v10  ;;  %5422 = vpow2.f32 %v4132_v34  ;;  %3241 = vst [vmem:[%s6664_s12 + $0x128] sm:$0xff] (%p5565_p5), %v3240_v51  ;;  %v3258_v34 = vld [vmem:[%s5687_s9 + $0xb0] sm:$0xff] (%p5565_p5)  ;;  %v3272_v10 = vld [vmem:[%s5687_s9 + $0xe8] sm:$0xff] (%p5565_p5) }
 0x329   : > { %v5405_v42 = vpop.eup %5404  ;;  %3174 = vst [vmem:[%s5687_s9 + $0x788] sm:$0xff] %v5403_v29  ;;  %5424 = vpow2.f32 %v4134_v19  ;;  %3243 = vst [vmem:[%s6664_s12 + $0x130] sm:$0xff] (%p5565_p5), %v3242_v56  ;;  %v3264_v19 = vld [vmem:[%s5687_s9 + $0xc8] sm:$0xff] (%p5565_p5)  ;;  %v3278_v29 = vld [vmem:[%s5687_s9 + $0x100] sm:$0xff] (%p5565_p5) }
 0x32a   : > { %v5407_v13 = vpop.eup %5406  ;;  %3176 = vst [vmem:[%s5687_s9 + $0x798] sm:$0xff] %v5405_v42  ;;  %5426 = vpow2.f32 %v4133_v1  ;;  %3245 = vst [vmem:[%s6664_s12 + $0x138] sm:$0xff] (%p5565_p5), %v3244_v62  ;;  %v3270_v1 = vld [vmem:[%s5687_s9 + $0xe0] sm:$0xff] (%p5565_p5)  ;;  %v3280_v42 = vld [vmem:[%s5687_s9 + $0x108] sm:$0xff] (%p5565_p5) }
 0x32b   : > { %v5409_v16 = vpop.eup %5408  ;;  %3177 = vst [vmem:[%s5687_s9 + $0x7a0] sm:$0xff] %v5407_v13  ;;  %5428 = vpow2.f32 %v4135_v7  ;;  %3247 = vst [vmem:[%s6664_s12 + $0x180] sm:$0xff] (%p5565_p5), %v3246_v23  ;;  %v3276_v7 = vld [vmem:[%s5687_s9 + $0xf8] sm:$0xff] (%p5565_p5)  ;;  %v3282_v13 = vld [vmem:[%s5687_s9 + $0x110] sm:$0xff] (%p5565_p5) }
 0x32c   : > { %v5411_v28 = vpop.eup %5410  ;;  %3179 = vst [vmem:[%s5687_s9 + $0x7b0] sm:$0xff] %v5409_v16  ;;  %3249 = vst [vmem:[%s6664_s12 + $0x188] sm:$0xff] (%p5565_p5), %v3248_v21  ;;  %v3284_v16 = vld [vmem:[%s5687_s9 + $0x118] sm:$0xff] (%p5565_p5)  ;;  %v3342_v6 = vld [vmem:[%s5687_s9 + $0x200] sm:$0xff] (%p5565_p5) }
 0x32d   : > { %v5413_v11 = vpop.eup %5412  ;;  %3178 = vst [vmem:[%s5687_s9 + $0x7a8] sm:$0xff] %v5411_v28  ;;  %3253 = vst [vmem:[%s6664_s12 + $0x198] sm:$0xff] (%p5565_p5), %v3252_v57  ;;  %v3286_v28 = vld [vmem:[%s5687_s9 + $0x120] sm:$0xff] (%p5565_p5)  ;;  %v3344_v41 = vld [vmem:[%s5687_s9 + $0x208] sm:$0xff] (%p5565_p5) }
 0x32e   : > { %v5415_v40 = vpop.eup %5414  ;;  %v2412_v50 = vadd.f32 1.0, %v5413_v11  ;;  %3255 = vst [vmem:[%s6664_s12 + $0x1e0] sm:$0xff] (%p5565_p5), %v3254_v52  ;;  %3259 = vst [vmem:[%s6664_s12 + $0x1f0] sm:$0xff] (%p5565_p5), %v3258_v34  ;;  %v3288_v11 = vld [vmem:[%s5687_s9 + $0x128] sm:$0xff] (%p5565_p5)  ;;  %v3346_v37 = vld [vmem:[%s5687_s9 + $0x210] sm:$0xff] (%p5565_p5) }
 0x32f   : > { %v5417_v46 = vpop.eup %5416  ;;  %v2413_v43 = vadd.f32 1.0, %v5415_v40  ;;  %3261 = vst [vmem:[%s6664_s12 + $0x1f8] sm:$0xff] (%p5565_p5), %v3260_v18  ;;  %3265 = vst [vmem:[%s6664_s12 + $0x248] sm:$0xff] (%p5565_p5), %v3264_v19  ;;  %v3290_v40 = vld [vmem:[%s5687_s9 + $0x130] sm:$0xff] (%p5565_p5)  ;;  %v3348_v63 = vld [vmem:[%s5687_s9 + $0x218] sm:$0xff] (%p5565_p5) }
 0x330   : > { %v5419_v44 = vpop.eup %5418  ;;  %5430 = vrcp.f32 %v2412_v50  ;;  %v2415_v47 = vadd.f32 1.0, %v5417_v46  ;;  %3267 = vst [vmem:[%s6664_s12 + $0x250] sm:$0xff] (%p5565_p5), %v3266_v58  ;;  %3271 = vst [vmem:[%s6664_s12 + $0x2a0] sm:$0xff] (%p5565_p5), %v3270_v1  ;;  %v3292_v50 = vld [vmem:[%s5687_s9 + $0x138] sm:$0xff] (%p5565_p5)  ;;  %v3294_v46 = vld [vmem:[%s5687_s9 + $0x140] sm:$0xff] (%p5565_p5) }
 0x331   : > { %v5421_v25 = vpop.eup %5420  ;;  %5432 = vrcp.f32 %v2413_v43  ;;  %v2414_v60 = vadd.f32 1.0, %v5419_v44  ;;  %3273 = vst [vmem:[%s6664_s12 + $0x2a8] sm:$0xff] (%p5565_p5), %v3272_v10  ;;  %3277 = vst [vmem:[%s6664_s12 + $0x2b8] sm:$0xff] (%p5565_p5), %v3276_v7  ;;  %v3296_v43 = vld [vmem:[%s5687_s9 + $0x148] sm:$0xff] (%p5565_p5)  ;;  %v3298_v44 = vld [vmem:[%s5687_s9 + $0x150] sm:$0xff] (%p5565_p5) }
 0x332   : > { %v5423_v0 = vpop.eup %5422  ;;  %5434 = vrcp.f32 %v2415_v47  ;;  %v2416_v33 = vadd.f32 1.0, %v5421_v25  ;;  %3279 = vst [vmem:[%s6664_s12 + $0x300] sm:$0xff] (%p5565_p5), %v3278_v29  ;;  %3281 = vst [vmem:[%s6664_s12 + $0x308] sm:$0xff] (%p5565_p5), %v3280_v42  ;;  %v3300_v47 = vld [vmem:[%s5687_s9 + $0x158] sm:$0xff] (%p5565_p5)  ;;  %v3302_v25 = vld [vmem:[%s5687_s9 + $0x160] sm:$0xff] (%p5565_p5) }
 0x333   : > { %v5425_v39 = vpop.eup %5424  ;;  %5436 = vrcp.f32 %v2414_v60  ;;  %v2417_v26 = vadd.f32 1.0, %v5423_v0  ;;  %3283 = vst [vmem:[%s6664_s12 + $0x310] sm:$0xff] (%p5565_p5), %v3282_v13  ;;  %3285 = vst [vmem:[%s6664_s12 + $0x318] sm:$0xff] (%p5565_p5), %v3284_v16  ;;  %v3304_v60 = vld [vmem:[%s5687_s9 + $0x168] sm:$0xff] (%p5565_p5)  ;;  %v3306_v0 = vld [vmem:[%s5687_s9 + $0x170] sm:$0xff] (%p5565_p5) }
 0x334   : > { %v5427_v27 = vpop.eup %5426  ;;  %5438 = vrcp.f32 %v2416_v33  ;;  %v2419_v24 = vadd.f32 1.0, %v5425_v39  ;;  %3287 = vst [vmem:[%s6664_s12 + $0x360] sm:$0xff] (%p5565_p5), %v3286_v28  ;;  %3289 = vst [vmem:[%s6664_s12 + $0x368] sm:$0xff] (%p5565_p5), %v3288_v11  ;;  %v3308_v33 = vld [vmem:[%s5687_s9 + $0x178] sm:$0xff] (%p5565_p5)  ;;  %v3310_v39 = vld [vmem:[%s5687_s9 + $0x180] sm:$0xff] (%p5565_p5) }
 0x335   : > { %v5429_v8 = vpop.eup %5428  ;;  %5440 = vrcp.f32 %v2417_v26  ;;  %v2418_v12 = vadd.f32 1.0, %v5427_v27  ;;  %3291 = vst [vmem:[%s6664_s12 + $0x370] sm:$0xff] (%p5565_p5), %v3290_v40  ;;  %3293 = vst [vmem:[%s6664_s12 + $0x378] sm:$0xff] (%p5565_p5), %v3292_v50  ;;  %v3312_v26 = vld [vmem:[%s5687_s9 + $0x188] sm:$0xff] (%p5565_p5)  ;;  %v3314_v27 = vld [vmem:[%s5687_s9 + $0x190] sm:$0xff] (%p5565_p5) }
 0x336   : > { %5442 = vrcp.f32 %v2419_v24  ;;  %v2420_v30 = vadd.f32 1.0, %v5429_v8  ;;  %3295 = vst [vmem:[%s6664_s12 + $0x3c0] sm:$0xff] (%p5565_p5), %v3294_v46  ;;  %3297 = vst [vmem:[%s6664_s12 + $0x3c8] sm:$0xff] (%p5565_p5), %v3296_v43  ;;  %v3316_v24 = vld [vmem:[%s5687_s9 + $0x198] sm:$0xff] (%p5565_p5)  ;;  %v3318_v8 = vld [vmem:[%s5687_s9 + $0x1a0] sm:$0xff] (%p5565_p5) }
 0x337   : > { %5444 = vrcp.f32 %v2418_v12  ;;  %3299 = vst [vmem:[%s6664_s12 + $0x3d0] sm:$0xff] (%p5565_p5), %v3298_v44  ;;  %3301 = vst [vmem:[%s6664_s12 + $0x3d8] sm:$0xff] (%p5565_p5), %v3300_v47  ;;  %v3320_v12 = vld [vmem:[%s5687_s9 + $0x1a8] sm:$0xff] (%p5565_p5)  ;;  %v3350_v4 = vld [vmem:[%s5687_s9 + $0x220] sm:$0xff] (%p5565_p5) }
 0x338   : > { %5446 = vrcp.f32 %v2420_v30  ;;  %3303 = vst [vmem:[%s6664_s12 + $0x420] sm:$0xff] (%p5565_p5), %v3302_v25  ;;  %3305 = vst [vmem:[%s6664_s12 + $0x428] sm:$0xff] (%p5565_p5), %v3304_v60  ;;  %v3322_v30 = vld [vmem:[%s5687_s9 + $0x1b0] sm:$0xff] (%p5565_p5)  ;;  %v3352_v31 = vld [vmem:[%s5687_s9 + $0x228] sm:$0xff] (%p5565_p5) }
 0x339   : > { %3307 = vst [vmem:[%s6664_s12 + $0x430] sm:$0xff] (%p5565_p5), %v3306_v0  ;;  %3309 = vst [vmem:[%s6664_s12 + $0x438] sm:$0xff] (%p5565_p5), %v3308_v33  ;;  %v3354_v49 = vld [vmem:[%s5687_s9 + $0x230] sm:$0xff] (%p5565_p5)  ;;  %v3356_v38 = vld [vmem:[%s5687_s9 + $0x238] sm:$0xff] (%p5565_p5) }
 0x33a   : > { %v5431_v54 = vpop.eup %5430  ;;  %3311 = vst [vmem:[%s6664_s12 + $0x480] sm:$0xff] (%p5565_p5), %v3310_v39  ;;  %3313 = vst [vmem:[%s6664_s12 + $0x488] sm:$0xff] (%p5565_p5), %v3312_v26  ;;  %v3358_v55 = vld [vmem:[%s5687_s9 + $0x240] sm:$0xff] (%p5565_p5)  ;;  %v3360_v14 = vld [vmem:[%s5687_s9 + $0x248] sm:$0xff] (%p5565_p5) }
 0x33b   : > { %v5433_v48 = vpop.eup %5432  ;;  %3180 = vst [vmem:[%s5687_s9 + $0x7b8] sm:$0xff] %v5431_v54  ;;  %3315 = vst [vmem:[%s6664_s12 + $0x490] sm:$0xff] (%p5565_p5), %v3314_v27  ;;  %v3324_v54 = vld [vmem:[%s5687_s9 + $0x1b8] sm:$0xff] (%p5565_p5)  ;;  %v3362_v32 = vld [vmem:[%s5687_s9 + $0x250] sm:$0xff] (%p5565_p5) }
 0x33c   : > { %v5435_v2 = vpop.eup %5434  ;;  %3181 = vst [vmem:[%s5687_s9 + $0x7c0] sm:$0xff] %v5433_v48  ;;  %3317 = vst [vmem:[%s6664_s12 + $0x498] sm:$0xff] (%p5565_p5), %v3316_v24  ;;  %v3326_v48 = vld [vmem:[%s5687_s9 + $0x1c0] sm:$0xff] (%p5565_p5)  ;;  %v3364_v3 = vld [vmem:[%s5687_s9 + $0x258] sm:$0xff] (%p5565_p5) }
 0x33d   : > { %v5437_v53 = vpop.eup %5436  ;;  %3183 = vst [vmem:[%s5687_s9 + $0x7d0] sm:$0xff] %v5435_v2  ;;  %3195 = sbr.rel (!%p5565_p5) target bundleno = 927 (0x39f), region = 32  ;;  %3319 = vst [vmem:[%s6664_s12 + $0x4e0] sm:$0xff] (%p5565_p5), %v3318_v8  ;;  %v3328_v2 = vld [vmem:[%s5687_s9 + $0x1c8] sm:$0xff] (%p5565_p5)  ;;  %v3366_v45 = vld [vmem:[%s5687_s9 + $0x260] sm:$0xff] (%p5565_p5) }
 0x33e   : > { %v5439_v17 = vpop.eup %5438  ;;  %3182 = vst [vmem:[%s5687_s9 + $0x7c8] sm:$0xff] %v5437_v53  ;;  %3321 = vst [vmem:[%s6664_s12 + $0x4e8] sm:$0xff] (%p5565_p5), %v3320_v12  ;;  %v3330_v53 = vld [vmem:[%s5687_s9 + $0x1d0] sm:$0xff] (%p5565_p5)  ;;  %v3368_v51 = vld [vmem:[%s5687_s9 + $0x268] sm:$0xff] (%p5565_p5) }
 0x33f   : > { %v5441_v5 = vpop.eup %5440  ;;  %3184 = vst [vmem:[%s5687_s9 + $0x7d8] sm:$0xff] %v5439_v17  ;;  %3323 = vst [vmem:[%s6664_s12 + $0x4f0] sm:$0xff] (%p5565_p5), %v3322_v30  ;;  %v3332_v17 = vld [vmem:[%s5687_s9 + $0x1d8] sm:$0xff] (%p5565_p5)  ;;  %v3370_v56 = vld [vmem:[%s5687_s9 + $0x270] sm:$0xff] (%p5565_p5) }
 0x340   : > { %v5443_v36 = vpop.eup %5442  ;;  %3185 = vst [vmem:[%s5687_s9 + $0x7e0] sm:$0xff] %v5441_v5  ;;  %3325 = vst [vmem:[%s6664_s12 + $0x4f8] sm:$0xff] (%p5565_p5), %v3324_v54  ;;  %v3334_v5 = vld [vmem:[%s5687_s9 + $0x1e0] sm:$0xff] (%p5565_p5)  ;;  %v3372_v62 = vld [vmem:[%s5687_s9 + $0x278] sm:$0xff] (%p5565_p5) }
 0x341   : > { %v5445_v9 = vpop.eup %5444  ;;  %3187 = vst [vmem:[%s5687_s9 + $0x7f0] sm:$0xff] %v5443_v36  ;;  %3327 = vst [vmem:[%s6664_s12 + $0x540] sm:$0xff] (%p5565_p5), %v3326_v48  ;;  %v3336_v36 = vld [vmem:[%s5687_s9 + $0x1e8] sm:$0xff] (%p5565_p5)  ;;  %v3374_v23 = vld [vmem:[%s5687_s9 + $0x280] sm:$0xff] (%p5565_p5) }
 0x342   : > { %v5447_v20 = vpop.eup %5446  ;;  %3186 = vst [vmem:[%s5687_s9 + $0x7e8] sm:$0xff] %v5445_v9  ;;  %3329 = vst [vmem:[%s6664_s12 + $0x548] sm:$0xff] (%p5565_p5), %v3328_v2  ;;  %v3338_v9 = vld [vmem:[%s5687_s9 + $0x1f0] sm:$0xff] (%p5565_p5)  ;;  %v3376_v21 = vld [vmem:[%s5687_s9 + $0x288] sm:$0xff] (%p5565_p5) }
 0x343   : > { %3188 = vst [vmem:[%s5687_s9 + $0x7f8] sm:$0xff] %v5447_v20  ;;  %3331 = vst [vmem:[%s6664_s12 + $0x550] sm:$0xff] (%p5565_p5), %v3330_v53  ;;  %v3340_v20 = vld [vmem:[%s5687_s9 + $0x1f8] sm:$0xff] (%p5565_p5)  ;;  %v3382_v52 = vld [vmem:[%s5687_s9 + $0x2a0] sm:$0xff] (%p5565_p5) }
 0x344   : > { %3333 = vst [vmem:[%s6664_s12 + $0x558] sm:$0xff] %v3332_v17  ;;  %3335 = vst [vmem:[%s6664_s12 + $0x5a0] sm:$0xff] %v3334_v5  ;;  %v3380_v57 = vld [vmem:[%s5687_s9 + $0x298] sm:$0xff]  ;;  %v3386_v34 = vld [vmem:[%s5687_s9 + $0x2b0] sm:$0xff] }
 0x345   : > { %3337 = vst [vmem:[%s6664_s12 + $0x5a8] sm:$0xff] %v3336_v36  ;;  %3339 = vst [vmem:[%s6664_s12 + $0x5b0] sm:$0xff] %v3338_v9  ;;  %v3388_v18 = vld [vmem:[%s5687_s9 + $0x2b8] sm:$0xff]  ;;  %v3392_v19 = vld [vmem:[%s5687_s9 + $0x2c8] sm:$0xff] }
 0x346   : > { %3341 = vst [vmem:[%s6664_s12 + $0x5b8] sm:$0xff] %v3340_v20  ;;  %3343 = vst [vmem:[%s6664_s12 + $0x600] sm:$0xff] %v3342_v6  ;;  %v3394_v58 = vld [vmem:[%s5687_s9 + $0x2d0] sm:$0xff]  ;;  %v3398_v1 = vld [vmem:[%s5687_s9 + $0x2e0] sm:$0xff] }
 0x347   : > { %3345 = vst [vmem:[%s6664_s12 + $0x608] sm:$0xff] %v3344_v41  ;;  %3347 = vst [vmem:[%s6664_s12 + $0x610] sm:$0xff] %v3346_v37  ;;  %v3400_v10 = vld [vmem:[%s5687_s9 + $0x2e8] sm:$0xff]  ;;  %v3404_v7 = vld [vmem:[%s5687_s9 + $0x2f8] sm:$0xff] }
 0x348   : > { %3349 = vst [vmem:[%s6664_s12 + $0x618] sm:$0xff] %v3348_v63  ;;  %3351 = vst [vmem:[%s6664_s12 + $0x660] sm:$0xff] %v3350_v4  ;;  %v3406_v29 = vld [vmem:[%s5687_s9 + $0x300] sm:$0xff]  ;;  %v3408_v42 = vld [vmem:[%s5687_s9 + $0x308] sm:$0xff] }
 0x349   : > { %3353 = vst [vmem:[%s6664_s12 + $0x668] sm:$0xff] %v3352_v31  ;;  %3355 = vst [vmem:[%s6664_s12 + $0x670] sm:$0xff] %v3354_v49  ;;  %v3410_v13 = vld [vmem:[%s5687_s9 + $0x310] sm:$0xff]  ;;  %v3412_v16 = vld [vmem:[%s5687_s9 + $0x318] sm:$0xff] }
 0x34a   : > { %3357 = vst [vmem:[%s6664_s12 + $0x678] sm:$0xff] %v3356_v38  ;;  %3359 = vst [vmem:[%s6664_s12 + $0x6c0] sm:$0xff] %v3358_v55  ;;  %v3414_v28 = vld [vmem:[%s5687_s9 + $0x320] sm:$0xff]  ;;  %v3416_v11 = vld [vmem:[%s5687_s9 + $0x328] sm:$0xff] }
 0x34b   : > { %3361 = vst [vmem:[%s6664_s12 + $0x6c8] sm:$0xff] %v3360_v14  ;;  %3363 = vst [vmem:[%s6664_s12 + $0x6d0] sm:$0xff] %v3362_v32  ;;  %v3418_v40 = vld [vmem:[%s5687_s9 + $0x330] sm:$0xff]  ;;  %v3420_v50 = vld [vmem:[%s5687_s9 + $0x338] sm:$0xff] }
 0x34c   : > { %3365 = vst [vmem:[%s6664_s12 + $0x6d8] sm:$0xff] %v3364_v3  ;;  %3367 = vst [vmem:[%s6664_s12 + $0x720] sm:$0xff] %v3366_v45  ;;  %v3422_v46 = vld [vmem:[%s5687_s9 + $0x340] sm:$0xff]  ;;  %v3424_v43 = vld [vmem:[%s5687_s9 + $0x348] sm:$0xff] }
 0x34d   : > { %3369 = vst [vmem:[%s6664_s12 + $0x728] sm:$0xff] %v3368_v51  ;;  %3371 = vst [vmem:[%s6664_s12 + $0x730] sm:$0xff] %v3370_v56  ;;  %v3426_v44 = vld [vmem:[%s5687_s9 + $0x350] sm:$0xff]  ;;  %v3428_v47 = vld [vmem:[%s5687_s9 + $0x358] sm:$0xff] }
 0x34e   : > { %3373 = vst [vmem:[%s6664_s12 + $0x738] sm:$0xff] %v3372_v62  ;;  %3375 = vst [vmem:[%s6664_s12 + $0x780] sm:$0xff] %v3374_v23  ;;  %v3430_v25 = vld [vmem:[%s5687_s9 + $0x360] sm:$0xff]  ;;  %v3432_v60 = vld [vmem:[%s5687_s9 + $0x368] sm:$0xff] }
 0x34f   : > { %3377 = vst [vmem:[%s6664_s12 + $0x788] sm:$0xff] %v3376_v21  ;;  %3381 = vst [vmem:[%s6664_s12 + $0x798] sm:$0xff] %v3380_v57  ;;  %v3434_v0 = vld [vmem:[%s5687_s9 + $0x370] sm:$0xff]  ;;  %v3436_v33 = vld [vmem:[%s5687_s9 + $0x378] sm:$0xff] }
 0x350   : > { %3383 = vst [vmem:[%s6664_s12 + $0x7e0] sm:$0xff] %v3382_v52  ;;  %3387 = vst [vmem:[%s6664_s12 + $0x7f0] sm:$0xff] %v3386_v34  ;;  %v3438_v39 = vld [vmem:[%s5687_s9 + $0x380] sm:$0xff]  ;;  %v3440_v26 = vld [vmem:[%s5687_s9 + $0x388] sm:$0xff] }
 0x351   : > { %3389 = vst [vmem:[%s6664_s12 + $0x7f8] sm:$0xff] %v3388_v18  ;;  %3393 = vst [vmem:[%s6664_s12 + $0x848] sm:$0xff] %v3392_v19  ;;  %v3442_v27 = vld [vmem:[%s5687_s9 + $0x390] sm:$0xff]  ;;  %v3444_v24 = vld [vmem:[%s5687_s9 + $0x398] sm:$0xff] }
 0x352   : > { %3395 = vst [vmem:[%s6664_s12 + $0x850] sm:$0xff] %v3394_v58  ;;  %3399 = vst [vmem:[%s6664_s12 + $0x8a0] sm:$0xff] %v3398_v1  ;;  %v3446_v8 = vld [vmem:[%s5687_s9 + $0x3a0] sm:$0xff]  ;;  %v3448_v12 = vld [vmem:[%s5687_s9 + $0x3a8] sm:$0xff] }
 0x353   : > { %3401 = vst [vmem:[%s6664_s12 + $0x8a8] sm:$0xff] %v3400_v10  ;;  %3405 = vst [vmem:[%s6664_s12 + $0x8b8] sm:$0xff] %v3404_v7  ;;  %v3450_v30 = vld [vmem:[%s5687_s9 + $0x3b0] sm:$0xff]  ;;  %v3452_v54 = vld [vmem:[%s5687_s9 + $0x3b8] sm:$0xff] }
 0x354   : > { %3407 = vst [vmem:[%s6664_s12 + $0x900] sm:$0xff] %v3406_v29  ;;  %3409 = vst [vmem:[%s6664_s12 + $0x908] sm:$0xff] %v3408_v42  ;;  %v3454_v48 = vld [vmem:[%s5687_s9 + $0x3c0] sm:$0xff]  ;;  %v3456_v2 = vld [vmem:[%s5687_s9 + $0x3c8] sm:$0xff] }
 0x355   : > { %3411 = vst [vmem:[%s6664_s12 + $0x910] sm:$0xff] %v3410_v13  ;;  %3413 = vst [vmem:[%s6664_s12 + $0x918] sm:$0xff] %v3412_v16  ;;  %v3458_v53 = vld [vmem:[%s5687_s9 + $0x3d0] sm:$0xff]  ;;  %v3460_v17 = vld [vmem:[%s5687_s9 + $0x3d8] sm:$0xff] }
 0x356   : > { %3415 = vst [vmem:[%s6664_s12 + $0x960] sm:$0xff] %v3414_v28  ;;  %3417 = vst [vmem:[%s6664_s12 + $0x968] sm:$0xff] %v3416_v11  ;;  %v3462_v5 = vld [vmem:[%s5687_s9 + $0x3e0] sm:$0xff]  ;;  %v3464_v36 = vld [vmem:[%s5687_s9 + $0x3e8] sm:$0xff] }
 0x357   : > { %3419 = vst [vmem:[%s6664_s12 + $0x970] sm:$0xff] %v3418_v40  ;;  %3421 = vst [vmem:[%s6664_s12 + $0x978] sm:$0xff] %v3420_v50  ;;  %v3466_v9 = vld [vmem:[%s5687_s9 + $0x3f0] sm:$0xff]  ;;  %v3468_v20 = vld [vmem:[%s5687_s9 + $0x3f8] sm:$0xff] }
 0x358   : > { %3423 = vst [vmem:[%s6664_s12 + $0x9c0] sm:$0xff] %v3422_v46  ;;  %3425 = vst [vmem:[%s6664_s12 + $0x9c8] sm:$0xff] %v3424_v43  ;;  %v3470_v6 = vld [vmem:[%s5687_s9 + $0x400] sm:$0xff]  ;;  %v3472_v41 = vld [vmem:[%s5687_s9 + $0x408] sm:$0xff] }
 0x359   : > { %3427 = vst [vmem:[%s6664_s12 + $0x9d0] sm:$0xff] %v3426_v44  ;;  %3429 = vst [vmem:[%s6664_s12 + $0x9d8] sm:$0xff] %v3428_v47  ;;  %v3474_v37 = vld [vmem:[%s5687_s9 + $0x410] sm:$0xff]  ;;  %v3476_v63 = vld [vmem:[%s5687_s9 + $0x418] sm:$0xff] }
 0x35a   : > { %3431 = vst [vmem:[%s6664_s12 + $0xa20] sm:$0xff] %v3430_v25  ;;  %3433 = vst [vmem:[%s6664_s12 + $0xa28] sm:$0xff] %v3432_v60  ;;  %v3478_v4 = vld [vmem:[%s5687_s9 + $0x420] sm:$0xff]  ;;  %v3480_v31 = vld [vmem:[%s5687_s9 + $0x428] sm:$0xff] }
 0x35b   : > { %3435 = vst [vmem:[%s6664_s12 + $0xa30] sm:$0xff] %v3434_v0  ;;  %3437 = vst [vmem:[%s6664_s12 + $0xa38] sm:$0xff] %v3436_v33  ;;  %v3482_v49 = vld [vmem:[%s5687_s9 + $0x430] sm:$0xff]  ;;  %v3484_v38 = vld [vmem:[%s5687_s9 + $0x438] sm:$0xff] }
 0x35c   : > { %3439 = vst [vmem:[%s6664_s12 + $0xa80] sm:$0xff] %v3438_v39  ;;  %3441 = vst [vmem:[%s6664_s12 + $0xa88] sm:$0xff] %v3440_v26  ;;  %v3486_v55 = vld [vmem:[%s5687_s9 + $0x440] sm:$0xff]  ;;  %v3488_v14 = vld [vmem:[%s5687_s9 + $0x448] sm:$0xff] }
 0x35d   : > { %3443 = vst [vmem:[%s6664_s12 + $0xa90] sm:$0xff] %v3442_v27  ;;  %3445 = vst [vmem:[%s6664_s12 + $0xa98] sm:$0xff] %v3444_v24  ;;  %v3490_v32 = vld [vmem:[%s5687_s9 + $0x450] sm:$0xff]  ;;  %v3492_v3 = vld [vmem:[%s5687_s9 + $0x458] sm:$0xff] }
 0x35e   : > { %3447 = vst [vmem:[%s6664_s12 + $0xae0] sm:$0xff] %v3446_v8  ;;  %3449 = vst [vmem:[%s6664_s12 + $0xae8] sm:$0xff] %v3448_v12  ;;  %v3494_v45 = vld [vmem:[%s5687_s9 + $0x460] sm:$0xff]  ;;  %v3496_v51 = vld [vmem:[%s5687_s9 + $0x468] sm:$0xff] }
 0x35f   : > { %3451 = vst [vmem:[%s6664_s12 + $0xaf0] sm:$0xff] %v3450_v30  ;;  %3453 = vst [vmem:[%s6664_s12 + $0xaf8] sm:$0xff] %v3452_v54  ;;  %v3498_v56 = vld [vmem:[%s5687_s9 + $0x470] sm:$0xff]  ;;  %v3500_v62 = vld [vmem:[%s5687_s9 + $0x478] sm:$0xff] }
 0x360   : > { %3455 = vst [vmem:[%s6664_s12 + $0xb40] sm:$0xff] %v3454_v48  ;;  %3457 = vst [vmem:[%s6664_s12 + $0xb48] sm:$0xff] %v3456_v2  ;;  %v3502_v23 = vld [vmem:[%s5687_s9 + $0x480] sm:$0xff]  ;;  %v3504_v21 = vld [vmem:[%s5687_s9 + $0x488] sm:$0xff] }
 0x361   : > { %3459 = vst [vmem:[%s6664_s12 + $0xb50] sm:$0xff] %v3458_v53  ;;  %3461 = vst [vmem:[%s6664_s12 + $0xb58] sm:$0xff] %v3460_v17  ;;  %v3508_v57 = vld [vmem:[%s5687_s9 + $0x498] sm:$0xff]  ;;  %v3510_v52 = vld [vmem:[%s5687_s9 + $0x4a0] sm:$0xff] }
 0x362   : > { %3463 = vst [vmem:[%s6664_s12 + $0xba0] sm:$0xff] %v3462_v5  ;;  %3465 = vst [vmem:[%s6664_s12 + $0xba8] sm:$0xff] %v3464_v36  ;;  %v3514_v34 = vld [vmem:[%s5687_s9 + $0x4b0] sm:$0xff]  ;;  %v3516_v18 = vld [vmem:[%s5687_s9 + $0x4b8] sm:$0xff] }
 0x363   : > { %3467 = vst [vmem:[%s6664_s12 + $0xbb0] sm:$0xff] %v3466_v9  ;;  %3469 = vst [vmem:[%s6664_s12 + $0xbb8] sm:$0xff] %v3468_v20  ;;  %v3520_v19 = vld [vmem:[%s5687_s9 + $0x4c8] sm:$0xff]  ;;  %v3522_v58 = vld [vmem:[%s5687_s9 + $0x4d0] sm:$0xff] }
 0x364   : > { %3471 = vst [vmem:[%s6664_s12 + $0xc00] sm:$0xff] %v3470_v6  ;;  %3473 = vst [vmem:[%s6664_s12 + $0xc08] sm:$0xff] %v3472_v41  ;;  %v3526_v1 = vld [vmem:[%s5687_s9 + $0x4e0] sm:$0xff]  ;;  %v3528_v10 = vld [vmem:[%s5687_s9 + $0x4e8] sm:$0xff] }
 0x365   : > { %3475 = vst [vmem:[%s6664_s12 + $0xc10] sm:$0xff] %v3474_v37  ;;  %3477 = vst [vmem:[%s6664_s12 + $0xc18] sm:$0xff] %v3476_v63  ;;  %v3532_v7 = vld [vmem:[%s5687_s9 + $0x4f8] sm:$0xff]  ;;  %v3534_v29 = vld [vmem:[%s5687_s9 + $0x500] sm:$0xff] }
 0x366   : > { %3479 = vst [vmem:[%s6664_s12 + $0xc60] sm:$0xff] %v3478_v4  ;;  %3481 = vst [vmem:[%s6664_s12 + $0xc68] sm:$0xff] %v3480_v31  ;;  %v3536_v42 = vld [vmem:[%s5687_s9 + $0x508] sm:$0xff]  ;;  %v3538_v13 = vld [vmem:[%s5687_s9 + $0x510] sm:$0xff] }
 0x367   : > { %3483 = vst [vmem:[%s6664_s12 + $0xc70] sm:$0xff] %v3482_v49  ;;  %3485 = vst [vmem:[%s6664_s12 + $0xc78] sm:$0xff] %v3484_v38  ;;  %v3540_v16 = vld [vmem:[%s5687_s9 + $0x518] sm:$0xff]  ;;  %v3542_v28 = vld [vmem:[%s5687_s9 + $0x520] sm:$0xff] }
 0x368   : > { %3487 = vst [vmem:[%s6664_s12 + $0xcc0] sm:$0xff] %v3486_v55  ;;  %3489 = vst [vmem:[%s6664_s12 + $0xcc8] sm:$0xff] %v3488_v14  ;;  %v3544_v11 = vld [vmem:[%s5687_s9 + $0x528] sm:$0xff]  ;;  %v3546_v40 = vld [vmem:[%s5687_s9 + $0x530] sm:$0xff] }
 0x369   : > { %3491 = vst [vmem:[%s6664_s12 + $0xcd0] sm:$0xff] %v3490_v32  ;;  %3493 = vst [vmem:[%s6664_s12 + $0xcd8] sm:$0xff] %v3492_v3  ;;  %v3548_v50 = vld [vmem:[%s5687_s9 + $0x538] sm:$0xff]  ;;  %v3550_v46 = vld [vmem:[%s5687_s9 + $0x540] sm:$0xff] }
 0x36a   : > { %3495 = vst [vmem:[%s6664_s12 + $0xd20] sm:$0xff] %v3494_v45  ;;  %3497 = vst [vmem:[%s6664_s12 + $0xd28] sm:$0xff] %v3496_v51  ;;  %v3552_v43 = vld [vmem:[%s5687_s9 + $0x548] sm:$0xff]  ;;  %v3554_v44 = vld [vmem:[%s5687_s9 + $0x550] sm:$0xff] }
 0x36b   : > { %3499 = vst [vmem:[%s6664_s12 + $0xd30] sm:$0xff] %v3498_v56  ;;  %3501 = vst [vmem:[%s6664_s12 + $0xd38] sm:$0xff] %v3500_v62  ;;  %v3556_v47 = vld [vmem:[%s5687_s9 + $0x558] sm:$0xff]  ;;  %v3558_v25 = vld [vmem:[%s5687_s9 + $0x560] sm:$0xff] }
 0x36c   : > { %3503 = vst [vmem:[%s6664_s12 + $0xd80] sm:$0xff] %v3502_v23  ;;  %3505 = vst [vmem:[%s6664_s12 + $0xd88] sm:$0xff] %v3504_v21  ;;  %v3560_v60 = vld [vmem:[%s5687_s9 + $0x568] sm:$0xff]  ;;  %v3562_v0 = vld [vmem:[%s5687_s9 + $0x570] sm:$0xff] }
 0x36d   : > { %3509 = vst [vmem:[%s6664_s12 + $0xd98] sm:$0xff] %v3508_v57  ;;  %3511 = vst [vmem:[%s6664_s12 + $0xde0] sm:$0xff] %v3510_v52  ;;  %v3564_v33 = vld [vmem:[%s5687_s9 + $0x578] sm:$0xff]  ;;  %v3566_v39 = vld [vmem:[%s5687_s9 + $0x580] sm:$0xff] }
 0x36e   : > { %3515 = vst [vmem:[%s6664_s12 + $0xdf0] sm:$0xff] %v3514_v34  ;;  %3517 = vst [vmem:[%s6664_s12 + $0xdf8] sm:$0xff] %v3516_v18  ;;  %v3568_v26 = vld [vmem:[%s5687_s9 + $0x588] sm:$0xff]  ;;  %v3570_v27 = vld [vmem:[%s5687_s9 + $0x590] sm:$0xff] }
 0x36f   : > { %3521 = vst [vmem:[%s6664_s12 + $0xe48] sm:$0xff] %v3520_v19  ;;  %3523 = vst [vmem:[%s6664_s12 + $0xe50] sm:$0xff] %v3522_v58  ;;  %v3572_v24 = vld [vmem:[%s5687_s9 + $0x598] sm:$0xff]  ;;  %v3574_v8 = vld [vmem:[%s5687_s9 + $0x5a0] sm:$0xff] }
 0x370   : > { %3527 = vst [vmem:[%s6664_s12 + $0xea0] sm:$0xff] %v3526_v1  ;;  %3529 = vst [vmem:[%s6664_s12 + $0xea8] sm:$0xff] %v3528_v10  ;;  %v3576_v12 = vld [vmem:[%s5687_s9 + $0x5a8] sm:$0xff]  ;;  %v3578_v30 = vld [vmem:[%s5687_s9 + $0x5b0] sm:$0xff] }
 0x371   : > { %3533 = vst [vmem:[%s6664_s12 + $0xeb8] sm:$0xff] %v3532_v7  ;;  %3535 = vst [vmem:[%s6664_s12 + $0xf00] sm:$0xff] %v3534_v29  ;;  %v3580_v54 = vld [vmem:[%s5687_s9 + $0x5b8] sm:$0xff]  ;;  %v3582_v48 = vld [vmem:[%s5687_s9 + $0x5c0] sm:$0xff] }
 0x372   : > { %3537 = vst [vmem:[%s6664_s12 + $0xf08] sm:$0xff] %v3536_v42  ;;  %3539 = vst [vmem:[%s6664_s12 + $0xf10] sm:$0xff] %v3538_v13  ;;  %v3584_v2 = vld [vmem:[%s5687_s9 + $0x5c8] sm:$0xff]  ;;  %v3586_v53 = vld [vmem:[%s5687_s9 + $0x5d0] sm:$0xff] }
 0x373   : > { %3541 = vst [vmem:[%s6664_s12 + $0xf18] sm:$0xff] %v3540_v16  ;;  %3543 = vst [vmem:[%s6664_s12 + $0xf60] sm:$0xff] %v3542_v28  ;;  %v3588_v17 = vld [vmem:[%s5687_s9 + $0x5d8] sm:$0xff]  ;;  %v3590_v5 = vld [vmem:[%s5687_s9 + $0x5e0] sm:$0xff] }
 0x374   : > { %3545 = vst [vmem:[%s6664_s12 + $0xf68] sm:$0xff] %v3544_v11  ;;  %3547 = vst [vmem:[%s6664_s12 + $0xf70] sm:$0xff] %v3546_v40  ;;  %v3592_v36 = vld [vmem:[%s5687_s9 + $0x5e8] sm:$0xff]  ;;  %v3594_v9 = vld [vmem:[%s5687_s9 + $0x5f0] sm:$0xff] }
 0x375   : > { %3549 = vst [vmem:[%s6664_s12 + $0xf78] sm:$0xff] %v3548_v50  ;;  %3551 = vst [vmem:[%s6664_s12 + $0xfc0] sm:$0xff] %v3550_v46  ;;  %v3596_v20 = vld [vmem:[%s5687_s9 + $0x5f8] sm:$0xff]  ;;  %v3598_v6 = vld [vmem:[%s5687_s9 + $0x600] sm:$0xff] }
 0x376   : > { %3553 = vst [vmem:[%s6664_s12 + $0xfc8] sm:$0xff] %v3552_v43  ;;  %3555 = vst [vmem:[%s6664_s12 + $0xfd0] sm:$0xff] %v3554_v44  ;;  %v3600_v41 = vld [vmem:[%s5687_s9 + $0x608] sm:$0xff]  ;;  %v3602_v37 = vld [vmem:[%s5687_s9 + $0x610] sm:$0xff] }
 0x377   : > { %3557 = vst [vmem:[%s6664_s12 + $0xfd8] sm:$0xff] %v3556_v47  ;;  %3559 = vst [vmem:[%s6664_s12 + $0x1020] sm:$0xff] %v3558_v25  ;;  %v3604_v63 = vld [vmem:[%s5687_s9 + $0x618] sm:$0xff]  ;;  %v3606_v4 = vld [vmem:[%s5687_s9 + $0x620] sm:$0xff] }
 0x378   : > { %3561 = vst [vmem:[%s6664_s12 + $0x1028] sm:$0xff] %v3560_v60  ;;  %3563 = vst [vmem:[%s6664_s12 + $0x1030] sm:$0xff] %v3562_v0  ;;  %v3608_v31 = vld [vmem:[%s5687_s9 + $0x628] sm:$0xff]  ;;  %v3610_v49 = vld [vmem:[%s5687_s9 + $0x630] sm:$0xff] }
 0x379   : > { %3565 = vst [vmem:[%s6664_s12 + $0x1038] sm:$0xff] %v3564_v33  ;;  %3567 = vst [vmem:[%s6664_s12 + $0x1080] sm:$0xff] %v3566_v39  ;;  %v3612_v38 = vld [vmem:[%s5687_s9 + $0x638] sm:$0xff]  ;;  %v3614_v55 = vld [vmem:[%s5687_s9 + $0x640] sm:$0xff] }
 0x37a   : > { %3569 = vst [vmem:[%s6664_s12 + $0x1088] sm:$0xff] %v3568_v26  ;;  %3571 = vst [vmem:[%s6664_s12 + $0x1090] sm:$0xff] %v3570_v27  ;;  %v3616_v14 = vld [vmem:[%s5687_s9 + $0x648] sm:$0xff]  ;;  %v3618_v32 = vld [vmem:[%s5687_s9 + $0x650] sm:$0xff] }
 0x37b   : > { %3573 = vst [vmem:[%s6664_s12 + $0x1098] sm:$0xff] %v3572_v24  ;;  %3575 = vst [vmem:[%s6664_s12 + $0x10e0] sm:$0xff] %v3574_v8  ;;  %v3620_v3 = vld [vmem:[%s5687_s9 + $0x658] sm:$0xff]  ;;  %v3622_v45 = vld [vmem:[%s5687_s9 + $0x660] sm:$0xff] }
 0x37c   : > { %3577 = vst [vmem:[%s6664_s12 + $0x10e8] sm:$0xff] %v3576_v12  ;;  %3579 = vst [vmem:[%s6664_s12 + $0x10f0] sm:$0xff] %v3578_v30  ;;  %v3624_v51 = vld [vmem:[%s5687_s9 + $0x668] sm:$0xff]  ;;  %v3626_v56 = vld [vmem:[%s5687_s9 + $0x670] sm:$0xff] }
 0x37d   : > { %3581 = vst [vmem:[%s6664_s12 + $0x10f8] sm:$0xff] %v3580_v54  ;;  %3583 = vst [vmem:[%s6664_s12 + $0x1140] sm:$0xff] %v3582_v48  ;;  %v3628_v62 = vld [vmem:[%s5687_s9 + $0x678] sm:$0xff]  ;;  %v3630_v23 = vld [vmem:[%s5687_s9 + $0x680] sm:$0xff] }
 0x37e   : > { %3585 = vst [vmem:[%s6664_s12 + $0x1148] sm:$0xff] %v3584_v2  ;;  %3587 = vst [vmem:[%s6664_s12 + $0x1150] sm:$0xff] %v3586_v53  ;;  %v3632_v21 = vld [vmem:[%s5687_s9 + $0x688] sm:$0xff]  ;;  %v3636_v57 = vld [vmem:[%s5687_s9 + $0x698] sm:$0xff] }
 0x37f   : > { %3589 = vst [vmem:[%s6664_s12 + $0x1158] sm:$0xff] %v3588_v17  ;;  %3591 = vst [vmem:[%s6664_s12 + $0x11a0] sm:$0xff] %v3590_v5  ;;  %v3638_v52 = vld [vmem:[%s5687_s9 + $0x6a0] sm:$0xff]  ;;  %v3642_v34 = vld [vmem:[%s5687_s9 + $0x6b0] sm:$0xff] }
 0x380   : > { %3593 = vst [vmem:[%s6664_s12 + $0x11a8] sm:$0xff] %v3592_v36  ;;  %3595 = vst [vmem:[%s6664_s12 + $0x11b0] sm:$0xff] %v3594_v9  ;;  %v3644_v18 = vld [vmem:[%s5687_s9 + $0x6b8] sm:$0xff]  ;;  %v3648_v19 = vld [vmem:[%s5687_s9 + $0x6c8] sm:$0xff] }
 0x381   : > { %3597 = vst [vmem:[%s6664_s12 + $0x11b8] sm:$0xff] %v3596_v20  ;;  %3599 = vst [vmem:[%s6664_s12 + $0x1200] sm:$0xff] %v3598_v6  ;;  %v3650_v58 = vld [vmem:[%s5687_s9 + $0x6d0] sm:$0xff]  ;;  %v3654_v1 = vld [vmem:[%s5687_s9 + $0x6e0] sm:$0xff] }
 0x382   : > { %3601 = vst [vmem:[%s6664_s12 + $0x1208] sm:$0xff] %v3600_v41  ;;  %3603 = vst [vmem:[%s6664_s12 + $0x1210] sm:$0xff] %v3602_v37  ;;  %v3656_v10 = vld [vmem:[%s5687_s9 + $0x6e8] sm:$0xff]  ;;  %v3660_v7 = vld [vmem:[%s5687_s9 + $0x6f8] sm:$0xff] }
 0x383   : > { %3605 = vst [vmem:[%s6664_s12 + $0x1218] sm:$0xff] %v3604_v63  ;;  %3607 = vst [vmem:[%s6664_s12 + $0x1260] sm:$0xff] %v3606_v4  ;;  %v3662_v29 = vld [vmem:[%s5687_s9 + $0x700] sm:$0xff]  ;;  %v3664_v42 = vld [vmem:[%s5687_s9 + $0x708] sm:$0xff] }
 0x384   : > { %3609 = vst [vmem:[%s6664_s12 + $0x1268] sm:$0xff] %v3608_v31  ;;  %3611 = vst [vmem:[%s6664_s12 + $0x1270] sm:$0xff] %v3610_v49  ;;  %v3666_v13 = vld [vmem:[%s5687_s9 + $0x710] sm:$0xff]  ;;  %v3668_v16 = vld [vmem:[%s5687_s9 + $0x718] sm:$0xff] }
 0x385   : > { %3613 = vst [vmem:[%s6664_s12 + $0x1278] sm:$0xff] %v3612_v38  ;;  %3615 = vst [vmem:[%s6664_s12 + $0x12c0] sm:$0xff] %v3614_v55  ;;  %v3670_v28 = vld [vmem:[%s5687_s9 + $0x720] sm:$0xff]  ;;  %v3672_v11 = vld [vmem:[%s5687_s9 + $0x728] sm:$0xff] }
 0x386   : > { %3617 = vst [vmem:[%s6664_s12 + $0x12c8] sm:$0xff] %v3616_v14  ;;  %3619 = vst [vmem:[%s6664_s12 + $0x12d0] sm:$0xff] %v3618_v32  ;;  %v3674_v40 = vld [vmem:[%s5687_s9 + $0x730] sm:$0xff]  ;;  %v3676_v50 = vld [vmem:[%s5687_s9 + $0x738] sm:$0xff] }
 0x387   : > { %3621 = vst [vmem:[%s6664_s12 + $0x12d8] sm:$0xff] %v3620_v3  ;;  %3623 = vst [vmem:[%s6664_s12 + $0x1320] sm:$0xff] %v3622_v45  ;;  %v3678_v46 = vld [vmem:[%s5687_s9 + $0x740] sm:$0xff]  ;;  %v3680_v43 = vld [vmem:[%s5687_s9 + $0x748] sm:$0xff] }
 0x388   : > { %3625 = vst [vmem:[%s6664_s12 + $0x1328] sm:$0xff] %v3624_v51  ;;  %3627 = vst [vmem:[%s6664_s12 + $0x1330] sm:$0xff] %v3626_v56  ;;  %v3682_v44 = vld [vmem:[%s5687_s9 + $0x750] sm:$0xff]  ;;  %v3684_v47 = vld [vmem:[%s5687_s9 + $0x758] sm:$0xff] }
 0x389   : > { %3629 = vst [vmem:[%s6664_s12 + $0x1338] sm:$0xff] %v3628_v62  ;;  %3631 = vst [vmem:[%s6664_s12 + $0x1380] sm:$0xff] %v3630_v23  ;;  %v3686_v25 = vld [vmem:[%s5687_s9 + $0x760] sm:$0xff]  ;;  %v3688_v60 = vld [vmem:[%s5687_s9 + $0x768] sm:$0xff] }
 0x38a   : > { %3633 = vst [vmem:[%s6664_s12 + $0x1388] sm:$0xff] %v3632_v21  ;;  %3637 = vst [vmem:[%s6664_s12 + $0x1398] sm:$0xff] %v3636_v57  ;;  %v3690_v0 = vld [vmem:[%s5687_s9 + $0x770] sm:$0xff]  ;;  %v3692_v33 = vld [vmem:[%s5687_s9 + $0x778] sm:$0xff] }
 0x38b   : > { %3639 = vst [vmem:[%s6664_s12 + $0x13e0] sm:$0xff] %v3638_v52  ;;  %3643 = vst [vmem:[%s6664_s12 + $0x13f0] sm:$0xff] %v3642_v34  ;;  %v3694_v39 = vld [vmem:[%s5687_s9 + $0x780] sm:$0xff]  ;;  %v3696_v26 = vld [vmem:[%s5687_s9 + $0x788] sm:$0xff] }
 0x38c   : > { %3645 = vst [vmem:[%s6664_s12 + $0x13f8] sm:$0xff] %v3644_v18  ;;  %3649 = vst [vmem:[%s6664_s12 + $0x1448] sm:$0xff] %v3648_v19  ;;  %v3698_v27 = vld [vmem:[%s5687_s9 + $0x790] sm:$0xff]  ;;  %v3700_v24 = vld [vmem:[%s5687_s9 + $0x798] sm:$0xff] }
 0x38d   : > { %3651 = vst [vmem:[%s6664_s12 + $0x1450] sm:$0xff] %v3650_v58  ;;  %3655 = vst [vmem:[%s6664_s12 + $0x14a0] sm:$0xff] %v3654_v1  ;;  %v3702_v8 = vld [vmem:[%s5687_s9 + $0x7a0] sm:$0xff]  ;;  %v3704_v12 = vld [vmem:[%s5687_s9 + $0x7a8] sm:$0xff] }
 0x38e   : > { %3657 = vst [vmem:[%s6664_s12 + $0x14a8] sm:$0xff] %v3656_v10  ;;  %3661 = vst [vmem:[%s6664_s12 + $0x14b8] sm:$0xff] %v3660_v7  ;;  %v3706_v30 = vld [vmem:[%s5687_s9 + $0x7b0] sm:$0xff]  ;;  %v3708_v54 = vld [vmem:[%s5687_s9 + $0x7b8] sm:$0xff] }
 0x38f   : > { %3663 = vst [vmem:[%s6664_s12 + $0x1500] sm:$0xff] %v3662_v29  ;;  %3665 = vst [vmem:[%s6664_s12 + $0x1508] sm:$0xff] %v3664_v42  ;;  %v3710_v48 = vld [vmem:[%s5687_s9 + $0x7c0] sm:$0xff]  ;;  %v3712_v2 = vld [vmem:[%s5687_s9 + $0x7c8] sm:$0xff] }
 0x390   : > { %3667 = vst [vmem:[%s6664_s12 + $0x1510] sm:$0xff] %v3666_v13  ;;  %3669 = vst [vmem:[%s6664_s12 + $0x1518] sm:$0xff] %v3668_v16  ;;  %v3714_v53 = vld [vmem:[%s5687_s9 + $0x7d0] sm:$0xff]  ;;  %v3716_v17 = vld [vmem:[%s5687_s9 + $0x7d8] sm:$0xff] }
 0x391   : > { %3671 = vst [vmem:[%s6664_s12 + $0x1560] sm:$0xff] %v3670_v28  ;;  %3673 = vst [vmem:[%s6664_s12 + $0x1568] sm:$0xff] %v3672_v11  ;;  %v3718_v5 = vld [vmem:[%s5687_s9 + $0x7e0] sm:$0xff]  ;;  %v3720_v36 = vld [vmem:[%s5687_s9 + $0x7e8] sm:$0xff] }
 0x392   : > { %3675 = vst [vmem:[%s6664_s12 + $0x1570] sm:$0xff] %v3674_v40  ;;  %3677 = vst [vmem:[%s6664_s12 + $0x1578] sm:$0xff] %v3676_v50  ;;  %v3722_v9 = vld [vmem:[%s5687_s9 + $0x7f0] sm:$0xff]  ;;  %v3724_v20 = vld [vmem:[%s5687_s9 + $0x7f8] sm:$0xff] }
 0x393   : > { %3679 = vst [vmem:[%s6664_s12 + $0x15c0] sm:$0xff] %v3678_v46  ;;  %3681 = vst [vmem:[%s6664_s12 + $0x15c8] sm:$0xff] %v3680_v43 }
 0x394   : > { %3683 = vst [vmem:[%s6664_s12 + $0x15d0] sm:$0xff] %v3682_v44  ;;  %3685 = vst [vmem:[%s6664_s12 + $0x15d8] sm:$0xff] %v3684_v47 }
 0x395   : > { %3687 = vst [vmem:[%s6664_s12 + $0x1620] sm:$0xff] %v3686_v25  ;;  %3689 = vst [vmem:[%s6664_s12 + $0x1628] sm:$0xff] %v3688_v60 }
 0x396   : > { %3691 = vst [vmem:[%s6664_s12 + $0x1630] sm:$0xff] %v3690_v0  ;;  %3693 = vst [vmem:[%s6664_s12 + $0x1638] sm:$0xff] %v3692_v33 }
 0x397   : > { %3695 = vst [vmem:[%s6664_s12 + $0x1680] sm:$0xff] %v3694_v39  ;;  %3697 = vst [vmem:[%s6664_s12 + $0x1688] sm:$0xff] %v3696_v26 }
 0x398   : > { %3699 = vst [vmem:[%s6664_s12 + $0x1690] sm:$0xff] %v3698_v27  ;;  %3701 = vst [vmem:[%s6664_s12 + $0x1698] sm:$0xff] %v3700_v24 }
 0x399   : > { %3703 = vst [vmem:[%s6664_s12 + $0x16e0] sm:$0xff] %v3702_v8  ;;  %3705 = vst [vmem:[%s6664_s12 + $0x16e8] sm:$0xff] %v3704_v12 }
 0x39a   : > { %3707 = vst [vmem:[%s6664_s12 + $0x16f0] sm:$0xff] %v3706_v30  ;;  %3709 = vst [vmem:[%s6664_s12 + $0x16f8] sm:$0xff] %v3708_v54 }
 0x39b   : > { %3711 = vst [vmem:[%s6664_s12 + $0x1740] sm:$0xff] %v3710_v48  ;;  %3713 = vst [vmem:[%s6664_s12 + $0x1748] sm:$0xff] %v3712_v2 }
 0x39c   : > { %3715 = vst [vmem:[%s6664_s12 + $0x1750] sm:$0xff] %v3714_v53  ;;  %3717 = vst [vmem:[%s6664_s12 + $0x1758] sm:$0xff] %v3716_v17 }
 0x39d   : > { %3719 = vst [vmem:[%s6664_s12 + $0x17a0] sm:$0xff] %v3718_v5  ;;  %3721 = vst [vmem:[%s6664_s12 + $0x17a8] sm:$0xff] %v3720_v36 }
 0x39e   : > { %3723 = vst [vmem:[%s6664_s12 + $0x17b0] sm:$0xff] %v3722_v9  ;;  %3725 = vst [vmem:[%s6664_s12 + $0x17b8] sm:$0xff] %v3724_v20 }
 0x39f PF: > { %s12_s15 = sadd.s32 1, %s5502_s15   ;;  %s7279_s9 = smov %s5482_s10 }
 0x3a0   : > { %p9_p11 = scmp.ge.s32.totalorder %s12_s15, 11   ;;  %s7280_s10 = smov %s5576_s24 }
 0x3a1   : > { %s7281_s11 = smov %s5494_s13  ;;  %s7282_s12 = smov %s5498_s14 }
 0x3a2   : > { %s7283_s13 = smov %s7286_s16  ;;  %s7284_s14 = smov %s7290_s17 }
 0x3a3   :  { %11 = sbr.rel (!%p9_p11) target bundleno = 4 (0x4), region = 84 }

</bundles_post_ra>
